<compile_context>
chip_gen: v7x
topology: tpu7x:2x2x1
jax: 0.10.0
libtpu: 0.0.40
codegen_flags: <defaults>
</compile_context>

<pallas_src>
import jax
import jax.numpy as jnp
from jax import lax
from jax.experimental import pallas as pl
from jax.experimental.pallas import tpu as pltpu

EPS = 1e-5
NEG_SLOPE = 0.2
LANES = 128


def _round_up(x, m):
    return ((x + m - 1) // m) * m


_DEVICE_KIND = None


def _device_kind():
    global _DEVICE_KIND
    if _DEVICE_KIND is None:
        try:
            _DEVICE_KIND = jax.devices()[0].device_kind.lower()
        except Exception:
            _DEVICE_KIND = ""
    return _DEVICE_KIND


def _pick_cout_tile(coutp):
    """256-wide Cout tile on 256x256-MXU generations (v6e/v7x), else 128."""
    kind = _device_kind()
    small_mxu = any(g in kind for g in ("v2", "v3", "v4", "v5"))
    if (not small_mxu) and coutp % 256 == 0:
        return 256
    return 128


# --------------------------------------------------------------------------
# Pallas kernel: aligned tap matmuls + (bias) + InstanceNorm + LeakyReLU
# --------------------------------------------------------------------------
def _make_layer_kernel(num_taps, row_stride, p_out, add_bias, apply_norm,
                       apply_act, inv_count):
    """row_stride is a multiple of 16, so every tap slice is sublane-aligned."""

    def kernel(x_ref, w_ref, p_ref, o_ref):
        # x_ref : (1, Pin, Ce)   bf16 folded/flattened activation (one sample)
        # w_ref : (T, Ce, TC)    bf16 per-tap weights (one Cout tile)
        # p_ref : (3, TC)        f32 packed [bias; gamma; beta]
        # o_ref : (1, P, TC)
        y = jnp.dot(x_ref[0, 0:p_out, :], w_ref[0],
                    preferred_element_type=jnp.float32)
        for t in range(1, num_taps):
            off = t * row_stride
            y = y + jnp.dot(x_ref[0, off:off + p_out, :], w_ref[t],
                            preferred_element_type=jnp.float32)

        if add_bias:                       # only when no IN follows
            y = y + p_ref[0:1, :]

        if apply_norm:
            # Single-pass stats.  Width-padding columns are exactly zero here
            # (zero folded input, bias skipped), so unmasked sums divided by
            # the true valid count are the exact masked statistics.
            s = jnp.sum(y, axis=0, keepdims=True)
            ss = jnp.sum(y * y, axis=0, keepdims=True)
            mean = s * inv_count
            var = jnp.maximum(ss * inv_count - mean * mean, 0.0)
            scale = lax.rsqrt(var + EPS) * p_ref[1:2, :]      # gamma
            shift = p_ref[2:3, :] - mean * scale              # beta
            y = y * scale + shift

        if apply_act:
            y = jnp.maximum(y, NEG_SLOPE * y)                  # LeakyReLU(0.2)

        o_ref[0] = y.astype(o_ref.dtype)

    return kernel


# --------------------------------------------------------------------------
# One conv(+IN+LeakyReLU) layer: wrapper relayout + pallas_call
# --------------------------------------------------------------------------
def _conv_layer(x, lp, out_dtype):
    """x: (N, H, W, C) bf16 NHWC (C already lane-padded except raw input).
    Returns (N, Ho, Wo, coutp)."""
    n, h, w, c = x.shape
    stride = lp["stride"]

    if stride == 2:
        ho = (h + 2 - 4) // 2 + 1
        wo = (w + 2 - 4) // 2 + 1
        hp, wp = h + 2, w + 2
        eh, ew = hp % 2, wp % 2
        xp = jnp.pad(x, ((0, 0), (1, 1 + eh), (1, 1 + ew), (0, 0)))
        hp += eh
        wp += ew
        hs, ws = hp // 2, wp // 2
        # space-to-depth: feature order (row-parity pp, col-parity q, channel)
        s2d = xp.reshape(n, hs, 2, ws, 2, c).transpose(0, 1, 3, 2, 4, 5)
        s2d = s2d.reshape(n, hs, ws, 4 * c)
        # width-to-depth: fold the 2 effective kw taps into the lane dim
        folded = jnp.concatenate([s2d[:, :, 0:wo, :], s2d[:, :, 1:1 + wo, :]],
                                 axis=-1)                      # (b2, pp, q, c)
        num_taps, ce, hx = 2, 8 * c, hs
    else:
        ho, wo = h - 1, w - 1
        xp = jnp.pad(x, ((0, 0), (1, 1), (1, 1), (0, 0)))
        folded = jnp.concatenate([xp[:, :, b:b + wo, :] for b in range(4)],
                                 axis=-1)                      # (b, c)
        num_taps, ce, hx = 4, 4 * c, h + 2

    # Pad the output-row width to a multiple of 16 (bf16 sublane pack) with
    # exact zeros so all tap offsets t*wop are aligned and IN stats stay exact.
    wop = _round_up(wo, 16)
    if wop > wo:
        folded = jnp.pad(folded, ((0, 0), (0, 0), (0, wop - wo), (0, 0)))
    x_flat = folded.reshape(n, hx * wop, ce)

    p_in, p_out = hx * wop, ho * wop
    coutp = lp["coutp"]
    tc = _pick_cout_tile(coutp)
    grid = (n, coutp // tc)

    add_bias = lp["has_bias"] and not lp["norm"]   # bias is a no-op under IN
    kernel = _make_layer_kernel(num_taps, wop, p_out, add_bias, lp["norm"],
                                lp["act"], 1.0 / float(ho * wo))

    itemsize_out = jnp.dtype(out_dtype).itemsize
    bytes_x = p_in * ce * 2
    bytes_w = num_taps * ce * tc * 2
    bytes_o = p_out * tc * itemsize_out
    bytes_acc = p_out * tc * 4
    est = 2 * bytes_x + 2 * bytes_w + 2 * bytes_o + 6 * bytes_acc + (4 << 20)
    vmem_limit = int(min(max(est, 32 << 20), 100 << 20))

    flops = 2 * n * num_taps * p_out * ce * coutp
    bytes_accessed = (n * bytes_x + num_taps * ce * coutp * 2
                      + n * p_out * coutp * itemsize_out + 3 * coutp * 4)
    transcendentals = n * coutp if lp["norm"] else 0

    out = pl.pallas_call(
        kernel,
        out_shape=jax.ShapeDtypeStruct((n, p_out, coutp), out_dtype),
        grid=grid,
        in_specs=[
            pl.BlockSpec((1, p_in, ce), lambda i, j: (i, 0, 0)),
            pl.BlockSpec((num_taps, ce, tc), lambda i, j: (0, 0, j)),
            pl.BlockSpec((3, tc), lambda i, j: (0, j)),
        ],
        out_specs=pl.BlockSpec((1, p_out, tc), lambda i, j: (i, 0, j)),
        compiler_params=pltpu.CompilerParams(
            dimension_semantics=("parallel", "parallel"),
            vmem_limit_bytes=vmem_limit),
        cost_estimate=pl.CostEstimate(flops=flops,
                                      transcendentals=transcendentals,
                                      bytes_accessed=bytes_accessed),
    )(x_flat, lp["w"], lp["bgb"])

    # drop the zero width-padding columns (fuses with the next layer's pad)
    return out.reshape(n, ho, wop, coutp)[:, :, :wo, :]


# --------------------------------------------------------------------------
# Parameter construction (deterministic, synthetic) + kernel-ready prep
# --------------------------------------------------------------------------
def init_params(key, in_channels, out_channels=64):
    # (cin, cout, kernel, stride, pad, has_bias, has_norm, has_act) mirroring
    # the PyTorch Sequential (first block has IN but no LeakyReLU; last block
    # is a bare biased conv).
    cfgs = [
        (in_channels,      out_channels,     4, 2, 1, True,  True,  False),
        (out_channels,     out_channels * 2, 4, 2, 1, False, True,  True),
        (out_channels * 2, out_channels * 4, 4, 2, 1, False, True,  True),
        (out_channels * 4, out_channels * 8, 4, 1, 1, False, True,  True),
        (out_channels * 8, 1,                4, 1, 1, True,  False, False),
    ]
    params = []
    for (cin, cout, k, stride, pad, has_bias, has_norm, has_act) in cfgs:
        key, kw_, kb_, kg_, kbt_ = jax.random.split(key, 5)
        # weight stored as HWIO == PyTorch weight.permute(2, 3, 1, 0)
        w = 0.05 * jax.random.normal(kw_, (k, k, cin, cout), jnp.float32)
        b = (0.05 * jax.random.normal(kb_, (cout,), jnp.float32)
             if has_bias else jnp.zeros((cout,), jnp.float32))
        gamma = (jnp.ones((cout,), jnp.float32)
                 + 0.1 * jax.random.normal(kg_, (cout,), jnp.float32))
        beta = 0.1 * jax.random.normal(kbt_, (cout,), jnp.float32)
        params.append(dict(w=w, b=b, gamma=gamma, beta=beta, stride=stride,
                           pad=pad, has_bias=has_bias, norm=has_norm,
                           act=has_act))
    return params


def prepare_params(params, in_channels):
    """Pad channels to lane multiples, fold space-to-depth + width-to-depth
    rearrangements into the weights, pack bias/gamma/beta, cast to bf16."""
    prepared = []
    cin = in_channels                    # network input channels not padded
    for p in params:
        kh, kw, cin_r, cout_r = p["w"].shape
        coutp = _round_up(cout_r, LANES)
        w = jnp.zeros((kh, kw, cin, coutp), jnp.float32)
        w = w.at[:, :, :cin_r, :cout_r].set(p["w"])
        if p["stride"] == 2:
            # a = 2*ta + pp, b = 2*b2 + q ; folded feature order (b2, pp, q, c)
            w = w.reshape(2, 2, 2, 2, cin, coutp)   # (ta, pp, b2, q, cin, co)
            w = w.transpose(0, 2, 1, 3, 4, 5)       # (ta, b2, pp, q, cin, co)
            w = w.reshape(2, 8 * cin, coutp)
        else:
            w = w.reshape(4, 4 * cin, coutp)        # (a, (b, cin), co)
        w = w.astype(jnp.bfloat16)

        bgb = jnp.zeros((3, coutp), jnp.float32)
        bgb = bgb.at[0, :cout_r].set(p["b"])
        bgb = bgb.at[1, :].set(1.0)                 # gamma=1 on padded chans
        bgb = bgb.at[1, :cout_r].set(p["gamma"])
        bgb = bgb.at[2, :cout_r].set(p["beta"])

        prepared.append(dict(w=w, bgb=bgb, stride=p["stride"], norm=p["norm"],
                             act=p["act"], has_bias=p["has_bias"],
                             coutp=coutp, cout_real=cout_r))
        cin = coutp
    return prepared


# --------------------------------------------------------------------------
# Full forward pass (input / output in NCHW, matching PyTorch)
# --------------------------------------------------------------------------
def patch_discriminator_forward(x_nchw, prepared):
    y = jnp.transpose(x_nchw, (0, 2, 3, 1)).astype(jnp.bfloat16)  # NCHW->NHWC
    last = len(prepared) - 1
    for li, lp in enumerate(prepared):
        out_dtype = jnp.float32 if li == last else jnp.bfloat16
        y = _conv_layer(y, lp, out_dtype)
    y = y[..., :prepared[-1]["cout_real"]]          # drop lane padding
    return jnp.transpose(y, (0, 3, 1, 2))           # NHWC -> NCHW


# --------------------------------------------------------------------------
# Pure-JAX reference (lax.conv) with the same precision policy as the kernels
# (bf16 MXU operands, f32 accumulation / InstanceNorm / activation).
# --------------------------------------------------------------------------
def reference_forward(x_nchw, params):
    y = jnp.transpose(x_nchw, (0, 2, 3, 1)).astype(jnp.float32)
    for p in params:
        y = lax.conv_general_dilated(
            y.astype(jnp.bfloat16), p["w"].astype(jnp.bfloat16),
            (p["stride"], p["stride"]),
            [(p["pad"], p["pad"]), (p["pad"], p["pad"])],
            dimension_numbers=("NHWC", "HWIO", "NHWC"),
            preferred_element_type=jnp.float32,
        )
        y = y + p["b"]
        if p["norm"]:
            mean = jnp.mean(y, axis=(1, 2), keepdims=True)
            var = jnp.mean((y - mean) ** 2, axis=(1, 2), keepdims=True)
            y = (y - mean) * lax.rsqrt(var + EPS)
            y = y * p["gamma"] + p["beta"]
        if p["act"]:
            y = jnp.where(y >= 0, y, NEG_SLOPE * y)
    return jnp.transpose(y, (0, 3, 1, 2))


if __name__ == "__main__":
    key = jax.random.PRNGKey(0)
    kx, kp = jax.random.split(key)

    # base_channels=32 -> layer 4 has coutp=256, exercising the 256-wide Cout
    # tile on 256x256-MXU chips as well as the 128-wide path elsewhere.
    batch, in_channels, base_channels, spatial = 2, 3, 32, 32
    x = jax.random.normal(kx, (batch, in_channels, spatial, spatial),
                          jnp.float32)

    params = init_params(kp, in_channels, out_channels=base_channels)
    prepared = prepare_params(params, in_channels)

    fwd = jax.jit(lambda xx: patch_discriminator_forward(xx, prepared))
    out = jax.block_until_ready(fwd(x))

    ref = jax.block_until_ready(reference_forward(x, params))

    assert out.shape == ref.shape, (out.shape, ref.shape)
    max_diff = float(jnp.max(jnp.abs(out - ref)))
    assert jnp.allclose(out, ref, atol=3e-2, rtol=3e-2), max_diff

    print("KERNEL_OK")
</pallas_src>

<mosaic_0001>
module attributes {stable_mosaic.version = 11 : i64} {
  func.func @kernel(%arg0: i32, %arg1: i32, %arg2: memref<1x272x24xbf16, #tpu.memory_space<vmem>>, %arg3: memref<2x24x128xbf16, #tpu.memory_space<vmem>>, %arg4: memref<3x128xf32, #tpu.memory_space<vmem>>, %arg5: memref<1x256x128xbf16, #tpu.memory_space<vmem>>) attributes {dimension_semantics = [#tpu.dimension_semantics<parallel>, #tpu.dimension_semantics<parallel>], iteration_bounds = array<i64: 2, 1>, scalar_prefetch = 0 : i64, scratch_operands = 0 : i64, tpu.core_type = #tpu.core_type<tc>, window_params = [{transform_indices = @transform_0, window_bounds = array<i64: 1, 272, 24>}, {transform_indices = @transform_1, window_bounds = array<i64: 2, 24, 128>}, {transform_indices = @transform_2, window_bounds = array<i64: 3, 128>}, {transform_indices = @transform_3, window_bounds = array<i64: 1, 256, 128>}]} {
    %c0 = arith.constant 0 : index
    %c0_0 = arith.constant 0 : index
    %c0_1 = arith.constant 0 : index
    %0 = vector.load %arg2[%c0, %c0_0, %c0_1] : memref<1x272x24xbf16, #tpu.memory_space<vmem>>, vector<1x256x24xbf16>
    %1 = vector.shape_cast %0 : vector<1x256x24xbf16> to vector<256x24xbf16>
    %c0_2 = arith.constant 0 : index
    %c0_3 = arith.constant 0 : index
    %c0_4 = arith.constant 0 : index
    %2 = vector.load %arg3[%c0_2, %c0_3, %c0_4] : memref<2x24x128xbf16, #tpu.memory_space<vmem>>, vector<1x24x128xbf16>
    %3 = vector.shape_cast %2 : vector<1x24x128xbf16> to vector<24x128xbf16>
    %cst = arith.constant dense<0.000000e+00> : vector<256x128xf32>
    %4 = tpu.matmul %1, %3, %cst {dimension_numbers = #tpu.dot_dimension_numbers<[1], [0], [0], [1], [0, 0, 1, 1], [], []>} : vector<256x24xbf16>, vector<24x128xbf16>, vector<256x128xf32> -> vector<256x128xf32>
    %c0_5 = arith.constant 0 : index
    %c16 = arith.constant 16 : index
    %c0_6 = arith.constant 0 : index
    %5 = vector.load %arg2[%c0_5, %c16, %c0_6] : memref<1x272x24xbf16, #tpu.memory_space<vmem>>, vector<1x256x24xbf16>
    %6 = vector.shape_cast %5 : vector<1x256x24xbf16> to vector<256x24xbf16>
    %c1 = arith.constant 1 : index
    %c0_7 = arith.constant 0 : index
    %c0_8 = arith.constant 0 : index
    %7 = vector.load %arg3[%c1, %c0_7, %c0_8] : memref<2x24x128xbf16, #tpu.memory_space<vmem>>, vector<1x24x128xbf16>
    %8 = vector.shape_cast %7 : vector<1x24x128xbf16> to vector<24x128xbf16>
    %cst_9 = arith.constant dense<0.000000e+00> : vector<256x128xf32>
    %9 = tpu.matmul %6, %8, %cst_9 {dimension_numbers = #tpu.dot_dimension_numbers<[1], [0], [0], [1], [0, 0, 1, 1], [], []>} : vector<256x24xbf16>, vector<24x128xbf16>, vector<256x128xf32> -> vector<256x128xf32>
    %10 = arith.addf %4, %9 : vector<256x128xf32>
    %cst_10 = arith.constant dense<0.000000e+00> : vector<128xf32>
    %11 = vector.multi_reduction <add>, %10, %cst_10 [0] : vector<256x128xf32> to vector<128xf32>
    %12 = vector.shape_cast %11 : vector<128xf32> to vector<1x128xf32>
    %13 = arith.mulf %10, %10 : vector<256x128xf32>
    %cst_11 = arith.constant dense<0.000000e+00> : vector<128xf32>
    %14 = vector.multi_reduction <add>, %13, %cst_11 [0] : vector<256x128xf32> to vector<128xf32>
    %15 = vector.shape_cast %14 : vector<128xf32> to vector<1x128xf32>
    %cst_12 = arith.constant 3.906250e-03 : f32
    %16 = vector.broadcast %cst_12 : f32 to vector<1x128xf32>
    %17 = arith.mulf %12, %16 : vector<1x128xf32>
    %cst_13 = arith.constant 3.906250e-03 : f32
    %18 = vector.broadcast %cst_13 : f32 to vector<1x128xf32>
    %19 = arith.mulf %15, %18 : vector<1x128xf32>
    %20 = arith.mulf %17, %17 : vector<1x128xf32>
    %21 = arith.subf %19, %20 : vector<1x128xf32>
    %cst_14 = arith.constant 0.000000e+00 : f32
    %22 = vector.broadcast %cst_14 : f32 to vector<1x128xf32>
    %23 = arith.maximumf %21, %22 : vector<1x128xf32>
    %cst_15 = arith.constant 9.99999974E-6 : f32
    %24 = vector.broadcast %cst_15 : f32 to vector<1x128xf32>
    %25 = arith.addf %23, %24 : vector<1x128xf32>
    %26 = math.rsqrt %25 : vector<1x128xf32>
    %c1_16 = arith.constant 1 : index
    %c0_17 = arith.constant 0 : index
    %27 = vector.load %arg4[%c1_16, %c0_17] : memref<3x128xf32, #tpu.memory_space<vmem>>, vector<1x128xf32>
    %28 = arith.mulf %26, %27 : vector<1x128xf32>
    %c2 = arith.constant 2 : index
    %c0_18 = arith.constant 0 : index
    %29 = vector.load %arg4[%c2, %c0_18] : memref<3x128xf32, #tpu.memory_space<vmem>>, vector<1x128xf32>
    %30 = arith.mulf %17, %28 : vector<1x128xf32>
    %31 = arith.subf %29, %30 : vector<1x128xf32>
    %32 = vector.broadcast %28 : vector<1x128xf32> to vector<256x128xf32>
    %33 = arith.mulf %10, %32 : vector<256x128xf32>
    %34 = vector.broadcast %31 : vector<1x128xf32> to vector<256x128xf32>
    %35 = arith.addf %33, %34 : vector<256x128xf32>
    %36 = arith.truncf %35 : vector<256x128xf32> to vector<256x128xbf16>
    %c0_19 = arith.constant 0 : index
    %c0_20 = arith.constant 0 : index
    %c0_21 = arith.constant 0 : index
    %37 = vector.load %arg5[%c0_19, %c0_20, %c0_21] : memref<1x256x128xbf16, #tpu.memory_space<vmem>>, vector<1x256x128xbf16>
    %38 = vector.shape_cast %37 : vector<1x256x128xbf16> to vector<256x128xbf16>
    %39 = vector.shape_cast %36 : vector<256x128xbf16> to vector<1x256x128xbf16>
    tpu.vector_store %arg5[%c0_19, %c0_20, %c0_21], %39 {strides = array<i32>} : memref<1x256x128xbf16, #tpu.memory_space<vmem>>, vector<1x256x128xbf16>,
    return
  }
  func.func @transform_0(%arg0: i32, %arg1: i32) -> (i32, i32, i32) {
    %c0_i32 = arith.constant 0 : i32
    %c0_i32_0 = arith.constant 0 : i32
    %c0_i32_1 = arith.constant 0 : i32
    return %arg0, %c0_i32, %c0_i32_0 : i32, i32, i32
  }
  func.func @transform_1(%arg0: i32, %arg1: i32) -> (i32, i32, i32) {
    %c0_i32 = arith.constant 0 : i32
    %c0_i32_0 = arith.constant 0 : i32
    %c0_i32_1 = arith.constant 0 : i32
    return %c0_i32, %c0_i32_0, %arg1 : i32, i32, i32
  }
  func.func @transform_2(%arg0: i32, %arg1: i32) -> (i32, i32) {
    %c0_i32 = arith.constant 0 : i32
    %c0_i32_0 = arith.constant 0 : i32
    return %c0_i32, %arg1 : i32, i32
  }
  func.func @transform_3(%arg0: i32, %arg1: i32) -> (i32, i32, i32) {
    %c0_i32 = arith.constant 0 : i32
    %c0_i32_0 = arith.constant 0 : i32
    return %arg0, %c0_i32, %arg1 : i32, i32, i32
  }
}

module attributes {stable_mosaic.version = 11 : i64} {
  func.func @kernel(%arg0: i32, %arg1: i32, %arg2: memref<1x144x1024xbf16, #tpu.memory_space<vmem>>, %arg3: memref<2x1024x128xbf16, #tpu.memory_space<vmem>>, %arg4: memref<3x128xf32, #tpu.memory_space<vmem>>, %arg5: memref<1x128x128xbf16, #tpu.memory_space<vmem>>) attributes {dimension_semantics = [#tpu.dimension_semantics<parallel>, #tpu.dimension_semantics<parallel>], iteration_bounds = array<i64: 2, 1>, scalar_prefetch = 0 : i64, scratch_operands = 0 : i64, tpu.core_type = #tpu.core_type<tc>, window_params = [{transform_indices = @transform_0, window_bounds = array<i64: 1, 144, 1024>}, {transform_indices = @transform_1, window_bounds = array<i64: 2, 1024, 128>}, {transform_indices = @transform_2, window_bounds = array<i64: 3, 128>}, {transform_indices = @transform_3, window_bounds = array<i64: 1, 128, 128>}]} {
    %c0 = arith.constant 0 : index
    %c0_0 = arith.constant 0 : index
    %c0_1 = arith.constant 0 : index
    %0 = vector.load %arg2[%c0, %c0_0, %c0_1] : memref<1x144x1024xbf16, #tpu.memory_space<vmem>>, vector<1x128x1024xbf16>
    %1 = vector.shape_cast %0 : vector<1x128x1024xbf16> to vector<128x1024xbf16>
    %c0_2 = arith.constant 0 : index
    %c0_3 = arith.constant 0 : index
    %c0_4 = arith.constant 0 : index
    %2 = vector.load %arg3[%c0_2, %c0_3, %c0_4] : memref<2x1024x128xbf16, #tpu.memory_space<vmem>>, vector<1x1024x128xbf16>
    %3 = vector.shape_cast %2 : vector<1x1024x128xbf16> to vector<1024x128xbf16>
    %cst = arith.constant dense<0.000000e+00> : vector<128x128xf32>
    %4 = tpu.matmul %1, %3, %cst {dimension_numbers = #tpu.dot_dimension_numbers<[1], [0], [0], [1], [0, 0, 1, 1], [], []>} : vector<128x1024xbf16>, vector<1024x128xbf16>, vector<128x128xf32> -> vector<128x128xf32>
    %c0_5 = arith.constant 0 : index
    %c16 = arith.constant 16 : index
    %c0_6 = arith.constant 0 : index
    %5 = vector.load %arg2[%c0_5, %c16, %c0_6] : memref<1x144x1024xbf16, #tpu.memory_space<vmem>>, vector<1x128x1024xbf16>
    %6 = vector.shape_cast %5 : vector<1x128x1024xbf16> to vector<128x1024xbf16>
    %c1 = arith.constant 1 : index
    %c0_7 = arith.constant 0 : index
    %c0_8 = arith.constant 0 : index
    %7 = vector.load %arg3[%c1, %c0_7, %c0_8] : memref<2x1024x128xbf16, #tpu.memory_space<vmem>>, vector<1x1024x128xbf16>
    %8 = vector.shape_cast %7 : vector<1x1024x128xbf16> to vector<1024x128xbf16>
    %cst_9 = arith.constant dense<0.000000e+00> : vector<128x128xf32>
    %9 = tpu.matmul %6, %8, %cst_9 {dimension_numbers = #tpu.dot_dimension_numbers<[1], [0], [0], [1], [0, 0, 1, 1], [], []>} : vector<128x1024xbf16>, vector<1024x128xbf16>, vector<128x128xf32> -> vector<128x128xf32>
    %10 = arith.addf %4, %9 : vector<128x128xf32>
    %cst_10 = arith.constant dense<0.000000e+00> : vector<128xf32>
    %11 = vector.multi_reduction <add>, %10, %cst_10 [0] : vector<128x128xf32> to vector<128xf32>
    %12 = vector.shape_cast %11 : vector<128xf32> to vector<1x128xf32>
    %13 = arith.mulf %10, %10 : vector<128x128xf32>
    %cst_11 = arith.constant dense<0.000000e+00> : vector<128xf32>
    %14 = vector.multi_reduction <add>, %13, %cst_11 [0] : vector<128x128xf32> to vector<128xf32>
    %15 = vector.shape_cast %14 : vector<128xf32> to vector<1x128xf32>
    %cst_12 = arith.constant 1.562500e-02 : f32
    %16 = vector.broadcast %cst_12 : f32 to vector<1x128xf32>
    %17 = arith.mulf %12, %16 : vector<1x128xf32>
    %cst_13 = arith.constant 1.562500e-02 : f32
    %18 = vector.broadcast %cst_13 : f32 to vector<1x128xf32>
    %19 = arith.mulf %15, %18 : vector<1x128xf32>
    %20 = arith.mulf %17, %17 : vector<1x128xf32>
    %21 = arith.subf %19, %20 : vector<1x128xf32>
    %cst_14 = arith.constant 0.000000e+00 : f32
    %22 = vector.broadcast %cst_14 : f32 to vector<1x128xf32>
    %23 = arith.maximumf %21, %22 : vector<1x128xf32>
    %cst_15 = arith.constant 9.99999974E-6 : f32
    %24 = vector.broadcast %cst_15 : f32 to vector<1x128xf32>
    %25 = arith.addf %23, %24 : vector<1x128xf32>
    %26 = math.rsqrt %25 : vector<1x128xf32>
    %c1_16 = arith.constant 1 : index
    %c0_17 = arith.constant 0 : index
    %27 = vector.load %arg4[%c1_16, %c0_17] : memref<3x128xf32, #tpu.memory_space<vmem>>, vector<1x128xf32>
    %28 = arith.mulf %26, %27 : vector<1x128xf32>
    %c2 = arith.constant 2 : index
    %c0_18 = arith.constant 0 : index
    %29 = vector.load %arg4[%c2, %c0_18] : memref<3x128xf32, #tpu.memory_space<vmem>>, vector<1x128xf32>
    %30 = arith.mulf %17, %28 : vector<1x128xf32>
    %31 = arith.subf %29, %30 : vector<1x128xf32>
    %32 = vector.broadcast %28 : vector<1x128xf32> to vector<128x128xf32>
    %33 = arith.mulf %10, %32 : vector<128x128xf32>
    %34 = vector.broadcast %31 : vector<1x128xf32> to vector<128x128xf32>
    %35 = arith.addf %33, %34 : vector<128x128xf32>
    %cst_19 = arith.constant 2.000000e-01 : f32
    %36 = vector.broadcast %cst_19 : f32 to vector<128x128xf32>
    %37 = arith.mulf %36, %35 : vector<128x128xf32>
    %38 = arith.maximumf %35, %37 : vector<128x128xf32>
    %39 = arith.truncf %38 : vector<128x128xf32> to vector<128x128xbf16>
    %c0_20 = arith.constant 0 : index
    %c0_21 = arith.constant 0 : index
    %c0_22 = arith.constant 0 : index
    %40 = vector.load %arg5[%c0_20, %c0_21, %c0_22] : memref<1x128x128xbf16, #tpu.memory_space<vmem>>, vector<1x128x128xbf16>
    %41 = vector.shape_cast %40 : vector<1x128x128xbf16> to vector<128x128xbf16>
    %42 = vector.shape_cast %39 : vector<128x128xbf16> to vector<1x128x128xbf16>
    tpu.vector_store %arg5[%c0_20, %c0_21, %c0_22], %42 {strides = array<i32>} : memref<1x128x128xbf16, #tpu.memory_space<vmem>>, vector<1x128x128xbf16>,
    return
  }
  func.func @transform_0(%arg0: i32, %arg1: i32) -> (i32, i32, i32) {
    %c0_i32 = arith.constant 0 : i32
    %c0_i32_0 = arith.constant 0 : i32
    %c0_i32_1 = arith.constant 0 : i32
    return %arg0, %c0_i32, %c0_i32_0 : i32, i32, i32
  }
  func.func @transform_1(%arg0: i32, %arg1: i32) -> (i32, i32, i32) {
    %c0_i32 = arith.constant 0 : i32
    %c0_i32_0 = arith.constant 0 : i32
    %c0_i32_1 = arith.constant 0 : i32
    return %c0_i32, %c0_i32_0, %arg1 : i32, i32, i32
  }
  func.func @transform_2(%arg0: i32, %arg1: i32) -> (i32, i32) {
    %c0_i32 = arith.constant 0 : i32
    %c0_i32_0 = arith.constant 0 : i32
    return %c0_i32, %arg1 : i32, i32
  }
  func.func @transform_3(%arg0: i32, %arg1: i32) -> (i32, i32, i32) {
    %c0_i32 = arith.constant 0 : i32
    %c0_i32_0 = arith.constant 0 : i32
    return %arg0, %c0_i32, %arg1 : i32, i32, i32
  }
}

module attributes {stable_mosaic.version = 11 : i64} {
  func.func @kernel(%arg0: i32, %arg1: i32, %arg2: memref<1x80x1024xbf16, #tpu.memory_space<vmem>>, %arg3: memref<2x1024x128xbf16, #tpu.memory_space<vmem>>, %arg4: memref<3x128xf32, #tpu.memory_space<vmem>>, %arg5: memref<1x64x128xbf16, #tpu.memory_space<vmem>>) attributes {dimension_semantics = [#tpu.dimension_semantics<parallel>, #tpu.dimension_semantics<parallel>], iteration_bounds = array<i64: 2, 1>, scalar_prefetch = 0 : i64, scratch_operands = 0 : i64, tpu.core_type = #tpu.core_type<tc>, window_params = [{transform_indices = @transform_0, window_bounds = array<i64: 1, 80, 1024>}, {transform_indices = @transform_1, window_bounds = array<i64: 2, 1024, 128>}, {transform_indices = @transform_2, window_bounds = array<i64: 3, 128>}, {transform_indices = @transform_3, window_bounds = array<i64: 1, 64, 128>}]} {
    %c0 = arith.constant 0 : index
    %c0_0 = arith.constant 0 : index
    %c0_1 = arith.constant 0 : index
    %0 = vector.load %arg2[%c0, %c0_0, %c0_1] : memref<1x80x1024xbf16, #tpu.memory_space<vmem>>, vector<1x64x1024xbf16>
    %1 = vector.shape_cast %0 : vector<1x64x1024xbf16> to vector<64x1024xbf16>
    %c0_2 = arith.constant 0 : index
    %c0_3 = arith.constant 0 : index
    %c0_4 = arith.constant 0 : index
    %2 = vector.load %arg3[%c0_2, %c0_3, %c0_4] : memref<2x1024x128xbf16, #tpu.memory_space<vmem>>, vector<1x1024x128xbf16>
    %3 = vector.shape_cast %2 : vector<1x1024x128xbf16> to vector<1024x128xbf16>
    %cst = arith.constant dense<0.000000e+00> : vector<64x128xf32>
    %4 = tpu.matmul %1, %3, %cst {dimension_numbers = #tpu.dot_dimension_numbers<[1], [0], [0], [1], [0, 0, 1, 1], [], []>} : vector<64x1024xbf16>, vector<1024x128xbf16>, vector<64x128xf32> -> vector<64x128xf32>
    %c0_5 = arith.constant 0 : index
    %c16 = arith.constant 16 : index
    %c0_6 = arith.constant 0 : index
    %5 = vector.load %arg2[%c0_5, %c16, %c0_6] : memref<1x80x1024xbf16, #tpu.memory_space<vmem>>, vector<1x64x1024xbf16>
    %6 = vector.shape_cast %5 : vector<1x64x1024xbf16> to vector<64x1024xbf16>
    %c1 = arith.constant 1 : index
    %c0_7 = arith.constant 0 : index
    %c0_8 = arith.constant 0 : index
    %7 = vector.load %arg3[%c1, %c0_7, %c0_8] : memref<2x1024x128xbf16, #tpu.memory_space<vmem>>, vector<1x1024x128xbf16>
    %8 = vector.shape_cast %7 : vector<1x1024x128xbf16> to vector<1024x128xbf16>
    %cst_9 = arith.constant dense<0.000000e+00> : vector<64x128xf32>
    %9 = tpu.matmul %6, %8, %cst_9 {dimension_numbers = #tpu.dot_dimension_numbers<[1], [0], [0], [1], [0, 0, 1, 1], [], []>} : vector<64x1024xbf16>, vector<1024x128xbf16>, vector<64x128xf32> -> vector<64x128xf32>
    %10 = arith.addf %4, %9 : vector<64x128xf32>
    %cst_10 = arith.constant dense<0.000000e+00> : vector<128xf32>
    %11 = vector.multi_reduction <add>, %10, %cst_10 [0] : vector<64x128xf32> to vector<128xf32>
    %12 = vector.shape_cast %11 : vector<128xf32> to vector<1x128xf32>
    %13 = arith.mulf %10, %10 : vector<64x128xf32>
    %cst_11 = arith.constant dense<0.000000e+00> : vector<128xf32>
    %14 = vector.multi_reduction <add>, %13, %cst_11 [0] : vector<64x128xf32> to vector<128xf32>
    %15 = vector.shape_cast %14 : vector<128xf32> to vector<1x128xf32>
    %cst_12 = arith.constant 6.250000e-02 : f32
    %16 = vector.broadcast %cst_12 : f32 to vector<1x128xf32>
    %17 = arith.mulf %12, %16 : vector<1x128xf32>
    %cst_13 = arith.constant 6.250000e-02 : f32
    %18 = vector.broadcast %cst_13 : f32 to vector<1x128xf32>
    %19 = arith.mulf %15, %18 : vector<1x128xf32>
    %20 = arith.mulf %17, %17 : vector<1x128xf32>
    %21 = arith.subf %19, %20 : vector<1x128xf32>
    %cst_14 = arith.constant 0.000000e+00 : f32
    %22 = vector.broadcast %cst_14 : f32 to vector<1x128xf32>
    %23 = arith.maximumf %21, %22 : vector<1x128xf32>
    %cst_15 = arith.constant 9.99999974E-6 : f32
    %24 = vector.broadcast %cst_15 : f32 to vector<1x128xf32>
    %25 = arith.addf %23, %24 : vector<1x128xf32>
    %26 = math.rsqrt %25 : vector<1x128xf32>
    %c1_16 = arith.constant 1 : index
    %c0_17 = arith.constant 0 : index
    %27 = vector.load %arg4[%c1_16, %c0_17] : memref<3x128xf32, #tpu.memory_space<vmem>>, vector<1x128xf32>
    %28 = arith.mulf %26, %27 : vector<1x128xf32>
    %c2 = arith.constant 2 : index
    %c0_18 = arith.constant 0 : index
    %29 = vector.load %arg4[%c2, %c0_18] : memref<3x128xf32, #tpu.memory_space<vmem>>, vector<1x128xf32>
    %30 = arith.mulf %17, %28 : vector<1x128xf32>
    %31 = arith.subf %29, %30 : vector<1x128xf32>
    %32 = vector.broadcast %28 : vector<1x128xf32> to vector<64x128xf32>
    %33 = arith.mulf %10, %32 : vector<64x128xf32>
    %34 = vector.broadcast %31 : vector<1x128xf32> to vector<64x128xf32>
    %35 = arith.addf %33, %34 : vector<64x128xf32>
    %cst_19 = arith.constant 2.000000e-01 : f32
    %36 = vector.broadcast %cst_19 : f32 to vector<64x128xf32>
    %37 = arith.mulf %36, %35 : vector<64x128xf32>
    %38 = arith.maximumf %35, %37 : vector<64x128xf32>
    %39 = arith.truncf %38 : vector<64x128xf32> to vector<64x128xbf16>
    %c0_20 = arith.constant 0 : index
    %c0_21 = arith.constant 0 : index
    %c0_22 = arith.constant 0 : index
    %40 = vector.load %arg5[%c0_20, %c0_21, %c0_22] : memref<1x64x128xbf16, #tpu.memory_space<vmem>>, vector<1x64x128xbf16>
    %41 = vector.shape_cast %40 : vector<1x64x128xbf16> to vector<64x128xbf16>
    %42 = vector.shape_cast %39 : vector<64x128xbf16> to vector<1x64x128xbf16>
    tpu.vector_store %arg5[%c0_20, %c0_21, %c0_22], %42 {strides = array<i32>} : memref<1x64x128xbf16, #tpu.memory_space<vmem>>, vector<1x64x128xbf16>,
    return
  }
  func.func @transform_0(%arg0: i32, %arg1: i32) -> (i32, i32, i32) {
    %c0_i32 = arith.constant 0 : i32
    %c0_i32_0 = arith.constant 0 : i32
    %c0_i32_1 = arith.constant 0 : i32
    return %arg0, %c0_i32, %c0_i32_0 : i32, i32, i32
  }
  func.func @transform_1(%arg0: i32, %arg1: i32) -> (i32, i32, i32) {
    %c0_i32 = arith.constant 0 : i32
    %c0_i32_0 = arith.constant 0 : i32
    %c0_i32_1 = arith.constant 0 : i32
    return %c0_i32, %c0_i32_0, %arg1 : i32, i32, i32
  }
  func.func @transform_2(%arg0: i32, %arg1: i32) -> (i32, i32) {
    %c0_i32 = arith.constant 0 : i32
    %c0_i32_0 = arith.constant 0 : i32
    return %c0_i32, %arg1 : i32, i32
  }
  func.func @transform_3(%arg0: i32, %arg1: i32) -> (i32, i32, i32) {
    %c0_i32 = arith.constant 0 : i32
    %c0_i32_0 = arith.constant 0 : i32
    return %arg0, %c0_i32, %arg1 : i32, i32, i32
  }
}

module attributes {stable_mosaic.version = 11 : i64} {
  func.func @kernel(%arg0: i32, %arg1: i32, %arg2: memref<1x96x512xbf16, #tpu.memory_space<vmem>>, %arg3: memref<4x512x256xbf16, #tpu.memory_space<vmem>>, %arg4: memref<3x256xf32, #tpu.memory_space<vmem>>, %arg5: memref<1x48x256xbf16, #tpu.memory_space<vmem>>) attributes {dimension_semantics = [#tpu.dimension_semantics<parallel>, #tpu.dimension_semantics<parallel>], iteration_bounds = array<i64: 2, 1>, scalar_prefetch = 0 : i64, scratch_operands = 0 : i64, tpu.core_type = #tpu.core_type<tc>, window_params = [{transform_indices = @transform_0, window_bounds = array<i64: 1, 96, 512>}, {transform_indices = @transform_1, window_bounds = array<i64: 4, 512, 256>}, {transform_indices = @transform_2, window_bounds = array<i64: 3, 256>}, {transform_indices = @transform_3, window_bounds = array<i64: 1, 48, 256>}]} {
    %c0 = arith.constant 0 : index
    %c0_0 = arith.constant 0 : index
    %c0_1 = arith.constant 0 : index
    %0 = vector.load %arg2[%c0, %c0_0, %c0_1] : memref<1x96x512xbf16, #tpu.memory_space<vmem>>, vector<1x48x512xbf16>
    %1 = vector.shape_cast %0 : vector<1x48x512xbf16> to vector<48x512xbf16>
    %c0_2 = arith.constant 0 : index
    %c0_3 = arith.constant 0 : index
    %c0_4 = arith.constant 0 : index
    %2 = vector.load %arg3[%c0_2, %c0_3, %c0_4] : memref<4x512x256xbf16, #tpu.memory_space<vmem>>, vector<1x512x256xbf16>
    %3 = vector.shape_cast %2 : vector<1x512x256xbf16> to vector<512x256xbf16>
    %cst = arith.constant dense<0.000000e+00> : vector<48x256xf32>
    %4 = tpu.matmul %1, %3, %cst {dimension_numbers = #tpu.dot_dimension_numbers<[1], [0], [0], [1], [0, 0, 1, 1], [], []>} : vector<48x512xbf16>, vector<512x256xbf16>, vector<48x256xf32> -> vector<48x256xf32>
    %c0_5 = arith.constant 0 : index
    %c16 = arith.constant 16 : index
    %c0_6 = arith.constant 0 : index
    %5 = vector.load %arg2[%c0_5, %c16, %c0_6] : memref<1x96x512xbf16, #tpu.memory_space<vmem>>, vector<1x48x512xbf16>
    %6 = vector.shape_cast %5 : vector<1x48x512xbf16> to vector<48x512xbf16>
    %c1 = arith.constant 1 : index
    %c0_7 = arith.constant 0 : index
    %c0_8 = arith.constant 0 : index
    %7 = vector.load %arg3[%c1, %c0_7, %c0_8] : memref<4x512x256xbf16, #tpu.memory_space<vmem>>, vector<1x512x256xbf16>
    %8 = vector.shape_cast %7 : vector<1x512x256xbf16> to vector<512x256xbf16>
    %cst_9 = arith.constant dense<0.000000e+00> : vector<48x256xf32>
    %9 = tpu.matmul %6, %8, %cst_9 {dimension_numbers = #tpu.dot_dimension_numbers<[1], [0], [0], [1], [0, 0, 1, 1], [], []>} : vector<48x512xbf16>, vector<512x256xbf16>, vector<48x256xf32> -> vector<48x256xf32>
    %10 = arith.addf %4, %9 : vector<48x256xf32>
    %c0_10 = arith.constant 0 : index
    %c32 = arith.constant 32 : index
    %c0_11 = arith.constant 0 : index
    %11 = vector.load %arg2[%c0_10, %c32, %c0_11] : memref<1x96x512xbf16, #tpu.memory_space<vmem>>, vector<1x48x512xbf16>
    %12 = vector.shape_cast %11 : vector<1x48x512xbf16> to vector<48x512xbf16>
    %c2 = arith.constant 2 : index
    %c0_12 = arith.constant 0 : index
    %c0_13 = arith.constant 0 : index
    %13 = vector.load %arg3[%c2, %c0_12, %c0_13] : memref<4x512x256xbf16, #tpu.memory_space<vmem>>, vector<1x512x256xbf16>
    %14 = vector.shape_cast %13 : vector<1x512x256xbf16> to vector<512x256xbf16>
    %cst_14 = arith.constant dense<0.000000e+00> : vector<48x256xf32>
    %15 = tpu.matmul %12, %14, %cst_14 {dimension_numbers = #tpu.dot_dimension_numbers<[1], [0], [0], [1], [0, 0, 1, 1], [], []>} : vector<48x512xbf16>, vector<512x256xbf16>, vector<48x256xf32> -> vector<48x256xf32>
    %16 = arith.addf %10, %15 : vector<48x256xf32>
    %c0_15 = arith.constant 0 : index
    %c48 = arith.constant 48 : index
    %c0_16 = arith.constant 0 : index
    %17 = vector.load %arg2[%c0_15, %c48, %c0_16] : memref<1x96x512xbf16, #tpu.memory_space<vmem>>, vector<1x48x512xbf16>
    %18 = vector.shape_cast %17 : vector<1x48x512xbf16> to vector<48x512xbf16>
    %c3 = arith.constant 3 : index
    %c0_17 = arith.constant 0 : index
    %c0_18 = arith.constant 0 : index
    %19 = vector.load %arg3[%c3, %c0_17, %c0_18] : memref<4x512x256xbf16, #tpu.memory_space<vmem>>, vector<1x512x256xbf16>
    %20 = vector.shape_cast %19 : vector<1x512x256xbf16> to vector<512x256xbf16>
    %cst_19 = arith.constant dense<0.000000e+00> : vector<48x256xf32>
    %21 = tpu.matmul %18, %20, %cst_19 {dimension_numbers = #tpu.dot_dimension_numbers<[1], [0], [0], [1], [0, 0, 1, 1], [], []>} : vector<48x512xbf16>, vector<512x256xbf16>, vector<48x256xf32> -> vector<48x256xf32>
    %22 = arith.addf %16, %21 : vector<48x256xf32>
    %cst_20 = arith.constant dense<0.000000e+00> : vector<256xf32>
    %23 = vector.multi_reduction <add>, %22, %cst_20 [0] : vector<48x256xf32> to vector<256xf32>
    %24 = vector.shape_cast %23 : vector<256xf32> to vector<1x256xf32>
    %25 = arith.mulf %22, %22 : vector<48x256xf32>
    %cst_21 = arith.constant dense<0.000000e+00> : vector<256xf32>
    %26 = vector.multi_reduction <add>, %25, %cst_21 [0] : vector<48x256xf32> to vector<256xf32>
    %27 = vector.shape_cast %26 : vector<256xf32> to vector<1x256xf32>
    %cst_22 = arith.constant 0.111111112 : f32
    %28 = vector.broadcast %cst_22 : f32 to vector<1x256xf32>
    %29 = arith.mulf %24, %28 : vector<1x256xf32>
    %cst_23 = arith.constant 0.111111112 : f32
    %30 = vector.broadcast %cst_23 : f32 to vector<1x256xf32>
    %31 = arith.mulf %27, %30 : vector<1x256xf32>
    %32 = arith.mulf %29, %29 : vector<1x256xf32>
    %33 = arith.subf %31, %32 : vector<1x256xf32>
    %cst_24 = arith.constant 0.000000e+00 : f32
    %34 = vector.broadcast %cst_24 : f32 to vector<1x256xf32>
    %35 = arith.maximumf %33, %34 : vector<1x256xf32>
    %cst_25 = arith.constant 9.99999974E-6 : f32
    %36 = vector.broadcast %cst_25 : f32 to vector<1x256xf32>
    %37 = arith.addf %35, %36 : vector<1x256xf32>
    %38 = math.rsqrt %37 : vector<1x256xf32>
    %c1_26 = arith.constant 1 : index
    %c0_27 = arith.constant 0 : index
    %39 = vector.load %arg4[%c1_26, %c0_27] : memref<3x256xf32, #tpu.memory_space<vmem>>, vector<1x256xf32>
    %40 = arith.mulf %38, %39 : vector<1x256xf32>
    %c2_28 = arith.constant 2 : index
    %c0_29 = arith.constant 0 : index
    %41 = vector.load %arg4[%c2_28, %c0_29] : memref<3x256xf32, #tpu.memory_space<vmem>>, vector<1x256xf32>
    %42 = arith.mulf %29, %40 : vector<1x256xf32>
    %43 = arith.subf %41, %42 : vector<1x256xf32>
    %44 = vector.broadcast %40 : vector<1x256xf32> to vector<48x256xf32>
    %45 = arith.mulf %22, %44 : vector<48x256xf32>
    %46 = vector.broadcast %43 : vector<1x256xf32> to vector<48x256xf32>
    %47 = arith.addf %45, %46 : vector<48x256xf32>
    %cst_30 = arith.constant 2.000000e-01 : f32
    %48 = vector.broadcast %cst_30 : f32 to vector<48x256xf32>
    %49 = arith.mulf %48, %47 : vector<48x256xf32>
    %50 = arith.maximumf %47, %49 : vector<48x256xf32>
    %51 = arith.truncf %50 : vector<48x256xf32> to vector<48x256xbf16>
    %c0_31 = arith.constant 0 : index
    %c0_32 = arith.constant 0 : index
    %c0_33 = arith.constant 0 : index
    %52 = vector.load %arg5[%c0_31, %c0_32, %c0_33] : memref<1x48x256xbf16, #tpu.memory_space<vmem>>, vector<1x48x256xbf16>
    %53 = vector.shape_cast %52 : vector<1x48x256xbf16> to vector<48x256xbf16>
    %54 = vector.shape_cast %51 : vector<48x256xbf16> to vector<1x48x256xbf16>
    tpu.vector_store %arg5[%c0_31, %c0_32, %c0_33], %54 {strides = array<i32>} : memref<1x48x256xbf16, #tpu.memory_space<vmem>>, vector<1x48x256xbf16>,
    return
  }
  func.func @transform_0(%arg0: i32, %arg1: i32) -> (i32, i32, i32) {
    %c0_i32 = arith.constant 0 : i32
    %c0_i32_0 = arith.constant 0 : i32
    %c0_i32_1 = arith.constant 0 : i32
    return %arg0, %c0_i32, %c0_i32_0 : i32, i32, i32
  }
  func.func @transform_1(%arg0: i32, %arg1: i32) -> (i32, i32, i32) {
    %c0_i32 = arith.constant 0 : i32
    %c0_i32_0 = arith.constant 0 : i32
    %c0_i32_1 = arith.constant 0 : i32
    return %c0_i32, %c0_i32_0, %arg1 : i32, i32, i32
  }
  func.func @transform_2(%arg0: i32, %arg1: i32) -> (i32, i32) {
    %c0_i32 = arith.constant 0 : i32
    %c0_i32_0 = arith.constant 0 : i32
    return %c0_i32, %arg1 : i32, i32
  }
  func.func @transform_3(%arg0: i32, %arg1: i32) -> (i32, i32, i32) {
    %c0_i32 = arith.constant 0 : i32
    %c0_i32_0 = arith.constant 0 : i32
    return %arg0, %c0_i32, %arg1 : i32, i32, i32
  }
}

module attributes {stable_mosaic.version = 11 : i64} {
  func.func @kernel(%arg0: i32, %arg1: i32, %arg2: memref<1x80x1024xbf16, #tpu.memory_space<vmem>>, %arg3: memref<4x1024x128xbf16, #tpu.memory_space<vmem>>, %arg4: memref<3x128xf32, #tpu.memory_space<vmem>>, %arg5: memref<1x32x128xf32, #tpu.memory_space<vmem>>) attributes {dimension_semantics = [#tpu.dimension_semantics<parallel>, #tpu.dimension_semantics<parallel>], iteration_bounds = array<i64: 2, 1>, scalar_prefetch = 0 : i64, scratch_operands = 0 : i64, tpu.core_type = #tpu.core_type<tc>, window_params = [{transform_indices = @transform_0, window_bounds = array<i64: 1, 80, 1024>}, {transform_indices = @transform_1, window_bounds = array<i64: 4, 1024, 128>}, {transform_indices = @transform_2, window_bounds = array<i64: 3, 128>}, {transform_indices = @transform_3, window_bounds = array<i64: 1, 32, 128>}]} {
    %c0 = arith.constant 0 : index
    %c0_0 = arith.constant 0 : index
    %c0_1 = arith.constant 0 : index
    %0 = vector.load %arg2[%c0, %c0_0, %c0_1] : memref<1x80x1024xbf16, #tpu.memory_space<vmem>>, vector<1x32x1024xbf16>
    %1 = vector.shape_cast %0 : vector<1x32x1024xbf16> to vector<32x1024xbf16>
    %c0_2 = arith.constant 0 : index
    %c0_3 = arith.constant 0 : index
    %c0_4 = arith.constant 0 : index
    %2 = vector.load %arg3[%c0_2, %c0_3, %c0_4] : memref<4x1024x128xbf16, #tpu.memory_space<vmem>>, vector<1x1024x128xbf16>
    %3 = vector.shape_cast %2 : vector<1x1024x128xbf16> to vector<1024x128xbf16>
    %cst = arith.constant dense<0.000000e+00> : vector<32x128xf32>
    %4 = tpu.matmul %1, %3, %cst {dimension_numbers = #tpu.dot_dimension_numbers<[1], [0], [0], [1], [0, 0, 1, 1], [], []>} : vector<32x1024xbf16>, vector<1024x128xbf16>, vector<32x128xf32> -> vector<32x128xf32>
    %c0_5 = arith.constant 0 : index
    %c16 = arith.constant 16 : index
    %c0_6 = arith.constant 0 : index
    %5 = vector.load %arg2[%c0_5, %c16, %c0_6] : memref<1x80x1024xbf16, #tpu.memory_space<vmem>>, vector<1x32x1024xbf16>
    %6 = vector.shape_cast %5 : vector<1x32x1024xbf16> to vector<32x1024xbf16>
    %c1 = arith.constant 1 : index
    %c0_7 = arith.constant 0 : index
    %c0_8 = arith.constant 0 : index
    %7 = vector.load %arg3[%c1, %c0_7, %c0_8] : memref<4x1024x128xbf16, #tpu.memory_space<vmem>>, vector<1x1024x128xbf16>
    %8 = vector.shape_cast %7 : vector<1x1024x128xbf16> to vector<1024x128xbf16>
    %cst_9 = arith.constant dense<0.000000e+00> : vector<32x128xf32>
    %9 = tpu.matmul %6, %8, %cst_9 {dimension_numbers = #tpu.dot_dimension_numbers<[1], [0], [0], [1], [0, 0, 1, 1], [], []>} : vector<32x1024xbf16>, vector<1024x128xbf16>, vector<32x128xf32> -> vector<32x128xf32>
    %10 = arith.addf %4, %9 : vector<32x128xf32>
    %c0_10 = arith.constant 0 : index
    %c32 = arith.constant 32 : index
    %c0_11 = arith.constant 0 : index
    %11 = vector.load %arg2[%c0_10, %c32, %c0_11] : memref<1x80x1024xbf16, #tpu.memory_space<vmem>>, vector<1x32x1024xbf16>
    %12 = vector.shape_cast %11 : vector<1x32x1024xbf16> to vector<32x1024xbf16>
    %c2 = arith.constant 2 : index
    %c0_12 = arith.constant 0 : index
    %c0_13 = arith.constant 0 : index
    %13 = vector.load %arg3[%c2, %c0_12, %c0_13] : memref<4x1024x128xbf16, #tpu.memory_space<vmem>>, vector<1x1024x128xbf16>
    %14 = vector.shape_cast %13 : vector<1x1024x128xbf16> to vector<1024x128xbf16>
    %cst_14 = arith.constant dense<0.000000e+00> : vector<32x128xf32>
    %15 = tpu.matmul %12, %14, %cst_14 {dimension_numbers = #tpu.dot_dimension_numbers<[1], [0], [0], [1], [0, 0, 1, 1], [], []>} : vector<32x1024xbf16>, vector<1024x128xbf16>, vector<32x128xf32> -> vector<32x128xf32>
    %16 = arith.addf %10, %15 : vector<32x128xf32>
    %c0_15 = arith.constant 0 : index
    %c48 = arith.constant 48 : index
    %c0_16 = arith.constant 0 : index
    %17 = vector.load %arg2[%c0_15, %c48, %c0_16] : memref<1x80x1024xbf16, #tpu.memory_space<vmem>>, vector<1x32x1024xbf16>
    %18 = vector.shape_cast %17 : vector<1x32x1024xbf16> to vector<32x1024xbf16>
    %c3 = arith.constant 3 : index
    %c0_17 = arith.constant 0 : index
    %c0_18 = arith.constant 0 : index
    %19 = vector.load %arg3[%c3, %c0_17, %c0_18] : memref<4x1024x128xbf16, #tpu.memory_space<vmem>>, vector<1x1024x128xbf16>
    %20 = vector.shape_cast %19 : vector<1x1024x128xbf16> to vector<1024x128xbf16>
    %cst_19 = arith.constant dense<0.000000e+00> : vector<32x128xf32>
    %21 = tpu.matmul %18, %20, %cst_19 {dimension_numbers = #tpu.dot_dimension_numbers<[1], [0], [0], [1], [0, 0, 1, 1], [], []>} : vector<32x1024xbf16>, vector<1024x128xbf16>, vector<32x128xf32> -> vector<32x128xf32>
    %22 = arith.addf %16, %21 : vector<32x128xf32>
    %c0_20 = arith.constant 0 : index
    %c0_21 = arith.constant 0 : index
    %23 = vector.load %arg4[%c0_20, %c0_21] : memref<3x128xf32, #tpu.memory_space<vmem>>, vector<1x128xf32>
    %24 = vector.broadcast %23 : vector<1x128xf32> to vector<32x128xf32>
    %25 = arith.addf %22, %24 : vector<32x128xf32>
    %c0_22 = arith.constant 0 : index
    %c0_23 = arith.constant 0 : index
    %c0_24 = arith.constant 0 : index
    %26 = vector.load %arg5[%c0_22, %c0_23, %c0_24] : memref<1x32x128xf32, #tpu.memory_space<vmem>>, vector<1x32x128xf32>
    %27 = vector.shape_cast %26 : vector<1x32x128xf32> to vector<32x128xf32>
    %28 = vector.shape_cast %25 : vector<32x128xf32> to vector<1x32x128xf32>
    tpu.vector_store %arg5[%c0_22, %c0_23, %c0_24], %28 {strides = array<i32>} : memref<1x32x128xf32, #tpu.memory_space<vmem>>, vector<1x32x128xf32>,
    return
  }
  func.func @transform_0(%arg0: i32, %arg1: i32) -> (i32, i32, i32) {
    %c0_i32 = arith.constant 0 : i32
    %c0_i32_0 = arith.constant 0 : i32
    %c0_i32_1 = arith.constant 0 : i32
    return %arg0, %c0_i32, %c0_i32_0 : i32, i32, i32
  }
  func.func @transform_1(%arg0: i32, %arg1: i32) -> (i32, i32, i32) {
    %c0_i32 = arith.constant 0 : i32
    %c0_i32_0 = arith.constant 0 : i32
    %c0_i32_1 = arith.constant 0 : i32
    return %c0_i32, %c0_i32_0, %arg1 : i32, i32, i32
  }
  func.func @transform_2(%arg0: i32, %arg1: i32) -> (i32, i32) {
    %c0_i32 = arith.constant 0 : i32
    %c0_i32_0 = arith.constant 0 : i32
    return %c0_i32, %arg1 : i32, i32
  }
  func.func @transform_3(%arg0: i32, %arg1: i32) -> (i32, i32, i32) {
    %c0_i32 = arith.constant 0 : i32
    %c0_i32_0 = arith.constant 0 : i32
    return %arg0, %c0_i32, %arg1 : i32, i32, i32
  }
}

</mosaic_0001>

<bundles_post_ra>
// kernel: _lambda_.5
= control target key start
LH: loop header
LB: loop body
LE: loop exit
PB: predicated region body
PF: predicated region fallthrough
CT: control target
= control target key end

     0   :  { %s1671_s12 = smov 0   ;;  %s1673_s13 = smov 0   ;;  %s1987_s0 = inlined_call_operand.vmem [shape: bf16[2,272,24], index: 0, kind: input, shape index: {}]   ;;  %s1988_s1 = inlined_call_operand.vmem [shape: bf16[2,24,128], index: 1, kind: input, shape index: {}]   ;;  %s1989_s2 = inlined_call_operand.vmem [shape: f32[3,128], index: 2, kind: input, shape index: {}]   ;;  %s1990_s3 = inlined_call_operand.vmem [shape: bf16[2,256,128], index: 3, kind: output, shape index: {}]  }
   0x1   :  { %s1675_s14 = smov 0  }
   0x2 LB: > { %s25_s15 = sadd.s32 1, %s1645_s13  ;;  %p1215_p0 = scmp.ge.s32.totalorder %s1649_s14, 1  ;;  %s1649_s14 = sphi %s1675_s14, %s13_s14   ;;  %s1645_s13 = sphi %s1673_s13, %s1992_s13   ;;  %s1641_s12 = sphi %s1671_s12, %s1991_s12  }
   0x3   : > { %p27_p1 = scmp.ge.s32.totalorder %s25_s15, 2  ;;  %p169_p2 = scmp.lt.s32.totalorder %s1649_s14, 3 }
   0x5   : > { %s1994_s15 = smov (%p27_p1, %s25_s15), 0  ;;  %p170_p3 = pnand %p1215_p0, %p169_p2 }
   0x6   : > { %v1604_v0 = vld [vmem:[%s1988_s1 + $0xc] sm:$0xff] (!%p170_p3)   ;;  %vm405_vm0 = vcmask (!%p170_p3), 1043456   ;;  %v1605_v1 = vld [vmem:[%s1988_s1] sm:$0xff] (!%p170_p3)   ;;  %p204_p4 = scmp.lt.s32.totalorder (!%p170_p3), %s1641_s12, 1  ;;  %v1606_v2 = vld [vmem:[%s1988_s1 + $0x14] ss:$0 sps:$4 sm:$0xff] (!%p170_p3)  }
   0x7   : > { %173 = sbr.rel (%p170_p3) target bundleno = 363 (0x16b), region = 32  ;;  %1473 = vmatprep.subr.bf16.mxu1 (!%p170_p3), %v1604_v0  ;;  %1509 = vmatprep.subr.bf16.mxu0 (!%p170_p3), %v1605_v1  ;;  %v1607_v3 = vld [vmem:[%s1988_s1 + $0x8] ss:$0 sps:$4 sm:$0xff] (!%p170_p3)   ;;  %v407_v4 = vsel (!%p170_p3), %vm405_vm0, %v1606_v2, 0  ;;  %vm356_vm1 = vcmask (!%p170_p3), 195584  }
   0x8   : > { %1474 = vmatpush3.bf16.msra.mxu1 (!%p170_p3), %v1604_v0  ;;  %1510 = vmatpush3.bf16.msra.mxu0 (!%p170_p3), %v1605_v1  ;;  %v588_v5 = vsel (!%p170_p3), %vm405_vm0, %v1607_v3, 0 }
   0x9   : > { %1577 = vmatprep.subr.msk.bf16.mxu1 (!%p170_p3), %vm405_vm0, %v1606_v2  ;;  %1578 = vmatprep.subr.msk.bf16.mxu0 (!%p170_p3), %vm405_vm0, %v1607_v3 }
   0xc   : > { %1476 = vmatpush3.bf16.msra.mxu1 (!%p170_p3), %v407_v4  ;;  %1512 = vmatpush3.bf16.msra.mxu0 (!%p170_p3), %v588_v5 }
   0xe   : > { %s1996_s12 = smov (!%p204_p4, %s1641_s12), 1 }
   0xf   : > { %s1579_s24 = smul.u32 136, %s1996_s12  ;;  %s1309_s5 = sshll.u32 %s1996_s12, 7 }
  0x10   : > { %s1960_s8 = scalar_lea.vmem %s1990_s3, %s1309_s5 }
  0x11   : > { %s1707_s27 = scalar_lea.vmem %s1987_s0, %s1579_s24 }
  0x12   : > { %v1608_v6 = vld [vmem:[%s1707_s27 + $0x8] sm:$0xff]   ;;  %v1609_v7 = vld [vmem:[%s1707_s27] sm:$0xff]   ;;  %v1610_v8 = vld [vmem:[%s1707_s27 + $0x10] sm:$0xff]  }
  0x13   : > { %1477 = vmatprep.mubr.msk.bf16.mxu1 %vm356_vm1, %v1608_v6  ;;  %1513 = vmatprep.mubr.msk.bf16.mxu0 %vm356_vm1, %v1609_v7  ;;  %v1611_v9 = vld [vmem:[%s1707_s27 + $0x18] sm:$0xff]   ;;  %v1612_v10 = vld [vmem:[%s1707_s27 + $0x20] sm:$0xff]   ;;  %v1613_v11 = vld [vmem:[%s1707_s27 + $0x28] sm:$0xff]  }
  0x14   : > { %1478 = vmatmul.mubr.msk.bf16.vlgmr.msra.gmra.mrb[0].mxu1 %vm356_vm1, %v1610_v8  ;;  %1514 = vmatmul.mubr.msk.bf16.vlgmr.msra.gmra.mrb[0].mxu0 %vm356_vm1, %v1608_v6  ;;  %v1614_v12 = vld [vmem:[%s1707_s27 + $0x30] sm:$0xff]   ;;  %v1615_v13 = vld [vmem:[%s1707_s27 + $0x38] sm:$0xff]   ;;  %v1616_v14 = vld [vmem:[%s1707_s27 + $0x40] sm:$0xff]  }
  0x15   : > { %1481 = vmatprep.mubr.msk.bf16.mxu1 %vm356_vm1, %v1611_v9  ;;  %1517 = vmatprep.mubr.msk.bf16.mxu0 %vm356_vm1, %v1610_v8  ;;  %v1617_v15 = vld [vmem:[%s1707_s27 + $0x48] sm:$0xff]   ;;  %v1618_v16 = vld [vmem:[%s1707_s27 + $0x50] sm:$0xff]   ;;  %v1619_v17 = vld [vmem:[%s1707_s27 + $0x58] sm:$0xff]  }
  0x16   : > { %v1620_v18 = vld [vmem:[%s1707_s27 + $0x60] sm:$0xff]   ;;  %v1621_v19 = vld [vmem:[%s1707_s27 + $0x68] sm:$0xff]   ;;  %v1622_v20 = vld [vmem:[%s1707_s27 + $0x70] sm:$0xff]  }
  0x17   : > { %v1623_v21 = vld [vmem:[%s1707_s27 + $0x78] sm:$0xff]   ;;  %v1624_v22 = vld [vmem:[%s1707_s27 + $0x80] sm:$0xff]  }
  0x1c   : > { %1482 = vmatmul.mubr.msk.bf16.gmra.mrb[4].mxu1 %vm356_vm1, %v1612_v10  ;;  %1518 = vmatmul.mubr.msk.bf16.gmra.mrb[4].mxu0 %vm356_vm1, %v1611_v9 }
  0x1d   : > { %1485 = vmatprep.mubr.msk.bf16.mxu1 %vm356_vm1, %v1613_v11  ;;  %1521 = vmatprep.mubr.msk.bf16.mxu0 %vm356_vm1, %v1612_v10 }
  0x24   : > { %1486 = vmatmul.mubr.msk.bf16.gmra.mrb[8].mxu1 %vm356_vm1, %v1614_v12  ;;  %1522 = vmatmul.mubr.msk.bf16.gmra.mrb[8].mxu0 %vm356_vm1, %v1613_v11 }
  0x25   : > { %1489 = vmatprep.mubr.msk.bf16.mxu1 %vm356_vm1, %v1615_v13  ;;  %1525 = vmatprep.mubr.msk.bf16.mxu0 %vm356_vm1, %v1614_v12 }
  0x2c   : > { %1490 = vmatmul.mubr.msk.bf16.gmra.mrb[12].mxu1 %vm356_vm1, %v1616_v14  ;;  %1526 = vmatmul.mubr.msk.bf16.gmra.mrb[12].mxu0 %vm356_vm1, %v1615_v13 }
  0x2d   : > { %1493 = vmatprep.mubr.msk.bf16.mxu1 %vm356_vm1, %v1617_v15  ;;  %1529 = vmatprep.mubr.msk.bf16.mxu0 %vm356_vm1, %v1616_v14 }
  0x34   : > { %1494 = vmatmul.mubr.msk.bf16.gmra.mrb[16].mxu1 %vm356_vm1, %v1618_v16  ;;  %1530 = vmatmul.mubr.msk.bf16.gmra.mrb[16].mxu0 %vm356_vm1, %v1617_v15 }
  0x35   : > { %1497 = vmatprep.mubr.msk.bf16.mxu1 %vm356_vm1, %v1619_v17  ;;  %1533 = vmatprep.mubr.msk.bf16.mxu0 %vm356_vm1, %v1618_v16 }
  0x3c   : > { %1498 = vmatmul.mubr.msk.bf16.gmra.mrb[20].mxu1 %vm356_vm1, %v1620_v18  ;;  %1534 = vmatmul.mubr.msk.bf16.gmra.mrb[20].mxu0 %vm356_vm1, %v1619_v17 }
  0x3d   : > { %1501 = vmatprep.mubr.msk.bf16.mxu1 %vm356_vm1, %v1621_v19  ;;  %1537 = vmatprep.mubr.msk.bf16.mxu0 %vm356_vm1, %v1620_v18 }
  0x44   : > { %1502 = vmatmul.mubr.msk.bf16.gmra.mrb[24].mxu1 %vm356_vm1, %v1622_v20  ;;  %1538 = vmatmul.mubr.msk.bf16.gmra.mrb[24].mxu0 %vm356_vm1, %v1621_v19 }
  0x45   : > { %1505 = vmatprep.mubr.msk.bf16.mxu1 %vm356_vm1, %v1623_v21  ;;  %1541 = vmatprep.mubr.msk.bf16.mxu0 %vm356_vm1, %v1622_v20 }
  0x4c   : > { %1506 = vmatmul.mubr.msk.bf16.gmra.mrb[28].mxu1 %vm356_vm1, %v1624_v22  ;;  %1542 = vmatmul.mubr.msk.bf16.gmra.mrb[28].mxu0 %vm356_vm1, %v1623_v21 }
  0xe7   : > { %v1479_v23 = vpop.f32.mrb[0].mxu1  ;;  %v1515_v24 = vpop.f32.mrb[0].mxu0 }
  0xe8   : > { %v1758_v25 = vadd.f32 %v1515_v24, %v1479_v23  ;;  %v443_v26 = vpop.f32.mrb[1].mxu1  ;;  %v624_v27 = vpop.f32.mrb[1].mxu0 }
  0xe9   : > { %v1760_v28 = vadd.f32 %v624_v27, %v443_v26  ;;  %v1480_v29 = vpop.f32.mrb[2].mxu1  ;;  %v1516_v30 = vpop.f32.mrb[2].mxu0 }
  0xea   : > { %v1762_v31 = vadd.f32 %v1516_v30, %v1480_v29  ;;  %v446_v32 = vpop.f32.mrb[3].mxu1  ;;  %v627_v33 = vpop.f32.mrb[3].mxu0  ;;  %v790_v38 = vmul.f32 %v1758_v25, %v1758_v25 }
  0xeb   : > { %v1764_v34 = vadd.f32 %v627_v33, %v446_v32  ;;  %v788_v35 = vmul.f32 %v1760_v28, %v1760_v28 }
  0xec   : > { %v791_v46 = vmul.f32 %v1762_v31, %v1762_v31 }
  0xed   : > { %v751_v36 = vadd.f32 %v1764_v34, %v1760_v28  ;;  %v789_v37 = vmul.f32 %v1764_v34, %v1764_v34 }
  0xef   : > { %v752_v39 = vadd.f32 %v751_v36, %v1758_v25  ;;  %v820_v40 = vadd.f32 %v789_v37, %v788_v35  ;;  %v1483_v41 = vpop.f32.mrb[4].mxu1  ;;  %v1519_v42 = vpop.f32.mrb[4].mxu0 }
  0xf0   : > { %v1775_v43 = vadd.f32 %v1519_v42, %v1483_v41  ;;  %v459_v44 = vpop.f32.mrb[5].mxu1  ;;  %v640_v45 = vpop.f32.mrb[5].mxu0 }
  0xf1   : > { %v821_v47 = vadd.f32 %v820_v40, %v790_v38  ;;  %v1779_v48 = vadd.f32 %v640_v45, %v459_v44  ;;  %v753_v49 = vadd.f32 %v752_v39, %v1762_v31  ;;  %v1484_v50 = vpop.f32.mrb[6].mxu1  ;;  %v1520_v51 = vpop.f32.mrb[6].mxu0 }
  0xf2   : > { %v1782_v52 = vadd.f32 %v1520_v51, %v1484_v50  ;;  %v462_v53 = vpop.f32.mrb[7].mxu1  ;;  %v643_v54 = vpop.f32.mrb[7].mxu0  ;;  %v794_v62 = vmul.f32 %v1775_v43, %v1775_v43 }
  0xf3   : > { %v754_v55 = vadd.f32 %v753_v49, %v1779_v48  ;;  %v792_v56 = vmul.f32 %v1779_v48, %v1779_v48  ;;  %v822_v57 = vadd.f32 %v821_v47, %v791_v46  ;;  %v1787_v58 = vadd.f32 %v643_v54, %v462_v53 }
  0xf4   : > { %v795_v6 = vmul.f32 %v1782_v52, %v1782_v52 }
  0xf5   : > { %v823_v59 = vadd.f32 %v822_v57, %v792_v56  ;;  %v755_v60 = vadd.f32 %v754_v55, %v1787_v58  ;;  %v793_v61 = vmul.f32 %v1787_v58, %v1787_v58 }
  0xf7   : > { %v756_v63 = vadd.f32 %v755_v60, %v1775_v43  ;;  %v824_v0 = vadd.f32 %v823_v59, %v793_v61  ;;  %v1487_v1 = vpop.f32.mrb[8].mxu1  ;;  %v1523_v2 = vpop.f32.mrb[8].mxu0 }
  0xf8   : > { %v1795_v3 = vadd.f32 %v1523_v2, %v1487_v1  ;;  %v475_v4 = vpop.f32.mrb[9].mxu1  ;;  %v656_v5 = vpop.f32.mrb[9].mxu0 }
  0xf9   : > { %v825_v7 = vadd.f32 %v824_v0, %v794_v62  ;;  %v1799_v8 = vadd.f32 %v656_v5, %v475_v4  ;;  %v757_v9 = vadd.f32 %v756_v63, %v1782_v52  ;;  %v1488_v10 = vpop.f32.mrb[10].mxu1  ;;  %v1524_v11 = vpop.f32.mrb[10].mxu0 }
  0xfa   : > { %v1802_v12 = vadd.f32 %v1524_v11, %v1488_v10  ;;  %v478_v13 = vpop.f32.mrb[11].mxu1  ;;  %v659_v14 = vpop.f32.mrb[11].mxu0  ;;  %v798_v22 = vmul.f32 %v1795_v3, %v1795_v3 }
  0xfb   : > { %v758_v15 = vadd.f32 %v757_v9, %v1799_v8  ;;  %v796_v16 = vmul.f32 %v1799_v8, %v1799_v8  ;;  %v826_v17 = vadd.f32 %v825_v7, %v795_v6  ;;  %v1807_v18 = vadd.f32 %v659_v14, %v478_v13 }
  0xfc   : > { %v799_v33 = vmul.f32 %v1802_v12, %v1802_v12 }
  0xfd   : > { %v827_v19 = vadd.f32 %v826_v17, %v796_v16  ;;  %v759_v20 = vadd.f32 %v758_v15, %v1807_v18  ;;  %v797_v21 = vmul.f32 %v1807_v18, %v1807_v18 }
  0xff   : > { %v760_v23 = vadd.f32 %v759_v20, %v1795_v3  ;;  %v828_v24 = vadd.f32 %v827_v19, %v797_v21  ;;  %v1491_v26 = vpop.f32.mrb[12].mxu1  ;;  %v1527_v27 = vpop.f32.mrb[12].mxu0 }
 0x100   : > { %v1815_v29 = vadd.f32 %v1527_v27, %v1491_v26  ;;  %v491_v30 = vpop.f32.mrb[13].mxu1  ;;  %v672_v32 = vpop.f32.mrb[13].mxu0 }
 0x101   : > { %v829_v35 = vadd.f32 %v828_v24, %v798_v22  ;;  %v1819_v36 = vadd.f32 %v672_v32, %v491_v30  ;;  %v761_v37 = vadd.f32 %v760_v23, %v1802_v12  ;;  %v1492_v38 = vpop.f32.mrb[14].mxu1  ;;  %v1528_v39 = vpop.f32.mrb[14].mxu0 }
 0x102   : > { %v1822_v40 = vadd.f32 %v1528_v39, %v1492_v38  ;;  %v494_v41 = vpop.f32.mrb[15].mxu1  ;;  %v675_v42 = vpop.f32.mrb[15].mxu0  ;;  %v802_v53 = vmul.f32 %v1815_v29, %v1815_v29 }
 0x103   : > { %v762_v44 = vadd.f32 %v761_v37, %v1819_v36  ;;  %v800_v45 = vmul.f32 %v1819_v36, %v1819_v36  ;;  %v830_v46 = vadd.f32 %v829_v35, %v799_v33  ;;  %v1827_v47 = vadd.f32 %v675_v42, %v494_v41 }
 0x104   : > { %v803_v62 = vmul.f32 %v1822_v40, %v1822_v40 }
 0x105   : > { %v831_v49 = vadd.f32 %v830_v46, %v800_v45  ;;  %v763_v50 = vadd.f32 %v762_v44, %v1827_v47  ;;  %v801_v51 = vmul.f32 %v1827_v47, %v1827_v47 }
 0x107   : > { %v764_v54 = vadd.f32 %v763_v50, %v1815_v29  ;;  %v832_v55 = vadd.f32 %v831_v49, %v801_v51  ;;  %v1495_v56 = vpop.f32.mrb[16].mxu1  ;;  %v1531_v57 = vpop.f32.mrb[16].mxu0 }
 0x108   : > { %v1835_v59 = vadd.f32 %v1531_v57, %v1495_v56  ;;  %v507_v60 = vpop.f32.mrb[17].mxu1  ;;  %v688_v61 = vpop.f32.mrb[17].mxu0 }
 0x109   : > { %v833_v63 = vadd.f32 %v832_v55, %v802_v53  ;;  %v1839_v0 = vadd.f32 %v688_v61, %v507_v60  ;;  %v765_v1 = vadd.f32 %v764_v54, %v1822_v40  ;;  %v1496_v2 = vpop.f32.mrb[18].mxu1  ;;  %v1532_v4 = vpop.f32.mrb[18].mxu0 }
 0x10a   : > { %v1842_v5 = vadd.f32 %v1532_v4, %v1496_v2  ;;  %v510_v6 = vpop.f32.mrb[19].mxu1  ;;  %v691_v7 = vpop.f32.mrb[19].mxu0  ;;  %v806_v17 = vmul.f32 %v1835_v59, %v1835_v59 }
 0x10b   : > { %v766_v9 = vadd.f32 %v765_v1, %v1839_v0  ;;  %v804_v10 = vmul.f32 %v1839_v0, %v1839_v0  ;;  %v834_v11 = vadd.f32 %v833_v63, %v803_v62  ;;  %v1847_v13 = vadd.f32 %v691_v7, %v510_v6 }
 0x10c   : > { %v807_v27 = vmul.f32 %v1842_v5, %v1842_v5 }
 0x10d   : > { %v835_v14 = vadd.f32 %v834_v11, %v804_v10  ;;  %v767_v15 = vadd.f32 %v766_v9, %v1847_v13  ;;  %v805_v16 = vmul.f32 %v1847_v13, %v1847_v13 }
 0x10f   : > { %v768_v19 = vadd.f32 %v767_v15, %v1835_v59  ;;  %v836_v20 = vadd.f32 %v835_v14, %v805_v16  ;;  %v1499_v21 = vpop.f32.mrb[20].mxu1  ;;  %v1535_v22 = vpop.f32.mrb[20].mxu0 }
 0x110   : > { %v1855_v23 = vadd.f32 %v1535_v22, %v1499_v21  ;;  %v523_v24 = vpop.f32.mrb[21].mxu1  ;;  %v704_v26 = vpop.f32.mrb[21].mxu0 }
 0x111   : > { %v837_v30 = vadd.f32 %v836_v20, %v806_v17  ;;  %v1859_v32 = vadd.f32 %v704_v26, %v523_v24  ;;  %v769_v33 = vadd.f32 %v768_v19, %v1842_v5  ;;  %v1500_v35 = vpop.f32.mrb[22].mxu1  ;;  %v1536_v37 = vpop.f32.mrb[22].mxu0 }
 0x112   : > { %v1862_v38 = vadd.f32 %v1536_v37, %v1500_v35  ;;  %v526_v39 = vpop.f32.mrb[23].mxu1  ;;  %v707_v41 = vpop.f32.mrb[23].mxu0  ;;  %v810_v53 = vmul.f32 %v1855_v23, %v1855_v23 }
 0x113   : > { %v770_v42 = vadd.f32 %v769_v33, %v1859_v32  ;;  %v808_v44 = vmul.f32 %v1859_v32, %v1859_v32  ;;  %v838_v45 = vadd.f32 %v837_v30, %v807_v27  ;;  %v1867_v46 = vadd.f32 %v707_v41, %v526_v39 }
 0x114   : > { %v811_v63 = vmul.f32 %v1862_v38, %v1862_v38 }
 0x115   : > { %v839_v49 = vadd.f32 %v838_v45, %v808_v44  ;;  %v771_v50 = vadd.f32 %v770_v42, %v1867_v46  ;;  %v809_v51 = vmul.f32 %v1867_v46, %v1867_v46 }
 0x117   : > { %v772_v54 = vadd.f32 %v771_v50, %v1855_v23  ;;  %v840_v55 = vadd.f32 %v839_v49, %v809_v51  ;;  %v1503_v56 = vpop.f32.mrb[24].mxu1  ;;  %v1539_v57 = vpop.f32.mrb[24].mxu0 }
 0x118   : > { %v1875_v60 = vadd.f32 %v1539_v57, %v1503_v56  ;;  %v539_v61 = vpop.f32.mrb[25].mxu1  ;;  %v720_v62 = vpop.f32.mrb[25].mxu0 }
 0x119   : > { %v841_v1 = vadd.f32 %v840_v55, %v810_v53  ;;  %v1879_v2 = vadd.f32 %v720_v62, %v539_v61  ;;  %v773_v4 = vadd.f32 %v772_v54, %v1862_v38  ;;  %v1504_v6 = vpop.f32.mrb[26].mxu1  ;;  %v1540_v7 = vpop.f32.mrb[26].mxu0 }
 0x11a   : > { %v1882_v9 = vadd.f32 %v1540_v7, %v1504_v6  ;;  %v542_v10 = vpop.f32.mrb[27].mxu1  ;;  %v723_v11 = vpop.f32.mrb[27].mxu0  ;;  %v814_v22 = vmul.f32 %v1875_v60, %v1875_v60 }
 0x11b   : > { %v774_v14 = vadd.f32 %v773_v4, %v1879_v2  ;;  %v812_v15 = vmul.f32 %v1879_v2, %v1879_v2  ;;  %v842_v16 = vadd.f32 %v841_v1, %v811_v63  ;;  %v1887_v17 = vadd.f32 %v723_v11, %v542_v10 }
 0x11c   : > { %v815_v39 = vmul.f32 %v1882_v9, %v1882_v9 }
 0x11d   : > { %v843_v19 = vadd.f32 %v842_v16, %v812_v15  ;;  %v775_v20 = vadd.f32 %v774_v14, %v1887_v17  ;;  %v813_v21 = vmul.f32 %v1887_v17, %v1887_v17 }
 0x11f   : > { %v776_v24 = vadd.f32 %v775_v20, %v1875_v60  ;;  %v844_v26 = vadd.f32 %v843_v19, %v813_v21  ;;  %v1507_v27 = vpop.f32.mrb[28].mxu1  ;;  %v1543_v30 = vpop.f32.mrb[28].mxu0 }
 0x120   : > { %v1895_v33 = vadd.f32 %v1543_v30, %v1507_v27  ;;  %v555_v35 = vpop.f32.mrb[29].mxu1  ;;  %v736_v37 = vpop.f32.mrb[29].mxu0 }
 0x121   : > { %v845_v41 = vadd.f32 %v844_v26, %v814_v22  ;;  %v1899_v42 = vadd.f32 %v736_v37, %v555_v35  ;;  %v777_v44 = vadd.f32 %v776_v24, %v1882_v9  ;;  %v1508_v45 = vpop.f32.mrb[30].mxu1  ;;  %v1544_v49 = vpop.f32.mrb[30].mxu0 }
 0x122   : > { %v1902_v50 = vadd.f32 %v1544_v49, %v1508_v45  ;;  %v558_v51 = vpop.f32.mrb[31].mxu1  ;;  %v739_v53 = vpop.f32.mrb[31].mxu0  ;;  %v818_v1 = vmul.f32 %v1895_v33, %v1895_v33 }
 0x123   : > { %v778_v54 = vadd.f32 %v777_v44, %v1899_v42  ;;  %v816_v55 = vmul.f32 %v1899_v42, %v1899_v42  ;;  %v846_v56 = vadd.f32 %v845_v41, %v815_v39  ;;  %v1907_v57 = vadd.f32 %v739_v53, %v558_v51 }
 0x124   : > { %v819_v7 = vmul.f32 %v1902_v50, %v1902_v50  ;;  %v869_v53 = vlaneseq }
 0x125   : > { %v847_v61 = vadd.f32 %v846_v56, %v816_v55  ;;  %v779_v62 = vadd.f32 %v778_v54, %v1907_v57  ;;  %v817_v63 = vmul.f32 %v1907_v57, %v1907_v57  ;;  %v864_v55 = vld [vmem:[%s1989_s2 + $0x1] sm:$0x1] }
 0x126   : > { %v870_v54 = vshrl.u32 %v869_v53, 7 }
 0x127   : > { %v780_v4 = vadd.f32 %v779_v62, %v1895_v33  ;;  %v848_v6 = vadd.f32 %v847_v61, %v817_v63  ;;  %v866_v63 = vld [vmem:[%s1989_s2 + $0x2] sm:$0x1] }
 0x128   : > { %v871_v56 = vsub.s32 0, %v870_v54 }
 0x129   : > { %v781_v10 = vadd.f32 %v780_v4, %v1902_v50  ;;  %v849_v11 = vadd.f32 %v848_v6, %v818_v1 }
 0x12b   : > { %v782_v14 = vrot.slane %v781_v10, 4  ;;  %v850_v15 = vadd.f32 %v849_v11, %v819_v7 }
 0x12d   : > { %v783_v16 = vadd.f32 %v782_v14, %v781_v10  ;;  %v851_v19 = vrot.slane %v850_v15, 4 }
 0x12f   : > { %v784_v20 = vrot.slane %v783_v16, 2  ;;  %v852_v21 = vadd.f32 %v851_v19, %v850_v15 }
 0x131   : > { %v785_v22 = vadd.f32 %v784_v20, %v783_v16  ;;  %v853_v24 = vrot.slane %v852_v21, 2 }
 0x133   : > { %v786_v26 = vrot.slane %v785_v22, 1  ;;  %v854_v27 = vadd.f32 %v853_v24, %v852_v21 }
 0x135   : > { %v787_v30 = vadd.f32 %v786_v26, %v785_v22  ;;  %v855_v35 = vrot.slane %v854_v27, 1 }
 0x137   : > { %v856_v37 = vadd.f32 %v855_v35, %v854_v27  ;;  %v857_v39 = vmul.f32 0.00390625, %v787_v30 }
 0x139   : > { %v858_v41 = vmul.f32 0.00390625, %v856_v37  ;;  %v859_v44 = vmul.f32 %v857_v39, %v857_v39 }
 0x13b   : > { %v860_v45 = vsub.f32 %v858_v41, %v859_v44 }
 0x13d   : > { %v861_v49 = vmax.f32 %v860_v45, 0.0 }
 0x13f   : > { %v862_v51 = vadd.f32 1e-05, %v861_v49 }
 0x141   : > { %1625 = vrsqrt.f32 %v862_v51 }
 0x14b   : > { %v1626_v61 = vpop.eup %1625 }
 0x14c   : > { %v865_v62 = vmul.f32 %v1626_v61, %v864_v55 }
 0x14e   : > { %v867_v1 = vmul.f32 %v865_v62, %v857_v39  ;;  %v872_v4 = vrot.slane %v865_v62, %v871_v56 }
 0x150   : > { %v868_v6 = vsub.f32 %v866_v63, %v867_v1  ;;  %v873_v7 = vmul.f32 %v872_v4, %v1760_v28  ;;  %v874_v10 = vmul.f32 %v872_v4, %v1764_v34  ;;  %v875_v11 = vmul.f32 %v872_v4, %v1758_v25 }
 0x151   : > { %v876_v14 = vmul.f32 %v872_v4, %v1762_v31  ;;  %v877_v15 = vmul.f32 %v872_v4, %v1779_v48  ;;  %v878_v16 = vmul.f32 %v872_v4, %v1787_v58  ;;  %v879_v19 = vmul.f32 %v872_v4, %v1775_v43 }
 0x152   : > { %v880_v20 = vmul.f32 %v872_v4, %v1782_v52  ;;  %v881_v21 = vmul.f32 %v872_v4, %v1799_v8  ;;  %v882_v22 = vmul.f32 %v872_v4, %v1807_v18  ;;  %v883_v28 = vmul.f32 %v872_v4, %v1795_v3 }
 0x153   : > { %v884_v34 = vmul.f32 %v872_v4, %v1802_v12  ;;  %v885_v25 = vmul.f32 %v872_v4, %v1819_v36  ;;  %v886_v31 = vmul.f32 %v872_v4, %v1827_v47  ;;  %v887_v48 = vmul.f32 %v872_v4, %v1815_v29 }
 0x154   : > { %v894_v58 = vmul.f32 %v872_v4, %v1867_v46  ;;  %v895_v43 = vmul.f32 %v872_v4, %v1855_v23  ;;  %v896_v52 = vmul.f32 %v872_v4, %v1862_v38  ;;  %v897_v8 = vmul.f32 %v872_v4, %v1879_v2 }
 0x155   : > { %v898_v18 = vmul.f32 %v872_v4, %v1887_v17  ;;  %v899_v3 = vmul.f32 %v872_v4, %v1875_v60  ;;  %v900_v12 = vmul.f32 %v872_v4, %v1882_v9  ;;  %v901_v36 = vmul.f32 %v872_v4, %v1899_v42 }
 0x156   : > { %v902_v47 = vmul.f32 %v872_v4, %v1907_v57  ;;  %v903_v29 = vmul.f32 %v872_v4, %v1895_v33  ;;  %v888_v46 = vmul.f32 %v872_v4, %v1822_v40  ;;  %v889_v23 = vmul.f32 %v872_v4, %v1839_v0 }
 0x157   : > { %v904_v38 = vmul.f32 %v872_v4, %v1902_v50  ;;  %v908_v24 = vrot.slane %v868_v6, %v871_v56  ;;  %v890_v2 = vmul.f32 %v872_v4, %v1847_v13  ;;  %v891_v17 = vmul.f32 %v872_v4, %v1835_v59 }
 0x158   : > { %v892_v60 = vmul.f32 %v872_v4, %v1842_v5  ;;  %v893_v9 = vmul.f32 %v872_v4, %v1859_v32 }
 0x159   : > { %v909_v42 = vadd.f32 %v908_v24, %v873_v7  ;;  %v910_v57 = vadd.f32 %v908_v24, %v874_v10  ;;  %v911_v26 = vadd.f32 %v908_v24, %v875_v11  ;;  %v912_v33 = vadd.f32 %v908_v24, %v876_v14 }
 0x15a   : > { %v913_v27 = vadd.f32 %v908_v24, %v877_v15  ;;  %v914_v40 = vadd.f32 %v908_v24, %v878_v16  ;;  %v915_v30 = vadd.f32 %v908_v24, %v879_v19  ;;  %v916_v0 = vadd.f32 %v908_v24, %v880_v20 }
 0x15b   : > { %v917_v35 = vadd.f32 %v908_v24, %v881_v21  ;;  %v918_v50 = vadd.f32 %v908_v24, %v882_v22  ;;  %v919_v37 = vadd.f32 %v908_v24, %v883_v28  ;;  %v920_v39 = vadd.f32 %v908_v24, %v884_v34 }
 0x15c   : > { %v921_v13 = vadd.f32 %v908_v24, %v885_v25  ;;  %v922_v41 = vadd.f32 %v908_v24, %v886_v31  ;;  %v923_v59 = vadd.f32 %v908_v24, %v887_v48  ;;  %v924_v44 = vadd.f32 %v908_v24, %v888_v46 }
 0x15d   : > { %v925_v5 = vadd.f32 %v908_v24, %v889_v23  ;;  %v926_v32 = vadd.f32 %v908_v24, %v890_v2  ;;  %v927_v45 = vadd.f32 %v908_v24, %v891_v17  ;;  %v928_v49 = vadd.f32 %v908_v24, %v892_v60 }
 0x15e   : > { %v929_v51 = vadd.f32 %v908_v24, %v893_v9  ;;  %v930_v53 = vadd.f32 %v908_v24, %v894_v58  ;;  %v931_v54 = vadd.f32 %v908_v24, %v895_v43  ;;  %v932_v55 = vadd.f32 %v908_v24, %v896_v52 }
 0x15f   : > { %v933_v56 = vadd.f32 %v908_v24, %v897_v8  ;;  %v934_v61 = vadd.f32 %v908_v24, %v898_v18  ;;  %v935_v62 = vadd.f32 %v908_v24, %v899_v3  ;;  %v936_v63 = vadd.f32 %v908_v24, %v900_v12 }
 0x160   : > { %v937_v1 = vadd.f32 %v908_v24, %v901_v36  ;;  %v938_v4 = vadd.f32 %v908_v24, %v902_v47  ;;  %v939_v6 = vadd.f32 %v908_v24, %v903_v29  ;;  %v940_v7 = vadd.f32 %v908_v24, %v904_v38 }
 0x161   : > { %v1345_v10 = vpack.c.bf16 %v910_v57, %v909_v42  ;;  %v1350_v11 = vpack.c.bf16 %v912_v33, %v911_v26  ;;  %v1355_v14 = vpack.c.bf16 %v914_v40, %v913_v27  ;;  %v1360_v15 = vpack.c.bf16 %v916_v0, %v915_v30 }
 0x162   : > { %v1365_v16 = vpack.c.bf16 %v918_v50, %v917_v35  ;;  %v1370_v19 = vpack.c.bf16 %v920_v39, %v919_v37  ;;  %v1375_v20 = vpack.c.bf16 %v922_v41, %v921_v13  ;;  %v1380_v21 = vpack.c.bf16 %v924_v44, %v923_v59 }
 0x163   : > { %1346 = vst [vmem:[%s1960_s8] sm:$0xff] %v1345_v10   ;;  %1422 = vst [vmem:[%s1960_s8 + $0x8] sm:$0xff] %v1350_v11   ;;  %v1385_v22 = vpack.c.bf16 %v926_v32, %v925_v5  ;;  %v1390_v28 = vpack.c.bf16 %v928_v49, %v927_v45  ;;  %v1395_v34 = vpack.c.bf16 %v930_v53, %v929_v51 }
 0x164   : > { %1423 = vst [vmem:[%s1960_s8 + $0x10] sm:$0xff] %v1355_v14   ;;  %1424 = vst [vmem:[%s1960_s8 + $0x18] sm:$0xff] %v1360_v15   ;;  %v1400_v25 = vpack.c.bf16 %v932_v55, %v931_v54  ;;  %v1405_v31 = vpack.c.bf16 %v934_v61, %v933_v56  ;;  %v1410_v48 = vpack.c.bf16 %v936_v63, %v935_v62 }
 0x165   : > { %1425 = vst [vmem:[%s1960_s8 + $0x20] sm:$0xff] %v1365_v16   ;;  %1426 = vst [vmem:[%s1960_s8 + $0x28] sm:$0xff] %v1370_v19   ;;  %v1415_v58 = vpack.c.bf16 %v938_v4, %v937_v1  ;;  %v1420_v43 = vpack.c.bf16 %v940_v7, %v939_v6 }
 0x166   : > { %1427 = vst [vmem:[%s1960_s8 + $0x30] sm:$0xff] %v1375_v20   ;;  %1428 = vst [vmem:[%s1960_s8 + $0x38] sm:$0xff] %v1380_v21  }
 0x167   : > { %1429 = vst [vmem:[%s1960_s8 + $0x40] sm:$0xff] %v1385_v22   ;;  %1430 = vst [vmem:[%s1960_s8 + $0x48] sm:$0xff] %v1390_v28  }
 0x168   : > { %1431 = vst [vmem:[%s1960_s8 + $0x50] sm:$0xff] %v1395_v34   ;;  %1432 = vst [vmem:[%s1960_s8 + $0x58] sm:$0xff] %v1400_v25  }
 0x169   : > { %1433 = vst [vmem:[%s1960_s8 + $0x60] sm:$0xff] %v1405_v31   ;;  %1434 = vst [vmem:[%s1960_s8 + $0x68] sm:$0xff] %v1410_v48  }
 0x16a   : > { %1435 = vst [vmem:[%s1960_s8 + $0x70] sm:$0xff] %v1415_v58   ;;  %1436 = vst [vmem:[%s1960_s8 + $0x78] sm:$0xff] %v1420_v43  }
 0x16b PF: > { %s13_s14 = sadd.s32 1, %s1649_s14   ;;  %s1991_s12 = smov %s1645_s13 }
 0x16c   : > { %p10_p5 = scmp.ge.s32.totalorder %s13_s14, 4   ;;  %s1992_s13 = smov %s1994_s15 }
 0x16e   :  { %12 = sbr.rel (!%p10_p5) target bundleno = 2 (0x2), region = 69 }

// kernel: _lambda_.6
= control target key start
LH: loop header
LB: loop body
LE: loop exit
PB: predicated region body
PF: predicated region fallthrough
CT: control target
= control target key end

     0   :  { %s4312_s12 = smov 0   ;;  %s4314_s13 = smov 0   ;;  %s5271_s0 = inlined_call_operand.vmem [shape: bf16[2,144,1024], index: 0, kind: input, shape index: {}]   ;;  %s5272_s1 = inlined_call_operand.vmem [shape: bf16[2,1024,128], index: 1, kind: input, shape index: {}]   ;;  %s5273_s2 = inlined_call_operand.vmem [shape: f32[3,128], index: 2, kind: input, shape index: {}]   ;;  %s5274_s3 = inlined_call_operand.vmem [shape: bf16[2,128,128], index: 3, kind: output, shape index: {}]  }
   0x1   :  { %s4316_s14 = smov 0  }
   0x2 LB: > { %s25_s15 = sadd.s32 1, %s4286_s13  ;;  %p3131_p0 = scmp.ge.s32.totalorder %s4290_s14, 1  ;;  %s4290_s14 = sphi %s4316_s14, %s13_s14   ;;  %s4286_s13 = sphi %s4314_s13, %s5306_s13   ;;  %s4282_s12 = sphi %s4312_s12, %s5305_s12  }
   0x3   : > { %p27_p1 = scmp.ge.s32.totalorder %s25_s15, 2  ;;  %p169_p2 = scmp.lt.s32.totalorder %s4290_s14, 3 }
   0x5   : > { %s5308_s15 = smov (%p27_p1, %s25_s15), 0  ;;  %p170_p3 = pnand %p3131_p0, %p169_p2 }
   0x7   : > { %173 = sbr.rel (%p170_p3) target bundleno = 580 (0x244), region = 32 }
   0xe   : > { %v4138_v0 = vld [vmem:[%s5272_s1 + $0x240] sm:$0xff]   ;;  %v4142_v4 = vld [vmem:[%s5272_s1 + $0x248] sm:$0xff]   ;;  %v4146_v8 = vld [vmem:[%s5272_s1 + $0x250] sm:$0xff]   ;;  %p204_p4 = scmp.lt.s32.totalorder %s4282_s12, 1 }
   0xf   : > { %v4139_v1 = vld [vmem:[%s5272_s1 + $0x2c0] sm:$0xff]   ;;  %3601 = vmatprep.subr.bf16.mxu0 %v4138_v0  ;;  %v4143_v5 = vld [vmem:[%s5272_s1 + $0x2c8] sm:$0xff]   ;;  %v4147_v9 = vld [vmem:[%s5272_s1 + $0x2d0] sm:$0xff]  }
  0x10   : > { %v4140_v2 = vld [vmem:[%s5272_s1 + $0x200] sm:$0xff]   ;;  %3665 = vmatprep.subr.bf16.mxu1 %v4139_v1  ;;  %v4144_v6 = vld [vmem:[%s5272_s1 + $0x208] sm:$0xff]   ;;  %v4148_v10 = vld [vmem:[%s5272_s1 + $0x210] sm:$0xff]   ;;  %s5310_s12 = smov (!%p204_p4, %s4282_s12), 1 }
  0x11   : > { %v4141_v3 = vld [vmem:[%s5272_s1 + $0x280] sm:$0xff]   ;;  %3602 = vmatpush3.bf16.msra.mxu0 %v4140_v2  ;;  %v4145_v7 = vld [vmem:[%s5272_s1 + $0x288] sm:$0xff]   ;;  %v4149_v11 = vld [vmem:[%s5272_s1 + $0x290] sm:$0xff]   ;;  %s4113_s22 = smul.u32 576, %s5310_s12  ;;  %s3537_s8 = sshll.u32 %s5310_s12, 6 }
  0x12   : > { %3666 = vmatpush3.bf16.msra.mxu1 %v4141_v3  ;;  %3603 = vmatprep.subr.bf16.mxu0 %v4142_v4  ;;  %v4150_v12 = vld [vmem:[%s5272_s1 + $0x258] sm:$0xff]   ;;  %v4154_v16 = vld [vmem:[%s5272_s1 + $0x260] sm:$0xff]   ;;  %v4158_v20 = vld [vmem:[%s5272_s1 + $0x268] sm:$0xff]   ;;  %s224_s11 = scalar_lea.vmem %s5274_s3, %s3537_s8 }
  0x13   : > { %3667 = vmatprep.subr.bf16.mxu1 %v4143_v5  ;;  %v4151_v13 = vld [vmem:[%s5272_s1 + $0x2d8] sm:$0xff]   ;;  %v4155_v17 = vld [vmem:[%s5272_s1 + $0x2e0] sm:$0xff]   ;;  %v4159_v21 = vld [vmem:[%s5272_s1 + $0x2e8] sm:$0xff]   ;;  %s4430_s6 = scalar_lea.vmem %s5271_s0, %s4113_s22 }
  0x14   : > { %v4152_v14 = vld [vmem:[%s5272_s1 + $0x218] sm:$0xff]   ;;  %v4156_v18 = vld [vmem:[%s5272_s1 + $0x220] sm:$0xff]   ;;  %v4160_v22 = vld [vmem:[%s5272_s1 + $0x228] sm:$0xff]  }
  0x15   : > { %3604 = vmatpush3.bf16.msra.mxu0 %v4144_v6  ;;  %v4153_v15 = vld [vmem:[%s5272_s1 + $0x298] sm:$0xff]   ;;  %v4157_v19 = vld [vmem:[%s5272_s1 + $0x2a0] sm:$0xff]   ;;  %v4161_v23 = vld [vmem:[%s5272_s1 + $0x2a8] sm:$0xff]  }
  0x16   : > { %3668 = vmatpush3.bf16.msra.mxu1 %v4145_v7  ;;  %3605 = vmatprep.subr.bf16.mxu0 %v4146_v8  ;;  %v4162_v24 = vld [vmem:[%s5272_s1 + $0x270] sm:$0xff]   ;;  %v4166_v28 = vld [vmem:[%s5272_s1 + $0x278] sm:$0xff]   ;;  %v418_v32 = vld [vmem:[%s4430_s6 + $0x40] sm:$0xff] }
  0x17   : > { %3669 = vmatprep.subr.bf16.mxu1 %v4147_v9  ;;  %v4163_v25 = vld [vmem:[%s5272_s1 + $0x2f0] sm:$0xff]   ;;  %v4167_v29 = vld [vmem:[%s5272_s1 + $0x2f8] sm:$0xff]   ;;  %v422_v33 = vld [vmem:[%s4430_s6 + $0x60] sm:$0xff] }
  0x18   : > { %v4164_v26 = vld [vmem:[%s5272_s1 + $0x230] sm:$0xff]   ;;  %v4168_v30 = vld [vmem:[%s5272_s1 + $0x238] sm:$0xff]   ;;  %v419_v34 = vld [vmem:[%s4430_s6 + $0x48] sm:$0xff]  ;;  %v4441_v35 = vcombine.low %v418_v32, %v422_v33  ;;  %v4443_v36 = vcombine.high %v418_v32, %v422_v33 }
  0x19   : > { %3606 = vmatpush3.bf16.msra.mxu0 %v4148_v10  ;;  %v4165_v27 = vld [vmem:[%s5272_s1 + $0x2b0] sm:$0xff]   ;;  %v4169_v31 = vld [vmem:[%s5272_s1 + $0x2b8] sm:$0xff]   ;;  %v423_v37 = vld [vmem:[%s4430_s6 + $0x68] sm:$0xff] }
  0x1a   : > { %3670 = vmatpush3.bf16.msra.mxu1 %v4149_v11  ;;  %3607 = vmatprep.subr.bf16.mxu0 %v4150_v12  ;;  %v4446_v38 = vcombine.low %v419_v34, %v423_v37  ;;  %v4448_v39 = vcombine.high %v419_v34, %v423_v37  ;;  %v4170_v40 = vld [vmem:[%s5272_s1 + $0x340] sm:$0xff]   ;;  %v427_v47 = vld [vmem:[%s4430_s6 + $0x88] sm:$0xff]  ;;  %v4178_v62 = vld [vmem:[%s5272_s1 + $0x350] sm:$0xff]  }
  0x1b   : > { %3671 = vmatprep.subr.bf16.mxu1 %v4151_v13  ;;  %1347 = vmatprep.mubr.bf16.mxu0 %v4443_v36  ;;  %v4171_v41 = vld [vmem:[%s5272_s1 + $0x300] sm:$0xff]   ;;  %v431_v48 = vld [vmem:[%s4430_s6 + $0xa8] sm:$0xff]  ;;  %v4179_v63 = vld [vmem:[%s5272_s1 + $0x310] sm:$0xff]  }
  0x1c   : > { %1444 = vmatprep.mubr.bf16.mxu1 %v4448_v39  ;;  %v4172_v42 = vld [vmem:[%s5272_s1 + $0x3c0] sm:$0xff]   ;;  %v4472_v49 = vcombine.high %v427_v47, %v431_v48  ;;  %v4174_v50 = vld [vmem:[%s5272_s1 + $0x348] sm:$0xff]   ;;  %v4484_v53 = vcombine.low %v427_v47, %v431_v48  ;;  %v4180_v0 = vld [vmem:[%s5272_s1 + $0x3d0] sm:$0xff]  }
  0x1d   : > { %3608 = vmatpush3.bf16.msra.mxu0 %v4152_v14  ;;  %v4173_v43 = vld [vmem:[%s5272_s1 + $0x380] sm:$0xff]   ;;  %v4175_v52 = vld [vmem:[%s5272_s1 + $0x308] sm:$0xff]   ;;  %v4181_v1 = vld [vmem:[%s5272_s1 + $0x390] sm:$0xff]  }
  0x1e   : > { %3672 = vmatpush3.bf16.msra.mxu1 %v4153_v15  ;;  %3609 = vmatprep.subr.bf16.mxu0 %v4154_v16  ;;  %v426_v44 = vld [vmem:[%s4430_s6 + $0x80] sm:$0xff]  ;;  %v4176_v54 = vld [vmem:[%s5272_s1 + $0x3c8] sm:$0xff]   ;;  %v4182_v10 = vld [vmem:[%s5272_s1 + $0x358] sm:$0xff]  }
  0x1f   : > { %3673 = vmatprep.subr.bf16.mxu1 %v4155_v17  ;;  %v430_v45 = vld [vmem:[%s4430_s6 + $0xa0] sm:$0xff]  ;;  %v4177_v55 = vld [vmem:[%s5272_s1 + $0x388] sm:$0xff]   ;;  %v4183_v11 = vld [vmem:[%s5272_s1 + $0x318] sm:$0xff]  }
  0x20   : > { %v4468_v46 = vcombine.high %v426_v44, %v430_v45  ;;  %v4478_v51 = vcombine.low %v426_v44, %v430_v45  ;;  %v434_v56 = vld [vmem:[%s4430_s6 + $0xc0] sm:$0xff]  ;;  %v435_v58 = vld [vmem:[%s4430_s6 + $0xc8] sm:$0xff]  ;;  %v4184_v12 = vld [vmem:[%s5272_s1 + $0x3d8] sm:$0xff]  }
  0x21   : > { %3610 = vmatpush3.bf16.msra.mxu0 %v4156_v18  ;;  %v438_v57 = vld [vmem:[%s4430_s6 + $0xe0] sm:$0xff]  ;;  %v439_v59 = vld [vmem:[%s4430_s6 + $0xe8] sm:$0xff]  ;;  %v4185_v13 = vld [vmem:[%s5272_s1 + $0x398] sm:$0xff]  }
  0x22   : > { %3674 = vmatpush3.bf16.msra.mxu1 %v4157_v19  ;;  %3611 = vmatprep.subr.bf16.mxu0 %v4158_v20  ;;  %v4497_v60 = vcombine.high %v434_v56, %v438_v57  ;;  %v4499_v61 = vcombine.high %v435_v58, %v439_v59  ;;  %v4516_v2 = vcombine.low %v434_v56, %v438_v57  ;;  %v442_v3 = vld [vmem:[%s4430_s6 + $0x100] sm:$0xff]  ;;  %v443_v5 = vld [vmem:[%s4430_s6 + $0x108] sm:$0xff]  ;;  %v4196_v44 = vld [vmem:[%s5272_s1 + $0x3f0] sm:$0xff]  }
  0x23   : > { %3675 = vmatprep.subr.bf16.mxu1 %v4159_v21  ;;  %v446_v4 = vld [vmem:[%s4430_s6 + $0x120] sm:$0xff]  ;;  %v4521_v6 = vcombine.low %v435_v58, %v439_v59  ;;  %v447_v8 = vld [vmem:[%s4430_s6 + $0x128] sm:$0xff]  ;;  %v4197_v48 = vld [vmem:[%s5272_s1 + $0x3b0] sm:$0xff]  }
  0x24   : > { %v4523_v7 = vcombine.high %v442_v3, %v446_v4  ;;  %v4526_v9 = vcombine.high %v443_v5, %v447_v8  ;;  %v450_v14 = vld [vmem:[%s4430_s6 + $0x140] sm:$0xff]  ;;  %v451_v16 = vld [vmem:[%s4430_s6 + $0x148] sm:$0xff]  ;;  %v4551_v19 = vcombine.low %v442_v3, %v446_v4  ;;  %v4556_v21 = vcombine.low %v443_v5, %v447_v8  ;;  %v4199_v56 = vld [vmem:[%s5272_s1 + $0x338] sm:$0xff]  }
  0x25   : > { %3612 = vmatpush3.bf16.msra.mxu0 %v4160_v22  ;;  %v454_v15 = vld [vmem:[%s4430_s6 + $0x160] sm:$0xff]  ;;  %v455_v17 = vld [vmem:[%s4430_s6 + $0x168] sm:$0xff]  ;;  %v4200_v59 = vld [vmem:[%s5272_s1 + $0x3f8] sm:$0xff]  }
  0x26   : > { %3676 = vmatpush3.bf16.msra.mxu1 %v4161_v23  ;;  %3613 = vmatprep.subr.bf16.mxu0 %v4162_v24  ;;  %v4186_v18 = vld [vmem:[%s5272_s1 + $0x360] sm:$0xff]   ;;  %v4558_v22 = vcombine.high %v450_v14, %v454_v15  ;;  %v4563_v24 = vcombine.high %v451_v16, %v455_v17  ;;  %v4192_v32 = vld [vmem:[%s5272_s1 + $0x3e8] sm:$0xff]   ;;  %v4588_v34 = vcombine.low %v450_v14, %v454_v15  ;;  %v420_v14 = vld [vmem:[%s4430_s6 + $0x50] sm:$0xff] }
  0x27   : > { %3677 = vmatprep.subr.bf16.mxu1 %v4163_v25  ;;  %v4187_v20 = vld [vmem:[%s5272_s1 + $0x320] sm:$0xff]   ;;  %v4193_v33 = vld [vmem:[%s5272_s1 + $0x3a8] sm:$0xff]   ;;  %v4590_v37 = vcombine.low %v451_v16, %v455_v17  ;;  %v424_v15 = vld [vmem:[%s4430_s6 + $0x70] sm:$0xff] }
  0x28   : > { %v4188_v23 = vld [vmem:[%s5272_s1 + $0x3e0] sm:$0xff]   ;;  %v475_v4 = vld [vmem:[%s4430_s6 + $0x208] sm:$0xff]  ;;  %v421_v16 = vld [vmem:[%s4430_s6 + $0x58] sm:$0xff] }
  0x29   : > { %3614 = vmatpush3.bf16.msra.mxu0 %v4164_v26  ;;  %v4189_v25 = vld [vmem:[%s5272_s1 + $0x3a0] sm:$0xff]   ;;  %v479_v8 = vld [vmem:[%s4430_s6 + $0x228] sm:$0xff]  ;;  %v425_v17 = vld [vmem:[%s4430_s6 + $0x78] sm:$0xff] }
  0x2a   : > { %3678 = vmatpush3.bf16.msra.mxu1 %v4165_v27  ;;  %3615 = vmatprep.subr.bf16.mxu0 %v4166_v28  ;;  %v458_v26 = vld [vmem:[%s4430_s6 + $0x180] sm:$0xff]  ;;  %v4190_v28 = vld [vmem:[%s5272_s1 + $0x368] sm:$0xff]  }
  0x2b   : > { %3679 = vmatprep.subr.bf16.mxu1 %v4167_v29  ;;  %v462_v27 = vld [vmem:[%s4430_s6 + $0x1a0] sm:$0xff]  ;;  %v459_v29 = vld [vmem:[%s4430_s6 + $0x188] sm:$0xff] }
  0x2c   : > { %v466_v45 = vld [vmem:[%s4430_s6 + $0x1c0] sm:$0xff] }
  0x2d   : > { %3616 = vmatpush3.bf16.msra.mxu0 %v4168_v30  ;;  %v463_v30 = vld [vmem:[%s4430_s6 + $0x1a8] sm:$0xff]  ;;  %v470_v47 = vld [vmem:[%s4430_s6 + $0x1e0] sm:$0xff] }
  0x2e   : > { %3680 = vmatpush3.bf16.msra.mxu1 %v4169_v31  ;;  %3729 = vmatprep.subr.bf16.mxu0 %v4170_v40  ;;  %v4191_v31 = vld [vmem:[%s5272_s1 + $0x328] sm:$0xff]   ;;  %v4592_v40 = vcombine.high %v458_v26, %v462_v27  ;;  %v4624_v57 = vcombine.low %v459_v29, %v463_v30  ;;  %v4626_v58 = vcombine.high %v466_v45, %v470_v47  ;;  %v4202_v3 = vld [vmem:[%s5272_s1 + $0x40] sm:$0xff]  }
  0x2f   : > { %3793 = vmatprep.subr.bf16.mxu1 %v4172_v42  ;;  %v4194_v42 = vld [vmem:[%s5272_s1 + $0x370] sm:$0xff]   ;;  %v4204_v5 = vld [vmem:[%s5272_s1 + $0xc0] sm:$0xff]  }
  0x30   : > { %1348 = vmatmul.mubr.bf16.vlgmr.msra.gmra.mrb[0].mxu0 %v4441_v35 }
  0x31   : > { %1445 = vmatmul.mubr.bf16.vlgmr.msra.gmra.mrb[0].mxu1 %v4446_v38  ;;  %3730 = vmatpush3.bf16.msra.mxu0 %v4171_v41  ;;  %v4594_v41 = vcombine.high %v459_v29, %v463_v30  ;;  %v4203_v29 = vld [vmem:[%s5272_s1] sm:$0xff]   ;;  %v429_v30 = vld [vmem:[%s4430_s6 + $0x98] sm:$0xff] }
  0x32   : > { %3794 = vmatpush3.bf16.msra.mxu1 %v4173_v43  ;;  %1355 = vmatprep.mubr.bf16.mxu0 %v4468_v46  ;;  %v4195_v43 = vld [vmem:[%s5272_s1 + $0x330] sm:$0xff]  }
  0x33   : > { %1452 = vmatprep.mubr.bf16.mxu1 %v4472_v49  ;;  %3731 = vmatprep.subr.bf16.mxu0 %v4174_v50  ;;  %v467_v50 = vld [vmem:[%s4430_s6 + $0x1c8] sm:$0xff] }
  0x34   : > { %3795 = vmatprep.subr.bf16.mxu1 %v4176_v54  ;;  %v4198_v54 = vld [vmem:[%s5272_s1 + $0x378] sm:$0xff]  }
  0x35   : > { %3732 = vmatpush3.bf16.msra.mxu0 %v4175_v52  ;;  %v471_v52 = vld [vmem:[%s4430_s6 + $0x1e8] sm:$0xff] }
  0x36   : > { %3796 = vmatpush3.bf16.msra.mxu1 %v4177_v55  ;;  %3733 = vmatprep.subr.bf16.mxu0 %v4178_v62  ;;  %v4619_v55 = vcombine.low %v458_v26, %v462_v27  ;;  %v4631_v62 = vcombine.high %v467_v50, %v471_v52  ;;  %v428_v26 = vld [vmem:[%s4430_s6 + $0x90] sm:$0xff] }
  0x37   : > { %3797 = vmatprep.subr.bf16.mxu1 %v4180_v0  ;;  %v474_v0 = vld [vmem:[%s4430_s6 + $0x200] sm:$0xff]  ;;  %v432_v27 = vld [vmem:[%s4430_s6 + $0xb0] sm:$0xff] }
  0x38   : > { %1356 = vmatmul.mubr.bf16.gmra.mrb[4].mxu0 %v4478_v51 }
  0x39   : > { %1453 = vmatmul.mubr.bf16.gmra.mrb[4].mxu1 %v4484_v53  ;;  %1363 = vmatprep.mubr.bf16.mxu0 %v4497_v60 }
  0x3a   : > { %1460 = vmatprep.mubr.bf16.mxu1 %v4499_v61  ;;  %3734 = vmatpush3.bf16.msra.mxu0 %v4179_v63  ;;  %v4201_v63 = vld [vmem:[%s5272_s1 + $0x3b8] sm:$0xff]  }
  0x3b   : > { %3798 = vmatpush3.bf16.msra.mxu1 %v4181_v1  ;;  %3735 = vmatprep.subr.bf16.mxu0 %v4182_v10  ;;  %v478_v1 = vld [vmem:[%s4430_s6 + $0x220] sm:$0xff]  ;;  %v4650_v10 = vcombine.low %v466_v45, %v470_v47  ;;  %v4207_v45 = vld [vmem:[%s5272_s1 + $0x8] sm:$0xff]  }
  0x3c   : > { %3799 = vmatprep.subr.bf16.mxu1 %v4184_v12  ;;  %v3320_v12 = vcombine.high %v474_v0, %v478_v1  ;;  %v4208_v47 = vld [vmem:[%s5272_s1 + $0xc8] sm:$0xff]  }
  0x3e   : > { %3736 = vmatpush3.bf16.msra.mxu0 %v4183_v11  ;;  %v4652_v11 = vcombine.low %v467_v50, %v471_v52  ;;  %v436_v50 = vld [vmem:[%s4430_s6 + $0xd0] sm:$0xff] }
  0x3f   : > { %3800 = vmatpush3.bf16.msra.mxu1 %v4185_v13  ;;  %3737 = vmatprep.subr.bf16.mxu0 %v4186_v18  ;;  %v3322_v13 = vcombine.high %v475_v4, %v479_v8  ;;  %v3319_v18 = vcombine.low %v474_v0, %v478_v1  ;;  %v440_v52 = vld [vmem:[%s4430_s6 + $0xf0] sm:$0xff]  ;;  %v4710_v0 = vcombine.low %v428_v26, %v432_v27 }
  0x40   : > { %1364 = vmatmul.mubr.bf16.gmra.mrb[8].mxu0 %v4516_v2  ;;  %3801 = vmatprep.subr.bf16.mxu1 %v4188_v23  ;;  %v4660_v23 = vcombine.high %v420_v14, %v424_v15 }
  0x41   : > { %1461 = vmatmul.mubr.bf16.gmra.mrb[8].mxu1 %v4521_v6  ;;  %1371 = vmatprep.mubr.bf16.mxu0 %v4523_v7 }
  0x42   : > { %1468 = vmatprep.mubr.bf16.mxu1 %v4526_v9  ;;  %3738 = vmatpush3.bf16.msra.mxu0 %v4187_v20  ;;  %v3321_v20 = vcombine.low %v475_v4, %v479_v8  ;;  %v4213_v8 = vld [vmem:[%s5272_s1 + $0x90] sm:$0xff]  }
  0x43   : > { %3802 = vmatpush3.bf16.msra.mxu1 %v4189_v25  ;;  %3739 = vmatprep.subr.bf16.mxu0 %v4190_v28  ;;  %v4662_v25 = vcombine.high %v421_v16, %v425_v17  ;;  %v4668_v28 = vcombine.low %v420_v14, %v424_v15  ;;  %v448_v14 = vld [vmem:[%s4430_s6 + $0x130] sm:$0xff]  ;;  %v4216_v15 = vld [vmem:[%s5272_s1 + $0xd8] sm:$0xff]  }
  0x44   : > { %3803 = vmatprep.subr.bf16.mxu1 %v4192_v32  ;;  %v4675_v32 = vcombine.low %v421_v16, %v425_v17  ;;  %v445_v16 = vld [vmem:[%s4430_s6 + $0x118] sm:$0xff] }
  0x45   : > { %v449_v17 = vld [vmem:[%s4430_s6 + $0x138] sm:$0xff] }
  0x46   : > { %3740 = vmatpush3.bf16.msra.mxu0 %v4191_v31  ;;  %v433_v31 = vld [vmem:[%s4430_s6 + $0xb8] sm:$0xff] }
  0x47   : > { %3804 = vmatpush3.bf16.msra.mxu1 %v4193_v33  ;;  %3741 = vmatprep.subr.bf16.mxu0 %v4194_v42  ;;  %v4205_v33 = vld [vmem:[%s5272_s1 + $0x80] sm:$0xff]   ;;  %v4680_v42 = vcombine.high %v428_v26, %v432_v27  ;;  %v4712_v1 = vcombine.low %v429_v30, %v433_v31  ;;  %v4747_v27 = vcombine.low %v436_v50, %v440_v52 }
  0x48   : > { %1372 = vmatmul.mubr.bf16.gmra.mrb[12].mxu0 %v4551_v19  ;;  %3805 = vmatprep.subr.bf16.mxu1 %v4196_v44  ;;  %v4685_v44 = vcombine.high %v429_v30, %v433_v31  ;;  %v4218_v26 = vld [vmem:[%s5272_s1 + $0x60] sm:$0xff]  }
  0x49   : > { %1469 = vmatmul.mubr.bf16.gmra.mrb[12].mxu1 %v4556_v21  ;;  %1379 = vmatprep.mubr.bf16.mxu0 %v4558_v22 }
  0x4a   : > { %1476 = vmatprep.mubr.bf16.mxu1 %v4563_v24  ;;  %3742 = vmatpush3.bf16.msra.mxu0 %v4195_v43  ;;  %v4206_v43 = vld [vmem:[%s5272_s1 + $0x48] sm:$0xff]  }
  0x4b   : > { %3806 = vmatpush3.bf16.msra.mxu1 %v4197_v48  ;;  %3743 = vmatprep.subr.bf16.mxu0 %v4198_v54  ;;  %v4209_v48 = vld [vmem:[%s5272_s1 + $0x88] sm:$0xff]   ;;  %v437_v54 = vld [vmem:[%s4430_s6 + $0xd8] sm:$0xff] }
  0x4c   : > { %3807 = vmatprep.subr.bf16.mxu1 %v4200_v59  ;;  %v4210_v59 = vld [vmem:[%s5272_s1 + $0x50] sm:$0xff]  }
  0x4e   : > { %3744 = vmatpush3.bf16.msra.mxu0 %v4199_v56  ;;  %v441_v56 = vld [vmem:[%s4430_s6 + $0xf8] sm:$0xff] }
  0x4f   : > { %3808 = vmatpush3.bf16.msra.mxu1 %v4201_v63  ;;  %3857 = vmatprep.subr.bf16.mxu0 %v4202_v3  ;;  %v4212_v63 = vld [vmem:[%s5272_s1 + $0xd0] sm:$0xff]   ;;  %v4714_v3 = vcombine.high %v436_v50, %v440_v52  ;;  %v4716_v4 = vcombine.high %v437_v54, %v441_v56  ;;  %v4752_v30 = vcombine.low %v437_v54, %v441_v56  ;;  %v4224_v50 = vld [vmem:[%s5272_s1 + $0xe8] sm:$0xff]   ;;  %v453_v54 = vld [vmem:[%s4430_s6 + $0x158] sm:$0xff] }
  0x50   : > { %1380 = vmatmul.mubr.bf16.gmra.mrb[16].mxu0 %v4588_v34  ;;  %3921 = vmatprep.subr.bf16.mxu1 %v4204_v5  ;;  %v4211_v5 = vld [vmem:[%s5272_s1 + $0x10] sm:$0xff]   ;;  %v457_v56 = vld [vmem:[%s4430_s6 + $0x178] sm:$0xff] }
  0x51   : > { %1477 = vmatmul.mubr.bf16.gmra.mrb[16].mxu1 %v4590_v37  ;;  %1387 = vmatprep.mubr.bf16.mxu0 %v4592_v40  ;;  %v456_v52 = vld [vmem:[%s4430_s6 + $0x170] sm:$0xff] }
  0x52   : > { %1484 = vmatprep.mubr.bf16.mxu1 %v4594_v41 }
  0x58   : > { %1388 = vmatmul.mubr.bf16.gmra.mrb[20].mxu0 %v4619_v55 }
  0x59   : > { %1485 = vmatmul.mubr.bf16.gmra.mrb[20].mxu1 %v4624_v57  ;;  %1395 = vmatprep.mubr.bf16.mxu0 %v4626_v58 }
  0x5a   : > { %1492 = vmatprep.mubr.bf16.mxu1 %v4631_v62 }
  0x60   : > { %1396 = vmatmul.mubr.bf16.gmra.mrb[24].mxu0 %v4650_v10 }
  0x61   : > { %1493 = vmatmul.mubr.bf16.gmra.mrb[24].mxu1 %v4652_v11  ;;  %1403 = vmatprep.mubr.bf16.mxu0 %v3320_v12  ;;  %v4214_v12 = vld [vmem:[%s5272_s1 + $0x58] sm:$0xff]  }
  0x62   : > { %1500 = vmatprep.mubr.bf16.mxu1 %v3322_v13  ;;  %v444_v13 = vld [vmem:[%s4430_s6 + $0x110] sm:$0xff] }
  0x63   : > { %v4754_v31 = vcombine.high %v444_v13, %v448_v14 }
  0x68   : > { %1404 = vmatmul.mubr.bf16.gmra.mrb[28].mxu0 %v3319_v18  ;;  %v4215_v18 = vld [vmem:[%s5272_s1 + $0x18] sm:$0xff]  }
  0x69   : > { %1501 = vmatmul.mubr.bf16.gmra.mrb[28].mxu1 %v3321_v20  ;;  %1541 = vmatprep.mubr.bf16.mxu0 %v4660_v23  ;;  %v4217_v20 = vld [vmem:[%s5272_s1 + $0x98] sm:$0xff]  }
  0x6a   : > { %1638 = vmatprep.mubr.bf16.mxu1 %v4662_v25 }
  0x70   : > { %1542 = vmatmul.mubr.bf16.vlgmr.msra.gmra.mrb[32].mxu0 %v4668_v28 }
  0x71   : > { %1639 = vmatmul.mubr.bf16.vlgmr.msra.gmra.mrb[32].mxu1 %v4675_v32  ;;  %3858 = vmatpush3.bf16.msra.mxu0 %v4203_v29  ;;  %v4220_v29 = vld [vmem:[%s5272_s1 + $0xe0] sm:$0xff]  }
  0x72   : > { %3922 = vmatpush3.bf16.msra.mxu1 %v4205_v33  ;;  %1549 = vmatprep.mubr.bf16.mxu0 %v4680_v42  ;;  %v4219_v33 = vld [vmem:[%s5272_s1 + $0x20] sm:$0xff]  }
  0x73   : > { %1646 = vmatprep.mubr.bf16.mxu1 %v4685_v44  ;;  %3859 = vmatprep.subr.bf16.mxu0 %v4206_v43  ;;  %v4759_v43 = vcombine.high %v445_v16, %v449_v17 }
  0x74   : > { %3923 = vmatprep.subr.bf16.mxu1 %v4208_v47  ;;  %v4222_v47 = vld [vmem:[%s5272_s1 + $0x68] sm:$0xff]  }
  0x75   : > { %3860 = vmatpush3.bf16.msra.mxu0 %v4207_v45  ;;  %v4221_v45 = vld [vmem:[%s5272_s1 + $0xa0] sm:$0xff]  }
  0x76   : > { %3924 = vmatpush3.bf16.msra.mxu1 %v4209_v48  ;;  %3861 = vmatprep.subr.bf16.mxu0 %v4210_v59  ;;  %v452_v48 = vld [vmem:[%s4430_s6 + $0x150] sm:$0xff]  ;;  %v4223_v59 = vld [vmem:[%s5272_s1 + $0x28] sm:$0xff]  }
  0x77   : > { %3925 = vmatprep.subr.bf16.mxu1 %v4212_v63  ;;  %v4225_v63 = vld [vmem:[%s5272_s1 + $0xa8] sm:$0xff]  }
  0x78   : > { %1550 = vmatmul.mubr.bf16.gmra.mrb[36].mxu0 %v4710_v0 }
  0x79   : > { %1647 = vmatmul.mubr.bf16.gmra.mrb[36].mxu1 %v4712_v1  ;;  %1557 = vmatprep.mubr.bf16.mxu0 %v4714_v3 }
  0x7a   : > { %1654 = vmatprep.mubr.bf16.mxu1 %v4716_v4  ;;  %3862 = vmatpush3.bf16.msra.mxu0 %v4211_v5  ;;  %v4226_v5 = vld [vmem:[%s5272_s1 + $0x70] sm:$0xff]  }
  0x7b   : > { %3926 = vmatpush3.bf16.msra.mxu1 %v4213_v8  ;;  %3863 = vmatprep.subr.bf16.mxu0 %v4214_v12  ;;  %v4787_v8 = vcombine.low %v444_v13, %v448_v14  ;;  %v4228_v12 = vld [vmem:[%s5272_s1 + $0xf0] sm:$0xff]   ;;  %v4230_v14 = vld [vmem:[%s5272_s1 + $0x78] sm:$0xff]  }
  0x7c   : > { %3927 = vmatprep.subr.bf16.mxu1 %v4216_v15  ;;  %v4792_v15 = vcombine.low %v445_v16, %v449_v17  ;;  %v4229_v13 = vld [vmem:[%s5272_s1 + $0xb0] sm:$0xff]  }
  0x7d   : > { %v460_v16 = vld [vmem:[%s4430_s6 + $0x190] sm:$0xff] }
  0x7e   : > { %3864 = vmatpush3.bf16.msra.mxu0 %v4215_v18  ;;  %v4794_v18 = vcombine.high %v452_v48, %v456_v52  ;;  %v464_v17 = vld [vmem:[%s4430_s6 + $0x1b0] sm:$0xff] }
  0x7f   : > { %3928 = vmatpush3.bf16.msra.mxu1 %v4217_v20  ;;  %3865 = vmatprep.subr.bf16.mxu0 %v4218_v26  ;;  %v4227_v20 = vld [vmem:[%s5272_s1 + $0x30] sm:$0xff]   ;;  %v4799_v26 = vcombine.high %v453_v54, %v457_v56 }
  0x80   : > { %1558 = vmatmul.mubr.bf16.gmra.mrb[40].mxu0 %v4747_v27  ;;  %3929 = vmatprep.subr.bf16.mxu1 %v4220_v29  ;;  %5285 = vst [vmem:[#allocation2_spill] sm:$0xff] %v4794_v18  ;;  %v4232_v29 = vld [vmem:[%s5272_s1 + $0xf8] sm:$0xff]  }
  0x81   : > { %1655 = vmatmul.mubr.bf16.gmra.mrb[40].mxu1 %v4752_v30  ;;  %1565 = vmatprep.mubr.bf16.mxu0 %v4754_v31  ;;  %5286 = vst [vmem:[#allocation3_spill] sm:$0xff] %v4799_v26 }
  0x82   : > { %1662 = vmatprep.mubr.bf16.mxu1 %v4759_v43  ;;  %3866 = vmatpush3.bf16.msra.mxu0 %v4219_v33  ;;  %v461_v33 = vld [vmem:[%s4430_s6 + $0x198] sm:$0xff] }
  0x83   : > { %3930 = vmatpush3.bf16.msra.mxu1 %v4221_v45  ;;  %3867 = vmatprep.subr.bf16.mxu0 %v4222_v47  ;;  %v465_v45 = vld [vmem:[%s4430_s6 + $0x1b8] sm:$0xff] }
  0x84   : > { %3931 = vmatprep.subr.bf16.mxu1 %v4224_v50  ;;  %v4231_v47 = vld [vmem:[%s5272_s1 + $0x38] sm:$0xff]  }
  0x85   : > { %v4233_v50 = vld [vmem:[%s5272_s1 + $0xb8] sm:$0xff]  }
  0x86   : > { %3868 = vmatpush3.bf16.msra.mxu0 %v4223_v59  ;;  %v4234_v59 = vld [vmem:[%s5272_s1 + $0x140] sm:$0xff]  }
  0x87   : > { %3932 = vmatpush3.bf16.msra.mxu1 %v4225_v63  ;;  %3869 = vmatprep.subr.bf16.mxu0 %v4226_v5  ;;  %v4827_v63 = vcombine.low %v452_v48, %v456_v52  ;;  %v4236_v5 = vld [vmem:[%s5272_s1 + $0x1c0] sm:$0xff]   ;;  %v468_v48 = vld [vmem:[%s4430_s6 + $0x1d0] sm:$0xff] }
  0x88   : > { %1566 = vmatmul.mubr.bf16.gmra.mrb[44].mxu0 %v4787_v8  ;;  %3933 = vmatprep.subr.bf16.mxu1 %v4228_v12  ;;  %v4832_v12 = vcombine.low %v453_v54, %v457_v56  ;;  %v472_v52 = vld [vmem:[%s4430_s6 + $0x1f0] sm:$0xff]  ;;  %v469_v54 = vld [vmem:[%s4430_s6 + $0x1d8] sm:$0xff] }
  0x89   : > { %1663 = vmatmul.mubr.bf16.gmra.mrb[44].mxu1 %v4792_v15  ;;  %1573 = vmatprep.mubr.bf16.mxu0 %v4794_v18  ;;  %5287 = vst [vmem:[#allocation4_spill] sm:$0xff] %v4827_v63  ;;  %v473_v56 = vld [vmem:[%s4430_s6 + $0x1f8] sm:$0xff] }
  0x8a   : > { %1670 = vmatprep.mubr.bf16.mxu1 %v4799_v26  ;;  %3870 = vmatpush3.bf16.msra.mxu0 %v4227_v20  ;;  %5288 = vst [vmem:[#allocation5_spill] sm:$0xff] %v4832_v12  ;;  %v4834_v20 = vcombine.high %v460_v16, %v464_v17 }
  0x8b   : > { %3934 = vmatpush3.bf16.msra.mxu1 %v4229_v13  ;;  %3871 = vmatprep.subr.bf16.mxu0 %v4230_v14  ;;  %v4836_v13 = vcombine.high %v461_v33, %v465_v45  ;;  %v4846_v14 = vcombine.low %v460_v16, %v464_v17  ;;  %v477_v16 = vld [vmem:[%s4430_s6 + $0x218] sm:$0xff] }
  0x8c   : > { %3935 = vmatprep.subr.bf16.mxu1 %v4232_v29  ;;  %5289 = vst [vmem:[#allocation6_spill] sm:$0xff] %v4834_v20  ;;  %v4848_v29 = vcombine.low %v461_v33, %v465_v45  ;;  %v481_v17 = vld [vmem:[%s4430_s6 + $0x238] sm:$0xff]  ;;  %v4862_v33 = vcombine.low %v468_v48, %v472_v52  ;;  %v4864_v45 = vcombine.low %v469_v54, %v473_v56 }
  0x8d   : > { %5290 = vst [vmem:[#allocation7_spill] sm:$0xff] %v4836_v13  ;;  %5291 = vst [vmem:[#allocation8_spill] sm:$0xff] %v4846_v14 }
  0x8e   : > { %3872 = vmatpush3.bf16.msra.mxu0 %v4231_v47  ;;  %5292 = vst [vmem:[#allocation9_spill] sm:$0xff] %v4848_v29  ;;  %v4850_v47 = vcombine.high %v468_v48, %v472_v52 }
  0x8f   : > { %3936 = vmatpush3.bf16.msra.mxu1 %v4233_v50  ;;  %3985 = vmatprep.subr.bf16.mxu0 %v4234_v59  ;;  %v4852_v50 = vcombine.high %v469_v54, %v473_v56  ;;  %v476_v59 = vld [vmem:[%s4430_s6 + $0x210] sm:$0xff]  ;;  %v4235_v54 = vld [vmem:[%s5272_s1 + $0x100] sm:$0xff]   ;;  %v4238_v56 = vld [vmem:[%s5272_s1 + $0x148] sm:$0xff]  }
  0x90   : > { %1574 = vmatmul.mubr.bf16.gmra.mrb[48].mxu0 %v4827_v63  ;;  %4049 = vmatprep.subr.bf16.mxu1 %v4236_v5  ;;  %5293 = vst [vmem:[#allocation10_spill] sm:$0xff] %v4850_v47  ;;  %v480_v5 = vld [vmem:[%s4430_s6 + $0x230] sm:$0xff] }
  0x91   : > { %1671 = vmatmul.mubr.bf16.gmra.mrb[48].mxu1 %v4832_v12  ;;  %1581 = vmatprep.mubr.bf16.mxu0 %v4834_v20  ;;  %5294 = vst [vmem:[#allocation11_spill] sm:$0xff] %v4852_v50  ;;  %v227_v20 = vld [vmem:[%s4430_s6 + $0x8] sm:$0xff]  ;;  %v3323_v63 = vcombine.low %v476_v59, %v480_v5 }
  0x92   : > { %1678 = vmatprep.mubr.bf16.mxu1 %v4836_v13  ;;  %v3324_v13 = vcombine.high %v476_v59, %v480_v5  ;;  %v231_v12 = vld [vmem:[%s4430_s6 + $0x28] sm:$0xff] }
  0x93   : > { %v3394_v18 = vcombine.high %v227_v20, %v231_v12  ;;  %v3393_v52 = vcombine.low %v227_v20, %v231_v12  ;;  %v4242_v12 = vld [vmem:[%s5272_s1 + $0x150] sm:$0xff]   ;;  %v4254_v59 = vld [vmem:[%s5272_s1 + $0x168] sm:$0xff]  }
  0x94   : > { %v4244_v20 = vld [vmem:[%s5272_s1 + $0x1d0] sm:$0xff]   ;;  %v4256_v5 = vld [vmem:[%s5272_s1 + $0x1e8] sm:$0xff]  }
  0x98   : > { %1582 = vmatmul.mubr.bf16.gmra.mrb[52].mxu0 %v4846_v14  ;;  %v3326_v14 = vcombine.high %v477_v16, %v481_v17 }
  0x99   : > { %1679 = vmatmul.mubr.bf16.gmra.mrb[52].mxu1 %v4848_v29  ;;  %1589 = vmatprep.mubr.bf16.mxu0 %v4850_v47  ;;  %v226_v29 = vld [vmem:[%s4430_s6] sm:$0xff] }
  0x9a   : > { %1686 = vmatprep.mubr.bf16.mxu1 %v4852_v50  ;;  %v230_v47 = vld [vmem:[%s4430_s6 + $0x20] sm:$0xff]  ;;  %v3325_v50 = vcombine.low %v477_v16, %v481_v17  ;;  %v4255_v16 = vld [vmem:[%s5272_s1 + $0x128] sm:$0xff]   ;;  %v4258_v17 = vld [vmem:[%s5272_s1 + $0x170] sm:$0xff]  }
  0x9b   : > { %v3392_v26 = vcombine.high %v226_v29, %v230_v47  ;;  %v3391_v48 = vcombine.low %v226_v29, %v230_v47  ;;  %v4248_v29 = vld [vmem:[%s5272_s1 + $0x1d8] sm:$0xff]  }
  0x9c   : > { %v4247_v47 = vld [vmem:[%s5272_s1 + $0x118] sm:$0xff]  }
  0xa0   : > { %1590 = vmatmul.mubr.bf16.gmra.mrb[56].mxu0 %v4862_v33 }
  0xa1   : > { %1687 = vmatmul.mubr.bf16.gmra.mrb[56].mxu1 %v4864_v45  ;;  %1597 = vmatprep.mubr.bf16.mxu0 %v3324_v13  ;;  %v4237_v13 = vld [vmem:[%s5272_s1 + $0x180] sm:$0xff]  }
  0xa2   : > { %1694 = vmatprep.mubr.bf16.mxu1 %v3326_v14  ;;  %v4245_v14 = vld [vmem:[%s5272_s1 + $0x190] sm:$0xff]  }
  0xa8   : > { %1598 = vmatmul.mubr.bf16.gmra.mrb[60].mxu0 %v3323_v63  ;;  %v4241_v63 = vld [vmem:[%s5272_s1 + $0x188] sm:$0xff]  }
  0xa9   : > { %1695 = vmatmul.mubr.bf16.gmra.mrb[60].mxu1 %v3325_v50  ;;  %2439 = vmatprep.mubr.bf16.mxu0 %v3392_v26  ;;  %v4240_v26 = vld [vmem:[%s5272_s1 + $0x1c8] sm:$0xff]   ;;  %v4250_v50 = vld [vmem:[%s5272_s1 + $0x160] sm:$0xff]  }
  0xaa   : > { %2536 = vmatprep.mubr.bf16.mxu1 %v3394_v18  ;;  %v4239_v18 = vld [vmem:[%s5272_s1 + $0x108] sm:$0xff]  }
  0xb0   : > { %2440 = vmatmul.mubr.bf16.vlgmr.msra.gmra.mrb[64].mxu0 %v3391_v48  ;;  %v4262_v48 = vld [vmem:[%s5272_s1 + $0x178] sm:$0xff]  }
  0xb1   : > { %2537 = vmatmul.mubr.bf16.vlgmr.msra.gmra.mrb[64].mxu1 %v3393_v52  ;;  %3986 = vmatpush3.bf16.msra.mxu0 %v4235_v54  ;;  %v4264_v52 = vld [vmem:[%s5272_s1 + $0x1f8] sm:$0xff]  }
  0xb2   : > { %4050 = vmatpush3.bf16.msra.mxu1 %v4237_v13  ;;  %2447 = vmatprep.mubr.bf16.mxu0 %v4443_v36  ;;  %v4243_v36 = vld [vmem:[%s5272_s1 + $0x110] sm:$0xff]   ;;  %v4263_v54 = vld [vmem:[%s5272_s1 + $0x138] sm:$0xff]  }
  0xb3   : > { %2544 = vmatprep.mubr.bf16.mxu1 %v4448_v39  ;;  %3987 = vmatprep.subr.bf16.mxu0 %v4238_v56  ;;  %v4246_v39 = vld [vmem:[%s5272_s1 + $0x158] sm:$0xff]  }
  0xb4   : > { %4051 = vmatprep.subr.bf16.mxu1 %v4240_v26 }
  0xb5   : > { %3988 = vmatpush3.bf16.msra.mxu0 %v4239_v18 }
  0xb6   : > { %4052 = vmatpush3.bf16.msra.mxu1 %v4241_v63  ;;  %3989 = vmatprep.subr.bf16.mxu0 %v4242_v12 }
  0xb7   : > { %4053 = vmatprep.subr.bf16.mxu1 %v4244_v20  ;;  %v5296_v20 = vld [vmem:[#allocation3_spill] sm:$0xff] }
  0xb8   : > { %2448 = vmatmul.mubr.bf16.gmra.mrb[68].mxu0 %v4441_v35  ;;  %v4249_v35 = vld [vmem:[%s5272_s1 + $0x198] sm:$0xff]  }
  0xb9   : > { %2545 = vmatmul.mubr.bf16.gmra.mrb[68].mxu1 %v4446_v38  ;;  %2455 = vmatprep.mubr.bf16.mxu0 %v4468_v46  ;;  %v4252_v38 = vld [vmem:[%s5272_s1 + $0x1e0] sm:$0xff]  }
  0xba   : > { %2552 = vmatprep.mubr.bf16.mxu1 %v4472_v49  ;;  %3990 = vmatpush3.bf16.msra.mxu0 %v4243_v36  ;;  %v4251_v46 = vld [vmem:[%s5272_s1 + $0x120] sm:$0xff]  }
  0xbb   : > { %4054 = vmatpush3.bf16.msra.mxu1 %v4245_v14  ;;  %3991 = vmatprep.subr.bf16.mxu0 %v4246_v39  ;;  %v4253_v49 = vld [vmem:[%s5272_s1 + $0x1a0] sm:$0xff]  }
  0xbc   : > { %4055 = vmatprep.subr.bf16.mxu1 %v4248_v29 }
  0xbe   : > { %3992 = vmatpush3.bf16.msra.mxu0 %v4247_v47 }
  0xbf   : > { %4056 = vmatpush3.bf16.msra.mxu1 %v4249_v35  ;;  %3993 = vmatprep.subr.bf16.mxu0 %v4250_v50 }
  0xc0   : > { %2456 = vmatmul.mubr.bf16.gmra.mrb[72].mxu0 %v4478_v51  ;;  %4057 = vmatprep.subr.bf16.mxu1 %v4252_v38  ;;  %v4257_v51 = vld [vmem:[%s5272_s1 + $0x1a8] sm:$0xff]  }
  0xc1   : > { %2553 = vmatmul.mubr.bf16.gmra.mrb[72].mxu1 %v4484_v53  ;;  %2463 = vmatprep.mubr.bf16.mxu0 %v4497_v60  ;;  %v4260_v53 = vld [vmem:[%s5272_s1 + $0x1f0] sm:$0xff]  }
  0xc2   : > { %2560 = vmatprep.mubr.bf16.mxu1 %v4499_v61  ;;  %3994 = vmatpush3.bf16.msra.mxu0 %v4251_v46  ;;  %v4259_v60 = vld [vmem:[%s5272_s1 + $0x130] sm:$0xff]  }
  0xc3   : > { %4058 = vmatpush3.bf16.msra.mxu1 %v4253_v49  ;;  %3995 = vmatprep.subr.bf16.mxu0 %v4254_v59  ;;  %v4261_v61 = vld [vmem:[%s5272_s1 + $0x1b0] sm:$0xff]  }
  0xc4   : > { %4059 = vmatprep.subr.bf16.mxu1 %v4256_v5  ;;  %v5297_v5 = vld [vmem:[#allocation4_spill] sm:$0xff] }
  0xc6   : > { %3996 = vmatpush3.bf16.msra.mxu0 %v4255_v16  ;;  %v5298_v16 = vld [vmem:[#allocation5_spill] sm:$0xff] }
  0xc7   : > { %4060 = vmatpush3.bf16.msra.mxu1 %v4257_v51  ;;  %3997 = vmatprep.subr.bf16.mxu0 %v4258_v17  ;;  %v5299_v51 = vld [vmem:[#allocation6_spill] sm:$0xff] }
  0xc8   : > { %2464 = vmatmul.mubr.bf16.gmra.mrb[76].mxu0 %v4516_v2  ;;  %4061 = vmatprep.subr.bf16.mxu1 %v4260_v53  ;;  %v4265_v2 = vld [vmem:[%s5272_s1 + $0x1b8] sm:$0xff]   ;;  %v5300_v53 = vld [vmem:[#allocation7_spill] sm:$0xff] }
  0xc9   : > { %2561 = vmatmul.mubr.bf16.gmra.mrb[76].mxu1 %v4521_v6  ;;  %2471 = vmatprep.mubr.bf16.mxu0 %v4523_v7  ;;  %v228_v6 = vld [vmem:[%s4430_s6 + $0x10] sm:$0xff] }
  0xca   : > { %2568 = vmatprep.mubr.bf16.mxu1 %v4526_v9  ;;  %3998 = vmatpush3.bf16.msra.mxu0 %v4259_v60  ;;  %v232_v7 = vld [vmem:[%s4430_s6 + $0x30] sm:$0xff]  ;;  %v229_v9 = vld [vmem:[%s4430_s6 + $0x18] sm:$0xff] }
  0xcb   : > { %4062 = vmatpush3.bf16.msra.mxu1 %v4261_v61  ;;  %3999 = vmatprep.subr.bf16.mxu0 %v4262_v48 }
  0xcc   : > { %4063 = vmatprep.subr.bf16.mxu1 %v4264_v52 }
  0xce   : > { %4000 = vmatpush3.bf16.msra.mxu0 %v4263_v54 }
  0xcf   : > { %4064 = vmatpush3.bf16.msra.mxu1 %v4265_v2 }
  0xd0   : > { %2472 = vmatmul.mubr.bf16.gmra.mrb[80].mxu0 %v4551_v19  ;;  %v233_v19 = vld [vmem:[%s4430_s6 + $0x38] sm:$0xff] }
  0xd1   : > { %2569 = vmatmul.mubr.bf16.gmra.mrb[80].mxu1 %v4556_v21  ;;  %2479 = vmatprep.mubr.bf16.mxu0 %v4558_v22  ;;  %v3396_v21 = vcombine.high %v228_v6, %v232_v7  ;;  %v3398_v22 = vcombine.high %v229_v9, %v233_v19 }
  0xd2   : > { %2576 = vmatprep.mubr.bf16.mxu1 %v4563_v24  ;;  %v3395_v24 = vcombine.low %v228_v6, %v232_v7 }
  0xd8   : > { %2480 = vmatmul.mubr.bf16.gmra.mrb[84].mxu0 %v4588_v34  ;;  %v3397_v34 = vcombine.low %v229_v9, %v233_v19 }
  0xd9   : > { %2577 = vmatmul.mubr.bf16.gmra.mrb[84].mxu1 %v4590_v37  ;;  %2487 = vmatprep.mubr.bf16.mxu0 %v4592_v40 }
  0xda   : > { %2584 = vmatprep.mubr.bf16.mxu1 %v4594_v41 }
  0xe0   : > { %2488 = vmatmul.mubr.bf16.gmra.mrb[88].mxu0 %v4619_v55 }
  0xe1   : > { %2585 = vmatmul.mubr.bf16.gmra.mrb[88].mxu1 %v4624_v57  ;;  %2495 = vmatprep.mubr.bf16.mxu0 %v4626_v58 }
  0xe2   : > { %2592 = vmatprep.mubr.bf16.mxu1 %v4631_v62 }
  0xe8   : > { %2496 = vmatmul.mubr.bf16.gmra.mrb[92].mxu0 %v4650_v10 }
  0xe9   : > { %2593 = vmatmul.mubr.bf16.gmra.mrb[92].mxu1 %v4652_v11  ;;  %2633 = vmatprep.mubr.bf16.mxu0 %v3396_v21 }
  0xea   : > { %2730 = vmatprep.mubr.bf16.mxu1 %v3398_v22 }
  0xf0   : > { %2634 = vmatmul.mubr.bf16.vlgmr.msra.gmra.mrb[96].mxu0 %v3395_v24 }
  0xf1   : > { %2731 = vmatmul.mubr.bf16.vlgmr.msra.gmra.mrb[96].mxu1 %v3397_v34  ;;  %2641 = vmatprep.mubr.bf16.mxu0 %v4660_v23  ;;  %v5301_v34 = vld [vmem:[#allocation8_spill] sm:$0xff] }
  0xf2   : > { %2738 = vmatprep.mubr.bf16.mxu1 %v4662_v25 }
  0xf8   : > { %2642 = vmatmul.mubr.bf16.gmra.mrb[100].mxu0 %v4668_v28 }
  0xf9   : > { %2739 = vmatmul.mubr.bf16.gmra.mrb[100].mxu1 %v4675_v32  ;;  %2649 = vmatprep.mubr.bf16.mxu0 %v4680_v42 }
  0xfa   : > { %2746 = vmatprep.mubr.bf16.mxu1 %v4685_v44 }
 0x100   : > { %2650 = vmatmul.mubr.bf16.gmra.mrb[104].mxu0 %v4710_v0 }
 0x101   : > { %2747 = vmatmul.mubr.bf16.gmra.mrb[104].mxu1 %v4712_v1  ;;  %2657 = vmatprep.mubr.bf16.mxu0 %v4714_v3 }
 0x102   : > { %2754 = vmatprep.mubr.bf16.mxu1 %v4716_v4 }
 0x103   : > { %v3617_v37 = vpop.f32.mrb[0].mxu0 }
 0x104   : > { %v3681_v40 = vpop.f32.mrb[0].mxu1  ;;  %v3618_v41 = vpop.f32.mrb[1].mxu0 }
 0x105   : > { %v3619_v55 = vadd.f32 %v3618_v41, %v3617_v37  ;;  %v3682_v57 = vpop.f32.mrb[1].mxu1  ;;  %v3620_v58 = vpop.f32.mrb[2].mxu0  ;;  %v5302_v37 = vld [vmem:[#allocation9_spill] sm:$0xff] }
 0x106   : > { %v3683_v62 = vadd.f32 %v3682_v57, %v3681_v40  ;;  %v3684_v10 = vpop.f32.mrb[2].mxu1  ;;  %v3621_v11 = vpop.f32.mrb[3].mxu0  ;;  %v5303_v40 = vld [vmem:[#allocation10_spill] sm:$0xff] }
 0x107   : > { %v3622_v23 = vadd.f32 %v3621_v11, %v3620_v58  ;;  %v3685_v25 = vpop.f32.mrb[3].mxu1 }
 0x108   : > { %v5004_v28 = vadd.f32 %v3683_v62, %v3619_v55  ;;  %v3686_v32 = vadd.f32 %v3685_v25, %v3684_v10  ;;  %2658 = vmatmul.mubr.bf16.gmra.mrb[108].mxu0 %v4747_v27  ;;  %v5304_v55 = vld [vmem:[#allocation11_spill] sm:$0xff] }
 0x109   : > { %2755 = vmatmul.mubr.bf16.gmra.mrb[108].mxu1 %v4752_v30  ;;  %2665 = vmatprep.mubr.bf16.mxu0 %v4754_v31  ;;  %v5295_v31 = vld [vmem:[#allocation2_spill] sm:$0xff] }
 0x10a   : > { %v5009_v42 = vadd.f32 %v3686_v32, %v3622_v23  ;;  %2762 = vmatprep.mubr.bf16.mxu1 %v4759_v43 }
 0x10b   : > { %v3623_v44 = vpop.f32.mrb[4].mxu0 }
 0x10c   : > { %v3687_v0 = vpop.f32.mrb[4].mxu1  ;;  %v3624_v1 = vpop.f32.mrb[5].mxu0 }
 0x10d   : > { %v3625_v3 = vadd.f32 %v3624_v1, %v3623_v44  ;;  %v3688_v4 = vpop.f32.mrb[5].mxu1  ;;  %v3626_v13 = vpop.f32.mrb[6].mxu0 }
 0x10e   : > { %v3689_v56 = vadd.f32 %v3688_v4, %v3687_v0  ;;  %v3690_v26 = vpop.f32.mrb[6].mxu1  ;;  %v3627_v18 = vpop.f32.mrb[7].mxu0 }
 0x10f   : > { %v3628_v63 = vadd.f32 %v3627_v18, %v3626_v13  ;;  %v3691_v12 = vpop.f32.mrb[7].mxu1 }
 0x110   : > { %v5012_v27 = vadd.f32 %v3689_v56, %v3625_v3  ;;  %v3692_v30 = vadd.f32 %v3691_v12, %v3690_v26  ;;  %2666 = vmatmul.mubr.bf16.gmra.mrb[112].mxu0 %v4787_v8 }
 0x111   : > { %2763 = vmatmul.mubr.bf16.gmra.mrb[112].mxu1 %v4792_v15  ;;  %2673 = vmatprep.mubr.bf16.mxu0 %v5295_v31 }
 0x112   : > { %v5017_v43 = vadd.f32 %v3692_v30, %v3628_v63  ;;  %2770 = vmatprep.mubr.bf16.mxu1 %v5296_v20 }
 0x113   : > { %v3629_v36 = vpop.f32.mrb[8].mxu0 }
 0x114   : > { %v3693_v14 = vpop.f32.mrb[8].mxu1  ;;  %v3630_v39 = vpop.f32.mrb[9].mxu0 }
 0x115   : > { %v3631_v29 = vadd.f32 %v3630_v39, %v3629_v36  ;;  %v3694_v47 = vpop.f32.mrb[9].mxu1  ;;  %v3632_v35 = vpop.f32.mrb[10].mxu0 }
 0x116   : > { %v3695_v50 = vadd.f32 %v3694_v47, %v3693_v14  ;;  %v3696_v38 = vpop.f32.mrb[10].mxu1  ;;  %v3633_v46 = vpop.f32.mrb[11].mxu0 }
 0x117   : > { %v3634_v49 = vadd.f32 %v3633_v46, %v3632_v35  ;;  %v3697_v59 = vpop.f32.mrb[11].mxu1 }
 0x118   : > { %v5020_v8 = vadd.f32 %v3695_v50, %v3631_v29  ;;  %v3698_v15 = vadd.f32 %v3697_v59, %v3696_v38  ;;  %2674 = vmatmul.mubr.bf16.gmra.mrb[116].mxu0 %v5297_v5 }
 0x119   : > { %2771 = vmatmul.mubr.bf16.gmra.mrb[116].mxu1 %v5298_v16  ;;  %2681 = vmatprep.mubr.bf16.mxu0 %v5299_v51 }
 0x11a   : > { %v5025_v17 = vadd.f32 %v3698_v15, %v3634_v49  ;;  %2778 = vmatprep.mubr.bf16.mxu1 %v5300_v53 }
 0x11b   : > { %v3635_v60 = vpop.f32.mrb[12].mxu0 }
 0x11c   : > { %v3699_v61 = vpop.f32.mrb[12].mxu1  ;;  %v3636_v48 = vpop.f32.mrb[13].mxu0 }
 0x11d   : > { %v3637_v52 = vadd.f32 %v3636_v48, %v3635_v60  ;;  %v3700_v54 = vpop.f32.mrb[13].mxu1  ;;  %v3638_v2 = vpop.f32.mrb[14].mxu0 }
 0x11e   : > { %v3701_v6 = vadd.f32 %v3700_v54, %v3699_v61  ;;  %v3702_v7 = vpop.f32.mrb[14].mxu1  ;;  %v3639_v9 = vpop.f32.mrb[15].mxu0 }
 0x11f   : > { %v3640_v19 = vadd.f32 %v3639_v9, %v3638_v2  ;;  %v3703_v21 = vpop.f32.mrb[15].mxu1 }
 0x120   : > { %v5028_v22 = vadd.f32 %v3701_v6, %v3637_v52  ;;  %v3704_v24 = vadd.f32 %v3703_v21, %v3702_v7  ;;  %2682 = vmatmul.mubr.bf16.gmra.mrb[120].mxu0 %v5301_v34 }
 0x121   : > { %2779 = vmatmul.mubr.bf16.gmra.mrb[120].mxu1 %v5302_v37  ;;  %2689 = vmatprep.mubr.bf16.mxu0 %v5303_v40 }
 0x122   : > { %v5033_v41 = vadd.f32 %v3704_v24, %v3640_v19  ;;  %2786 = vmatprep.mubr.bf16.mxu1 %v5304_v55 }
 0x123   : > { %v3641_v57 = vpop.f32.mrb[16].mxu0 }
 0x124   : > { %v3705_v58 = vpop.f32.mrb[16].mxu1  ;;  %v3642_v62 = vpop.f32.mrb[17].mxu0 }
 0x125   : > { %v3643_v10 = vadd.f32 %v3642_v62, %v3641_v57  ;;  %v3706_v11 = vpop.f32.mrb[17].mxu1  ;;  %v3644_v23 = vpop.f32.mrb[18].mxu0 }
 0x126   : > { %v3707_v25 = vadd.f32 %v3706_v11, %v3705_v58  ;;  %v3708_v32 = vpop.f32.mrb[18].mxu1  ;;  %v3645_v44 = vpop.f32.mrb[19].mxu0 }
 0x127   : > { %v3646_v0 = vadd.f32 %v3645_v44, %v3644_v23  ;;  %v3709_v1 = vpop.f32.mrb[19].mxu1 }
 0x128   : > { %v5036_v3 = vadd.f32 %v3707_v25, %v3643_v10  ;;  %v3710_v4 = vadd.f32 %v3709_v1, %v3708_v32  ;;  %2690 = vmatmul.mubr.bf16.gmra.mrb[124].mxu0 %v4862_v33 }
 0x129   : > { %2787 = vmatmul.mubr.bf16.gmra.mrb[124].mxu1 %v4864_v45 }
 0x12a   : > { %v5040_v13 = vadd.f32 %v3710_v4, %v3646_v0 }
 0x12b   : > { %v3647_v56 = vpop.f32.mrb[20].mxu0 }
 0x12c   : > { %v3711_v26 = vpop.f32.mrb[20].mxu1  ;;  %v3648_v18 = vpop.f32.mrb[21].mxu0 }
 0x12d   : > { %v3649_v63 = vadd.f32 %v3648_v18, %v3647_v56  ;;  %v3712_v12 = vpop.f32.mrb[21].mxu1  ;;  %v3650_v30 = vpop.f32.mrb[22].mxu0 }
 0x12e   : > { %v3713_v31 = vadd.f32 %v3712_v12, %v3711_v26  ;;  %v3714_v20 = vpop.f32.mrb[22].mxu1  ;;  %v3651_v36 = vpop.f32.mrb[23].mxu0 }
 0x12f   : > { %v3652_v14 = vadd.f32 %v3651_v36, %v3650_v30  ;;  %v3715_v39 = vpop.f32.mrb[23].mxu1 }
 0x130   : > { %v5042_v29 = vadd.f32 %v3713_v31, %v3649_v63  ;;  %v3716_v47 = vadd.f32 %v3715_v39, %v3714_v20 }
 0x132   : > { %v5044_v35 = vadd.f32 %v3716_v47, %v3652_v14 }
 0x133   : > { %v3653_v33 = vpop.f32.mrb[24].mxu0 }
 0x134   : > { %v3717_v45 = vpop.f32.mrb[24].mxu1  ;;  %v3654_v50 = vpop.f32.mrb[25].mxu0 }
 0x135   : > { %v3655_v38 = vadd.f32 %v3654_v50, %v3653_v33  ;;  %v3718_v46 = vpop.f32.mrb[25].mxu1  ;;  %v3656_v49 = vpop.f32.mrb[26].mxu0 }
 0x136   : > { %v3719_v59 = vadd.f32 %v3718_v46, %v3717_v45  ;;  %v3720_v15 = vpop.f32.mrb[26].mxu1  ;;  %v3657_v5 = vpop.f32.mrb[27].mxu0 }
 0x137   : > { %v3658_v16 = vadd.f32 %v3657_v5, %v3656_v49  ;;  %v3721_v51 = vpop.f32.mrb[27].mxu1 }
 0x138   : > { %v5046_v53 = vadd.f32 %v3719_v59, %v3655_v38  ;;  %v3722_v60 = vadd.f32 %v3721_v51, %v3720_v15 }
 0x13a   : > { %v5048_v61 = vadd.f32 %v3722_v60, %v3658_v16 }
 0x13b   : > { %v3659_v48 = vpop.f32.mrb[28].mxu0 }
 0x13c   : > { %v3723_v52 = vpop.f32.mrb[28].mxu1  ;;  %v3660_v54 = vpop.f32.mrb[29].mxu0 }
 0x13d   : > { %v3661_v2 = vadd.f32 %v3660_v54, %v3659_v48  ;;  %v3724_v6 = vpop.f32.mrb[29].mxu1  ;;  %v3662_v7 = vpop.f32.mrb[30].mxu0 }
 0x13e   : > { %v3725_v9 = vadd.f32 %v3724_v6, %v3723_v52  ;;  %v3726_v19 = vpop.f32.mrb[30].mxu1  ;;  %v3663_v21 = vpop.f32.mrb[31].mxu0 }
 0x13f   : > { %v3664_v24 = vadd.f32 %v3663_v21, %v3662_v7  ;;  %v3727_v34 = vpop.f32.mrb[31].mxu1 }
 0x140   : > { %v5050_v37 = vadd.f32 %v3725_v9, %v3661_v2  ;;  %v3728_v40 = vadd.f32 %v3727_v34, %v3726_v19 }
 0x142   : > { %v5052_v55 = vadd.f32 %v3728_v40, %v3664_v24 }
 0x143   : > { %v3745_v57 = vpop.f32.mrb[32].mxu0 }
 0x144   : > { %v3809_v58 = vpop.f32.mrb[32].mxu1  ;;  %v3746_v62 = vpop.f32.mrb[33].mxu0 }
 0x145   : > { %v3747_v10 = vadd.f32 %v3746_v62, %v3745_v57  ;;  %v3810_v11 = vpop.f32.mrb[33].mxu1  ;;  %v3748_v23 = vpop.f32.mrb[34].mxu0 }
 0x146   : > { %v3811_v25 = vadd.f32 %v3810_v11, %v3809_v58  ;;  %v3812_v32 = vpop.f32.mrb[34].mxu1  ;;  %v3749_v44 = vpop.f32.mrb[35].mxu0 }
 0x147   : > { %v1544_v0 = vadd.f32 %v3747_v10, %v5004_v28  ;;  %v3750_v1 = vadd.f32 %v3749_v44, %v3748_v23  ;;  %v3813_v4 = vpop.f32.mrb[35].mxu1 }
 0x148   : > { %v3814_v56 = vadd.f32 %v3813_v4, %v3812_v32 }
 0x149   : > { %v5055_v26 = vadd.f32 %v3811_v25, %v1544_v0  ;;  %v1547_v18 = vadd.f32 %v3750_v1, %v5009_v42 }
 0x14b   : > { %v5058_v63 = vadd.f32 %v3814_v56, %v1547_v18  ;;  %v3751_v12 = vpop.f32.mrb[36].mxu0 }
 0x14c   : > { %v3815_v30 = vpop.f32.mrb[36].mxu1  ;;  %v3752_v31 = vpop.f32.mrb[37].mxu0 }
 0x14d   : > { %v3753_v20 = vadd.f32 %v3752_v31, %v3751_v12  ;;  %v3816_v36 = vpop.f32.mrb[37].mxu1  ;;  %v3754_v14 = vpop.f32.mrb[38].mxu0 }
 0x14e   : > { %v3817_v39 = vadd.f32 %v3816_v36, %v3815_v30  ;;  %v3818_v47 = vpop.f32.mrb[38].mxu1  ;;  %v3755_v33 = vpop.f32.mrb[39].mxu0 }
 0x14f   : > { %v1552_v28 = vadd.f32 %v3753_v20, %v5012_v27  ;;  %v3756_v45 = vadd.f32 %v3755_v33, %v3754_v14  ;;  %v3819_v50 = vpop.f32.mrb[39].mxu1 }
 0x150   : > { %v3820_v38 = vadd.f32 %v3819_v50, %v3818_v47 }
 0x151   : > { %v5061_v46 = vadd.f32 %v3817_v39, %v1552_v28  ;;  %v1555_v42 = vadd.f32 %v3756_v45, %v5017_v43 }
 0x153   : > { %v5064_v49 = vadd.f32 %v3820_v38, %v1555_v42  ;;  %v3757_v59 = vpop.f32.mrb[40].mxu0 }
 0x154   : > { %v3821_v15 = vpop.f32.mrb[40].mxu1  ;;  %v3758_v5 = vpop.f32.mrb[41].mxu0 }
 0x155   : > { %v3759_v16 = vadd.f32 %v3758_v5, %v3757_v59  ;;  %v3822_v51 = vpop.f32.mrb[41].mxu1  ;;  %v3760_v60 = vpop.f32.mrb[42].mxu0 }
 0x156   : > { %v3823_v48 = vadd.f32 %v3822_v51, %v3821_v15  ;;  %v3824_v52 = vpop.f32.mrb[42].mxu1  ;;  %v3761_v54 = vpop.f32.mrb[43].mxu0 }
 0x157   : > { %v1560_v27 = vadd.f32 %v3759_v16, %v5020_v8  ;;  %v3762_v2 = vadd.f32 %v3761_v54, %v3760_v60  ;;  %v3825_v6 = vpop.f32.mrb[43].mxu1 }
 0x158   : > { %v3826_v7 = vadd.f32 %v3825_v6, %v3824_v52 }
 0x159   : > { %v5067_v9 = vadd.f32 %v3823_v48, %v1560_v27  ;;  %v1563_v43 = vadd.f32 %v3762_v2, %v5025_v17 }
 0x15b   : > { %v5070_v19 = vadd.f32 %v3826_v7, %v1563_v43  ;;  %v3763_v21 = vpop.f32.mrb[44].mxu0 }
 0x15c   : > { %v3827_v24 = vpop.f32.mrb[44].mxu1  ;;  %v3764_v34 = vpop.f32.mrb[45].mxu0 }
 0x15d   : > { %v3765_v40 = vadd.f32 %v3764_v34, %v3763_v21  ;;  %v3828_v57 = vpop.f32.mrb[45].mxu1  ;;  %v3766_v58 = vpop.f32.mrb[46].mxu0 }
 0x15e   : > { %v3829_v62 = vadd.f32 %v3828_v57, %v3827_v24  ;;  %v3830_v10 = vpop.f32.mrb[46].mxu1  ;;  %v3767_v11 = vpop.f32.mrb[47].mxu0 }
 0x15f   : > { %v1568_v8 = vadd.f32 %v3765_v40, %v5028_v22  ;;  %v3768_v23 = vadd.f32 %v3767_v11, %v3766_v58  ;;  %v3831_v25 = vpop.f32.mrb[47].mxu1 }
 0x160   : > { %v3832_v32 = vadd.f32 %v3831_v25, %v3830_v10 }
 0x161   : > { %v5073_v44 = vadd.f32 %v3829_v62, %v1568_v8  ;;  %v1571_v17 = vadd.f32 %v3768_v23, %v5033_v41 }
 0x163   : > { %v5076_v0 = vadd.f32 %v3832_v32, %v1571_v17  ;;  %v3769_v1 = vpop.f32.mrb[48].mxu0 }
 0x164   : > { %v3833_v4 = vpop.f32.mrb[48].mxu1  ;;  %v3770_v56 = vpop.f32.mrb[49].mxu0 }
 0x165   : > { %v3771_v18 = vadd.f32 %v3770_v56, %v3769_v1  ;;  %v3834_v12 = vpop.f32.mrb[49].mxu1  ;;  %v3772_v30 = vpop.f32.mrb[50].mxu0 }
 0x166   : > { %v3835_v31 = vadd.f32 %v3834_v12, %v3833_v4  ;;  %v3836_v20 = vpop.f32.mrb[50].mxu1  ;;  %v3773_v36 = vpop.f32.mrb[51].mxu0 }
 0x167   : > { %v1576_v22 = vadd.f32 %v3771_v18, %v5036_v3  ;;  %v3774_v14 = vadd.f32 %v3773_v36, %v3772_v30  ;;  %v3837_v39 = vpop.f32.mrb[51].mxu1 }
 0x168   : > { %v3838_v47 = vadd.f32 %v3837_v39, %v3836_v20 }
 0x169   : > { %v5079_v33 = vadd.f32 %v3835_v31, %v1576_v22  ;;  %v1579_v41 = vadd.f32 %v3774_v14, %v5040_v13 }
 0x16b   : > { %v5082_v28 = vadd.f32 %v3838_v47, %v1579_v41  ;;  %v3775_v45 = vpop.f32.mrb[52].mxu0 }
 0x16c   : > { %v3839_v50 = vpop.f32.mrb[52].mxu1  ;;  %v3776_v38 = vpop.f32.mrb[53].mxu0 }
 0x16d   : > { %v3777_v42 = vadd.f32 %v3776_v38, %v3775_v45  ;;  %v3840_v59 = vpop.f32.mrb[53].mxu1  ;;  %v3778_v15 = vpop.f32.mrb[54].mxu0 }
 0x16e   : > { %v3841_v5 = vadd.f32 %v3840_v59, %v3839_v50  ;;  %v3842_v16 = vpop.f32.mrb[54].mxu1  ;;  %v3779_v51 = vpop.f32.mrb[55].mxu0 }
 0x16f   : > { %v1584_v3 = vadd.f32 %v3777_v42, %v5042_v29  ;;  %v3780_v60 = vadd.f32 %v3779_v51, %v3778_v15  ;;  %v3843_v48 = vpop.f32.mrb[55].mxu1 }
 0x170   : > { %v3844_v52 = vadd.f32 %v3843_v48, %v3842_v16 }
 0x171   : > { %v5085_v54 = vadd.f32 %v3841_v5, %v1584_v3  ;;  %v1587_v13 = vadd.f32 %v3780_v60, %v5044_v35 }
 0x173   : > { %v5088_v27 = vadd.f32 %v3844_v52, %v1587_v13  ;;  %v3781_v2 = vpop.f32.mrb[56].mxu0 }
 0x174   : > { %v3845_v6 = vpop.f32.mrb[56].mxu1  ;;  %v3782_v7 = vpop.f32.mrb[57].mxu0 }
 0x175   : > { %v3783_v43 = vadd.f32 %v3782_v7, %v3781_v2  ;;  %v3846_v21 = vpop.f32.mrb[57].mxu1  ;;  %v3784_v24 = vpop.f32.mrb[58].mxu0 }
 0x176   : > { %v3847_v34 = vadd.f32 %v3846_v21, %v3845_v6  ;;  %v3848_v40 = vpop.f32.mrb[58].mxu1  ;;  %v3785_v57 = vpop.f32.mrb[59].mxu0 }
 0x177   : > { %v1592_v29 = vadd.f32 %v3783_v43, %v5046_v53  ;;  %v3786_v58 = vadd.f32 %v3785_v57, %v3784_v24  ;;  %v3849_v62 = vpop.f32.mrb[59].mxu1 }
 0x178   : > { %v3850_v10 = vadd.f32 %v3849_v62, %v3848_v40 }
 0x179   : > { %v5091_v11 = vadd.f32 %v3847_v34, %v1592_v29  ;;  %v1595_v35 = vadd.f32 %v3786_v58, %v5048_v61 }
 0x17b   : > { %v5094_v8 = vadd.f32 %v3850_v10, %v1595_v35  ;;  %v3787_v23 = vpop.f32.mrb[60].mxu0 }
 0x17c   : > { %v3851_v25 = vpop.f32.mrb[60].mxu1  ;;  %v3788_v32 = vpop.f32.mrb[61].mxu0 }
 0x17d   : > { %v3789_v17 = vadd.f32 %v3788_v32, %v3787_v23  ;;  %v3852_v1 = vpop.f32.mrb[61].mxu1  ;;  %v3790_v4 = vpop.f32.mrb[62].mxu0 }
 0x17e   : > { %v3853_v56 = vadd.f32 %v3852_v1, %v3851_v25  ;;  %v3854_v18 = vpop.f32.mrb[62].mxu1  ;;  %v3791_v12 = vpop.f32.mrb[63].mxu0 }
 0x17f   : > { %v1600_v53 = vadd.f32 %v3789_v17, %v5050_v37  ;;  %v3792_v30 = vadd.f32 %v3791_v12, %v3790_v4  ;;  %v3855_v31 = vpop.f32.mrb[63].mxu1 }
 0x180   : > { %v3856_v20 = vadd.f32 %v3855_v31, %v3854_v18 }
 0x181   : > { %v5097_v36 = vadd.f32 %v3853_v56, %v1600_v53  ;;  %v1603_v61 = vadd.f32 %v3792_v30, %v5052_v55 }
 0x183   : > { %v5100_v22 = vadd.f32 %v3856_v20, %v1603_v61  ;;  %v3873_v14 = vpop.f32.mrb[64].mxu0 }
 0x184   : > { %v3937_v39 = vpop.f32.mrb[64].mxu1  ;;  %v3874_v47 = vpop.f32.mrb[65].mxu0 }
 0x185   : > { %v3875_v41 = vadd.f32 %v3874_v47, %v3873_v14  ;;  %v3938_v45 = vpop.f32.mrb[65].mxu1  ;;  %v3876_v50 = vpop.f32.mrb[66].mxu0 }
 0x186   : > { %v3939_v38 = vadd.f32 %v3938_v45, %v3937_v39  ;;  %v3940_v42 = vpop.f32.mrb[66].mxu1  ;;  %v3877_v59 = vpop.f32.mrb[67].mxu0 }
 0x187   : > { %v2442_v37 = vadd.f32 %v3875_v41, %v5055_v26  ;;  %v3878_v15 = vadd.f32 %v3877_v59, %v3876_v50  ;;  %v3941_v5 = vpop.f32.mrb[67].mxu1 }
 0x188   : > { %v3942_v16 = vadd.f32 %v3941_v5, %v3940_v42 }
 0x189   : > { %v5103_v51 = vadd.f32 %v3939_v38, %v2442_v37  ;;  %v2445_v55 = vadd.f32 %v3878_v15, %v5058_v63 }
 0x18b   : > { %v5106_v3 = vadd.f32 %v3942_v16, %v2445_v55  ;;  %v3879_v60 = vpop.f32.mrb[68].mxu0 }
 0x18c   : > { %v3943_v48 = vpop.f32.mrb[68].mxu1  ;;  %v3880_v52 = vpop.f32.mrb[69].mxu0 }
 0x18d   : > { %v3881_v13 = vadd.f32 %v3880_v52, %v3879_v60  ;;  %v3944_v2 = vpop.f32.mrb[69].mxu1  ;;  %v3882_v6 = vpop.f32.mrb[70].mxu0 }
 0x18e   : > { %v3945_v7 = vadd.f32 %v3944_v2, %v3943_v48  ;;  %v3946_v43 = vpop.f32.mrb[70].mxu1  ;;  %v3883_v21 = vpop.f32.mrb[71].mxu0 }
 0x18f   : > { %v2450_v26 = vadd.f32 %v3881_v13, %v5061_v46  ;;  %v3884_v24 = vadd.f32 %v3883_v21, %v3882_v6  ;;  %v3947_v34 = vpop.f32.mrb[71].mxu1 }
 0x190   : > { %v3948_v40 = vadd.f32 %v3947_v34, %v3946_v43 }
 0x191   : > { %v5109_v57 = vadd.f32 %v3945_v7, %v2450_v26  ;;  %v2453_v63 = vadd.f32 %v3884_v24, %v5064_v49 }
 0x193   : > { %v5112_v29 = vadd.f32 %v3948_v40, %v2453_v63  ;;  %v3885_v58 = vpop.f32.mrb[72].mxu0 }
 0x194   : > { %v3949_v62 = vpop.f32.mrb[72].mxu1  ;;  %v3886_v10 = vpop.f32.mrb[73].mxu0 }
 0x195   : > { %v3887_v35 = vadd.f32 %v3886_v10, %v3885_v58  ;;  %v3950_v23 = vpop.f32.mrb[73].mxu1  ;;  %v3888_v25 = vpop.f32.mrb[74].mxu0 }
 0x196   : > { %v3951_v32 = vadd.f32 %v3950_v23, %v3949_v62  ;;  %v3952_v17 = vpop.f32.mrb[74].mxu1  ;;  %v3889_v1 = vpop.f32.mrb[75].mxu0 }
 0x197   : > { %v2458_v46 = vadd.f32 %v3887_v35, %v5067_v9  ;;  %v3890_v4 = vadd.f32 %v3889_v1, %v3888_v25  ;;  %v3953_v56 = vpop.f32.mrb[75].mxu1 }
 0x198   : > { %v3954_v18 = vadd.f32 %v3953_v56, %v3952_v17 }
 0x199   : > { %v5115_v12 = vadd.f32 %v3951_v32, %v2458_v46  ;;  %v2461_v49 = vadd.f32 %v3890_v4, %v5070_v19 }
 0x19b   : > { %v5118_v53 = vadd.f32 %v3954_v18, %v2461_v49  ;;  %v3891_v30 = vpop.f32.mrb[76].mxu0 }
 0x19c   : > { %v3955_v31 = vpop.f32.mrb[76].mxu1  ;;  %v3892_v20 = vpop.f32.mrb[77].mxu0 }
 0x19d   : > { %v3893_v61 = vadd.f32 %v3892_v20, %v3891_v30  ;;  %v3956_v14 = vpop.f32.mrb[77].mxu1  ;;  %v3894_v39 = vpop.f32.mrb[78].mxu0 }
 0x19e   : > { %v3957_v47 = vadd.f32 %v3956_v14, %v3955_v31  ;;  %v3958_v41 = vpop.f32.mrb[78].mxu1  ;;  %v3895_v45 = vpop.f32.mrb[79].mxu0 }
 0x19f   : > { %v2466_v9 = vadd.f32 %v3893_v61, %v5073_v44  ;;  %v3896_v50 = vadd.f32 %v3895_v45, %v3894_v39  ;;  %v3959_v38 = vpop.f32.mrb[79].mxu1 }
 0x1a0   : > { %v3960_v42 = vadd.f32 %v3959_v38, %v3958_v41 }
 0x1a1   : > { %v5121_v59 = vadd.f32 %v3957_v47, %v2466_v9  ;;  %v2469_v19 = vadd.f32 %v3896_v50, %v5076_v0 }
 0x1a3   : > { %v5124_v37 = vadd.f32 %v3960_v42, %v2469_v19  ;;  %v3897_v15 = vpop.f32.mrb[80].mxu0 }
 0x1a4   : > { %v3961_v5 = vpop.f32.mrb[80].mxu1  ;;  %v3898_v16 = vpop.f32.mrb[81].mxu0 }
 0x1a5   : > { %v3899_v55 = vadd.f32 %v3898_v16, %v3897_v15  ;;  %v3962_v60 = vpop.f32.mrb[81].mxu1  ;;  %v3900_v48 = vpop.f32.mrb[82].mxu0 }
 0x1a6   : > { %v3963_v52 = vadd.f32 %v3962_v60, %v3961_v5  ;;  %v3964_v13 = vpop.f32.mrb[82].mxu1  ;;  %v3901_v2 = vpop.f32.mrb[83].mxu0 }
 0x1a7   : > { %v2474_v44 = vadd.f32 %v3899_v55, %v5079_v33  ;;  %v3902_v6 = vadd.f32 %v3901_v2, %v3900_v48  ;;  %v3965_v7 = vpop.f32.mrb[83].mxu1 }
 0x1a8   : > { %v3966_v43 = vadd.f32 %v3965_v7, %v3964_v13 }
 0x1a9   : > { %v5127_v21 = vadd.f32 %v3963_v52, %v2474_v44  ;;  %v2477_v0 = vadd.f32 %v3902_v6, %v5082_v28 }
 0x1ab   : > { %v5130_v26 = vadd.f32 %v3966_v43, %v2477_v0  ;;  %v3903_v24 = vpop.f32.mrb[84].mxu0 }
 0x1ac   : > { %v3967_v34 = vpop.f32.mrb[84].mxu1  ;;  %v3904_v40 = vpop.f32.mrb[85].mxu0 }
 0x1ad   : > { %v3905_v63 = vadd.f32 %v3904_v40, %v3903_v24  ;;  %v3968_v58 = vpop.f32.mrb[85].mxu1  ;;  %v3906_v62 = vpop.f32.mrb[86].mxu0 }
 0x1ae   : > { %v3969_v10 = vadd.f32 %v3968_v58, %v3967_v34  ;;  %v3970_v35 = vpop.f32.mrb[86].mxu1  ;;  %v3907_v23 = vpop.f32.mrb[87].mxu0 }
 0x1af   : > { %v2482_v33 = vadd.f32 %v3905_v63, %v5085_v54  ;;  %v3908_v25 = vadd.f32 %v3907_v23, %v3906_v62  ;;  %v3971_v32 = vpop.f32.mrb[87].mxu1 }
 0x1b0   : > { %v3972_v17 = vadd.f32 %v3971_v32, %v3970_v35 }
 0x1b1   : > { %v5133_v1 = vadd.f32 %v3969_v10, %v2482_v33  ;;  %v2485_v28 = vadd.f32 %v3908_v25, %v5088_v27 }
 0x1b3   : > { %v5136_v46 = vadd.f32 %v3972_v17, %v2485_v28  ;;  %v3909_v4 = vpop.f32.mrb[88].mxu0 }
 0x1b4   : > { %v3973_v56 = vpop.f32.mrb[88].mxu1  ;;  %v3910_v18 = vpop.f32.mrb[89].mxu0 }
 0x1b5   : > { %v3911_v49 = vadd.f32 %v3910_v18, %v3909_v4  ;;  %v3974_v30 = vpop.f32.mrb[89].mxu1  ;;  %v3912_v31 = vpop.f32.mrb[90].mxu0 }
 0x1b6   : > { %v3975_v20 = vadd.f32 %v3974_v30, %v3973_v56  ;;  %v3976_v61 = vpop.f32.mrb[90].mxu1  ;;  %v3913_v14 = vpop.f32.mrb[91].mxu0 }
 0x1b7   : > { %v2490_v54 = vadd.f32 %v3911_v49, %v5091_v11  ;;  %v3914_v39 = vadd.f32 %v3913_v14, %v3912_v31  ;;  %v3977_v47 = vpop.f32.mrb[91].mxu1 }
 0x1b8   : > { %v3978_v41 = vadd.f32 %v3977_v47, %v3976_v61 }
 0x1b9   : > { %v5139_v45 = vadd.f32 %v3975_v20, %v2490_v54  ;;  %v2493_v27 = vadd.f32 %v3914_v39, %v5094_v8 }
 0x1bb   : > { %v5142_v9 = vadd.f32 %v3978_v41, %v2493_v27  ;;  %v3915_v50 = vpop.f32.mrb[92].mxu0 }
 0x1bc   : > { %v3979_v38 = vpop.f32.mrb[92].mxu1  ;;  %v3916_v42 = vpop.f32.mrb[93].mxu0 }
 0x1bd   : > { %v3917_v19 = vadd.f32 %v3916_v42, %v3915_v50  ;;  %v3980_v15 = vpop.f32.mrb[93].mxu1  ;;  %v3918_v5 = vpop.f32.mrb[94].mxu0 }
 0x1be   : > { %v3981_v16 = vadd.f32 %v3980_v15, %v3979_v38  ;;  %v3982_v55 = vpop.f32.mrb[94].mxu1  ;;  %v3919_v60 = vpop.f32.mrb[95].mxu0 }
 0x1bf   : > { %v2498_v11 = vadd.f32 %v3917_v19, %v5097_v36  ;;  %v3920_v48 = vadd.f32 %v3919_v60, %v3918_v5  ;;  %v3983_v52 = vpop.f32.mrb[95].mxu1 }
 0x1c0   : > { %v3984_v13 = vadd.f32 %v3983_v52, %v3982_v55 }
 0x1c1   : > { %v5145_v2 = vadd.f32 %v3981_v16, %v2498_v11  ;;  %v2501_v8 = vadd.f32 %v3920_v48, %v5100_v22 }
 0x1c3   : > { %v5148_v44 = vadd.f32 %v3984_v13, %v2501_v8  ;;  %v4001_v6 = vpop.f32.mrb[96].mxu0 }
 0x1c4   : > { %v4065_v7 = vpop.f32.mrb[96].mxu1  ;;  %v4002_v43 = vpop.f32.mrb[97].mxu0 }
 0x1c5   : > { %v4003_v0 = vadd.f32 %v4002_v43, %v4001_v6  ;;  %v4066_v24 = vpop.f32.mrb[97].mxu1  ;;  %v4004_v34 = vpop.f32.mrb[98].mxu0 }
 0x1c6   : > { %v4067_v40 = vadd.f32 %v4066_v24, %v4065_v7  ;;  %v4068_v63 = vpop.f32.mrb[98].mxu1  ;;  %v4005_v58 = vpop.f32.mrb[99].mxu0 }
 0x1c7   : > { %v2636_v36 = vadd.f32 %v4003_v0, %v5103_v51  ;;  %v4006_v62 = vadd.f32 %v4005_v58, %v4004_v34  ;;  %v4069_v10 = vpop.f32.mrb[99].mxu1 }
 0x1c8   : > { %v4070_v35 = vadd.f32 %v4069_v10, %v4068_v63 }
 0x1c9   : > { %v5151_v23 = vadd.f32 %v4067_v40, %v2636_v36  ;;  %v2639_v22 = vadd.f32 %v4006_v62, %v5106_v3 }
 0x1cb   : > { %v5154_v33 = vadd.f32 %v4070_v35, %v2639_v22  ;;  %v4007_v25 = vpop.f32.mrb[100].mxu0  ;;  %v2816_v39 = vmul.f32 %v5151_v23, %v5151_v23 }
 0x1cc   : > { %v4071_v32 = vpop.f32.mrb[100].mxu1  ;;  %v4008_v17 = vpop.f32.mrb[101].mxu0 }
 0x1cd   : > { %v4009_v28 = vadd.f32 %v4008_v17, %v4007_v25  ;;  %v4072_v4 = vpop.f32.mrb[101].mxu1  ;;  %v4010_v56 = vpop.f32.mrb[102].mxu0  ;;  %v2817_v14 = vmul.f32 %v5154_v33, %v5154_v33  ;;  %v2795_v47 = vadd.f32 %v5154_v33, %v5151_v23 }
 0x1ce   : > { %v4073_v18 = vadd.f32 %v4072_v4, %v4071_v32  ;;  %v4074_v49 = vpop.f32.mrb[102].mxu1  ;;  %v4011_v30 = vpop.f32.mrb[103].mxu0 }
 0x1cf   : > { %v2644_v51 = vadd.f32 %v4009_v28, %v5109_v57  ;;  %v4012_v31 = vadd.f32 %v4011_v30, %v4010_v56  ;;  %v4075_v20 = vpop.f32.mrb[103].mxu1  ;;  %v2832_v42 = vadd.f32 %v2817_v14, %v2816_v39 }
 0x1d0   : > { %v4076_v61 = vadd.f32 %v4075_v20, %v4074_v49 }
 0x1d1   : > { %v5159_v3 = vadd.f32 %v4073_v18, %v2644_v51  ;;  %v2647_v54 = vadd.f32 %v4012_v31, %v5112_v29 }
 0x1d3   : > { %v2818_v41 = vmul.f32 %v5159_v3, %v5159_v3  ;;  %v5168_v57 = vadd.f32 %v4076_v61, %v2647_v54  ;;  %v4013_v27 = vpop.f32.mrb[104].mxu0  ;;  %v2796_v19 = vadd.f32 %v2795_v47, %v5159_v3 }
 0x1d4   : > { %v4077_v50 = vpop.f32.mrb[104].mxu1  ;;  %v4014_v38 = vpop.f32.mrb[105].mxu0 }
 0x1d5   : > { %v4015_v15 = vadd.f32 %v4014_v38, %v4013_v27  ;;  %v4078_v5 = vpop.f32.mrb[105].mxu1  ;;  %v4016_v29 = vpop.f32.mrb[106].mxu0  ;;  %v2833_v11 = vadd.f32 %v2832_v42, %v2818_v41  ;;  %v2819_v48 = vmul.f32 %v5168_v57, %v5168_v57  ;;  %v2797_v7 = vadd.f32 %v2796_v19, %v5168_v57 }
 0x1d6   : > { %v4079_v16 = vadd.f32 %v4078_v5, %v4077_v50  ;;  %v4080_v55 = vpop.f32.mrb[106].mxu1  ;;  %v4017_v60 = vpop.f32.mrb[107].mxu0 }
 0x1d7   : > { %v2652_v52 = vadd.f32 %v4015_v15, %v5115_v12  ;;  %v4018_v13 = vadd.f32 %v4017_v60, %v4016_v29  ;;  %v4081_v8 = vpop.f32.mrb[107].mxu1  ;;  %v2834_v24 = vadd.f32 %v2833_v11, %v2819_v48 }
 0x1d8   : > { %v4082_v6 = vadd.f32 %v4081_v8, %v4080_v55 }
 0x1d9   : > { %v5175_v43 = vadd.f32 %v4079_v16, %v2652_v52  ;;  %v2655_v0 = vadd.f32 %v4018_v13, %v5118_v53 }
 0x1db   : > { %v2798_v34 = vadd.f32 %v2797_v7, %v5175_v43  ;;  %v2820_v40 = vmul.f32 %v5175_v43, %v5175_v43  ;;  %v5181_v63 = vadd.f32 %v4082_v6, %v2655_v0  ;;  %v4019_v58 = vpop.f32.mrb[108].mxu0 }
 0x1dc   : > { %v4083_v36 = vpop.f32.mrb[108].mxu1  ;;  %v4020_v12 = vpop.f32.mrb[109].mxu0 }
 0x1dd   : > { %v2835_v62 = vadd.f32 %v2834_v24, %v2820_v40  ;;  %v2799_v10 = vadd.f32 %v2798_v34, %v5181_v63  ;;  %v2821_v35 = vmul.f32 %v5181_v63, %v5181_v63  ;;  %v4021_v22 = vadd.f32 %v4020_v12, %v4019_v58  ;;  %v4084_v25 = vpop.f32.mrb[109].mxu1  ;;  %v4022_v53 = vpop.f32.mrb[110].mxu0 }
 0x1de   : > { %v4085_v32 = vadd.f32 %v4084_v25, %v4083_v36  ;;  %v4086_v17 = vpop.f32.mrb[110].mxu1  ;;  %v4023_v28 = vpop.f32.mrb[111].mxu0 }
 0x1df   : > { %v2836_v4 = vadd.f32 %v2835_v62, %v2821_v35  ;;  %v2660_v56 = vadd.f32 %v4021_v22, %v5121_v59  ;;  %v4024_v18 = vadd.f32 %v4023_v28, %v4022_v53  ;;  %v4087_v49 = vpop.f32.mrb[111].mxu1 }
 0x1e0   : > { %v4088_v30 = vadd.f32 %v4087_v49, %v4086_v17 }
 0x1e1   : > { %v5187_v51 = vadd.f32 %v4085_v32, %v2660_v56  ;;  %v2663_v31 = vadd.f32 %v4024_v18, %v5124_v37 }
 0x1e3   : > { %v2800_v20 = vadd.f32 %v2799_v10, %v5187_v51  ;;  %v2822_v61 = vmul.f32 %v5187_v51, %v5187_v51  ;;  %v5193_v14 = vadd.f32 %v4088_v30, %v2663_v31  ;;  %v4025_v54 = vpop.f32.mrb[112].mxu0 }
 0x1e4   : > { %v4089_v39 = vpop.f32.mrb[112].mxu1  ;;  %v4026_v47 = vpop.f32.mrb[113].mxu0 }
 0x1e5   : > { %v2837_v41 = vadd.f32 %v2836_v4, %v2822_v61  ;;  %v2801_v59 = vadd.f32 %v2800_v20, %v5193_v14  ;;  %v2823_v27 = vmul.f32 %v5193_v14, %v5193_v14  ;;  %v4027_v50 = vadd.f32 %v4026_v47, %v4025_v54  ;;  %v4090_v38 = vpop.f32.mrb[113].mxu1  ;;  %v4028_v42 = vpop.f32.mrb[114].mxu0 }
 0x1e6   : > { %v4091_v37 = vadd.f32 %v4090_v38, %v4089_v39  ;;  %v4092_v19 = vpop.f32.mrb[114].mxu1  ;;  %v4029_v15 = vpop.f32.mrb[115].mxu0 }
 0x1e7   : > { %v2838_v5 = vadd.f32 %v2837_v41, %v2823_v27  ;;  %v2668_v29 = vadd.f32 %v4027_v50, %v5127_v21  ;;  %v4030_v16 = vadd.f32 %v4029_v15, %v4028_v42  ;;  %v4093_v55 = vpop.f32.mrb[115].mxu1 }
 0x1e8   : > { %v4094_v60 = vadd.f32 %v4093_v55, %v4092_v19 }
 0x1e9   : > { %v5199_v11 = vadd.f32 %v4091_v37, %v2668_v29  ;;  %v2671_v48 = vadd.f32 %v4030_v16, %v5130_v26 }
 0x1eb   : > { %v2802_v52 = vadd.f32 %v2801_v59, %v5199_v11  ;;  %v2824_v13 = vmul.f32 %v5199_v11, %v5199_v11  ;;  %v5205_v8 = vadd.f32 %v4094_v60, %v2671_v48  ;;  %v4031_v6 = vpop.f32.mrb[116].mxu0 }
 0x1ec   : > { %v4095_v7 = vpop.f32.mrb[116].mxu1  ;;  %v4032_v0 = vpop.f32.mrb[117].mxu0 }
 0x1ed   : > { %v2839_v24 = vadd.f32 %v2838_v5, %v2824_v13  ;;  %v2803_v21 = vadd.f32 %v2802_v52, %v5205_v8  ;;  %v2825_v34 = vmul.f32 %v5205_v8, %v5205_v8  ;;  %v4033_v40 = vadd.f32 %v4032_v0, %v4031_v6  ;;  %v4096_v58 = vpop.f32.mrb[117].mxu1  ;;  %v4034_v36 = vpop.f32.mrb[118].mxu0 }
 0x1ee   : > { %v4097_v26 = vadd.f32 %v4096_v58, %v4095_v7  ;;  %v4098_v12 = vpop.f32.mrb[118].mxu1  ;;  %v4035_v62 = vpop.f32.mrb[119].mxu0 }
 0x1ef   : > { %v2840_v10 = vadd.f32 %v2839_v24, %v2825_v34  ;;  %v2676_v35 = vadd.f32 %v4033_v40, %v5133_v1  ;;  %v4036_v22 = vadd.f32 %v4035_v62, %v4034_v36  ;;  %v4099_v25 = vpop.f32.mrb[119].mxu1 }
 0x1f0   : > { %v4100_v53 = vadd.f32 %v4099_v25, %v4098_v12 }
 0x1f1   : > { %v5211_v32 = vadd.f32 %v4097_v26, %v2676_v35  ;;  %v2679_v17 = vadd.f32 %v4036_v22, %v5136_v46 }
 0x1f3   : > { %v2804_v28 = vadd.f32 %v2803_v21, %v5211_v32  ;;  %v2826_v4 = vmul.f32 %v5211_v32, %v5211_v32  ;;  %v5217_v56 = vadd.f32 %v4100_v53, %v2679_v17  ;;  %v4037_v18 = vpop.f32.mrb[120].mxu0 }
 0x1f4   : > { %v4101_v49 = vpop.f32.mrb[120].mxu1  ;;  %v4038_v30 = vpop.f32.mrb[121].mxu0 }
 0x1f5   : > { %v2841_v31 = vadd.f32 %v2840_v10, %v2826_v4  ;;  %v2805_v1 = vadd.f32 %v2804_v28, %v5217_v56  ;;  %v2827_v20 = vmul.f32 %v5217_v56, %v5217_v56  ;;  %v4039_v61 = vadd.f32 %v4038_v30, %v4037_v18  ;;  %v4102_v54 = vpop.f32.mrb[121].mxu1  ;;  %v4040_v39 = vpop.f32.mrb[122].mxu0 }
 0x1f6   : > { %v4103_v46 = vadd.f32 %v4102_v54, %v4101_v49  ;;  %v4104_v47 = vpop.f32.mrb[122].mxu1  ;;  %v4041_v41 = vpop.f32.mrb[123].mxu0 }
 0x1f7   : > { %v2842_v59 = vadd.f32 %v2841_v31, %v2827_v20  ;;  %v2684_v27 = vadd.f32 %v4039_v61, %v5139_v45  ;;  %v4042_v50 = vadd.f32 %v4041_v41, %v4040_v39  ;;  %v4105_v38 = vpop.f32.mrb[123].mxu1 }
 0x1f8   : > { %v4106_v42 = vadd.f32 %v4105_v38, %v4104_v47 }
 0x1f9   : > { %v5223_v37 = vadd.f32 %v4103_v46, %v2684_v27  ;;  %v2687_v19 = vadd.f32 %v4042_v50, %v5142_v9  ;;  %v2865_v50 = vlaneseq }
 0x1fb   : > { %v2806_v15 = vadd.f32 %v2805_v1, %v5223_v37  ;;  %v2828_v5 = vmul.f32 %v5223_v37, %v5223_v37  ;;  %v5229_v29 = vadd.f32 %v4106_v42, %v2687_v19  ;;  %v4043_v16 = vpop.f32.mrb[124].mxu0  ;;  %v2866_v38 = vshrl.u32 %v2865_v50, 7  ;;  %v2860_v42 = vld [vmem:[%s5273_s2 + $0x1] sm:$0x1] }
 0x1fc   : > { %v4107_v55 = vpop.f32.mrb[124].mxu1  ;;  %v4044_v60 = vpop.f32.mrb[125].mxu0 }
 0x1fd   : > { %v2843_v48 = vadd.f32 %v2842_v59, %v2828_v5  ;;  %v2807_v45 = vadd.f32 %v2806_v15, %v5229_v29  ;;  %v2829_v52 = vmul.f32 %v5229_v29, %v5229_v29  ;;  %v4045_v13 = vadd.f32 %v4044_v60, %v4043_v16  ;;  %v4108_v6 = vpop.f32.mrb[125].mxu1  ;;  %v4046_v7 = vpop.f32.mrb[126].mxu0  ;;  %v2862_v16 = vld [vmem:[%s5273_s2 + $0x2] sm:$0x1] }
 0x1fe   : > { %v4109_v9 = vadd.f32 %v4108_v6, %v4107_v55  ;;  %v4110_v0 = vpop.f32.mrb[126].mxu1  ;;  %v4047_v24 = vpop.f32.mrb[127].mxu0  ;;  %v2867_v19 = vsub.s32 0, %v2866_v38 }
 0x1ff   : > { %v2844_v21 = vadd.f32 %v2843_v48, %v2829_v52  ;;  %v2692_v34 = vadd.f32 %v4045_v13, %v5145_v2  ;;  %v4048_v40 = vadd.f32 %v4047_v24, %v4046_v7  ;;  %v4111_v58 = vpop.f32.mrb[127].mxu1 }
 0x200   : > { %v4112_v36 = vadd.f32 %v4111_v58, %v4110_v0 }
 0x201   : > { %v2789_v26 = vadd.f32 %v4109_v9, %v2692_v34  ;;  %v2695_v12 = vadd.f32 %v4048_v40, %v5148_v44 }
 0x203   : > { %v2808_v62 = vadd.f32 %v2807_v45, %v2789_v26  ;;  %v2830_v10 = vmul.f32 %v2789_v26, %v2789_v26  ;;  %v2792_v35 = vadd.f32 %v4112_v36, %v2695_v12 }
 0x205   : > { %v2845_v22 = vadd.f32 %v2844_v21, %v2830_v10  ;;  %v2809_v25 = vadd.f32 %v2808_v62, %v2792_v35  ;;  %v2831_v53 = vmul.f32 %v2792_v35, %v2792_v35 }
 0x207   : > { %v2810_v17 = vrot.slane %v2809_v25, 4  ;;  %v2846_v28 = vadd.f32 %v2845_v22, %v2831_v53 }
 0x209   : > { %v2811_v4 = vadd.f32 %v2810_v17, %v2809_v25  ;;  %v2847_v18 = vrot.slane %v2846_v28, 4 }
 0x20b   : > { %v2812_v49 = vrot.slane %v2811_v4, 2  ;;  %v2848_v30 = vadd.f32 %v2847_v18, %v2846_v28 }
 0x20d   : > { %v2813_v31 = vadd.f32 %v2812_v49, %v2811_v4  ;;  %v2849_v2 = vrot.slane %v2848_v30, 2 }
 0x20f   : > { %v2814_v1 = vrot.slane %v2813_v31, 1  ;;  %v2850_v20 = vadd.f32 %v2849_v2, %v2848_v30 }
 0x211   : > { %v2815_v61 = vadd.f32 %v2814_v1, %v2813_v31  ;;  %v2851_v54 = vrot.slane %v2850_v20, 1 }
 0x213   : > { %v2852_v39 = vadd.f32 %v2851_v54, %v2850_v20  ;;  %v2853_v44 = vmul.f32 0.015625, %v2815_v61 }
 0x215   : > { %v2854_v46 = vmul.f32 0.015625, %v2852_v39  ;;  %v2855_v47 = vmul.f32 %v2853_v44, %v2853_v44 }
 0x217   : > { %v2856_v41 = vsub.f32 %v2854_v46, %v2855_v47 }
 0x219   : > { %v2857_v59 = vmax.f32 %v2856_v41, 0.0 }
 0x21b   : > { %v2858_v27 = vadd.f32 1e-05, %v2857_v59 }
 0x21d   : > { %4266 = vrsqrt.f32 %v2858_v27 }
 0x227   : > { %v4267_v15 = vpop.eup %4266 }
 0x228   : > { %v2861_v5 = vmul.f32 %v4267_v15, %v2860_v42 }
 0x22a   : > { %v2863_v55 = vmul.f32 %v2861_v5, %v2853_v44  ;;  %v2868_v60 = vrot.slane %v2861_v5, %v2867_v19 }
 0x22c   : > { %v2864_v48 = vsub.f32 %v2862_v16, %v2863_v55  ;;  %v2869_v45 = vmul.f32 %v2868_v60, %v5151_v23  ;;  %v2870_v52 = vmul.f32 %v2868_v60, %v5154_v33  ;;  %v2873_v13 = vmul.f32 %v2868_v60, %v5175_v43 }
 0x22d   : > { %v2874_v6 = vmul.f32 %v2868_v60, %v5181_v63  ;;  %v2875_v7 = vmul.f32 %v2868_v60, %v5187_v51  ;;  %v2876_v9 = vmul.f32 %v2868_v60, %v5193_v14  ;;  %v2877_v0 = vmul.f32 %v2868_v60, %v5199_v11 }
 0x22e   : > { %v2878_v24 = vmul.f32 %v2868_v60, %v5205_v8  ;;  %v2879_v21 = vmul.f32 %v2868_v60, %v5211_v32  ;;  %v2880_v34 = vmul.f32 %v2868_v60, %v5217_v56  ;;  %v2881_v23 = vmul.f32 %v2868_v60, %v5223_v37 }
 0x22f   : > { %v2882_v33 = vmul.f32 %v2868_v60, %v5229_v29  ;;  %v2883_v40 = vmul.f32 %v2868_v60, %v2789_v26  ;;  %v2871_v43 = vmul.f32 %v2868_v60, %v5159_v3  ;;  %v2872_v63 = vmul.f32 %v2868_v60, %v5168_v57 }
 0x230   : > { %v2884_v51 = vmul.f32 %v2868_v60, %v2792_v35  ;;  %v2888_v14 = vrot.slane %v2864_v48, %v2867_v19 }
 0x232   : > { %v2889_v58 = vadd.f32 %v2888_v14, %v2869_v45  ;;  %v2890_v11 = vadd.f32 %v2888_v14, %v2870_v52  ;;  %v2891_v36 = vadd.f32 %v2888_v14, %v2871_v43  ;;  %v2892_v8 = vadd.f32 %v2888_v14, %v2872_v63 }
 0x233   : > { %v2893_v12 = vadd.f32 %v2888_v14, %v2873_v13  ;;  %v2894_v32 = vadd.f32 %v2888_v14, %v2874_v6  ;;  %v2895_v62 = vadd.f32 %v2888_v14, %v2875_v7  ;;  %v2896_v56 = vadd.f32 %v2888_v14, %v2876_v9 }
 0x234   : > { %v2897_v10 = vadd.f32 %v2888_v14, %v2877_v0  ;;  %v2898_v37 = vadd.f32 %v2888_v14, %v2878_v24  ;;  %v2899_v22 = vadd.f32 %v2888_v14, %v2879_v21  ;;  %v2900_v29 = vadd.f32 %v2888_v14, %v2880_v34 }
 0x235   : > { %v2901_v26 = vadd.f32 %v2888_v14, %v2881_v23  ;;  %v2902_v3 = vadd.f32 %v2888_v14, %v2882_v33  ;;  %v2903_v25 = vadd.f32 %v2888_v14, %v2883_v40  ;;  %v2904_v53 = vadd.f32 %v2888_v14, %v2884_v51 }
 0x236   : > { %v2905_v57 = vmul.f32 0.2, %v2889_v58  ;;  %v2906_v35 = vmul.f32 0.2, %v2890_v11  ;;  %v2907_v17 = vmul.f32 0.2, %v2891_v36 }
 0x237   : > { %v2908_v28 = vmul.f32 0.2, %v2892_v8  ;;  %v2909_v4 = vmul.f32 0.2, %v2893_v12  ;;  %v2910_v18 = vmul.f32 0.2, %v2894_v32 }
 0x238   : > { %v2911_v49 = vmul.f32 0.2, %v2895_v62  ;;  %v2912_v30 = vmul.f32 0.2, %v2896_v56  ;;  %v2913_v31 = vmul.f32 0.2, %v2897_v10  ;;  %v2921_v2 = vmax.f32 %v2889_v58, %v2905_v57 }
 0x239   : > { %v2914_v1 = vmul.f32 0.2, %v2898_v37  ;;  %v2915_v20 = vmul.f32 0.2, %v2899_v22  ;;  %v2916_v61 = vmul.f32 0.2, %v2900_v29  ;;  %v2922_v54 = vmax.f32 %v2890_v11, %v2906_v35 }
 0x23a   : > { %v2917_v39 = vmul.f32 0.2, %v2901_v26  ;;  %v2918_v44 = vmul.f32 0.2, %v2902_v3  ;;  %v2919_v46 = vmul.f32 0.2, %v2903_v25  ;;  %v2923_v47 = vmax.f32 %v2891_v36, %v2907_v17 }
 0x23b   : > { %v2920_v41 = vmul.f32 0.2, %v2904_v53  ;;  %v2924_v59 = vmax.f32 %v2892_v8, %v2908_v28  ;;  %v2925_v27 = vmax.f32 %v2893_v12, %v2909_v4  ;;  %v2926_v50 = vmax.f32 %v2894_v32, %v2910_v18 }
 0x23c   : > { %v2927_v38 = vmax.f32 %v2895_v62, %v2911_v49  ;;  %v2928_v42 = vmax.f32 %v2896_v56, %v2912_v30  ;;  %v2929_v19 = vmax.f32 %v2897_v10, %v2913_v31  ;;  %v2930_v15 = vmax.f32 %v2898_v37, %v2914_v1 }
 0x23d   : > { %v2931_v5 = vmax.f32 %v2899_v22, %v2915_v20  ;;  %v2932_v16 = vmax.f32 %v2900_v29, %v2916_v61  ;;  %v2933_v55 = vmax.f32 %v2901_v26, %v2917_v39  ;;  %v2934_v60 = vmax.f32 %v2902_v3, %v2918_v44 }
 0x23e   : > { %v2935_v48 = vmax.f32 %v2903_v25, %v2919_v46  ;;  %v2936_v45 = vmax.f32 %v2904_v53, %v2920_v41  ;;  %v3557_v52 = vpack.c.bf16 %v2922_v54, %v2921_v2  ;;  %v3562_v13 = vpack.c.bf16 %v2924_v59, %v2923_v47 }
 0x23f   : > { %v3567_v6 = vpack.c.bf16 %v2926_v50, %v2925_v27  ;;  %v3572_v7 = vpack.c.bf16 %v2928_v42, %v2927_v38  ;;  %v3577_v9 = vpack.c.bf16 %v2930_v15, %v2929_v19  ;;  %v3582_v0 = vpack.c.bf16 %v2932_v16, %v2931_v5 }
 0x240   : > { %3558 = vst [vmem:[%s224_s11] sm:$0xff] %v3557_v52   ;;  %3594 = vst [vmem:[%s224_s11 + $0x8] sm:$0xff] %v3562_v13   ;;  %v3587_v24 = vpack.c.bf16 %v2934_v60, %v2933_v55  ;;  %v3592_v21 = vpack.c.bf16 %v2936_v45, %v2935_v48 }
 0x241   : > { %3595 = vst [vmem:[%s224_s11 + $0x10] sm:$0xff] %v3567_v6   ;;  %3596 = vst [vmem:[%s224_s11 + $0x18] sm:$0xff] %v3572_v7  }
 0x242   : > { %3597 = vst [vmem:[%s224_s11 + $0x20] sm:$0xff] %v3577_v9   ;;  %3598 = vst [vmem:[%s224_s11 + $0x28] sm:$0xff] %v3582_v0  }
 0x243   : > { %3599 = vst [vmem:[%s224_s11 + $0x30] sm:$0xff] %v3587_v24   ;;  %3600 = vst [vmem:[%s224_s11 + $0x38] sm:$0xff] %v3592_v21  }
 0x244 PF: > { %s13_s14 = sadd.s32 1, %s4290_s14   ;;  %s5305_s12 = smov %s4286_s13 }
 0x245   : > { %p10_p5 = scmp.ge.s32.totalorder %s13_s14, 4   ;;  %s5306_s13 = smov %s5308_s15 }
 0x247   :  { %12 = sbr.rel (!%p10_p5) target bundleno = 2 (0x2), region = 69 }

// kernel: _lambda_.7
= control target key start
LH: loop header
LB: loop body
LE: loop exit
PB: predicated region body
PF: predicated region fallthrough
CT: control target
= control target key end

     0   :  { %s3280_s12 = smov 0   ;;  %s3282_s13 = smov 0   ;;  %s3915_s0 = inlined_call_operand.vmem [shape: bf16[2,80,1024], index: 0, kind: input, shape index: {}]   ;;  %s3916_s1 = inlined_call_operand.vmem [shape: bf16[2,1024,128], index: 1, kind: input, shape index: {}]   ;;  %s3917_s2 = inlined_call_operand.vmem [shape: f32[3,128], index: 2, kind: input, shape index: {}]   ;;  %s3918_s3 = inlined_call_operand.vmem [shape: bf16[2,64,128], index: 3, kind: output, shape index: {}]  }
   0x1   :  { %s3284_s14 = smov 0  }
   0x2 LB: > { %s25_s15 = sadd.s32 1, %s3254_s13  ;;  %p2395_p0 = scmp.ge.s32.totalorder %s3258_s14, 1  ;;  %s3258_s14 = sphi %s3284_s14, %s13_s14   ;;  %s3254_s13 = sphi %s3282_s13, %s3920_s13   ;;  %s3250_s12 = sphi %s3280_s12, %s3919_s12  }
   0x3   : > { %p27_p1 = scmp.ge.s32.totalorder %s25_s15, 2  ;;  %p169_p2 = scmp.lt.s32.totalorder %s3258_s14, 3 }
   0x5   : > { %s3922_s15 = smov (%p27_p1, %s25_s15), 0  ;;  %p170_p3 = pnand %p2395_p0, %p169_p2 }
   0x6   : > { %v3106_v0 = vld [vmem:[%s3916_s1 + $0x240] sm:$0xff] (!%p170_p3)   ;;  %v3110_v4 = vld [vmem:[%s3916_s1 + $0x248] sm:$0xff] (!%p170_p3)   ;;  %v3114_v8 = vld [vmem:[%s3916_s1 + $0x250] sm:$0xff] (!%p170_p3)   ;;  %p204_p4 = scmp.lt.s32.totalorder (!%p170_p3), %s3250_s12, 1 }
   0x7   : > { %173 = sbr.rel (%p170_p3) target bundleno = 436 (0x1b4), region = 32  ;;  %v3107_v1 = vld [vmem:[%s3916_s1 + $0x2c0] sm:$0xff] (!%p170_p3)   ;;  %2761 = vmatprep.subr.bf16.mxu0 (!%p170_p3), %v3106_v0  ;;  %v3111_v5 = vld [vmem:[%s3916_s1 + $0x2c8] sm:$0xff] (!%p170_p3)   ;;  %v3115_v9 = vld [vmem:[%s3916_s1 + $0x2d0] sm:$0xff] (!%p170_p3)  }
   0x8   : > { %v3108_v2 = vld [vmem:[%s3916_s1 + $0x200] sm:$0xff] (!%p170_p3)   ;;  %2801 = vmatprep.subr.bf16.mxu1 (!%p170_p3), %v3107_v1  ;;  %v3112_v6 = vld [vmem:[%s3916_s1 + $0x208] sm:$0xff] (!%p170_p3)   ;;  %v3116_v10 = vld [vmem:[%s3916_s1 + $0x210] sm:$0xff] (!%p170_p3)  }
   0x9   : > { %v3109_v3 = vld [vmem:[%s3916_s1 + $0x280] sm:$0xff] (!%p170_p3)   ;;  %2762 = vmatpush3.bf16.msra.mxu0 (!%p170_p3), %v3108_v2  ;;  %v3113_v7 = vld [vmem:[%s3916_s1 + $0x288] sm:$0xff] (!%p170_p3)   ;;  %v3117_v11 = vld [vmem:[%s3916_s1 + $0x290] sm:$0xff] (!%p170_p3)  }
   0xa   : > { %2802 = vmatpush3.bf16.msra.mxu1 (!%p170_p3), %v3109_v3  ;;  %2763 = vmatprep.subr.bf16.mxu0 (!%p170_p3), %v3110_v4  ;;  %v3118_v12 = vld [vmem:[%s3916_s1 + $0x258] sm:$0xff] (!%p170_p3)   ;;  %v3122_v16 = vld [vmem:[%s3916_s1 + $0x260] sm:$0xff] (!%p170_p3)   ;;  %v3126_v20 = vld [vmem:[%s3916_s1 + $0x268] sm:$0xff] (!%p170_p3)  }
   0xb   : > { %2803 = vmatprep.subr.bf16.mxu1 (!%p170_p3), %v3111_v5  ;;  %v3119_v13 = vld [vmem:[%s3916_s1 + $0x2d8] sm:$0xff] (!%p170_p3)   ;;  %v3123_v17 = vld [vmem:[%s3916_s1 + $0x2e0] sm:$0xff] (!%p170_p3)   ;;  %v3127_v21 = vld [vmem:[%s3916_s1 + $0x2e8] sm:$0xff] (!%p170_p3)  }
   0xc   : > { %v3120_v14 = vld [vmem:[%s3916_s1 + $0x218] sm:$0xff] (!%p170_p3)   ;;  %v3124_v18 = vld [vmem:[%s3916_s1 + $0x220] sm:$0xff] (!%p170_p3)   ;;  %v3128_v22 = vld [vmem:[%s3916_s1 + $0x228] sm:$0xff] (!%p170_p3)  }
   0xd   : > { %2764 = vmatpush3.bf16.msra.mxu0 (!%p170_p3), %v3112_v6  ;;  %v3121_v15 = vld [vmem:[%s3916_s1 + $0x298] sm:$0xff] (!%p170_p3)   ;;  %v3125_v19 = vld [vmem:[%s3916_s1 + $0x2a0] sm:$0xff] (!%p170_p3)   ;;  %v3129_v23 = vld [vmem:[%s3916_s1 + $0x2a8] sm:$0xff] (!%p170_p3)  }
   0xe   : > { %2804 = vmatpush3.bf16.msra.mxu1 %v3113_v7  ;;  %2765 = vmatprep.subr.bf16.mxu0 %v3114_v8  ;;  %s3924_s12 = smov (!%p204_p4, %s3250_s12), 1  ;;  %v3130_v24 = vld [vmem:[%s3916_s1 + $0x270] sm:$0xff]   ;;  %v3134_v28 = vld [vmem:[%s3916_s1 + $0x278] sm:$0xff]   ;;  %v3138_v40 = vld [vmem:[%s3916_s1 + $0x340] sm:$0xff]  }
   0xf   : > { %2805 = vmatprep.subr.bf16.mxu1 %v3115_v9  ;;  %v3131_v25 = vld [vmem:[%s3916_s1 + $0x2f0] sm:$0xff]   ;;  %s3081_s22 = smul.u32 320, %s3924_s12  ;;  %v3135_v29 = vld [vmem:[%s3916_s1 + $0x2f8] sm:$0xff]   ;;  %v3139_v41 = vld [vmem:[%s3916_s1 + $0x3c0] sm:$0xff]   ;;  %s2729_s8 = sshll.u32 %s3924_s12, 5 }
  0x10   : > { %v3132_v26 = vld [vmem:[%s3916_s1 + $0x230] sm:$0xff]   ;;  %v3136_v30 = vld [vmem:[%s3916_s1 + $0x238] sm:$0xff]   ;;  %v3140_v42 = vld [vmem:[%s3916_s1 + $0x300] sm:$0xff]   ;;  %s224_s11 = scalar_lea.vmem %s3918_s3, %s2729_s8 }
  0x11   : > { %2766 = vmatpush3.bf16.msra.mxu0 %v3116_v10  ;;  %v3133_v27 = vld [vmem:[%s3916_s1 + $0x2b0] sm:$0xff]   ;;  %s3398_s6 = scalar_lea.vmem %s3915_s0, %s3081_s22  ;;  %v3137_v31 = vld [vmem:[%s3916_s1 + $0x2b8] sm:$0xff]   ;;  %v3141_v43 = vld [vmem:[%s3916_s1 + $0x380] sm:$0xff]  }
  0x12   : > { %2806 = vmatpush3.bf16.msra.mxu1 %v3117_v11  ;;  %2767 = vmatprep.subr.bf16.mxu0 %v3118_v12  ;;  %v386_v32 = vld [vmem:[%s3398_s6 + $0x40] sm:$0xff]  ;;  %v387_v34 = vld [vmem:[%s3398_s6 + $0x48] sm:$0xff]  ;;  %v3146_v56 = vld [vmem:[%s3916_s1 + $0x350] sm:$0xff]  }
  0x13   : > { %2807 = vmatprep.subr.bf16.mxu1 %v3119_v13  ;;  %v390_v33 = vld [vmem:[%s3398_s6 + $0x60] sm:$0xff]  ;;  %v391_v37 = vld [vmem:[%s3398_s6 + $0x68] sm:$0xff]  ;;  %v3147_v57 = vld [vmem:[%s3916_s1 + $0x3d0] sm:$0xff]  }
  0x14   : > { %v3409_v35 = vcombine.low %v386_v32, %v390_v33  ;;  %v3411_v36 = vcombine.high %v386_v32, %v390_v33  ;;  %v3414_v38 = vcombine.low %v387_v34, %v391_v37  ;;  %v3416_v39 = vcombine.high %v387_v34, %v391_v37  ;;  %v3142_v44 = vld [vmem:[%s3916_s1 + $0x348] sm:$0xff]   ;;  %v394_v48 = vld [vmem:[%s3398_s6 + $0x80] sm:$0xff]  ;;  %v3148_v58 = vld [vmem:[%s3916_s1 + $0x310] sm:$0xff]  }
  0x15   : > { %2768 = vmatpush3.bf16.msra.mxu0 %v3120_v14  ;;  %v3143_v45 = vld [vmem:[%s3916_s1 + $0x3c8] sm:$0xff]   ;;  %v398_v49 = vld [vmem:[%s3398_s6 + $0xa0] sm:$0xff]  ;;  %v3149_v59 = vld [vmem:[%s3916_s1 + $0x390] sm:$0xff]  }
  0x16   : > { %2808 = vmatpush3.bf16.msra.mxu1 %v3121_v15  ;;  %2769 = vmatprep.subr.bf16.mxu0 %v3122_v16  ;;  %v3144_v46 = vld [vmem:[%s3916_s1 + $0x308] sm:$0xff]   ;;  %v3448_v50 = vcombine.high %v394_v48, %v398_v49  ;;  %v3452_v53 = vcombine.low %v394_v48, %v398_v49  ;;  %v3150_v60 = vld [vmem:[%s3916_s1 + $0x358] sm:$0xff]   ;;  %v402_v0 = vld [vmem:[%s3398_s6 + $0xc0] sm:$0xff] }
  0x17   : > { %2809 = vmatprep.subr.bf16.mxu1 %v3123_v17  ;;  %1123 = vmatprep.mubr.bf16.mxu0 %v3411_v36  ;;  %v3145_v47 = vld [vmem:[%s3916_s1 + $0x388] sm:$0xff]   ;;  %v3151_v61 = vld [vmem:[%s3916_s1 + $0x3d8] sm:$0xff]   ;;  %v406_v1 = vld [vmem:[%s3398_s6 + $0xe0] sm:$0xff] }
  0x18   : > { %1188 = vmatprep.mubr.bf16.mxu1 %v3416_v39  ;;  %v395_v51 = vld [vmem:[%s3398_s6 + $0x88] sm:$0xff]  ;;  %v3152_v62 = vld [vmem:[%s3916_s1 + $0x318] sm:$0xff]   ;;  %v3490_v4 = vcombine.high %v402_v0, %v406_v1  ;;  %v3494_v6 = vcombine.low %v402_v0, %v406_v1  ;;  %v3154_v8 = vld [vmem:[%s3916_s1 + $0x360] sm:$0xff]  }
  0x19   : > { %2770 = vmatpush3.bf16.msra.mxu0 %v3124_v18  ;;  %v399_v52 = vld [vmem:[%s3398_s6 + $0xa8] sm:$0xff]  ;;  %v3153_v63 = vld [vmem:[%s3916_s1 + $0x398] sm:$0xff]   ;;  %v3155_v9 = vld [vmem:[%s3916_s1 + $0x3e0] sm:$0xff]  }
  0x1a   : > { %2810 = vmatpush3.bf16.msra.mxu1 %v3125_v19  ;;  %2771 = vmatprep.subr.bf16.mxu0 %v3126_v20  ;;  %v3454_v54 = vcombine.high %v395_v51, %v399_v52  ;;  %v3456_v55 = vcombine.low %v395_v51, %v399_v52  ;;  %v403_v2 = vld [vmem:[%s3398_s6 + $0xc8] sm:$0xff]  ;;  %v3156_v10 = vld [vmem:[%s3916_s1 + $0x320] sm:$0xff]   ;;  %v388_v32 = vld [vmem:[%s3398_s6 + $0x50] sm:$0xff] }
  0x1b   : > { %2811 = vmatprep.subr.bf16.mxu1 %v3127_v21  ;;  %v407_v3 = vld [vmem:[%s3398_s6 + $0xe8] sm:$0xff]  ;;  %v3157_v11 = vld [vmem:[%s3916_s1 + $0x3a0] sm:$0xff]   ;;  %v392_v33 = vld [vmem:[%s3398_s6 + $0x70] sm:$0xff] }
  0x1c   : > { %v3492_v5 = vcombine.high %v403_v2, %v407_v3  ;;  %v3496_v7 = vcombine.low %v403_v2, %v407_v3  ;;  %v3158_v12 = vld [vmem:[%s3916_s1 + $0x368] sm:$0xff]   ;;  %v410_v16 = vld [vmem:[%s3398_s6 + $0x100] sm:$0xff]  ;;  %v3556_v34 = vcombine.low %v388_v32, %v392_v33  ;;  %v3558_v37 = vcombine.high %v388_v32, %v392_v33  ;;  %v3178_v0 = vld [vmem:[%s3916_s1 + $0x50] sm:$0xff]  }
  0x1d   : > { %2772 = vmatpush3.bf16.msra.mxu0 %v3128_v22  ;;  %v3159_v13 = vld [vmem:[%s3916_s1 + $0x3e8] sm:$0xff]   ;;  %v414_v17 = vld [vmem:[%s3398_s6 + $0x120] sm:$0xff]  ;;  %v3179_v1 = vld [vmem:[%s3916_s1 + $0xd0] sm:$0xff]  }
  0x1e   : > { %2812 = vmatpush3.bf16.msra.mxu1 %v3129_v23  ;;  %2773 = vmatprep.subr.bf16.mxu0 %v3130_v24  ;;  %v3160_v14 = vld [vmem:[%s3916_s1 + $0x328] sm:$0xff]   ;;  %v2552_v19 = vcombine.high %v410_v16, %v414_v17  ;;  %v2551_v21 = vcombine.low %v410_v16, %v414_v17  ;;  %v3162_v24 = vld [vmem:[%s3916_s1 + $0x370] sm:$0xff]   ;;  %v409_v16 = vld [vmem:[%s3398_s6 + $0xf8] sm:$0xff] }
  0x1f   : > { %2813 = vmatprep.subr.bf16.mxu1 %v3131_v25  ;;  %v3161_v15 = vld [vmem:[%s3916_s1 + $0x3a8] sm:$0xff]   ;;  %v3163_v25 = vld [vmem:[%s3916_s1 + $0x3f0] sm:$0xff]   ;;  %v417_v32 = vld [vmem:[%s3398_s6 + $0x138] sm:$0xff] }
  0x20   : > { %v411_v18 = vld [vmem:[%s3398_s6 + $0x108] sm:$0xff]  ;;  %v3180_v2 = vld [vmem:[%s3916_s1 + $0x10] sm:$0xff]  }
  0x21   : > { %2774 = vmatpush3.bf16.msra.mxu0 %v3132_v26  ;;  %v415_v20 = vld [vmem:[%s3398_s6 + $0x128] sm:$0xff]  ;;  %v3164_v26 = vld [vmem:[%s3916_s1 + $0x330] sm:$0xff]  }
  0x22   : > { %2814 = vmatpush3.bf16.msra.mxu1 %v3133_v27  ;;  %2775 = vmatprep.subr.bf16.mxu0 %v3134_v28  ;;  %v2554_v22 = vcombine.high %v411_v18, %v415_v20  ;;  %v2553_v23 = vcombine.low %v411_v18, %v415_v20  ;;  %v3165_v27 = vld [vmem:[%s3916_s1 + $0x3b0] sm:$0xff]   ;;  %v3166_v28 = vld [vmem:[%s3916_s1 + $0x378] sm:$0xff]   ;;  %v3174_v48 = vld [vmem:[%s3916_s1 + $0x48] sm:$0xff]  }
  0x23   : > { %2815 = vmatprep.subr.bf16.mxu1 %v3135_v29  ;;  %v3167_v29 = vld [vmem:[%s3916_s1 + $0x3f8] sm:$0xff]   ;;  %v3175_v49 = vld [vmem:[%s3916_s1 + $0xc8] sm:$0xff]   ;;  %v3181_v3 = vld [vmem:[%s3916_s1 + $0x90] sm:$0xff]  }
  0x24   : > { %v3176_v51 = vld [vmem:[%s3916_s1 + $0x8] sm:$0xff]   ;;  %v3186_v20 = vld [vmem:[%s3916_s1 + $0x60] sm:$0xff]  }
  0x25   : > { %2776 = vmatpush3.bf16.msra.mxu0 %v3136_v30  ;;  %v3168_v30 = vld [vmem:[%s3916_s1 + $0x338] sm:$0xff]   ;;  %v3177_v52 = vld [vmem:[%s3916_s1 + $0x88] sm:$0xff]  }
  0x26   : > { %2816 = vmatpush3.bf16.msra.mxu1 %v3137_v31  ;;  %2841 = vmatprep.subr.bf16.mxu0 %v3138_v40  ;;  %v3169_v31 = vld [vmem:[%s3916_s1 + $0x3b8] sm:$0xff]  }
  0x27   : > { %2881 = vmatprep.subr.bf16.mxu1 %v3139_v41  ;;  %v389_v40 = vld [vmem:[%s3398_s6 + $0x58] sm:$0xff] }
  0x28   : > { %1124 = vmatmul.mubr.bf16.vlgmr.msra.gmra.mrb[0].mxu0 %v3409_v35  ;;  %v393_v41 = vld [vmem:[%s3398_s6 + $0x78] sm:$0xff] }
  0x29   : > { %1189 = vmatmul.mubr.bf16.vlgmr.msra.gmra.mrb[0].mxu1 %v3414_v38  ;;  %2842 = vmatpush3.bf16.msra.mxu0 %v3140_v42  ;;  %v3562_v42 = vcombine.low %v389_v40, %v393_v41 }
  0x2a   : > { %2882 = vmatpush3.bf16.msra.mxu1 %v3141_v43  ;;  %2843 = vmatprep.subr.bf16.mxu0 %v3142_v44  ;;  %v3564_v43 = vcombine.high %v389_v40, %v393_v41  ;;  %v3170_v44 = vld [vmem:[%s3916_s1 + $0x40] sm:$0xff]  }
  0x2b   : > { %2883 = vmatprep.subr.bf16.mxu1 %v3143_v45  ;;  %1131 = vmatprep.mubr.bf16.mxu0 %v3448_v50  ;;  %v3171_v45 = vld [vmem:[%s3916_s1 + $0xc0] sm:$0xff]  }
  0x2c   : > { %1196 = vmatprep.mubr.bf16.mxu1 %v3454_v54 }
  0x2d   : > { %2844 = vmatpush3.bf16.msra.mxu0 %v3144_v46  ;;  %v3172_v46 = vld [vmem:[%s3916_s1] sm:$0xff]  }
  0x2e   : > { %2884 = vmatpush3.bf16.msra.mxu1 %v3145_v47  ;;  %2845 = vmatprep.subr.bf16.mxu0 %v3146_v56  ;;  %v3173_v47 = vld [vmem:[%s3916_s1 + $0x80] sm:$0xff]   ;;  %v396_v56 = vld [vmem:[%s3398_s6 + $0x90] sm:$0xff] }
  0x2f   : > { %2885 = vmatprep.subr.bf16.mxu1 %v3147_v57  ;;  %v400_v57 = vld [vmem:[%s3398_s6 + $0xb0] sm:$0xff] }
  0x30   : > { %1132 = vmatmul.mubr.bf16.gmra.mrb[4].mxu0 %v3452_v53 }
  0x31   : > { %1197 = vmatmul.mubr.bf16.gmra.mrb[4].mxu1 %v3456_v55  ;;  %2846 = vmatpush3.bf16.msra.mxu0 %v3148_v58  ;;  %v397_v58 = vld [vmem:[%s3398_s6 + $0x98] sm:$0xff] }
  0x32   : > { %2886 = vmatpush3.bf16.msra.mxu1 %v3149_v59  ;;  %2847 = vmatprep.subr.bf16.mxu0 %v3150_v60  ;;  %v401_v59 = vld [vmem:[%s3398_s6 + $0xb8] sm:$0xff]  ;;  %v3598_v60 = vcombine.high %v396_v56, %v400_v57 }
  0x33   : > { %2887 = vmatprep.subr.bf16.mxu1 %v3151_v61  ;;  %1139 = vmatprep.mubr.bf16.mxu0 %v3490_v4  ;;  %v3600_v61 = vcombine.high %v397_v58, %v401_v59 }
  0x34   : > { %1204 = vmatprep.mubr.bf16.mxu1 %v3492_v5 }
  0x35   : > { %2848 = vmatpush3.bf16.msra.mxu0 %v3152_v62  ;;  %v3602_v62 = vcombine.low %v396_v56, %v400_v57  ;;  %v226_v56 = vld [vmem:[%s3398_s6] sm:$0xff] }
  0x36   : > { %2888 = vmatpush3.bf16.msra.mxu1 %v3153_v63  ;;  %2849 = vmatprep.subr.bf16.mxu0 %v3154_v8  ;;  %v3604_v63 = vcombine.low %v397_v58, %v401_v59  ;;  %v3182_v8 = vld [vmem:[%s3916_s1 + $0x58] sm:$0xff]   ;;  %v230_v57 = vld [vmem:[%s3398_s6 + $0x20] sm:$0xff]  ;;  %v227_v58 = vld [vmem:[%s3398_s6 + $0x8] sm:$0xff] }
  0x37   : > { %2889 = vmatprep.subr.bf16.mxu1 %v3155_v9  ;;  %v3183_v9 = vld [vmem:[%s3916_s1 + $0xd8] sm:$0xff]   ;;  %v231_v59 = vld [vmem:[%s3398_s6 + $0x28] sm:$0xff] }
  0x38   : > { %1140 = vmatmul.mubr.bf16.gmra.mrb[8].mxu0 %v3494_v6 }
  0x39   : > { %1205 = vmatmul.mubr.bf16.gmra.mrb[8].mxu1 %v3496_v7  ;;  %2850 = vmatpush3.bf16.msra.mxu0 %v3156_v10  ;;  %v3184_v10 = vld [vmem:[%s3916_s1 + $0x18] sm:$0xff]  }
  0x3a   : > { %2890 = vmatpush3.bf16.msra.mxu1 %v3157_v11  ;;  %2851 = vmatprep.subr.bf16.mxu0 %v3158_v12  ;;  %v3185_v11 = vld [vmem:[%s3916_s1 + $0x98] sm:$0xff]   ;;  %v404_v12 = vld [vmem:[%s3398_s6 + $0xd0] sm:$0xff] }
  0x3b   : > { %2891 = vmatprep.subr.bf16.mxu1 %v3159_v13  ;;  %1147 = vmatprep.mubr.bf16.mxu0 %v2552_v19  ;;  %v408_v13 = vld [vmem:[%s3398_s6 + $0xf0] sm:$0xff] }
  0x3c   : > { %1212 = vmatprep.mubr.bf16.mxu1 %v2554_v22  ;;  %v3640_v17 = vcombine.low %v404_v12, %v408_v13  ;;  %v3188_v22 = vld [vmem:[%s3916_s1 + $0x20] sm:$0xff]  }
  0x3d   : > { %2852 = vmatpush3.bf16.msra.mxu0 %v3160_v14  ;;  %v405_v14 = vld [vmem:[%s3398_s6 + $0xd8] sm:$0xff] }
  0x3e   : > { %2892 = vmatpush3.bf16.msra.mxu1 %v3161_v15  ;;  %2853 = vmatprep.subr.bf16.mxu0 %v3162_v24  ;;  %v3637_v15 = vcombine.high %v404_v12, %v408_v13  ;;  %v3642_v18 = vcombine.high %v405_v14, %v409_v16  ;;  %v3644_v19 = vcombine.low %v405_v14, %v409_v16  ;;  %v3190_v24 = vld [vmem:[%s3916_s1 + $0x68] sm:$0xff]  }
  0x3f   : > { %2893 = vmatprep.subr.bf16.mxu1 %v3163_v25  ;;  %v3191_v25 = vld [vmem:[%s3916_s1 + $0xe8] sm:$0xff]  }
  0x40   : > { %1148 = vmatmul.mubr.bf16.gmra.mrb[12].mxu0 %v2551_v21  ;;  %v3187_v21 = vld [vmem:[%s3916_s1 + $0xe0] sm:$0xff]   ;;  %v3206_v12 = vld [vmem:[%s3916_s1 + $0x148] sm:$0xff]  }
  0x41   : > { %1213 = vmatmul.mubr.bf16.gmra.mrb[12].mxu1 %v2553_v23  ;;  %2854 = vmatpush3.bf16.msra.mxu0 %v3164_v26  ;;  %v3189_v23 = vld [vmem:[%s3916_s1 + $0xa0] sm:$0xff]   ;;  %v3192_v26 = vld [vmem:[%s3916_s1 + $0x28] sm:$0xff]  }
  0x42   : > { %2894 = vmatpush3.bf16.msra.mxu1 %v3165_v27  ;;  %2855 = vmatprep.subr.bf16.mxu0 %v3166_v28  ;;  %v3193_v27 = vld [vmem:[%s3916_s1 + $0xa8] sm:$0xff]   ;;  %v412_v28 = vld [vmem:[%s3398_s6 + $0x110] sm:$0xff] }
  0x43   : > { %2895 = vmatprep.subr.bf16.mxu1 %v3167_v29  ;;  %1253 = vmatprep.mubr.bf16.mxu0 %v3558_v37  ;;  %v416_v29 = vld [vmem:[%s3398_s6 + $0x130] sm:$0xff]  ;;  %v3207_v13 = vld [vmem:[%s3916_s1 + $0x1c8] sm:$0xff]  }
  0x44   : > { %1318 = vmatprep.mubr.bf16.mxu1 %v3564_v43  ;;  %v2555_v33 = vcombine.low %v412_v28, %v416_v29  ;;  %v3208_v14 = vld [vmem:[%s3916_s1 + $0x108] sm:$0xff]  }
  0x45   : > { %2856 = vmatpush3.bf16.msra.mxu0 %v3168_v30  ;;  %v2556_v30 = vcombine.high %v412_v28, %v416_v29  ;;  %v3209_v16 = vld [vmem:[%s3916_s1 + $0x188] sm:$0xff]   ;;  %v3227_v28 = vld [vmem:[%s3916_s1 + $0x1f0] sm:$0xff]  }
  0x46   : > { %2896 = vmatpush3.bf16.msra.mxu1 %v3169_v31  ;;  %2921 = vmatprep.subr.bf16.mxu0 %v3170_v44  ;;  %v413_v31 = vld [vmem:[%s3398_s6 + $0x118] sm:$0xff]  ;;  %v3194_v44 = vld [vmem:[%s3916_s1 + $0x70] sm:$0xff]  }
  0x47   : > { %2961 = vmatprep.subr.bf16.mxu1 %v3171_v45  ;;  %v2558_v40 = vcombine.high %v413_v31, %v417_v32  ;;  %v2557_v41 = vcombine.low %v413_v31, %v417_v32  ;;  %v3195_v45 = vld [vmem:[%s3916_s1 + $0xf0] sm:$0xff]   ;;  %v3231_v31 = vld [vmem:[%s3916_s1 + $0x1f8] sm:$0xff]  }
  0x48   : > { %1254 = vmatmul.mubr.bf16.vlgmr.msra.gmra.mrb[16].mxu0 %v3556_v34  ;;  %v3229_v29 = vld [vmem:[%s3916_s1 + $0x1b0] sm:$0xff]  }
  0x49   : > { %1319 = vmatmul.mubr.bf16.vlgmr.msra.gmra.mrb[16].mxu1 %v3562_v42  ;;  %2922 = vmatpush3.bf16.msra.mxu0 %v3172_v46  ;;  %v3196_v46 = vld [vmem:[%s3916_s1 + $0x30] sm:$0xff]  }
  0x4a   : > { %2962 = vmatpush3.bf16.msra.mxu1 %v3173_v47  ;;  %2923 = vmatprep.subr.bf16.mxu0 %v3174_v48  ;;  %v3197_v47 = vld [vmem:[%s3916_s1 + $0xb0] sm:$0xff]   ;;  %v3198_v48 = vld [vmem:[%s3916_s1 + $0x78] sm:$0xff]  }
  0x4b   : > { %2963 = vmatprep.subr.bf16.mxu1 %v3175_v49  ;;  %1261 = vmatprep.mubr.bf16.mxu0 %v3598_v60  ;;  %v3199_v49 = vld [vmem:[%s3916_s1 + $0xf8] sm:$0xff]   ;;  %v228_v32 = vld [vmem:[%s3398_s6 + $0x10] sm:$0xff] }
  0x4c   : > { %1326 = vmatprep.mubr.bf16.mxu1 %v3600_v61 }
  0x4d   : > { %2924 = vmatpush3.bf16.msra.mxu0 %v3176_v51  ;;  %v3200_v51 = vld [vmem:[%s3916_s1 + $0x38] sm:$0xff]  }
  0x4e   : > { %2964 = vmatpush3.bf16.msra.mxu1 %v3177_v52  ;;  %2925 = vmatprep.subr.bf16.mxu0 %v3178_v0  ;;  %v3201_v52 = vld [vmem:[%s3916_s1 + $0xb8] sm:$0xff]   ;;  %v2623_v0 = vcombine.low %v226_v56, %v230_v57 }
  0x4f   : > { %2965 = vmatprep.subr.bf16.mxu1 %v3179_v1  ;;  %v2624_v1 = vcombine.high %v226_v56, %v230_v57 }
  0x50   : > { %1262 = vmatmul.mubr.bf16.gmra.mrb[20].mxu0 %v3602_v62 }
  0x51   : > { %1327 = vmatmul.mubr.bf16.gmra.mrb[20].mxu1 %v3604_v63  ;;  %2926 = vmatpush3.bf16.msra.mxu0 %v3180_v2  ;;  %v2625_v2 = vcombine.low %v227_v58, %v231_v59 }
  0x52   : > { %2966 = vmatpush3.bf16.msra.mxu1 %v3181_v3  ;;  %2927 = vmatprep.subr.bf16.mxu0 %v3182_v8  ;;  %v2626_v3 = vcombine.high %v227_v58, %v231_v59  ;;  %v3202_v8 = vld [vmem:[%s3916_s1 + $0x140] sm:$0xff]  }
  0x53   : > { %2967 = vmatprep.subr.bf16.mxu1 %v3183_v9  ;;  %1269 = vmatprep.mubr.bf16.mxu0 %v3637_v15  ;;  %v3203_v9 = vld [vmem:[%s3916_s1 + $0x1c0] sm:$0xff]  }
  0x54   : > { %1334 = vmatprep.mubr.bf16.mxu1 %v3642_v18 }
  0x55   : > { %2928 = vmatpush3.bf16.msra.mxu0 %v3184_v10  ;;  %v3204_v10 = vld [vmem:[%s3916_s1 + $0x100] sm:$0xff]  }
  0x56   : > { %2968 = vmatpush3.bf16.msra.mxu1 %v3185_v11  ;;  %2929 = vmatprep.subr.bf16.mxu0 %v3186_v20  ;;  %v3205_v11 = vld [vmem:[%s3916_s1 + $0x180] sm:$0xff]   ;;  %v3210_v20 = vld [vmem:[%s3916_s1 + $0x150] sm:$0xff]  }
  0x57   : > { %2969 = vmatprep.subr.bf16.mxu1 %v3187_v21  ;;  %v3211_v21 = vld [vmem:[%s3916_s1 + $0x1d0] sm:$0xff]  }
  0x58   : > { %1270 = vmatmul.mubr.bf16.gmra.mrb[24].mxu0 %v3640_v17 }
  0x59   : > { %1335 = vmatmul.mubr.bf16.gmra.mrb[24].mxu1 %v3644_v19  ;;  %2930 = vmatpush3.bf16.msra.mxu0 %v3188_v22  ;;  %v3214_v22 = vld [vmem:[%s3916_s1 + $0x158] sm:$0xff]  }
  0x5a   : > { %2970 = vmatpush3.bf16.msra.mxu1 %v3189_v23  ;;  %2931 = vmatprep.subr.bf16.mxu0 %v3190_v24  ;;  %v3215_v23 = vld [vmem:[%s3916_s1 + $0x1d8] sm:$0xff]   ;;  %v3219_v24 = vld [vmem:[%s3916_s1 + $0x1e0] sm:$0xff]  }
  0x5b   : > { %2971 = vmatprep.subr.bf16.mxu1 %v3191_v25  ;;  %1277 = vmatprep.mubr.bf16.mxu0 %v2556_v30  ;;  %v3221_v25 = vld [vmem:[%s3916_s1 + $0x1a0] sm:$0xff]   ;;  %v3230_v30 = vld [vmem:[%s3916_s1 + $0x178] sm:$0xff]  }
  0x5c   : > { %1342 = vmatprep.mubr.bf16.mxu1 %v2558_v40  ;;  %v229_v40 = vld [vmem:[%s3398_s6 + $0x18] sm:$0xff] }
  0x5d   : > { %2932 = vmatpush3.bf16.msra.mxu0 %v3192_v26  ;;  %v3222_v26 = vld [vmem:[%s3916_s1 + $0x168] sm:$0xff]  }
  0x5e   : > { %2972 = vmatpush3.bf16.msra.mxu1 %v3193_v27  ;;  %2933 = vmatprep.subr.bf16.mxu0 %v3194_v44  ;;  %v3223_v27 = vld [vmem:[%s3916_s1 + $0x1e8] sm:$0xff]  }
  0x5f   : > { %2973 = vmatprep.subr.bf16.mxu1 %v3195_v45  ;;  %v233_v45 = vld [vmem:[%s3398_s6 + $0x38] sm:$0xff] }
  0x60   : > { %1278 = vmatmul.mubr.bf16.gmra.mrb[28].mxu0 %v2555_v33  ;;  %v232_v33 = vld [vmem:[%s3398_s6 + $0x30] sm:$0xff] }
  0x61   : > { %1343 = vmatmul.mubr.bf16.gmra.mrb[28].mxu1 %v2557_v41  ;;  %2934 = vmatpush3.bf16.msra.mxu0 %v3196_v46  ;;  %v2627_v41 = vcombine.low %v228_v32, %v232_v33  ;;  %v2628_v44 = vcombine.high %v228_v32, %v232_v33  ;;  %v2629_v46 = vcombine.low %v229_v40, %v233_v45 }
  0x62   : > { %2974 = vmatpush3.bf16.msra.mxu1 %v3197_v47  ;;  %2935 = vmatprep.subr.bf16.mxu0 %v3198_v48  ;;  %v2630_v47 = vcombine.high %v229_v40, %v233_v45 }
  0x63   : > { %2975 = vmatprep.subr.bf16.mxu1 %v3199_v49  ;;  %1927 = vmatprep.mubr.bf16.mxu0 %v2624_v1 }
  0x64   : > { %1992 = vmatprep.mubr.bf16.mxu1 %v2626_v3 }
  0x65   : > { %2936 = vmatpush3.bf16.msra.mxu0 %v3200_v51 }
  0x66   : > { %2976 = vmatpush3.bf16.msra.mxu1 %v3201_v52  ;;  %3001 = vmatprep.subr.bf16.mxu0 %v3202_v8 }
  0x67   : > { %3041 = vmatprep.subr.bf16.mxu1 %v3203_v9 }
  0x68   : > { %1928 = vmatmul.mubr.bf16.vlgmr.msra.gmra.mrb[32].mxu0 %v2623_v0 }
  0x69   : > { %1993 = vmatmul.mubr.bf16.vlgmr.msra.gmra.mrb[32].mxu1 %v2625_v2  ;;  %3002 = vmatpush3.bf16.msra.mxu0 %v3204_v10 }
  0x6a   : > { %3042 = vmatpush3.bf16.msra.mxu1 %v3205_v11  ;;  %3003 = vmatprep.subr.bf16.mxu0 %v3206_v12 }
  0x6b   : > { %1935 = vmatprep.mubr.bf16.mxu0 %v3411_v36  ;;  %3043 = vmatprep.subr.bf16.mxu1 %v3207_v13  ;;  %v3212_v36 = vld [vmem:[%s3916_s1 + $0x110] sm:$0xff]  }
  0x6c   : > { %2000 = vmatprep.mubr.bf16.mxu1 %v3416_v39  ;;  %v3213_v39 = vld [vmem:[%s3916_s1 + $0x190] sm:$0xff]  }
  0x6d   : > { %3004 = vmatpush3.bf16.msra.mxu0 %v3208_v14 }
  0x6e   : > { %3044 = vmatpush3.bf16.msra.mxu1 %v3209_v16  ;;  %3005 = vmatprep.subr.bf16.mxu0 %v3210_v20 }
  0x6f   : > { %3045 = vmatprep.subr.bf16.mxu1 %v3211_v21 }
  0x70   : > { %1936 = vmatmul.mubr.bf16.gmra.mrb[36].mxu0 %v3409_v35  ;;  %v3216_v35 = vld [vmem:[%s3916_s1 + $0x118] sm:$0xff]  }
  0x71   : > { %2001 = vmatmul.mubr.bf16.gmra.mrb[36].mxu1 %v3414_v38  ;;  %1943 = vmatprep.mubr.bf16.mxu0 %v3448_v50  ;;  %v3217_v38 = vld [vmem:[%s3916_s1 + $0x198] sm:$0xff]   ;;  %v3218_v50 = vld [vmem:[%s3916_s1 + $0x160] sm:$0xff]  }
  0x72   : > { %3006 = vmatpush3.bf16.msra.mxu0 %v3212_v36  ;;  %3046 = vmatpush3.bf16.msra.mxu1 %v3213_v39 }
  0x73   : > { %3007 = vmatprep.subr.bf16.mxu0 %v3214_v22  ;;  %2008 = vmatprep.mubr.bf16.mxu1 %v3454_v54  ;;  %v3220_v54 = vld [vmem:[%s3916_s1 + $0x120] sm:$0xff]  }
  0x74   : > { %3047 = vmatprep.subr.bf16.mxu1 %v3215_v23 }
  0x76   : > { %3008 = vmatpush3.bf16.msra.mxu0 %v3216_v35  ;;  %3048 = vmatpush3.bf16.msra.mxu1 %v3217_v38 }
  0x77   : > { %3009 = vmatprep.subr.bf16.mxu0 %v3218_v50  ;;  %3049 = vmatprep.subr.bf16.mxu1 %v3219_v24 }
  0x78   : > { %1944 = vmatmul.mubr.bf16.gmra.mrb[40].mxu0 %v3452_v53  ;;  %v3224_v53 = vld [vmem:[%s3916_s1 + $0x128] sm:$0xff]  }
  0x79   : > { %2009 = vmatmul.mubr.bf16.gmra.mrb[40].mxu1 %v3456_v55  ;;  %1951 = vmatprep.mubr.bf16.mxu0 %v3490_v4  ;;  %v3225_v55 = vld [vmem:[%s3916_s1 + $0x1a8] sm:$0xff]   ;;  %v3226_v4 = vld [vmem:[%s3916_s1 + $0x170] sm:$0xff]  }
  0x7a   : > { %3010 = vmatpush3.bf16.msra.mxu0 %v3220_v54  ;;  %3050 = vmatpush3.bf16.msra.mxu1 %v3221_v25 }
  0x7b   : > { %3011 = vmatprep.subr.bf16.mxu0 %v3222_v26  ;;  %2016 = vmatprep.mubr.bf16.mxu1 %v3492_v5  ;;  %v3228_v5 = vld [vmem:[%s3916_s1 + $0x130] sm:$0xff]  }
  0x7c   : > { %3051 = vmatprep.subr.bf16.mxu1 %v3223_v27 }
  0x7e   : > { %3012 = vmatpush3.bf16.msra.mxu0 %v3224_v53  ;;  %3052 = vmatpush3.bf16.msra.mxu1 %v3225_v55 }
  0x7f   : > { %3013 = vmatprep.subr.bf16.mxu0 %v3226_v4  ;;  %3053 = vmatprep.subr.bf16.mxu1 %v3227_v28 }
  0x80   : > { %1952 = vmatmul.mubr.bf16.gmra.mrb[44].mxu0 %v3494_v6  ;;  %v3232_v6 = vld [vmem:[%s3916_s1 + $0x138] sm:$0xff]  }
  0x81   : > { %2017 = vmatmul.mubr.bf16.gmra.mrb[44].mxu1 %v3496_v7  ;;  %v3233_v7 = vld [vmem:[%s3916_s1 + $0x1b8] sm:$0xff]   ;;  %2057 = vmatprep.mubr.bf16.mxu0 %v2628_v44 }
  0x82   : > { %3014 = vmatpush3.bf16.msra.mxu0 %v3228_v5  ;;  %3054 = vmatpush3.bf16.msra.mxu1 %v3229_v29 }
  0x83   : > { %3015 = vmatprep.subr.bf16.mxu0 %v3230_v30  ;;  %3055 = vmatprep.subr.bf16.mxu1 %v3231_v31 }
  0x84   : > { %2122 = vmatprep.mubr.bf16.mxu1 %v2630_v47 }
  0x86   : > { %3016 = vmatpush3.bf16.msra.mxu0 %v3232_v6  ;;  %3056 = vmatpush3.bf16.msra.mxu1 %v3233_v7 }
  0x89   : > { %2058 = vmatmul.mubr.bf16.vlgmr.msra.gmra.mrb[48].mxu0 %v2627_v41  ;;  %2123 = vmatmul.mubr.bf16.vlgmr.msra.gmra.mrb[48].mxu1 %v2629_v46 }
  0x8a   : > { %2065 = vmatprep.mubr.bf16.mxu0 %v3558_v37  ;;  %2130 = vmatprep.mubr.bf16.mxu1 %v3564_v43 }
  0x91   : > { %2066 = vmatmul.mubr.bf16.gmra.mrb[52].mxu0 %v3556_v34  ;;  %2131 = vmatmul.mubr.bf16.gmra.mrb[52].mxu1 %v3562_v42 }
  0x92   : > { %2073 = vmatprep.mubr.bf16.mxu0 %v3598_v60  ;;  %2138 = vmatprep.mubr.bf16.mxu1 %v3600_v61 }
  0x99   : > { %2074 = vmatmul.mubr.bf16.gmra.mrb[56].mxu0 %v3602_v62  ;;  %2139 = vmatmul.mubr.bf16.gmra.mrb[56].mxu1 %v3604_v63 }
  0x9a   : > { %2081 = vmatprep.mubr.bf16.mxu0 %v3637_v15  ;;  %2146 = vmatprep.mubr.bf16.mxu1 %v3642_v18 }
  0xa1   : > { %2082 = vmatmul.mubr.bf16.gmra.mrb[60].mxu0 %v3640_v17  ;;  %2147 = vmatmul.mubr.bf16.gmra.mrb[60].mxu1 %v3644_v19 }
  0xfb   : > { %v2777_v37 = vpop.f32.mrb[0].mxu0 }
  0xfc   : > { %v2817_v34 = vpop.f32.mrb[0].mxu1  ;;  %v2778_v43 = vpop.f32.mrb[1].mxu0 }
  0xfd   : > { %v2779_v42 = vadd.f32 %v2778_v43, %v2777_v37  ;;  %v2818_v48 = vpop.f32.mrb[1].mxu1  ;;  %v2780_v60 = vpop.f32.mrb[2].mxu0 }
  0xfe   : > { %v2819_v49 = vadd.f32 %v2818_v48, %v2817_v34  ;;  %v2820_v61 = vpop.f32.mrb[2].mxu1  ;;  %v2781_v51 = vpop.f32.mrb[3].mxu0 }
  0xff   : > { %v2782_v62 = vadd.f32 %v2781_v51, %v2780_v60  ;;  %v2821_v52 = vpop.f32.mrb[3].mxu1 }
 0x100   : > { %v1191_v63 = vadd.f32 %v2819_v49, %v2779_v42  ;;  %v2822_v56 = vadd.f32 %v2821_v52, %v2820_v61 }
 0x102   : > { %v1194_v15 = vadd.f32 %v2822_v56, %v2782_v62 }
 0x103   : > { %v2783_v57 = vpop.f32.mrb[4].mxu0 }
 0x104   : > { %v2823_v18 = vpop.f32.mrb[4].mxu1  ;;  %v2784_v58 = vpop.f32.mrb[5].mxu0 }
 0x105   : > { %v2785_v17 = vadd.f32 %v2784_v58, %v2783_v57  ;;  %v2824_v59 = vpop.f32.mrb[5].mxu1  ;;  %v2786_v19 = vpop.f32.mrb[6].mxu0 }
 0x106   : > { %v2825_v0 = vadd.f32 %v2824_v59, %v2823_v18  ;;  %v2826_v1 = vpop.f32.mrb[6].mxu1  ;;  %v2787_v2 = vpop.f32.mrb[7].mxu0 }
 0x107   : > { %v2788_v3 = vadd.f32 %v2787_v2, %v2786_v19  ;;  %v2827_v8 = vpop.f32.mrb[7].mxu1 }
 0x108   : > { %v1199_v9 = vadd.f32 %v2825_v0, %v2785_v17  ;;  %v2828_v10 = vadd.f32 %v2827_v8, %v2826_v1 }
 0x10a   : > { %v1202_v11 = vadd.f32 %v2828_v10, %v2788_v3 }
 0x10b   : > { %v2789_v12 = vpop.f32.mrb[8].mxu0 }
 0x10c   : > { %v2829_v13 = vpop.f32.mrb[8].mxu1  ;;  %v2790_v14 = vpop.f32.mrb[9].mxu0 }
 0x10d   : > { %v2830_v16 = vpop.f32.mrb[9].mxu1  ;;  %v2791_v20 = vadd.f32 %v2790_v14, %v2789_v12  ;;  %v2792_v36 = vpop.f32.mrb[10].mxu0 }
 0x10e   : > { %v2831_v21 = vadd.f32 %v2830_v16, %v2829_v13  ;;  %v2832_v39 = vpop.f32.mrb[10].mxu1  ;;  %v2793_v22 = vpop.f32.mrb[11].mxu0 }
 0x10f   : > { %v2833_v23 = vpop.f32.mrb[11].mxu1  ;;  %v2794_v38 = vadd.f32 %v2793_v22, %v2792_v36 }
 0x110   : > { %v1207_v35 = vadd.f32 %v2831_v21, %v2791_v20  ;;  %v2834_v50 = vadd.f32 %v2833_v23, %v2832_v39 }
 0x112   : > { %v1210_v24 = vadd.f32 %v2834_v50, %v2794_v38 }
 0x113   : > { %v2795_v54 = vpop.f32.mrb[12].mxu0 }
 0x114   : > { %v2835_v25 = vpop.f32.mrb[12].mxu1  ;;  %v2796_v26 = vpop.f32.mrb[13].mxu0 }
 0x115   : > { %v2797_v27 = vadd.f32 %v2796_v26, %v2795_v54  ;;  %v2836_v53 = vpop.f32.mrb[13].mxu1  ;;  %v2798_v55 = vpop.f32.mrb[14].mxu0 }
 0x116   : > { %v2837_v4 = vadd.f32 %v2836_v53, %v2835_v25  ;;  %v2838_v28 = vpop.f32.mrb[14].mxu1  ;;  %v2799_v5 = vpop.f32.mrb[15].mxu0 }
 0x117   : > { %v2800_v29 = vadd.f32 %v2799_v5, %v2798_v55  ;;  %v2839_v30 = vpop.f32.mrb[15].mxu1 }
 0x118   : > { %v1215_v31 = vadd.f32 %v2837_v4, %v2797_v27  ;;  %v2840_v6 = vadd.f32 %v2839_v30, %v2838_v28 }
 0x11a   : > { %v3830_v7 = vadd.f32 %v2840_v6, %v2800_v29 }
 0x11b   : > { %v2857_v32 = vpop.f32.mrb[16].mxu0 }
 0x11c   : > { %v2897_v33 = vpop.f32.mrb[16].mxu1  ;;  %v2858_v40 = vpop.f32.mrb[17].mxu0 }
 0x11d   : > { %v2859_v41 = vadd.f32 %v2858_v40, %v2857_v32  ;;  %v2898_v44 = vpop.f32.mrb[17].mxu1  ;;  %v2860_v45 = vpop.f32.mrb[18].mxu0 }
 0x11e   : > { %v2899_v46 = vadd.f32 %v2898_v44, %v2897_v33  ;;  %v2900_v47 = vpop.f32.mrb[18].mxu1  ;;  %v2861_v37 = vpop.f32.mrb[19].mxu0 }
 0x11f   : > { %v1256_v34 = vadd.f32 %v2859_v41, %v1191_v63  ;;  %v2862_v43 = vadd.f32 %v2861_v37, %v2860_v45  ;;  %v2901_v42 = vpop.f32.mrb[19].mxu1 }
 0x120   : > { %v2902_v48 = vadd.f32 %v2901_v42, %v2900_v47 }
 0x121   : > { %v1321_v60 = vadd.f32 %v2899_v46, %v1256_v34  ;;  %v1259_v49 = vadd.f32 %v2862_v43, %v1194_v15 }
 0x123   : > { %v3832_v61 = vadd.f32 %v2902_v48, %v1259_v49  ;;  %v2863_v51 = vpop.f32.mrb[20].mxu0 }
 0x124   : > { %v2903_v62 = vpop.f32.mrb[20].mxu1  ;;  %v2864_v52 = vpop.f32.mrb[21].mxu0 }
 0x125   : > { %v2904_v56 = vpop.f32.mrb[21].mxu1  ;;  %v2865_v57 = vadd.f32 %v2864_v52, %v2863_v51  ;;  %v2866_v58 = vpop.f32.mrb[22].mxu0 }
 0x126   : > { %v2905_v18 = vadd.f32 %v2904_v56, %v2903_v62  ;;  %v2906_v17 = vpop.f32.mrb[22].mxu1  ;;  %v2867_v59 = vpop.f32.mrb[23].mxu0 }
 0x127   : > { %v2907_v19 = vpop.f32.mrb[23].mxu1  ;;  %v1264_v0 = vadd.f32 %v2865_v57, %v1199_v9  ;;  %v2868_v1 = vadd.f32 %v2867_v59, %v2866_v58 }
 0x128   : > { %v2908_v63 = vadd.f32 %v2907_v19, %v2906_v17 }
 0x129   : > { %v1329_v2 = vadd.f32 %v2905_v18, %v1264_v0  ;;  %v1267_v3 = vadd.f32 %v2868_v1, %v1202_v11 }
 0x12b   : > { %v3834_v8 = vadd.f32 %v2908_v63, %v1267_v3  ;;  %v2869_v15 = vpop.f32.mrb[24].mxu0 }
 0x12c   : > { %v2909_v10 = vpop.f32.mrb[24].mxu1  ;;  %v2870_v12 = vpop.f32.mrb[25].mxu0 }
 0x12d   : > { %v2871_v13 = vadd.f32 %v2870_v12, %v2869_v15  ;;  %v2910_v14 = vpop.f32.mrb[25].mxu1  ;;  %v2872_v16 = vpop.f32.mrb[26].mxu0 }
 0x12e   : > { %v2911_v20 = vadd.f32 %v2910_v14, %v2909_v10  ;;  %v2912_v21 = vpop.f32.mrb[26].mxu1  ;;  %v2873_v36 = vpop.f32.mrb[27].mxu0 }
 0x12f   : > { %v1272_v39 = vadd.f32 %v2871_v13, %v1207_v35  ;;  %v2874_v22 = vadd.f32 %v2873_v36, %v2872_v16  ;;  %v2913_v23 = vpop.f32.mrb[27].mxu1 }
 0x130   : > { %v2914_v38 = vadd.f32 %v2913_v23, %v2912_v21 }
 0x131   : > { %v1337_v9 = vadd.f32 %v2911_v20, %v1272_v39  ;;  %v1275_v50 = vadd.f32 %v2874_v22, %v1210_v24 }
 0x133   : > { %v3836_v54 = vadd.f32 %v2914_v38, %v1275_v50  ;;  %v2875_v11 = vpop.f32.mrb[28].mxu0 }
 0x134   : > { %v2915_v25 = vpop.f32.mrb[28].mxu1  ;;  %v2876_v26 = vpop.f32.mrb[29].mxu0 }
 0x135   : > { %v2877_v27 = vadd.f32 %v2876_v26, %v2875_v11  ;;  %v2916_v53 = vpop.f32.mrb[29].mxu1  ;;  %v2878_v55 = vpop.f32.mrb[30].mxu0 }
 0x136   : > { %v2917_v4 = vadd.f32 %v2916_v53, %v2915_v25  ;;  %v2918_v28 = vpop.f32.mrb[30].mxu1  ;;  %v2879_v5 = vpop.f32.mrb[31].mxu0 }
 0x137   : > { %v1280_v29 = vadd.f32 %v2877_v27, %v1215_v31  ;;  %v2880_v30 = vadd.f32 %v2879_v5, %v2878_v55  ;;  %v2919_v6 = vpop.f32.mrb[31].mxu1 }
 0x138   : > { %v2920_v35 = vadd.f32 %v2919_v6, %v2918_v28 }
 0x139   : > { %v1345_v32 = vadd.f32 %v2917_v4, %v1280_v29  ;;  %v1283_v33 = vadd.f32 %v2880_v30, %v3830_v7 }
 0x13b   : > { %v3839_v40 = vadd.f32 %v2920_v35, %v1283_v33  ;;  %v2937_v24 = vpop.f32.mrb[32].mxu0 }
 0x13c   : > { %v2977_v41 = vpop.f32.mrb[32].mxu1  ;;  %v2938_v44 = vpop.f32.mrb[33].mxu0 }
 0x13d   : > { %v2978_v45 = vpop.f32.mrb[33].mxu1  ;;  %v2939_v46 = vadd.f32 %v2938_v44, %v2937_v24  ;;  %v2940_v37 = vpop.f32.mrb[34].mxu0 }
 0x13e   : > { %v2979_v47 = vadd.f32 %v2978_v45, %v2977_v41  ;;  %v2980_v34 = vpop.f32.mrb[34].mxu1  ;;  %v2941_v43 = vpop.f32.mrb[35].mxu0 }
 0x13f   : > { %v2981_v42 = vpop.f32.mrb[35].mxu1  ;;  %v1930_v48 = vadd.f32 %v2939_v46, %v1321_v60  ;;  %v2942_v31 = vadd.f32 %v2941_v43, %v2940_v37 }
 0x140   : > { %v2982_v49 = vadd.f32 %v2981_v42, %v2980_v34 }
 0x141   : > { %v1995_v51 = vadd.f32 %v2979_v47, %v1930_v48  ;;  %v1933_v62 = vadd.f32 %v2942_v31, %v3832_v61 }
 0x143   : > { %v3842_v52 = vadd.f32 %v2982_v49, %v1933_v62  ;;  %v2943_v7 = vpop.f32.mrb[36].mxu0 }
 0x144   : > { %v2983_v56 = vpop.f32.mrb[36].mxu1  ;;  %v2944_v57 = vpop.f32.mrb[37].mxu0 }
 0x145   : > { %v2984_v18 = vpop.f32.mrb[37].mxu1  ;;  %v2945_v58 = vadd.f32 %v2944_v57, %v2943_v7  ;;  %v2946_v59 = vpop.f32.mrb[38].mxu0 }
 0x146   : > { %v2985_v17 = vadd.f32 %v2984_v18, %v2983_v56  ;;  %v2986_v19 = vpop.f32.mrb[38].mxu1  ;;  %v2947_v0 = vpop.f32.mrb[39].mxu0 }
 0x147   : > { %v2987_v1 = vpop.f32.mrb[39].mxu1  ;;  %v1938_v63 = vadd.f32 %v2945_v58, %v1329_v2  ;;  %v2948_v3 = vadd.f32 %v2947_v0, %v2946_v59 }
 0x148   : > { %v2988_v60 = vadd.f32 %v2987_v1, %v2986_v19 }
 0x149   : > { %v3844_v15 = vadd.f32 %v2985_v17, %v1938_v63  ;;  %v1941_v10 = vadd.f32 %v2948_v3, %v3834_v8 }
 0x14b   : > { %v3847_v61 = vadd.f32 %v2988_v60, %v1941_v10  ;;  %v2949_v12 = vpop.f32.mrb[40].mxu0 }
 0x14c   : > { %v2989_v13 = vpop.f32.mrb[40].mxu1  ;;  %v2950_v14 = vpop.f32.mrb[41].mxu0 }
 0x14d   : > { %v2990_v16 = vpop.f32.mrb[41].mxu1  ;;  %v2951_v20 = vadd.f32 %v2950_v14, %v2949_v12  ;;  %v2952_v36 = vpop.f32.mrb[42].mxu0 }
 0x14e   : > { %v2991_v21 = vadd.f32 %v2990_v16, %v2989_v13  ;;  %v2992_v39 = vpop.f32.mrb[42].mxu1  ;;  %v2953_v22 = vpop.f32.mrb[43].mxu0 }
 0x14f   : > { %v2993_v23 = vpop.f32.mrb[43].mxu1  ;;  %v1946_v38 = vadd.f32 %v2951_v20, %v1337_v9  ;;  %v2954_v2 = vadd.f32 %v2953_v22, %v2952_v36 }
 0x150   : > { %v2994_v50 = vadd.f32 %v2993_v23, %v2992_v39 }
 0x151   : > { %v3849_v11 = vadd.f32 %v2991_v21, %v1946_v38  ;;  %v1949_v25 = vadd.f32 %v2954_v2, %v3836_v54 }
 0x153   : > { %v3852_v8 = vadd.f32 %v2994_v50, %v1949_v25  ;;  %v2955_v26 = vpop.f32.mrb[44].mxu0 }
 0x154   : > { %v2995_v27 = vpop.f32.mrb[44].mxu1  ;;  %v2956_v53 = vpop.f32.mrb[45].mxu0 }
 0x155   : > { %v2996_v55 = vpop.f32.mrb[45].mxu1  ;;  %v2957_v4 = vadd.f32 %v2956_v53, %v2955_v26  ;;  %v2958_v5 = vpop.f32.mrb[46].mxu0 }
 0x156   : > { %v2997_v28 = vadd.f32 %v2996_v55, %v2995_v27  ;;  %v2998_v29 = vpop.f32.mrb[46].mxu1  ;;  %v2959_v30 = vpop.f32.mrb[47].mxu0 }
 0x157   : > { %v2999_v6 = vpop.f32.mrb[47].mxu1  ;;  %v1954_v35 = vadd.f32 %v2957_v4, %v1345_v32  ;;  %v2960_v9 = vadd.f32 %v2959_v30, %v2958_v5 }
 0x158   : > { %v3000_v33 = vadd.f32 %v2999_v6, %v2998_v29 }
 0x159   : > { %v3854_v24 = vadd.f32 %v2997_v28, %v1954_v35  ;;  %v1957_v41 = vadd.f32 %v2960_v9, %v3839_v40 }
 0x15b   : > { %v3857_v54 = vadd.f32 %v3000_v33, %v1957_v41 }
 0x15c   : > { %v3017_v44 = vpop.f32.mrb[48].mxu0  ;;  %v3057_v45 = vpop.f32.mrb[48].mxu1 }
 0x15d   : > { %v3018_v46 = vpop.f32.mrb[49].mxu0  ;;  %v3058_v37 = vpop.f32.mrb[49].mxu1 }
 0x15e   : > { %v3019_v47 = vadd.f32 %v3018_v46, %v3017_v44  ;;  %v3020_v34 = vpop.f32.mrb[50].mxu0  ;;  %v3059_v43 = vadd.f32 %v3058_v37, %v3057_v45  ;;  %v3060_v42 = vpop.f32.mrb[50].mxu1 }
 0x15f   : > { %v3021_v48 = vpop.f32.mrb[51].mxu0  ;;  %v3061_v32 = vpop.f32.mrb[51].mxu1 }
 0x160   : > { %v2060_v31 = vadd.f32 %v3019_v47, %v1995_v51  ;;  %v3022_v49 = vadd.f32 %v3021_v48, %v3020_v34  ;;  %v3062_v62 = vadd.f32 %v3061_v32, %v3060_v42 }
 0x162   : > { %v3859_v7 = vadd.f32 %v3059_v43, %v2060_v31  ;;  %v2063_v56 = vadd.f32 %v3022_v49, %v3842_v52 }
 0x164   : > { %v3862_v40 = vadd.f32 %v3062_v62, %v2063_v56  ;;  %v3023_v57 = vpop.f32.mrb[52].mxu0  ;;  %v3063_v18 = vpop.f32.mrb[52].mxu1  ;;  %v2168_v17 = vmul.f32 %v3859_v7, %v3859_v7 }
 0x165   : > { %v3024_v58 = vpop.f32.mrb[53].mxu0  ;;  %v3064_v0 = vpop.f32.mrb[53].mxu1 }
 0x166   : > { %v2155_v59 = vadd.f32 %v3862_v40, %v3859_v7  ;;  %v2169_v51 = vmul.f32 %v3862_v40, %v3862_v40  ;;  %v3025_v19 = vadd.f32 %v3024_v58, %v3023_v57  ;;  %v3026_v1 = vpop.f32.mrb[54].mxu0  ;;  %v3065_v63 = vadd.f32 %v3064_v0, %v3063_v18  ;;  %v3066_v3 = vpop.f32.mrb[54].mxu1 }
 0x167   : > { %v3027_v52 = vpop.f32.mrb[55].mxu0  ;;  %v3067_v13 = vpop.f32.mrb[55].mxu1 }
 0x168   : > { %v2176_v60 = vadd.f32 %v2169_v51, %v2168_v17  ;;  %v2068_v10 = vadd.f32 %v3025_v19, %v3844_v15  ;;  %v3028_v12 = vadd.f32 %v3027_v52, %v3026_v1  ;;  %v3068_v14 = vadd.f32 %v3067_v13, %v3066_v3 }
 0x16a   : > { %v3871_v16 = vadd.f32 %v3065_v63, %v2068_v10  ;;  %v2071_v20 = vadd.f32 %v3028_v12, %v3847_v61 }
 0x16c   : > { %v2156_v21 = vadd.f32 %v2155_v59, %v3871_v16  ;;  %v2170_v36 = vmul.f32 %v3871_v16, %v3871_v16  ;;  %v3877_v39 = vadd.f32 %v3068_v14, %v2071_v20  ;;  %v3029_v22 = vpop.f32.mrb[56].mxu0  ;;  %v3069_v23 = vpop.f32.mrb[56].mxu1 }
 0x16d   : > { %v3030_v38 = vpop.f32.mrb[57].mxu0  ;;  %v3070_v26 = vpop.f32.mrb[57].mxu1 }
 0x16e   : > { %v2177_v2 = vadd.f32 %v2176_v60, %v2170_v36  ;;  %v2157_v15 = vadd.f32 %v2156_v21, %v3877_v39  ;;  %v2171_v50 = vmul.f32 %v3877_v39, %v3877_v39  ;;  %v3031_v25 = vadd.f32 %v3030_v38, %v3029_v22  ;;  %v3032_v27 = vpop.f32.mrb[58].mxu0  ;;  %v3072_v53 = vpop.f32.mrb[58].mxu1 }
 0x16f   : > { %v3071_v61 = vadd.f32 %v3070_v26, %v3069_v23  ;;  %v3033_v55 = vpop.f32.mrb[59].mxu0  ;;  %v3073_v29 = vpop.f32.mrb[59].mxu1 }
 0x170   : > { %v2178_v4 = vadd.f32 %v2177_v2, %v2171_v50  ;;  %v2076_v28 = vadd.f32 %v3031_v25, %v3849_v11  ;;  %v3034_v5 = vadd.f32 %v3033_v55, %v3032_v27  ;;  %v3074_v30 = vadd.f32 %v3073_v29, %v3072_v53  ;;  %v2196_v27 = vld [vmem:[%s3917_s2 + $0x1] sm:$0x1] }
 0x171   : > { %v2201_v25 = vlaneseq }
 0x172   : > { %v3883_v6 = vadd.f32 %v3071_v61, %v2076_v28  ;;  %v2079_v35 = vadd.f32 %v3034_v5, %v3852_v8 }
 0x173   : > { %v2202_v26 = vshrl.u32 %v2201_v25, 7 }
 0x174   : > { %v2158_v9 = vadd.f32 %v2157_v15, %v3883_v6  ;;  %v2172_v33 = vmul.f32 %v3883_v6, %v3883_v6  ;;  %v2144_v41 = vadd.f32 %v3074_v30, %v2079_v35  ;;  %v3035_v44 = vpop.f32.mrb[60].mxu0  ;;  %v3075_v45 = vpop.f32.mrb[60].mxu1 }
 0x175   : > { %v3036_v46 = vpop.f32.mrb[61].mxu0  ;;  %v3076_v43 = vpop.f32.mrb[61].mxu1  ;;  %v2203_v61 = vsub.s32 0, %v2202_v26 }
 0x176   : > { %v2179_v47 = vadd.f32 %v2178_v4, %v2172_v33  ;;  %v2159_v37 = vadd.f32 %v2158_v9, %v2144_v41  ;;  %v2173_v34 = vmul.f32 %v2144_v41, %v2144_v41  ;;  %v3037_v11 = vadd.f32 %v3036_v46, %v3035_v44  ;;  %v3038_v42 = vpop.f32.mrb[62].mxu0  ;;  %v3078_v31 = vpop.f32.mrb[62].mxu1  ;;  %v2198_v4 = vld [vmem:[%s3917_s2 + $0x2] sm:$0x1] }
 0x177   : > { %v3077_v48 = vadd.f32 %v3076_v43, %v3075_v45  ;;  %v3039_v49 = vpop.f32.mrb[63].mxu0  ;;  %v3079_v56 = vpop.f32.mrb[63].mxu1 }
 0x178   : > { %v2180_v32 = vadd.f32 %v2179_v47, %v2173_v34  ;;  %v2084_v8 = vadd.f32 %v3037_v11, %v3854_v24  ;;  %v3040_v62 = vadd.f32 %v3039_v49, %v3038_v42  ;;  %v3080_v57 = vadd.f32 %v3079_v56, %v3078_v31 }
 0x17a   : > { %v2149_v18 = vadd.f32 %v3077_v48, %v2084_v8  ;;  %v2087_v58 = vadd.f32 %v3040_v62, %v3857_v54 }
 0x17c   : > { %v2160_v17 = vadd.f32 %v2159_v37, %v2149_v18  ;;  %v2174_v59 = vmul.f32 %v2149_v18, %v2149_v18  ;;  %v2152_v51 = vadd.f32 %v3080_v57, %v2087_v58 }
 0x17e   : > { %v2181_v19 = vadd.f32 %v2180_v32, %v2174_v59  ;;  %v2161_v0 = vadd.f32 %v2160_v17, %v2152_v51  ;;  %v2175_v1 = vmul.f32 %v2152_v51, %v2152_v51 }
 0x180   : > { %v2162_v63 = vrot.slane %v2161_v0, 4  ;;  %v2182_v3 = vadd.f32 %v2181_v19, %v2175_v1 }
 0x182   : > { %v2163_v52 = vadd.f32 %v2162_v63, %v2161_v0  ;;  %v2183_v60 = vrot.slane %v2182_v3, 4 }
 0x184   : > { %v2164_v10 = vrot.slane %v2163_v52, 2  ;;  %v2184_v12 = vadd.f32 %v2183_v60, %v2182_v3 }
 0x186   : > { %v2165_v13 = vadd.f32 %v2164_v10, %v2163_v52  ;;  %v2185_v24 = vrot.slane %v2184_v12, 2 }
 0x188   : > { %v2166_v14 = vrot.slane %v2165_v13, 1  ;;  %v2186_v20 = vadd.f32 %v2185_v24, %v2184_v12 }
 0x18a   : > { %v2167_v21 = vadd.f32 %v2166_v14, %v2165_v13  ;;  %v2187_v36 = vrot.slane %v2186_v20, 1 }
 0x18c   : > { %v2188_v22 = vadd.f32 %v2187_v36, %v2186_v20  ;;  %v2189_v54 = vmul.f32 0.0625, %v2167_v21 }
 0x18e   : > { %v2190_v23 = vmul.f32 0.0625, %v2188_v22  ;;  %v2191_v38 = vmul.f32 %v2189_v54, %v2189_v54 }
 0x190   : > { %v2192_v2 = vsub.f32 %v2190_v23, %v2191_v38 }
 0x192   : > { %v2193_v15 = vmax.f32 %v2192_v2, 0.0 }
 0x194   : > { %v2194_v50 = vadd.f32 1e-05, %v2193_v15 }
 0x196   : > { %3234 = vrsqrt.f32 %v2194_v50 }
 0x1a0   : > { %v3235_v53 = vpop.eup %3234 }
 0x1a1   : > { %v2197_v55 = vmul.f32 %v3235_v53, %v2196_v27 }
 0x1a3   : > { %v2199_v28 = vmul.f32 %v2197_v55, %v2189_v54  ;;  %v2204_v5 = vrot.slane %v2197_v55, %v2203_v61 }
 0x1a5   : > { %v2200_v29 = vsub.f32 %v2198_v4, %v2199_v28  ;;  %v2205_v30 = vmul.f32 %v2204_v5, %v3859_v7  ;;  %v2206_v35 = vmul.f32 %v2204_v5, %v3862_v40  ;;  %v2207_v9 = vmul.f32 %v2204_v5, %v3871_v16 }
 0x1a6   : > { %v2208_v33 = vmul.f32 %v2204_v5, %v3877_v39  ;;  %v2209_v44 = vmul.f32 %v2204_v5, %v3883_v6  ;;  %v2210_v45 = vmul.f32 %v2204_v5, %v2144_v41  ;;  %v2211_v46 = vmul.f32 %v2204_v5, %v2149_v18 }
 0x1a7   : > { %v2212_v47 = vmul.f32 %v2204_v5, %v2152_v51  ;;  %v2216_v37 = vrot.slane %v2200_v29, %v2203_v61 }
 0x1a9   : > { %v2217_v34 = vadd.f32 %v2216_v37, %v2205_v30  ;;  %v2218_v11 = vadd.f32 %v2216_v37, %v2206_v35  ;;  %v2219_v43 = vadd.f32 %v2216_v37, %v2207_v9  ;;  %v2220_v42 = vadd.f32 %v2216_v37, %v2208_v33 }
 0x1aa   : > { %v2221_v48 = vadd.f32 %v2216_v37, %v2209_v44  ;;  %v2222_v31 = vadd.f32 %v2216_v37, %v2210_v45  ;;  %v2223_v7 = vadd.f32 %v2216_v37, %v2211_v46  ;;  %v2224_v49 = vadd.f32 %v2216_v37, %v2212_v47 }
 0x1ab   : > { %v2225_v40 = vmul.f32 0.2, %v2217_v34  ;;  %v2226_v32 = vmul.f32 0.2, %v2218_v11  ;;  %v2227_v16 = vmul.f32 0.2, %v2219_v43 }
 0x1ac   : > { %v2228_v8 = vmul.f32 0.2, %v2220_v42  ;;  %v2229_v39 = vmul.f32 0.2, %v2221_v48  ;;  %v2230_v62 = vmul.f32 0.2, %v2222_v31 }
 0x1ad   : > { %v2231_v6 = vmul.f32 0.2, %v2223_v7  ;;  %v2232_v41 = vmul.f32 0.2, %v2224_v49  ;;  %v2233_v56 = vmax.f32 %v2217_v34, %v2225_v40  ;;  %v2234_v57 = vmax.f32 %v2218_v11, %v2226_v32 }
 0x1ae   : > { %v2235_v18 = vmax.f32 %v2219_v43, %v2227_v16  ;;  %v2236_v58 = vmax.f32 %v2220_v42, %v2228_v8  ;;  %v2237_v17 = vmax.f32 %v2221_v48, %v2229_v39  ;;  %v2238_v59 = vmax.f32 %v2222_v31, %v2230_v62 }
 0x1af   : > { %v2239_v51 = vmax.f32 %v2223_v7, %v2231_v6  ;;  %v2240_v19 = vmax.f32 %v2224_v49, %v2232_v41  ;;  %v2741_v0 = vpack.c.bf16 %v2234_v57, %v2233_v56 }
 0x1b0   : > { %v2746_v1 = vpack.c.bf16 %v2236_v58, %v2235_v18  ;;  %v2751_v63 = vpack.c.bf16 %v2238_v59, %v2237_v17 }
 0x1b1   : > { %2742 = vst [vmem:[%s224_s11] sm:$0xff] %v2741_v0   ;;  %v2756_v3 = vpack.c.bf16 %v2240_v19, %v2239_v51 }
 0x1b2   : > { %2758 = vst [vmem:[%s224_s11 + $0x8] sm:$0xff] %v2746_v1   ;;  %2759 = vst [vmem:[%s224_s11 + $0x10] sm:$0xff] %v2751_v63  }
 0x1b3   : > { %2760 = vst [vmem:[%s224_s11 + $0x18] sm:$0xff] %v2756_v3  }
 0x1b4 PF: > { %s13_s14 = sadd.s32 1, %s3258_s14   ;;  %s3919_s12 = smov %s3254_s13 }
 0x1b5   : > { %p10_p5 = scmp.ge.s32.totalorder %s13_s14, 4   ;;  %s3920_s13 = smov %s3922_s15 }
 0x1b7   :  { %12 = sbr.rel (!%p10_p5) target bundleno = 2 (0x2), region = 69 }

// kernel: _lambda_.8
= control target key start
LH: loop header
LB: loop body
LE: loop exit
PB: predicated region body
PF: predicated region fallthrough
CT: control target
= control target key end

     0   :  { %s3969_s12 = smov 0   ;;  %s3971_s13 = smov 0   ;;  %s4943_s0 = inlined_call_operand.vmem [shape: bf16[2,96,512], index: 0, kind: input, shape index: {}]   ;;  %s4944_s1 = inlined_call_operand.vmem [shape: bf16[4,512,256], index: 1, kind: input, shape index: {}]   ;;  %s4945_s2 = inlined_call_operand.vmem [shape: f32[3,256], index: 2, kind: input, shape index: {}]   ;;  %s4946_s3 = inlined_call_operand.vmem [shape: bf16[2,48,256], index: 3, kind: output, shape index: {}]  }
   0x1   :  { %s3973_s14 = smov 0  }
   0x2 LB: > { %s25_s15 = sadd.s32 1, %s3942_s13  ;;  %p2879_p0 = scmp.ge.s32.totalorder %s3946_s14, 1  ;;  %s3946_s14 = sphi %s3973_s14, %s13_s14   ;;  %s3942_s13 = sphi %s3971_s13, %s4948_s13   ;;  %s3938_s12 = sphi %s3969_s12, %s4947_s12  }
   0x3   : > { %p27_p1 = scmp.ge.s32.totalorder %s25_s15, 2  ;;  %p173_p2 = scmp.lt.s32.totalorder %s3946_s14, 3 }
   0x5   : > { %s4950_s15 = smov (%p27_p1, %s25_s15), 0  ;;  %p174_p3 = pnand %p2879_p0, %p173_p2 }
   0x6   : > { %v3497_v0 = vld [vmem:[%s4944_s1 + $0x204] ss:$8 sps:$4 sm:$0xff] (!%p174_p3)   ;;  %v3501_v2 = vld [vmem:[%s4944_s1 + $0x200] ss:$8 sps:$4 sm:$0xff] (!%p174_p3)   ;;  %v3503_v4 = vld [vmem:[%s4944_s1 + $0x214] ss:$8 sps:$4 sm:$0xff] (!%p174_p3)  }
   0x7   : > { %177 = sbr.rel (%p174_p3) target bundleno = 560 (0x230), region = 32  ;;  %v3499_v1 = vld [vmem:[%s4944_s1 + $0x404] ss:$8 sps:$4 sm:$0xff] (!%p174_p3)   ;;  %763 = vmatprep.subr.bf16.mxu1 (!%p174_p3), %v3497_v0  ;;  %v3502_v3 = vld [vmem:[%s4944_s1 + $0x400] ss:$8 sps:$4 sm:$0xff] (!%p174_p3)   ;;  %p211_p4 = scmp.lt.s32.totalorder (!%p174_p3), %s3938_s12, 1 }
   0x8   : > { %1812 = vmatprep.subr.bf16.mxu0 (!%p174_p3), %v3499_v1  ;;  %764 = vmatpush1.bf16.msra.mxu1 (!%p174_p3), %v3501_v2  ;;  %v3505_v5 = vld [vmem:[%s4944_s1 + $0x414] ss:$8 sps:$4 sm:$0xff] (!%p174_p3)   ;;  %v3507_v6 = vld [vmem:[%s4944_s1 + $0x210] ss:$8 sps:$4 sm:$0xff] (!%p174_p3)   ;;  %v3509_v8 = vld [vmem:[%s4944_s1 + $0x224] ss:$8 sps:$4 sm:$0xff] (!%p174_p3)  }
   0x9   : > { %1813 = vmatpush1.bf16.msra.mxu0 (!%p174_p3), %v3502_v3  ;;  %765 = vmatprep.subr.bf16.mxu1 (!%p174_p3), %v3503_v4  ;;  %v3508_v7 = vld [vmem:[%s4944_s1 + $0x410] ss:$8 sps:$4 sm:$0xff] (!%p174_p3)   ;;  %v3511_v9 = vld [vmem:[%s4944_s1 + $0x424] ss:$8 sps:$4 sm:$0xff] (!%p174_p3)   ;;  %v3513_v10 = vld [vmem:[%s4944_s1 + $0x220] ss:$8 sps:$4 sm:$0xff] (!%p174_p3)  }
   0xa   : > { %1814 = vmatprep.subr.bf16.mxu0 (!%p174_p3), %v3505_v5  ;;  %v3514_v11 = vld [vmem:[%s4944_s1 + $0x420] ss:$8 sps:$4 sm:$0xff] (!%p174_p3)   ;;  %v3515_v12 = vld [vmem:[%s4944_s1 + $0x234] ss:$8 sps:$4 sm:$0xff] (!%p174_p3)   ;;  %v3519_v14 = vld [vmem:[%s4944_s1 + $0x230] ss:$8 sps:$4 sm:$0xff] (!%p174_p3)  }
   0xb   : > { %v3517_v13 = vld [vmem:[%s4944_s1 + $0x434] ss:$8 sps:$4 sm:$0xff] (!%p174_p3)   ;;  %v3520_v15 = vld [vmem:[%s4944_s1 + $0x430] ss:$8 sps:$4 sm:$0xff] (!%p174_p3)   ;;  %v3521_v16 = vld [vmem:[%s4944_s1 + $0x244] ss:$8 sps:$4 sm:$0xff] (!%p174_p3)  }
   0xc   : > { %766 = vmatpush1.bf16.msra.mxu1 (!%p174_p3), %v3507_v6  ;;  %v3523_v17 = vld [vmem:[%s4944_s1 + $0x444] ss:$8 sps:$4 sm:$0xff] (!%p174_p3)   ;;  %v3525_v18 = vld [vmem:[%s4944_s1 + $0x240] ss:$8 sps:$4 sm:$0xff] (!%p174_p3)   ;;  %v3527_v20 = vld [vmem:[%s4944_s1 + $0x254] ss:$8 sps:$4 sm:$0xff] (!%p174_p3)  }
   0xd   : > { %1815 = vmatpush1.bf16.msra.mxu0 (!%p174_p3), %v3508_v7  ;;  %767 = vmatprep.subr.bf16.mxu1 (!%p174_p3), %v3509_v8  ;;  %v3526_v19 = vld [vmem:[%s4944_s1 + $0x440] ss:$8 sps:$4 sm:$0xff] (!%p174_p3)   ;;  %v3529_v21 = vld [vmem:[%s4944_s1 + $0x454] ss:$8 sps:$4 sm:$0xff] (!%p174_p3)   ;;  %v3531_v22 = vld [vmem:[%s4944_s1 + $0x250] ss:$8 sps:$4 sm:$0xff] (!%p174_p3)  }
   0xe   : > { %1816 = vmatprep.subr.bf16.mxu0 %v3511_v9  ;;  %v3532_v23 = vld [vmem:[%s4944_s1 + $0x450] ss:$8 sps:$4 sm:$0xff]   ;;  %v3533_v24 = vld [vmem:[%s4944_s1 + $0x264] ss:$8 sps:$4 sm:$0xff]   ;;  %v3537_v26 = vld [vmem:[%s4944_s1 + $0x260] ss:$8 sps:$4 sm:$0xff]  }
   0xf   : > { %v3535_v25 = vld [vmem:[%s4944_s1 + $0x464] ss:$8 sps:$4 sm:$0xff]   ;;  %v3538_v27 = vld [vmem:[%s4944_s1 + $0x460] ss:$8 sps:$4 sm:$0xff]   ;;  %v3539_v28 = vld [vmem:[%s4944_s1 + $0x274] ss:$8 sps:$4 sm:$0xff]  }
  0x10   : > { %768 = vmatpush1.bf16.msra.mxu1 %v3513_v10  ;;  %v3541_v29 = vld [vmem:[%s4944_s1 + $0x474] ss:$8 sps:$4 sm:$0xff]   ;;  %v3543_v30 = vld [vmem:[%s4944_s1 + $0x270] ss:$8 sps:$4 sm:$0xff]   ;;  %v3545_v32 = vld [vmem:[%s4944_s1 + $0x284] ss:$8 sps:$4 sm:$0xff]  }
  0x11   : > { %1817 = vmatpush1.bf16.msra.mxu0 %v3514_v11  ;;  %769 = vmatprep.subr.bf16.mxu1 %v3515_v12  ;;  %v3544_v31 = vld [vmem:[%s4944_s1 + $0x470] ss:$8 sps:$4 sm:$0xff]   ;;  %v3547_v33 = vld [vmem:[%s4944_s1 + $0x484] ss:$8 sps:$4 sm:$0xff]   ;;  %v3549_v34 = vld [vmem:[%s4944_s1 + $0x280] ss:$8 sps:$4 sm:$0xff]  }
  0x12   : > { %1818 = vmatprep.subr.bf16.mxu0 %v3517_v13  ;;  %v3550_v35 = vld [vmem:[%s4944_s1 + $0x480] ss:$8 sps:$4 sm:$0xff]   ;;  %v3551_v36 = vld [vmem:[%s4944_s1 + $0x294] ss:$8 sps:$4 sm:$0xff]   ;;  %s4952_s12 = smov (!%p211_p4, %s3938_s12), 1 }
  0x13   : > { %v3553_v37 = vld [vmem:[%s4944_s1 + $0x494] ss:$8 sps:$4 sm:$0xff]   ;;  %v3555_v38 = vld [vmem:[%s4944_s1 + $0x290] ss:$8 sps:$4 sm:$0xff]   ;;  %v3557_v40 = vld [vmem:[%s4944_s1 + $0x2a4] ss:$8 sps:$4 sm:$0xff]  }
  0x14   : > { %770 = vmatpush1.bf16.msra.mxu1 %v3519_v14  ;;  %v3556_v39 = vld [vmem:[%s4944_s1 + $0x490] ss:$8 sps:$4 sm:$0xff]   ;;  %s3470_s29 = smul.u32 192, %s4952_s12  ;;  %v3559_v41 = vld [vmem:[%s4944_s1 + $0x4a4] ss:$8 sps:$4 sm:$0xff]  }
  0x15   : > { %1819 = vmatpush1.bf16.msra.mxu0 %v3520_v15  ;;  %771 = vmatprep.subr.bf16.mxu1 %v3521_v16  ;;  %v3561_v42 = vld [vmem:[%s4944_s1 + $0x2a0] ss:$8 sps:$4 sm:$0xff]   ;;  %v3563_v44 = vld [vmem:[%s4944_s1 + $0x2b4] ss:$8 sps:$4 sm:$0xff]   ;;  %v3567_v46 = vld [vmem:[%s4944_s1 + $0x2b0] ss:$8 sps:$4 sm:$0xff]  }
  0x16   : > { %1820 = vmatprep.subr.bf16.mxu0 %v3523_v17  ;;  %v3562_v43 = vld [vmem:[%s4944_s1 + $0x4a0] ss:$8 sps:$4 sm:$0xff]   ;;  %s4132_s17 = scalar_lea.vmem %s4943_s0, %s3470_s29  ;;  %v3565_v45 = vld [vmem:[%s4944_s1 + $0x4b4] ss:$8 sps:$4 sm:$0xff]   ;;  %v3568_v47 = vld [vmem:[%s4944_s1 + $0x4b0] ss:$8 sps:$4 sm:$0xff]  }
  0x17   : > { %v3595_v48 = vld [vmem:[%s4132_s17 + $0x24] ss:$16 sps:$4 sm:$0xff]   ;;  %v3573_v52 = vld [vmem:[%s4944_s1 + $0x2c0] ss:$8 sps:$4 sm:$0xff]   ;;  %v3579_v56 = vld [vmem:[%s4944_s1 + $0x2d0] ss:$8 sps:$4 sm:$0xff]  }
  0x18   : > { %772 = vmatpush1.bf16.msra.mxu1 %v3525_v18  ;;  %v3569_v49 = vld [vmem:[%s4944_s1 + $0x2c4] ss:$8 sps:$4 sm:$0xff]   ;;  %795 = vmatprep.mubr.bf16.mxu1 %v3595_v48  ;;  %v3574_v53 = vld [vmem:[%s4944_s1 + $0x4c0] ss:$8 sps:$4 sm:$0xff]   ;;  %v3575_v54 = vld [vmem:[%s4944_s1 + $0x2d4] ss:$8 sps:$4 sm:$0xff]  }
  0x19   : > { %1821 = vmatpush1.bf16.msra.mxu0 %v3526_v19  ;;  %773 = vmatprep.subr.bf16.mxu1 %v3527_v20  ;;  %v3571_v50 = vld [vmem:[%s4944_s1 + $0x4c4] ss:$8 sps:$4 sm:$0xff]   ;;  %v3577_v55 = vld [vmem:[%s4944_s1 + $0x4d4] ss:$8 sps:$4 sm:$0xff]   ;;  %v3580_v57 = vld [vmem:[%s4944_s1 + $0x4d0] ss:$8 sps:$4 sm:$0xff]  }
  0x1a   : > { %1822 = vmatprep.subr.bf16.mxu0 %v3529_v21  ;;  %v3601_v51 = vld [vmem:[%s4132_s17 + $0x44] ss:$16 sps:$4 sm:$0xff]   ;;  %v3585_v60 = vld [vmem:[%s4944_s1 + $0x2e0] ss:$8 sps:$4 sm:$0xff]   ;;  %v3591_v0 = vld [vmem:[%s4944_s1 + $0x2f0] ss:$8 sps:$4 sm:$0xff]  }
  0x1b   : > { %1844 = vmatprep.mubr.bf16.mxu0 %v3601_v51  ;;  %v3581_v58 = vld [vmem:[%s4944_s1 + $0x2e4] ss:$8 sps:$4 sm:$0xff]   ;;  %v3586_v61 = vld [vmem:[%s4944_s1 + $0x4e0] ss:$8 sps:$4 sm:$0xff]   ;;  %v3587_v62 = vld [vmem:[%s4944_s1 + $0x2f4] ss:$8 sps:$4 sm:$0xff]  }
  0x1c   : > { %774 = vmatpush1.bf16.msra.mxu1 %v3531_v22  ;;  %v3583_v59 = vld [vmem:[%s4944_s1 + $0x4e4] ss:$8 sps:$4 sm:$0xff]   ;;  %v3589_v63 = vld [vmem:[%s4944_s1 + $0x4f4] ss:$8 sps:$4 sm:$0xff]   ;;  %v3592_v1 = vld [vmem:[%s4944_s1 + $0x4f0] ss:$8 sps:$4 sm:$0xff]  }
  0x1d   : > { %1823 = vmatpush1.bf16.msra.mxu0 %v3532_v23  ;;  %775 = vmatprep.subr.bf16.mxu1 %v3533_v24  ;;  %v3598_v2 = vld [vmem:[%s4944_s1 + $0x304] ss:$8 sps:$4 sm:$0xff]   ;;  %v4200_v4 = vld [vmem:[%s4132_s17 + $0x20] ss:$16 sps:$4 sm:$0xff]   ;;  %v3607_v8 = vld [vmem:[%s4944_s1 + $0x314] ss:$8 sps:$4 sm:$0xff]  }
  0x1e   : > { %1824 = vmatprep.subr.bf16.mxu0 %v3535_v25  ;;  %v3604_v3 = vld [vmem:[%s4944_s1 + $0x504] ss:$8 sps:$4 sm:$0xff]   ;;  %v3596_v5 = vld [vmem:[%s4944_s1 + $0x300] ss:$8 sps:$4 sm:$0xff]   ;;  %v3610_v9 = vld [vmem:[%s4944_s1 + $0x514] ss:$8 sps:$4 sm:$0xff]  }
  0x1f   : > { %v3599_v6 = vld [vmem:[%s4132_s17 + $0x40] ss:$16 sps:$4 sm:$0xff]   ;;  %v3613_v12 = vld [vmem:[%s4944_s1 + $0x324] ss:$8 sps:$4 sm:$0xff]   ;;  %v3619_v16 = vld [vmem:[%s4944_s1 + $0x334] ss:$8 sps:$4 sm:$0xff]  }
  0x20   : > { %776 = vmatpush1.bf16.msra.mxu1 %v3537_v26  ;;  %v3602_v7 = vld [vmem:[%s4944_s1 + $0x500] ss:$8 sps:$4 sm:$0xff]   ;;  %v3605_v10 = vld [vmem:[%s4944_s1 + $0x310] ss:$8 sps:$4 sm:$0xff]   ;;  %v3616_v13 = vld [vmem:[%s4944_s1 + $0x524] ss:$8 sps:$4 sm:$0xff]  }
  0x21   : > { %1825 = vmatpush1.bf16.msra.mxu0 %v3538_v27  ;;  %777 = vmatprep.subr.bf16.mxu1 %v3539_v28  ;;  %v3608_v11 = vld [vmem:[%s4944_s1 + $0x510] ss:$8 sps:$4 sm:$0xff]   ;;  %v3611_v14 = vld [vmem:[%s4944_s1 + $0x320] ss:$8 sps:$4 sm:$0xff]   ;;  %v3622_v17 = vld [vmem:[%s4944_s1 + $0x534] ss:$8 sps:$4 sm:$0xff]  }
  0x22   : > { %1826 = vmatprep.subr.bf16.mxu0 %v3541_v29  ;;  %v3614_v15 = vld [vmem:[%s4944_s1 + $0x520] ss:$8 sps:$4 sm:$0xff]   ;;  %v3617_v18 = vld [vmem:[%s4944_s1 + $0x330] ss:$8 sps:$4 sm:$0xff]   ;;  %v3625_v20 = vld [vmem:[%s4944_s1 + $0x344] ss:$8 sps:$4 sm:$0xff]  }
  0x23   : > { %v3620_v19 = vld [vmem:[%s4944_s1 + $0x530] ss:$8 sps:$4 sm:$0xff]   ;;  %v3628_v21 = vld [vmem:[%s4944_s1 + $0x544] ss:$8 sps:$4 sm:$0xff]   ;;  %v3623_v22 = vld [vmem:[%s4944_s1 + $0x340] ss:$8 sps:$4 sm:$0xff]  }
  0x24   : > { %778 = vmatpush1.bf16.msra.mxu1 %v3543_v30  ;;  %v3626_v23 = vld [vmem:[%s4944_s1 + $0x540] ss:$8 sps:$4 sm:$0xff]   ;;  %v4259_v24 = vld [vmem:[%s4132_s17 + $0x64] ss:$16 sps:$4 sm:$0xff]   ;;  %v3629_v28 = vld [vmem:[%s4944_s1 + $0x350] ss:$8 sps:$4 sm:$0xff]  }
  0x25   : > { %1827 = vmatpush1.bf16.msra.mxu0 %v3544_v31  ;;  %779 = vmatprep.subr.bf16.mxu1 %v3545_v32  ;;  %v3631_v25 = vld [vmem:[%s4944_s1 + $0x354] ss:$8 sps:$4 sm:$0xff]   ;;  %v4268_v27 = vld [vmem:[%s4132_s17 + $0x60] ss:$16 sps:$4 sm:$0xff]   ;;  %v3637_v30 = vld [vmem:[%s4944_s1 + $0x364] ss:$8 sps:$4 sm:$0xff]  }
  0x26   : > { %1828 = vmatprep.subr.bf16.mxu0 %v3547_v33  ;;  %v3634_v26 = vld [vmem:[%s4944_s1 + $0x554] ss:$8 sps:$4 sm:$0xff]   ;;  %v3632_v29 = vld [vmem:[%s4944_s1 + $0x550] ss:$8 sps:$4 sm:$0xff]   ;;  %v3640_v31 = vld [vmem:[%s4944_s1 + $0x564] ss:$8 sps:$4 sm:$0xff]  }
  0x27   : > { %v4287_v32 = vld [vmem:[%s4132_s17 + $0x84] ss:$16 sps:$4 sm:$0xff]   ;;  %v3635_v33 = vld [vmem:[%s4944_s1 + $0x360] ss:$8 sps:$4 sm:$0xff]   ;;  %v3653_v48 = vld [vmem:[%s4944_s1 + $0x390] ss:$8 sps:$4 sm:$0xff]  }
  0x28   : > { %780 = vmatpush1.bf16.msra.mxu1 %v3549_v34  ;;  %v3638_v34 = vld [vmem:[%s4944_s1 + $0x560] ss:$8 sps:$4 sm:$0xff]   ;;  %s3471_s25 = smul.u32 48, %s4952_s12 }
  0x29   : > { %1829 = vmatpush1.bf16.msra.mxu0 %v3550_v35  ;;  %781 = vmatprep.subr.bf16.mxu1 %v3551_v36  ;;  %v4296_v35 = vld [vmem:[%s4132_s17 + $0x80] ss:$16 sps:$4 sm:$0xff]   ;;  %v3643_v36 = vld [vmem:[%s4944_s1 + $0x374] ss:$8 sps:$4 sm:$0xff]  }
  0x2a   : > { %1830 = vmatprep.subr.bf16.mxu0 %v3553_v37  ;;  %v3646_v37 = vld [vmem:[%s4944_s1 + $0x574] ss:$8 sps:$4 sm:$0xff]   ;;  %s236_s27 = scalar_lea.vmem %s4946_s3, %s3471_s25 }
  0x2c   : > { %782 = vmatpush1.bf16.msra.mxu1 %v3555_v38  ;;  %v3641_v38 = vld [vmem:[%s4944_s1 + $0x370] ss:$8 sps:$4 sm:$0xff]  }
  0x2d   : > { %1831 = vmatpush1.bf16.msra.mxu0 %v3556_v39  ;;  %783 = vmatprep.subr.bf16.mxu1 %v3557_v40  ;;  %v3644_v39 = vld [vmem:[%s4944_s1 + $0x570] ss:$8 sps:$4 sm:$0xff]   ;;  %v4313_v40 = vld [vmem:[%s4132_s17 + $0x2c] ss:$16 sps:$4 sm:$0xff]  }
  0x2e   : > { %1832 = vmatprep.subr.bf16.mxu0 %v3559_v41  ;;  %v3649_v41 = vld [vmem:[%s4944_s1 + $0x384] ss:$8 sps:$4 sm:$0xff]  }
  0x30   : > { %784 = vmatpush1.bf16.msra.mxu1 %v3561_v42  ;;  %v3652_v42 = vld [vmem:[%s4944_s1 + $0x584] ss:$8 sps:$4 sm:$0xff]  }
  0x31   : > { %1833 = vmatpush1.bf16.msra.mxu0 %v3562_v43  ;;  %785 = vmatprep.subr.bf16.mxu1 %v3563_v44  ;;  %v4323_v43 = vld [vmem:[%s4132_s17 + $0x4c] ss:$16 sps:$4 sm:$0xff]   ;;  %v3647_v44 = vld [vmem:[%s4944_s1 + $0x380] ss:$8 sps:$4 sm:$0xff]  }
  0x32   : > { %1834 = vmatprep.subr.bf16.mxu0 %v3565_v45  ;;  %v3650_v45 = vld [vmem:[%s4944_s1 + $0x580] ss:$8 sps:$4 sm:$0xff]  }
  0x34   : > { %786 = vmatpush1.bf16.msra.mxu1 %v3567_v46  ;;  %v3655_v46 = vld [vmem:[%s4944_s1 + $0x394] ss:$8 sps:$4 sm:$0xff]  }
  0x35   : > { %1835 = vmatpush1.bf16.msra.mxu0 %v3568_v47  ;;  %787 = vmatprep.subr.bf16.mxu1 %v3569_v49  ;;  %v3658_v47 = vld [vmem:[%s4944_s1 + $0x594] ss:$8 sps:$4 sm:$0xff]   ;;  %v3656_v49 = vld [vmem:[%s4944_s1 + $0x590] ss:$8 sps:$4 sm:$0xff]  }
  0x36   : > { %1836 = vmatprep.subr.bf16.mxu0 %v3571_v50  ;;  %v3661_v50 = vld [vmem:[%s4944_s1 + $0x3a4] ss:$8 sps:$4 sm:$0xff]  }
  0x38   : > { %788 = vmatpush1.bf16.msra.mxu1 %v3573_v52  ;;  %v3659_v52 = vld [vmem:[%s4944_s1 + $0x3a0] ss:$8 sps:$4 sm:$0xff]  }
  0x39   : > { %1837 = vmatpush1.bf16.msra.mxu0 %v3574_v53  ;;  %789 = vmatprep.subr.bf16.mxu1 %v3575_v54  ;;  %v3662_v53 = vld [vmem:[%s4944_s1 + $0x5a0] ss:$8 sps:$4 sm:$0xff]   ;;  %v3667_v54 = vld [vmem:[%s4944_s1 + $0x3b4] ss:$8 sps:$4 sm:$0xff]  }
  0x3a   : > { %1838 = vmatprep.subr.bf16.mxu0 %v3577_v55  ;;  %v3670_v55 = vld [vmem:[%s4944_s1 + $0x5b4] ss:$8 sps:$4 sm:$0xff]  }
  0x3c   : > { %790 = vmatpush1.bf16.msra.mxu1 %v3579_v56  ;;  %v3665_v56 = vld [vmem:[%s4944_s1 + $0x3b0] ss:$8 sps:$4 sm:$0xff]  }
  0x3d   : > { %1839 = vmatpush1.bf16.msra.mxu0 %v3580_v57  ;;  %791 = vmatprep.subr.bf16.mxu1 %v3581_v58  ;;  %v3668_v57 = vld [vmem:[%s4944_s1 + $0x5b0] ss:$8 sps:$4 sm:$0xff]   ;;  %v3673_v58 = vld [vmem:[%s4944_s1 + $0x3c4] ss:$8 sps:$4 sm:$0xff]  }
  0x3e   : > { %1840 = vmatprep.subr.bf16.mxu0 %v3583_v59  ;;  %v3678_v59 = vld [vmem:[%s4944_s1 + $0x5c4] ss:$8 sps:$4 sm:$0xff]  }
  0x40   : > { %792 = vmatpush1.bf16.msra.mxu1 %v3585_v60  ;;  %v3671_v60 = vld [vmem:[%s4944_s1 + $0x3c0] ss:$8 sps:$4 sm:$0xff]  }
  0x41   : > { %1841 = vmatpush1.bf16.msra.mxu0 %v3586_v61  ;;  %793 = vmatprep.subr.bf16.mxu1 %v3587_v62  ;;  %v3676_v61 = vld [vmem:[%s4944_s1 + $0x5c0] ss:$8 sps:$4 sm:$0xff]   ;;  %v3682_v62 = vld [vmem:[%s4944_s1 + $0x3d4] ss:$8 sps:$4 sm:$0xff]  }
  0x42   : > { %1842 = vmatprep.subr.bf16.mxu0 %v3589_v63  ;;  %v3685_v63 = vld [vmem:[%s4944_s1 + $0x5d4] ss:$8 sps:$4 sm:$0xff]  }
  0x44   : > { %794 = vmatpush1.bf16.msra.mxu1 %v3591_v0  ;;  %v3680_v0 = vld [vmem:[%s4944_s1 + $0x3d0] ss:$8 sps:$4 sm:$0xff]  }
  0x45   : > { %1843 = vmatpush1.bf16.msra.mxu0 %v3592_v1  ;;  %826 = vmatprep.subr.bf16.mxu1 %v3598_v2  ;;  %v3683_v1 = vld [vmem:[%s4944_s1 + $0x5d0] ss:$8 sps:$4 sm:$0xff]   ;;  %v3688_v2 = vld [vmem:[%s4944_s1 + $0x3e4] ss:$8 sps:$4 sm:$0xff]  }
  0x46   : > { %1875 = vmatprep.subr.bf16.mxu0 %v3604_v3  ;;  %v3693_v3 = vld [vmem:[%s4944_s1 + $0x5e4] ss:$8 sps:$4 sm:$0xff]  }
  0x47   : > { %796 = vmatmul.mubr.bf16.vlgmr.msra.gmra.mrb[0].mxu1 %v4200_v4 }
  0x48   : > { %1845 = vmatmul.mubr.bf16.vlgmr.msra.gmra.mrb[0].mxu0 %v3599_v6  ;;  %827 = vmatpush1.bf16.msra.mxu1 %v3596_v5  ;;  %v3686_v5 = vld [vmem:[%s4944_s1 + $0x3e0] ss:$8 sps:$4 sm:$0xff]  }
  0x49   : > { %1876 = vmatpush1.bf16.msra.mxu0 %v3602_v7  ;;  %828 = vmatprep.subr.bf16.mxu1 %v3607_v8  ;;  %v3697_v7 = vld [vmem:[%s4944_s1 + $0x3f4] ss:$8 sps:$4 sm:$0xff]  }
  0x4a   : > { %1877 = vmatprep.subr.bf16.mxu0 %v3610_v9  ;;  %805 = vmatprep.mubr.bf16.mxu1 %v3601_v51  ;;  %v3664_v51 = vld [vmem:[%s4944_s1 + $0x5a4] ss:$8 sps:$4 sm:$0xff]   ;;  %v3700_v8 = vld [vmem:[%s4944_s1 + $0x5f4] ss:$8 sps:$4 sm:$0xff]   ;;  %v3695_v9 = vld [vmem:[%s4944_s1 + $0x3f0] ss:$8 sps:$4 sm:$0xff]  }
  0x4b   : > { %1854 = vmatprep.mubr.bf16.mxu0 %v4259_v24 }
  0x4c   : > { %829 = vmatpush1.bf16.msra.mxu1 %v3605_v10  ;;  %v3698_v10 = vld [vmem:[%s4944_s1 + $0x5f0] ss:$8 sps:$4 sm:$0xff]  }
  0x4d   : > { %1878 = vmatpush1.bf16.msra.mxu0 %v3608_v11  ;;  %830 = vmatprep.subr.bf16.mxu1 %v3613_v12  ;;  %v3706_v11 = vld [vmem:[%s4944_s1 + $0x4] ss:$8 sps:$4 sm:$0xff]  }
  0x4e   : > { %1879 = vmatprep.subr.bf16.mxu0 %v3616_v13  ;;  %v3712_v12 = vld [vmem:[%s4944_s1 + $0x604] ss:$8 sps:$4 sm:$0xff]   ;;  %v4423_v13 = vld [vmem:[%s4132_s17 + $0x28] ss:$16 sps:$4 sm:$0xff]  }
  0x4f   : > { %806 = vmatmul.mubr.bf16.gmra.mrb[4].mxu1 %v3599_v6  ;;  %v3691_v6 = vld [vmem:[%s4944_s1 + $0x5e0] ss:$8 sps:$4 sm:$0xff]  }
  0x50   : > { %831 = vmatpush1.bf16.msra.mxu1 %v3611_v14  ;;  %815 = vmatprep.mubr.bf16.mxu1 %v4259_v24  ;;  %v3704_v14 = vld [vmem:[%s4944_s1] ss:$8 sps:$4 sm:$0xff]  }
  0x51   : > { %1880 = vmatpush1.bf16.msra.mxu0 %v3614_v15  ;;  %832 = vmatprep.subr.bf16.mxu1 %v3619_v16  ;;  %v4429_v15 = vld [vmem:[%s4132_s17 + $0x48] ss:$16 sps:$4 sm:$0xff]  }
  0x52   : > { %1881 = vmatprep.subr.bf16.mxu0 %v3622_v17  ;;  %1855 = vmatmul.mubr.bf16.gmra.mrb[4].mxu0 %v4268_v27  ;;  %v3710_v16 = vld [vmem:[%s4944_s1 + $0x600] ss:$8 sps:$4 sm:$0xff]   ;;  %v3715_v17 = vld [vmem:[%s4944_s1 + $0x14] ss:$8 sps:$4 sm:$0xff]  }
  0x53   : > { %1864 = vmatprep.mubr.bf16.mxu0 %v4287_v32 }
  0x54   : > { %833 = vmatpush1.bf16.msra.mxu1 %v3617_v18  ;;  %v3718_v18 = vld [vmem:[%s4944_s1 + $0x614] ss:$8 sps:$4 sm:$0xff]  }
  0x55   : > { %1882 = vmatpush1.bf16.msra.mxu0 %v3620_v19  ;;  %834 = vmatprep.subr.bf16.mxu1 %v3625_v20  ;;  %v4441_v19 = vld [vmem:[%s4132_s17 + $0x6c] ss:$16 sps:$4 sm:$0xff]   ;;  %v3713_v20 = vld [vmem:[%s4944_s1 + $0x10] ss:$8 sps:$4 sm:$0xff]  }
  0x56   : > { %1883 = vmatprep.subr.bf16.mxu0 %v3628_v21  ;;  %v3716_v21 = vld [vmem:[%s4944_s1 + $0x610] ss:$8 sps:$4 sm:$0xff]  }
  0x57   : > { %816 = vmatmul.mubr.bf16.gmra.mrb[8].mxu1 %v4268_v27 }
  0x58   : > { %835 = vmatpush1.bf16.msra.mxu1 %v3623_v22  ;;  %858 = vmatprep.mubr.bf16.mxu1 %v4313_v40  ;;  %v3721_v22 = vld [vmem:[%s4944_s1 + $0x24] ss:$8 sps:$4 sm:$0xff]  }
  0x59   : > { %1884 = vmatpush1.bf16.msra.mxu0 %v3626_v23  ;;  %836 = vmatprep.subr.bf16.mxu1 %v3631_v25  ;;  %v3724_v23 = vld [vmem:[%s4944_s1 + $0x624] ss:$8 sps:$4 sm:$0xff]   ;;  %v3719_v25 = vld [vmem:[%s4944_s1 + $0x20] ss:$8 sps:$4 sm:$0xff]  }
  0x5a   : > { %1885 = vmatprep.subr.bf16.mxu0 %v3634_v26  ;;  %1865 = vmatmul.mubr.bf16.gmra.mrb[8].mxu0 %v4296_v35  ;;  %v3722_v26 = vld [vmem:[%s4944_s1 + $0x620] ss:$8 sps:$4 sm:$0xff]  }
  0x5b   : > { %1907 = vmatprep.mubr.bf16.mxu0 %v4323_v43 }
  0x5c   : > { %837 = vmatpush1.bf16.msra.mxu1 %v3629_v28  ;;  %v4466_v28 = vld [vmem:[%s4132_s17 + $0x68] ss:$16 sps:$4 sm:$0xff]  }
  0x5d   : > { %1886 = vmatpush1.bf16.msra.mxu0 %v3632_v29  ;;  %838 = vmatprep.subr.bf16.mxu1 %v3637_v30  ;;  %v3727_v29 = vld [vmem:[%s4944_s1 + $0x34] ss:$8 sps:$4 sm:$0xff]  }
  0x5e   : > { %1887 = vmatprep.subr.bf16.mxu0 %v3640_v31  ;;  %v3730_v30 = vld [vmem:[%s4944_s1 + $0x634] ss:$8 sps:$4 sm:$0xff]  }
  0x5f   : > { %v4475_v31 = vld [vmem:[%s4132_s17 + $0x8c] ss:$16 sps:$4 sm:$0xff]  }
  0x60   : > { %839 = vmatpush1.bf16.msra.mxu1 %v3635_v33  ;;  %v3725_v33 = vld [vmem:[%s4944_s1 + $0x30] ss:$8 sps:$4 sm:$0xff]  }
  0x61   : > { %1888 = vmatpush1.bf16.msra.mxu0 %v3638_v34  ;;  %840 = vmatprep.subr.bf16.mxu1 %v3643_v36  ;;  %v3728_v34 = vld [vmem:[%s4944_s1 + $0x630] ss:$8 sps:$4 sm:$0xff]   ;;  %v3733_v36 = vld [vmem:[%s4944_s1 + $0x44] ss:$8 sps:$4 sm:$0xff]  }
  0x62   : > { %1889 = vmatprep.subr.bf16.mxu0 %v3646_v37  ;;  %v3736_v37 = vld [vmem:[%s4944_s1 + $0x644] ss:$8 sps:$4 sm:$0xff]  }
  0x64   : > { %841 = vmatpush1.bf16.msra.mxu1 %v3641_v38  ;;  %v3731_v38 = vld [vmem:[%s4944_s1 + $0x40] ss:$8 sps:$4 sm:$0xff]  }
  0x65   : > { %1890 = vmatpush1.bf16.msra.mxu0 %v3644_v39  ;;  %842 = vmatprep.subr.bf16.mxu1 %v3649_v41  ;;  %v3734_v39 = vld [vmem:[%s4944_s1 + $0x640] ss:$8 sps:$4 sm:$0xff]  }
  0x66   : > { %1891 = vmatprep.subr.bf16.mxu0 %v3652_v42  ;;  %v4500_v41 = vld [vmem:[%s4132_s17 + $0x88] ss:$16 sps:$4 sm:$0xff]   ;;  %v3739_v42 = vld [vmem:[%s4944_s1 + $0x54] ss:$8 sps:$4 sm:$0xff]  }
  0x68   : > { %843 = vmatpush1.bf16.msra.mxu1 %v3647_v44  ;;  %v3742_v44 = vld [vmem:[%s4944_s1 + $0x654] ss:$8 sps:$4 sm:$0xff]  }
  0x69   : > { %1892 = vmatpush1.bf16.msra.mxu0 %v3650_v45  ;;  %844 = vmatprep.subr.bf16.mxu1 %v3655_v46  ;;  %v3811_v45 = vld [vmem:[%s4132_s17 + $0x4] ss:$16 sps:$4 sm:$0xff]   ;;  %v3737_v46 = vld [vmem:[%s4944_s1 + $0x50] ss:$8 sps:$4 sm:$0xff]  }
  0x6a   : > { %1893 = vmatprep.subr.bf16.mxu0 %v3658_v47  ;;  %v3740_v47 = vld [vmem:[%s4944_s1 + $0x650] ss:$8 sps:$4 sm:$0xff]  }
  0x6c   : > { %845 = vmatpush1.bf16.msra.mxu1 %v3653_v48  ;;  %v3745_v48 = vld [vmem:[%s4944_s1 + $0x64] ss:$8 sps:$4 sm:$0xff]  }
  0x6d   : > { %1894 = vmatpush1.bf16.msra.mxu0 %v3656_v49  ;;  %846 = vmatprep.subr.bf16.mxu1 %v3661_v50  ;;  %v3748_v49 = vld [vmem:[%s4944_s1 + $0x664] ss:$8 sps:$4 sm:$0xff]   ;;  %v3743_v50 = vld [vmem:[%s4944_s1 + $0x60] ss:$8 sps:$4 sm:$0xff]  }
  0x6e   : > { %1895 = vmatprep.subr.bf16.mxu0 %v3664_v51  ;;  %v3746_v51 = vld [vmem:[%s4944_s1 + $0x660] ss:$8 sps:$4 sm:$0xff]  }
  0x70   : > { %847 = vmatpush1.bf16.msra.mxu1 %v3659_v52  ;;  %v3751_v52 = vld [vmem:[%s4944_s1 + $0x74] ss:$8 sps:$4 sm:$0xff]  }
  0x71   : > { %1896 = vmatpush1.bf16.msra.mxu0 %v3662_v53  ;;  %848 = vmatprep.subr.bf16.mxu1 %v3667_v54  ;;  %v3749_v53 = vld [vmem:[%s4944_s1 + $0x70] ss:$8 sps:$4 sm:$0xff]  }
  0x72   : > { %1897 = vmatprep.subr.bf16.mxu0 %v3670_v55  ;;  %v3752_v54 = vld [vmem:[%s4944_s1 + $0x670] ss:$8 sps:$4 sm:$0xff]   ;;  %v3757_v55 = vld [vmem:[%s4944_s1 + $0x84] ss:$8 sps:$4 sm:$0xff]  }
  0x74   : > { %849 = vmatpush1.bf16.msra.mxu1 %v3665_v56  ;;  %v3760_v56 = vld [vmem:[%s4944_s1 + $0x684] ss:$8 sps:$4 sm:$0xff]  }
  0x75   : > { %1898 = vmatpush1.bf16.msra.mxu0 %v3668_v57  ;;  %850 = vmatprep.subr.bf16.mxu1 %v3673_v58  ;;  %v3755_v57 = vld [vmem:[%s4944_s1 + $0x80] ss:$8 sps:$4 sm:$0xff]  }
  0x76   : > { %1899 = vmatprep.subr.bf16.mxu0 %v3678_v59  ;;  %v3758_v58 = vld [vmem:[%s4944_s1 + $0x680] ss:$8 sps:$4 sm:$0xff]   ;;  %v3763_v59 = vld [vmem:[%s4944_s1 + $0x94] ss:$8 sps:$4 sm:$0xff]  }
  0x78   : > { %851 = vmatpush1.bf16.msra.mxu1 %v3671_v60  ;;  %v3766_v60 = vld [vmem:[%s4944_s1 + $0x694] ss:$8 sps:$4 sm:$0xff]  }
  0x79   : > { %1900 = vmatpush1.bf16.msra.mxu0 %v3676_v61  ;;  %852 = vmatprep.subr.bf16.mxu1 %v3682_v62  ;;  %v3761_v61 = vld [vmem:[%s4944_s1 + $0x90] ss:$8 sps:$4 sm:$0xff]  }
  0x7a   : > { %1901 = vmatprep.subr.bf16.mxu0 %v3685_v63  ;;  %v3764_v62 = vld [vmem:[%s4944_s1 + $0x690] ss:$8 sps:$4 sm:$0xff]   ;;  %v3769_v63 = vld [vmem:[%s4944_s1 + $0xa4] ss:$8 sps:$4 sm:$0xff]  }
  0x7c   : > { %853 = vmatpush1.bf16.msra.mxu1 %v3680_v0  ;;  %v3772_v0 = vld [vmem:[%s4944_s1 + $0x6a4] ss:$8 sps:$4 sm:$0xff]  }
  0x7d   : > { %1902 = vmatpush1.bf16.msra.mxu0 %v3683_v1  ;;  %854 = vmatprep.subr.bf16.mxu1 %v3688_v2  ;;  %v3767_v1 = vld [vmem:[%s4944_s1 + $0xa0] ss:$8 sps:$4 sm:$0xff]  }
  0x7e   : > { %1903 = vmatprep.subr.bf16.mxu0 %v3693_v3  ;;  %v3770_v2 = vld [vmem:[%s4944_s1 + $0x6a0] ss:$8 sps:$4 sm:$0xff]   ;;  %v3775_v3 = vld [vmem:[%s4944_s1 + $0xb4] ss:$8 sps:$4 sm:$0xff]  }
  0x80   : > { %855 = vmatpush1.bf16.msra.mxu1 %v3686_v5  ;;  %v3778_v5 = vld [vmem:[%s4944_s1 + $0x6b4] ss:$8 sps:$4 sm:$0xff]  }
  0x81   : > { %1904 = vmatpush1.bf16.msra.mxu0 %v3691_v6  ;;  %856 = vmatprep.subr.bf16.mxu1 %v3697_v7  ;;  %v3773_v6 = vld [vmem:[%s4944_s1 + $0xb0] ss:$8 sps:$4 sm:$0xff]  }
  0x82   : > { %1905 = vmatprep.subr.bf16.mxu0 %v3700_v8  ;;  %v3776_v7 = vld [vmem:[%s4944_s1 + $0x6b0] ss:$8 sps:$4 sm:$0xff]   ;;  %v3781_v8 = vld [vmem:[%s4944_s1 + $0xc4] ss:$8 sps:$4 sm:$0xff]  }
  0x84   : > { %857 = vmatpush1.bf16.msra.mxu1 %v3695_v9  ;;  %v3786_v9 = vld [vmem:[%s4944_s1 + $0x6c4] ss:$8 sps:$4 sm:$0xff]  }
  0x85   : > { %1906 = vmatpush1.bf16.msra.mxu0 %v3698_v10  ;;  %1229 = vmatprep.subr.bf16.mxu1 %v3706_v11  ;;  %v3779_v10 = vld [vmem:[%s4944_s1 + $0xc0] ss:$8 sps:$4 sm:$0xff]  }
  0x86   : > { %2407 = vmatprep.subr.bf16.mxu0 %v3712_v12  ;;  %v3784_v11 = vld [vmem:[%s4944_s1 + $0x6c0] ss:$8 sps:$4 sm:$0xff]   ;;  %v3790_v12 = vld [vmem:[%s4944_s1 + $0xd4] ss:$8 sps:$4 sm:$0xff]  }
  0x87   : > { %859 = vmatmul.mubr.bf16.vlgmr.msra.gmra.mrb[0].mxu1 %v4423_v13 }
  0x88   : > { %1908 = vmatmul.mubr.bf16.vlgmr.msra.gmra.mrb[0].mxu0 %v4429_v15  ;;  %1230 = vmatpush1.bf16.msra.mxu1 %v3704_v14  ;;  %v3793_v14 = vld [vmem:[%s4944_s1 + $0x6d4] ss:$8 sps:$4 sm:$0xff]  }
  0x89   : > { %2408 = vmatpush1.bf16.msra.mxu0 %v3710_v16  ;;  %1231 = vmatprep.subr.bf16.mxu1 %v3715_v17  ;;  %v3788_v16 = vld [vmem:[%s4944_s1 + $0xd0] ss:$8 sps:$4 sm:$0xff]  }
  0x8a   : > { %2409 = vmatprep.subr.bf16.mxu0 %v3718_v18  ;;  %868 = vmatprep.mubr.bf16.mxu1 %v4323_v43  ;;  %v3791_v17 = vld [vmem:[%s4944_s1 + $0x6d0] ss:$8 sps:$4 sm:$0xff]   ;;  %v3796_v18 = vld [vmem:[%s4944_s1 + $0xe4] ss:$8 sps:$4 sm:$0xff]  }
  0x8b   : > { %1917 = vmatprep.mubr.bf16.mxu0 %v4441_v19 }
  0x8c   : > { %1232 = vmatpush1.bf16.msra.mxu1 %v3713_v20  ;;  %v3801_v20 = vld [vmem:[%s4944_s1 + $0x6e4] ss:$8 sps:$4 sm:$0xff]  }
  0x8d   : > { %2410 = vmatpush1.bf16.msra.mxu0 %v3716_v21  ;;  %1233 = vmatprep.subr.bf16.mxu1 %v3721_v22  ;;  %v3794_v21 = vld [vmem:[%s4944_s1 + $0xe0] ss:$8 sps:$4 sm:$0xff]  }
  0x8e   : > { %2411 = vmatprep.subr.bf16.mxu0 %v3724_v23  ;;  %v3799_v22 = vld [vmem:[%s4944_s1 + $0x6e0] ss:$8 sps:$4 sm:$0xff]   ;;  %v3805_v23 = vld [vmem:[%s4944_s1 + $0xf4] ss:$8 sps:$4 sm:$0xff]  }
  0x8f   : > { %869 = vmatmul.mubr.bf16.gmra.mrb[4].mxu1 %v4429_v15 }
  0x90   : > { %1918 = vmatmul.mubr.bf16.gmra.mrb[4].mxu0 %v4466_v28  ;;  %1234 = vmatpush1.bf16.msra.mxu1 %v3719_v25  ;;  %v3808_v25 = vld [vmem:[%s4944_s1 + $0x6f4] ss:$8 sps:$4 sm:$0xff]  }
  0x91   : > { %2412 = vmatpush1.bf16.msra.mxu0 %v3722_v26  ;;  %1235 = vmatprep.subr.bf16.mxu1 %v3727_v29  ;;  %v3803_v26 = vld [vmem:[%s4944_s1 + $0xf0] ss:$8 sps:$4 sm:$0xff]  }
  0x92   : > { %2413 = vmatprep.subr.bf16.mxu0 %v3730_v30  ;;  %878 = vmatprep.mubr.bf16.mxu1 %v4441_v19  ;;  %v3806_v29 = vld [vmem:[%s4944_s1 + $0x6f0] ss:$8 sps:$4 sm:$0xff]   ;;  %v3814_v30 = vld [vmem:[%s4944_s1 + $0x104] ss:$8 sps:$4 sm:$0xff]  }
  0x93   : > { %1927 = vmatprep.mubr.bf16.mxu0 %v4475_v31 }
  0x94   : > { %1236 = vmatpush1.bf16.msra.mxu1 %v3725_v33  ;;  %v3817_v33 = vld [vmem:[%s4944_s1 + $0x704] ss:$8 sps:$4 sm:$0xff]  }
  0x95   : > { %2414 = vmatpush1.bf16.msra.mxu0 %v3728_v34  ;;  %1237 = vmatprep.subr.bf16.mxu1 %v3733_v36  ;;  %v3809_v34 = vld [vmem:[%s4132_s17] ss:$16 sps:$4 sm:$0xff]  }
  0x96   : > { %2415 = vmatprep.subr.bf16.mxu0 %v3736_v37  ;;  %v3812_v36 = vld [vmem:[%s4944_s1 + $0x100] ss:$8 sps:$4 sm:$0xff]  }
  0x97   : > { %879 = vmatmul.mubr.bf16.gmra.mrb[8].mxu1 %v4466_v28  ;;  %v3815_v37 = vld [vmem:[%s4944_s1 + $0x700] ss:$8 sps:$4 sm:$0xff]  }
  0x98   : > { %1928 = vmatmul.mubr.bf16.gmra.mrb[8].mxu0 %v4500_v41  ;;  %1238 = vmatpush1.bf16.msra.mxu1 %v3731_v38  ;;  %v3820_v38 = vld [vmem:[%s4944_s1 + $0x114] ss:$8 sps:$4 sm:$0xff]  }
  0x99   : > { %2416 = vmatpush1.bf16.msra.mxu0 %v3734_v39  ;;  %1239 = vmatprep.subr.bf16.mxu1 %v3739_v42  ;;  %v3823_v39 = vld [vmem:[%s4944_s1 + $0x714] ss:$8 sps:$4 sm:$0xff]   ;;  %v3818_v42 = vld [vmem:[%s4944_s1 + $0x110] ss:$8 sps:$4 sm:$0xff]  }
  0x9a   : > { %2417 = vmatprep.subr.bf16.mxu0 %v3742_v44  ;;  %1261 = vmatprep.mubr.bf16.mxu1 %v3811_v45  ;;  %v3821_v44 = vld [vmem:[%s4944_s1 + $0x710] ss:$8 sps:$4 sm:$0xff]   ;;  %v3826_v45 = vld [vmem:[%s4944_s1 + $0x124] ss:$8 sps:$4 sm:$0xff]  }
  0x9b   : > { %2439 = vmatprep.mubr.bf16.mxu0 %v4259_v24  ;;  %v3754_v24 = vld [vmem:[%s4944_s1 + $0x674] ss:$8 sps:$4 sm:$0xff]  }
  0x9c   : > { %1240 = vmatpush1.bf16.msra.mxu1 %v3737_v46  ;;  %v3921_v46 = vld [vmem:[%s4132_s17 + $0x24] ss:$16 sps:$4 sm:$0xff]  }
  0x9d   : > { %2418 = vmatpush1.bf16.msra.mxu0 %v3740_v47  ;;  %1241 = vmatprep.subr.bf16.mxu1 %v3745_v48  ;;  %v3824_v47 = vld [vmem:[%s4944_s1 + $0x120] ss:$8 sps:$4 sm:$0xff]  }
  0x9e   : > { %2419 = vmatprep.subr.bf16.mxu0 %v3748_v49  ;;  %v3827_v48 = vld [vmem:[%s4944_s1 + $0x720] ss:$8 sps:$4 sm:$0xff]   ;;  %v3832_v49 = vld [vmem:[%s4944_s1 + $0x134] ss:$8 sps:$4 sm:$0xff]  }
  0xa0   : > { %1242 = vmatpush1.bf16.msra.mxu1 %v3743_v50  ;;  %v3896_v50 = vld [vmem:[%s4132_s17 + $0xa4] ss:$16 sps:$4 sm:$0xff]  }
  0xa1   : > { %2420 = vmatpush1.bf16.msra.mxu0 %v3746_v51  ;;  %1243 = vmatprep.subr.bf16.mxu1 %v3751_v52  ;;  %v3830_v51 = vld [vmem:[%s4944_s1 + $0x130] ss:$8 sps:$4 sm:$0xff]  }
  0xa2   : > { %2421 = vmatprep.subr.bf16.mxu0 %v3754_v24  ;;  %v3833_v52 = vld [vmem:[%s4944_s1 + $0x730] ss:$8 sps:$4 sm:$0xff]   ;;  %v3922_v24 = vld [vmem:[%s4132_s17 + $0x44] ss:$16 sps:$4 sm:$0xff]  }
  0xa4   : > { %1244 = vmatpush1.bf16.msra.mxu1 %v3749_v53  ;;  %v3901_v53 = vld [vmem:[%s4132_s17 + $0xa0] ss:$16 sps:$4 sm:$0xff]  }
  0xa5   : > { %2422 = vmatpush1.bf16.msra.mxu0 %v3752_v54  ;;  %1245 = vmatprep.subr.bf16.mxu1 %v3757_v55  ;;  %v3836_v54 = vld [vmem:[%s4944_s1 + $0x140] ss:$8 sps:$4 sm:$0xff]  }
  0xa6   : > { %2423 = vmatprep.subr.bf16.mxu0 %v3760_v56  ;;  %v3839_v55 = vld [vmem:[%s4944_s1 + $0x740] ss:$8 sps:$4 sm:$0xff]   ;;  %v3844_v56 = vld [vmem:[%s4944_s1 + $0x154] ss:$8 sps:$4 sm:$0xff]  }
  0xa8   : > { %1246 = vmatpush1.bf16.msra.mxu1 %v3755_v57  ;;  %v3847_v57 = vld [vmem:[%s4944_s1 + $0x754] ss:$8 sps:$4 sm:$0xff]  }
  0xa9   : > { %2424 = vmatpush1.bf16.msra.mxu0 %v3758_v58  ;;  %1247 = vmatprep.subr.bf16.mxu1 %v3763_v59  ;;  %v3913_v58 = vld [vmem:[%s4132_s17 + $0xc] ss:$16 sps:$4 sm:$0xff]   ;;  %v3923_v59 = vld [vmem:[%s4132_s17 + $0x40] ss:$16 sps:$4 sm:$0xff]  }
  0xaa   : > { %2425 = vmatprep.subr.bf16.mxu0 %v3766_v60  ;;  %v3842_v60 = vld [vmem:[%s4944_s1 + $0x150] ss:$8 sps:$4 sm:$0xff]  }
  0xac   : > { %1248 = vmatpush1.bf16.msra.mxu1 %v3761_v61  ;;  %v3845_v61 = vld [vmem:[%s4944_s1 + $0x750] ss:$8 sps:$4 sm:$0xff]  }
  0xad   : > { %2426 = vmatpush1.bf16.msra.mxu0 %v3764_v62  ;;  %1249 = vmatprep.subr.bf16.mxu1 %v3769_v63  ;;  %v3850_v62 = vld [vmem:[%s4944_s1 + $0x164] ss:$8 sps:$4 sm:$0xff]  }
  0xae   : > { %2427 = vmatprep.subr.bf16.mxu0 %v3772_v0  ;;  %v3853_v63 = vld [vmem:[%s4944_s1 + $0x764] ss:$8 sps:$4 sm:$0xff]   ;;  %v3848_v0 = vld [vmem:[%s4944_s1 + $0x160] ss:$8 sps:$4 sm:$0xff]  }
  0xb0   : > { %1250 = vmatpush1.bf16.msra.mxu1 %v3767_v1  ;;  %v3851_v1 = vld [vmem:[%s4944_s1 + $0x760] ss:$8 sps:$4 sm:$0xff]  }
  0xb1   : > { %2428 = vmatpush1.bf16.msra.mxu0 %v3770_v2  ;;  %1251 = vmatprep.subr.bf16.mxu1 %v3775_v3  ;;  %v3856_v2 = vld [vmem:[%s4944_s1 + $0x174] ss:$8 sps:$4 sm:$0xff]   ;;  %v3854_v3 = vld [vmem:[%s4944_s1 + $0x170] ss:$8 sps:$4 sm:$0xff]  }
  0xb2   : > { %2429 = vmatprep.subr.bf16.mxu0 %v3778_v5  ;;  %v3857_v5 = vld [vmem:[%s4944_s1 + $0x770] ss:$8 sps:$4 sm:$0xff]  }
  0xb4   : > { %1252 = vmatpush1.bf16.msra.mxu1 %v3773_v6  ;;  %v3862_v6 = vld [vmem:[%s4944_s1 + $0x184] ss:$8 sps:$4 sm:$0xff]  }
  0xb5   : > { %2430 = vmatpush1.bf16.msra.mxu0 %v3776_v7  ;;  %1253 = vmatprep.subr.bf16.mxu1 %v3781_v8  ;;  %v3865_v7 = vld [vmem:[%s4944_s1 + $0x784] ss:$8 sps:$4 sm:$0xff]   ;;  %v3860_v8 = vld [vmem:[%s4944_s1 + $0x180] ss:$8 sps:$4 sm:$0xff]  }
  0xb6   : > { %2431 = vmatprep.subr.bf16.mxu0 %v3786_v9  ;;  %v3863_v9 = vld [vmem:[%s4944_s1 + $0x780] ss:$8 sps:$4 sm:$0xff]  }
  0xb8   : > { %1254 = vmatpush1.bf16.msra.mxu1 %v3779_v10  ;;  %v3868_v10 = vld [vmem:[%s4944_s1 + $0x194] ss:$8 sps:$4 sm:$0xff]  }
  0xb9   : > { %2432 = vmatpush1.bf16.msra.mxu0 %v3784_v11  ;;  %1255 = vmatprep.subr.bf16.mxu1 %v3790_v12  ;;  %v3871_v11 = vld [vmem:[%s4944_s1 + $0x794] ss:$8 sps:$4 sm:$0xff]   ;;  %v3866_v12 = vld [vmem:[%s4944_s1 + $0x190] ss:$8 sps:$4 sm:$0xff]  }
  0xba   : > { %2433 = vmatprep.subr.bf16.mxu0 %v3793_v14  ;;  %v3869_v14 = vld [vmem:[%s4944_s1 + $0x790] ss:$8 sps:$4 sm:$0xff]  }
  0xbc   : > { %1256 = vmatpush1.bf16.msra.mxu1 %v3788_v16  ;;  %v3874_v16 = vld [vmem:[%s4944_s1 + $0x1a4] ss:$8 sps:$4 sm:$0xff]  }
  0xbd   : > { %2434 = vmatpush1.bf16.msra.mxu0 %v3791_v17  ;;  %1257 = vmatprep.subr.bf16.mxu1 %v3796_v18  ;;  %v3877_v17 = vld [vmem:[%s4944_s1 + $0x7a4] ss:$8 sps:$4 sm:$0xff]   ;;  %v3872_v18 = vld [vmem:[%s4944_s1 + $0x1a0] ss:$8 sps:$4 sm:$0xff]  }
  0xbe   : > { %2435 = vmatprep.subr.bf16.mxu0 %v3801_v20  ;;  %v3875_v20 = vld [vmem:[%s4944_s1 + $0x7a0] ss:$8 sps:$4 sm:$0xff]  }
  0xc0   : > { %1258 = vmatpush1.bf16.msra.mxu1 %v3794_v21  ;;  %v3880_v21 = vld [vmem:[%s4944_s1 + $0x1b4] ss:$8 sps:$4 sm:$0xff]  }
  0xc1   : > { %2436 = vmatpush1.bf16.msra.mxu0 %v3799_v22  ;;  %1259 = vmatprep.subr.bf16.mxu1 %v3805_v23  ;;  %v3883_v22 = vld [vmem:[%s4944_s1 + $0x7b4] ss:$8 sps:$4 sm:$0xff]   ;;  %v3878_v23 = vld [vmem:[%s4944_s1 + $0x1b0] ss:$8 sps:$4 sm:$0xff]  }
  0xc2   : > { %2437 = vmatprep.subr.bf16.mxu0 %v3808_v25  ;;  %v3881_v25 = vld [vmem:[%s4944_s1 + $0x7b0] ss:$8 sps:$4 sm:$0xff]  }
  0xc4   : > { %1260 = vmatpush1.bf16.msra.mxu1 %v3803_v26  ;;  %v3886_v26 = vld [vmem:[%s4944_s1 + $0x1c4] ss:$8 sps:$4 sm:$0xff]  }
  0xc5   : > { %2438 = vmatpush1.bf16.msra.mxu0 %v3806_v29  ;;  %1292 = vmatprep.subr.bf16.mxu1 %v3814_v30  ;;  %v3889_v29 = vld [vmem:[%s4944_s1 + $0x7c4] ss:$8 sps:$4 sm:$0xff]   ;;  %v3884_v30 = vld [vmem:[%s4944_s1 + $0x1c0] ss:$8 sps:$4 sm:$0xff]  }
  0xc6   : > { %2470 = vmatprep.subr.bf16.mxu0 %v3817_v33  ;;  %v3887_v33 = vld [vmem:[%s4944_s1 + $0x7c0] ss:$8 sps:$4 sm:$0xff]  }
  0xc7   : > { %1262 = vmatmul.mubr.bf16.vlgmr.msra.gmra.mrb[0].mxu1 %v3809_v34  ;;  %v3892_v34 = vld [vmem:[%s4944_s1 + $0x1d4] ss:$8 sps:$4 sm:$0xff]  }
  0xc8   : > { %2440 = vmatmul.mubr.bf16.vlgmr.msra.gmra.mrb[0].mxu0 %v4268_v27  ;;  %1293 = vmatpush1.bf16.msra.mxu1 %v3812_v36  ;;  %v3829_v27 = vld [vmem:[%s4944_s1 + $0x724] ss:$8 sps:$4 sm:$0xff]   ;;  %v3895_v36 = vld [vmem:[%s4944_s1 + $0x7d4] ss:$8 sps:$4 sm:$0xff]  }
  0xc9   : > { %2471 = vmatpush1.bf16.msra.mxu0 %v3815_v37  ;;  %1294 = vmatprep.subr.bf16.mxu1 %v3820_v38  ;;  %v3890_v37 = vld [vmem:[%s4944_s1 + $0x1d0] ss:$8 sps:$4 sm:$0xff]  }
  0xca   : > { %2472 = vmatprep.subr.bf16.mxu0 %v3823_v39  ;;  %1271 = vmatprep.mubr.bf16.mxu1 %v3921_v46  ;;  %v3893_v38 = vld [vmem:[%s4944_s1 + $0x7d0] ss:$8 sps:$4 sm:$0xff]   ;;  %v3900_v39 = vld [vmem:[%s4944_s1 + $0x1e4] ss:$8 sps:$4 sm:$0xff]   ;;  %v3910_v46 = vld [vmem:[%s4944_s1 + $0x7f4] ss:$8 sps:$4 sm:$0xff]  }
  0xcb   : > { %2449 = vmatprep.mubr.bf16.mxu0 %v4287_v32  ;;  %v3835_v32 = vld [vmem:[%s4944_s1 + $0x734] ss:$8 sps:$4 sm:$0xff]  }
  0xcc   : > { %1295 = vmatpush1.bf16.msra.mxu1 %v3818_v42  ;;  %v3904_v42 = vld [vmem:[%s4944_s1 + $0x7e4] ss:$8 sps:$4 sm:$0xff]  }
  0xcd   : > { %2473 = vmatpush1.bf16.msra.mxu0 %v3821_v44  ;;  %1296 = vmatprep.subr.bf16.mxu1 %v3826_v45  ;;  %v3898_v44 = vld [vmem:[%s4944_s1 + $0x1e0] ss:$8 sps:$4 sm:$0xff]  }
  0xce   : > { %2474 = vmatprep.subr.bf16.mxu0 %v3829_v27  ;;  %v3902_v45 = vld [vmem:[%s4944_s1 + $0x7e0] ss:$8 sps:$4 sm:$0xff]   ;;  %v3907_v27 = vld [vmem:[%s4944_s1 + $0x1f4] ss:$8 sps:$4 sm:$0xff]  }
  0xcf   : > { %1272 = vmatmul.mubr.bf16.gmra.mrb[4].mxu1 %v4200_v4  ;;  %v3838_v4 = vld [vmem:[%s4944_s1 + $0x144] ss:$8 sps:$4 sm:$0xff]  }
  0xd0   : > { %2450 = vmatmul.mubr.bf16.gmra.mrb[4].mxu0 %v4296_v35  ;;  %1297 = vmatpush1.bf16.msra.mxu1 %v3824_v47  ;;  %v3841_v35 = vld [vmem:[%s4944_s1 + $0x744] ss:$8 sps:$4 sm:$0xff]   ;;  %v3905_v47 = vld [vmem:[%s4944_s1 + $0x1f0] ss:$8 sps:$4 sm:$0xff]  }
  0xd1   : > { %2475 = vmatpush1.bf16.msra.mxu0 %v3827_v48  ;;  %1298 = vmatprep.subr.bf16.mxu1 %v3832_v49  ;;  %v3908_v48 = vld [vmem:[%s4944_s1 + $0x7f0] ss:$8 sps:$4 sm:$0xff]  }
  0xd2   : > { %2476 = vmatprep.subr.bf16.mxu0 %v3835_v32  ;;  %1281 = vmatprep.mubr.bf16.mxu1 %v3922_v24  ;;  %v3911_v49 = vld [vmem:[%s4132_s17 + $0x8] ss:$16 sps:$4 sm:$0xff]   ;;  %v3914_v32 = vld [vmem:[%s4132_s17 + $0xac] ss:$16 sps:$4 sm:$0xff]  }
  0xd3   : > { %2459 = vmatprep.mubr.bf16.mxu0 %v3896_v50  ;;  %v3916_v50 = vld [vmem:[%s4132_s17 + $0xa8] ss:$16 sps:$4 sm:$0xff]  }
  0xd4   : > { %1299 = vmatpush1.bf16.msra.mxu1 %v3830_v51 }
  0xd5   : > { %2477 = vmatpush1.bf16.msra.mxu0 %v3833_v52  ;;  %1300 = vmatprep.subr.bf16.mxu1 %v3838_v4 }
  0xd6   : > { %2478 = vmatprep.subr.bf16.mxu0 %v3841_v35 }
  0xd7   : > { %1282 = vmatmul.mubr.bf16.gmra.mrb[8].mxu1 %v3923_v59 }
  0xd8   : > { %2460 = vmatmul.mubr.bf16.gmra.mrb[8].mxu0 %v3901_v53  ;;  %1301 = vmatpush1.bf16.msra.mxu1 %v3836_v54 }
  0xd9   : > { %2479 = vmatpush1.bf16.msra.mxu0 %v3839_v55  ;;  %1302 = vmatprep.subr.bf16.mxu1 %v3844_v56 }
  0xda   : > { %2480 = vmatprep.subr.bf16.mxu0 %v3847_v57  ;;  %1324 = vmatprep.mubr.bf16.mxu1 %v3913_v58 }
  0xdb   : > { %2502 = vmatprep.mubr.bf16.mxu0 %v4441_v19  ;;  %v3859_v19 = vld [vmem:[%s4944_s1 + $0x774] ss:$8 sps:$4 sm:$0xff]  }
  0xdc   : > { %1303 = vmatpush1.bf16.msra.mxu1 %v3842_v60 }
  0xdd   : > { %2481 = vmatpush1.bf16.msra.mxu0 %v3845_v61  ;;  %1304 = vmatprep.subr.bf16.mxu1 %v3850_v62 }
  0xde   : > { %2482 = vmatprep.subr.bf16.mxu0 %v3853_v63 }
  0xe0   : > { %1305 = vmatpush1.bf16.msra.mxu1 %v3848_v0 }
  0xe1   : > { %2483 = vmatpush1.bf16.msra.mxu0 %v3851_v1  ;;  %1306 = vmatprep.subr.bf16.mxu1 %v3856_v2 }
  0xe2   : > { %2484 = vmatprep.subr.bf16.mxu0 %v3859_v19 }
  0xe4   : > { %1307 = vmatpush1.bf16.msra.mxu1 %v3854_v3 }
  0xe5   : > { %2485 = vmatpush1.bf16.msra.mxu0 %v3857_v5  ;;  %1308 = vmatprep.subr.bf16.mxu1 %v3862_v6 }
  0xe6   : > { %2486 = vmatprep.subr.bf16.mxu0 %v3865_v7 }
  0xe8   : > { %1309 = vmatpush1.bf16.msra.mxu1 %v3860_v8 }
  0xe9   : > { %2487 = vmatpush1.bf16.msra.mxu0 %v3863_v9  ;;  %1310 = vmatprep.subr.bf16.mxu1 %v3868_v10 }
  0xea   : > { %2488 = vmatprep.subr.bf16.mxu0 %v3871_v11 }
  0xec   : > { %1311 = vmatpush1.bf16.msra.mxu1 %v3866_v12 }
  0xed   : > { %2489 = vmatpush1.bf16.msra.mxu0 %v3869_v14  ;;  %1312 = vmatprep.subr.bf16.mxu1 %v3874_v16 }
  0xee   : > { %2490 = vmatprep.subr.bf16.mxu0 %v3877_v17 }
  0xf0   : > { %1313 = vmatpush1.bf16.msra.mxu1 %v3872_v18 }
  0xf1   : > { %2491 = vmatpush1.bf16.msra.mxu0 %v3875_v20  ;;  %1314 = vmatprep.subr.bf16.mxu1 %v3880_v21 }
  0xf2   : > { %2492 = vmatprep.subr.bf16.mxu0 %v3883_v22 }
  0xf4   : > { %1315 = vmatpush1.bf16.msra.mxu1 %v3878_v23 }
  0xf5   : > { %2493 = vmatpush1.bf16.msra.mxu0 %v3881_v25  ;;  %1316 = vmatprep.subr.bf16.mxu1 %v3886_v26 }
  0xf6   : > { %2494 = vmatprep.subr.bf16.mxu0 %v3889_v29 }
  0xf8   : > { %1317 = vmatpush1.bf16.msra.mxu1 %v3884_v30 }
  0xf9   : > { %2495 = vmatpush1.bf16.msra.mxu0 %v3887_v33  ;;  %1318 = vmatprep.subr.bf16.mxu1 %v3892_v34 }
  0xfa   : > { %2496 = vmatprep.subr.bf16.mxu0 %v3895_v36 }
  0xfc   : > { %1319 = vmatpush1.bf16.msra.mxu1 %v3890_v37 }
  0xfd   : > { %2497 = vmatpush1.bf16.msra.mxu0 %v3893_v38  ;;  %1320 = vmatprep.subr.bf16.mxu1 %v3900_v39 }
  0xfe   : > { %2498 = vmatprep.subr.bf16.mxu0 %v3904_v42 }
 0x100   : > { %1321 = vmatpush1.bf16.msra.mxu1 %v3898_v44 }
 0x101   : > { %2499 = vmatpush1.bf16.msra.mxu0 %v3902_v45  ;;  %1322 = vmatprep.subr.bf16.mxu1 %v3907_v27 }
 0x102   : > { %2500 = vmatprep.subr.bf16.mxu0 %v3910_v46 }
 0x104   : > { %1323 = vmatpush1.bf16.msra.mxu1 %v3905_v47 }
 0x105   : > { %2501 = vmatpush1.bf16.msra.mxu0 %v3908_v48 }
 0x107   : > { %1325 = vmatmul.mubr.bf16.vlgmr.msra.gmra.mrb[0].mxu1 %v3911_v49 }
 0x108   : > { %2503 = vmatmul.mubr.bf16.vlgmr.msra.gmra.mrb[0].mxu0 %v4466_v28  ;;  %1334 = vmatprep.mubr.bf16.mxu1 %v4313_v40 }
 0x109   : > { %2512 = vmatprep.mubr.bf16.mxu0 %v4475_v31 }
 0x10f   : > { %1335 = vmatmul.mubr.bf16.gmra.mrb[4].mxu1 %v4423_v13 }
 0x110   : > { %2513 = vmatmul.mubr.bf16.gmra.mrb[4].mxu0 %v4500_v41  ;;  %1344 = vmatprep.mubr.bf16.mxu1 %v4323_v43 }
 0x111   : > { %2522 = vmatprep.mubr.bf16.mxu0 %v3914_v32 }
 0x117   : > { %1345 = vmatmul.mubr.bf16.gmra.mrb[8].mxu1 %v4429_v15 }
 0x118   : > { %2523 = vmatmul.mubr.bf16.gmra.mrb[8].mxu0 %v3916_v50 }
 0x1da   : > { %v1326_v51 = vpop.f32.mrb[0].mxu1 }
 0x1db   : > { %v2504_v52 = vpop.f32.mrb[0].mxu0  ;;  %v1328_v28 = vpop.f32.mrb[1].mxu1 }
 0x1dc   : > { %v4852_v4 = vadd.f32 %v2504_v52, %v1326_v51  ;;  %v2506_v40 = vpop.f32.mrb[1].mxu0  ;;  %v1330_v31 = vpop.f32.mrb[2].mxu1 }
 0x1dd   : > { %v4854_v35 = vadd.f32 %v2506_v40, %v1328_v28  ;;  %v2508_v24 = vpop.f32.mrb[2].mxu0  ;;  %v1332_v41 = vpop.f32.mrb[3].mxu1 }
 0x1de   : > { %v4856_v13 = vadd.f32 %v2508_v24, %v1330_v31  ;;  %v2510_v53 = vpop.f32.mrb[3].mxu0  ;;  %v2567_v15 = vmul.f32 %v4852_v4, %v4852_v4 }
 0x1df   : > { %v4858_v43 = vadd.f32 %v2510_v53, %v1332_v41  ;;  %v2568_v56 = vmul.f32 %v4854_v35, %v4854_v35 }
 0x1e0   : > { %v2545_v54 = vadd.f32 %v4856_v13, %v4852_v4  ;;  %v2569_v55 = vmul.f32 %v4856_v13, %v4856_v13 }
 0x1e1   : > { %v2556_v57 = vadd.f32 %v4858_v43, %v4854_v35  ;;  %v2570_v58 = vmul.f32 %v4858_v43, %v4858_v43 }
 0x1e2   : > { %v2579_v59 = vadd.f32 %v2569_v55, %v2567_v15  ;;  %v1336_v61 = vpop.f32.mrb[4].mxu1 }
 0x1e3   : > { %v2590_v60 = vadd.f32 %v2570_v58, %v2568_v56  ;;  %v2514_v62 = vpop.f32.mrb[4].mxu0  ;;  %v1338_v0 = vpop.f32.mrb[5].mxu1 }
 0x1e4   : > { %v4872_v63 = vadd.f32 %v2514_v62, %v1336_v61  ;;  %v2516_v1 = vpop.f32.mrb[5].mxu0  ;;  %v1340_v19 = vpop.f32.mrb[6].mxu1 }
 0x1e5   : > { %v4874_v2 = vadd.f32 %v2516_v1, %v1338_v0  ;;  %v2518_v3 = vpop.f32.mrb[6].mxu0  ;;  %v1342_v8 = vpop.f32.mrb[7].mxu1 }
 0x1e6   : > { %v2546_v5 = vadd.f32 %v4872_v63, %v2545_v54  ;;  %v2571_v6 = vmul.f32 %v4872_v63, %v4872_v63  ;;  %v4879_v7 = vadd.f32 %v2518_v3, %v1340_v19  ;;  %v2520_v9 = vpop.f32.mrb[7].mxu0 }
 0x1e7   : > { %v2557_v10 = vadd.f32 %v4874_v2, %v2556_v57  ;;  %v2572_v11 = vmul.f32 %v4874_v2, %v4874_v2  ;;  %v4884_v12 = vadd.f32 %v2520_v9, %v1342_v8 }
 0x1e8   : > { %v2580_v14 = vadd.f32 %v2579_v59, %v2571_v6  ;;  %v2547_v16 = vadd.f32 %v4879_v7, %v2546_v5  ;;  %v2573_v17 = vmul.f32 %v4879_v7, %v4879_v7 }
 0x1e9   : > { %v2591_v18 = vadd.f32 %v2590_v60, %v2572_v11  ;;  %v2558_v20 = vadd.f32 %v4884_v12, %v2557_v10  ;;  %v2574_v21 = vmul.f32 %v4884_v12, %v4884_v12 }
 0x1ea   : > { %v2581_v22 = vadd.f32 %v2580_v14, %v2573_v17  ;;  %v1346_v25 = vpop.f32.mrb[8].mxu1 }
 0x1eb   : > { %v2592_v23 = vadd.f32 %v2591_v18, %v2574_v21  ;;  %v2524_v26 = vpop.f32.mrb[8].mxu0  ;;  %v1348_v30 = vpop.f32.mrb[9].mxu1 }
 0x1ec   : > { %v4892_v29 = vadd.f32 %v2524_v26, %v1346_v25  ;;  %v2526_v33 = vpop.f32.mrb[9].mxu0  ;;  %v1350_v36 = vpop.f32.mrb[10].mxu1 }
 0x1ed   : > { %v4894_v34 = vadd.f32 %v2526_v33, %v1348_v30  ;;  %v2528_v37 = vpop.f32.mrb[10].mxu0  ;;  %v1352_v44 = vpop.f32.mrb[11].mxu1 }
 0x1ee   : > { %v2548_v38 = vadd.f32 %v4892_v29, %v2547_v16  ;;  %v2575_v39 = vmul.f32 %v4892_v29, %v4892_v29  ;;  %v4899_v42 = vadd.f32 %v2528_v37, %v1350_v36  ;;  %v2530_v45 = vpop.f32.mrb[11].mxu0 }
 0x1ef   : > { %v2559_v27 = vadd.f32 %v4894_v34, %v2558_v20  ;;  %v2576_v46 = vmul.f32 %v4894_v34, %v4894_v34  ;;  %v4904_v47 = vadd.f32 %v2530_v45, %v1352_v44  ;;  %v3948_v45 = vmov 1966171168  }
 0x1f0   : > { %v2582_v48 = vadd.f32 %v2581_v22, %v2575_v39  ;;  %v2549_v49 = vadd.f32 %v4899_v42, %v2548_v38  ;;  %v2577_v32 = vmul.f32 %v4899_v42, %v4899_v42  ;;  %v3370_v39 = vld [vmem:[%s4945_s2 + $0x1] ss:$4 sm:$0x3] }
 0x1f1   : > { %v2593_v50 = vadd.f32 %v2592_v23, %v2576_v46  ;;  %v2560_v51 = vadd.f32 %v4904_v47, %v2559_v27  ;;  %v2578_v52 = vmul.f32 %v4904_v47, %v4904_v47  ;;  %v2618_v23 = vlaneseq }
 0x1f2   : > { %v2550_v28 = vrot.slane %v2549_v49, 4  ;;  %v2583_v40 = vadd.f32 %v2582_v48, %v2577_v32  ;;  %v2638_v27 = vunpack.c.l.s4 %v3948_v45 }
 0x1f3   : > { %v2561_v31 = vrot.slane %v2560_v51, 4  ;;  %v2594_v24 = vadd.f32 %v2593_v50, %v2578_v52  ;;  %v2619_v36 = vshrl.u32 %v2618_v23, 7 }
 0x1f4   : > { %v2551_v41 = vadd.f32 %v2550_v28, %v2549_v49  ;;  %v2584_v53 = vrot.slane %v2583_v40, 4  ;;  %v2639_v32 = vunpack.c.0.s8 %v2638_v27 }
 0x1f5   : > { %v2562_v15 = vadd.f32 %v2561_v31, %v2560_v51  ;;  %v2595_v54 = vrot.slane %v2594_v24, 4  ;;  %v2620_v38 = vsub.s32 0, %v2619_v36  ;;  %v2624_v44 = vsub.s32 1, %v2619_v36 }
 0x1f6   : > { %v2552_v55 = vrot.slane %v2551_v41, 2  ;;  %v2585_v56 = vadd.f32 %v2584_v53, %v2583_v40 }
 0x1f7   : > { %v2563_v57 = vrot.slane %v2562_v15, 2  ;;  %v2596_v58 = vadd.f32 %v2595_v54, %v2594_v24  ;;  %v2621_v46 = vrot.slane %v3370_v39, %v2620_v38  ;;  %v2625_v48 = vrot.slane %v3370_v39, %v2624_v44 }
 0x1f8   : > { %v2553_v59 = vadd.f32 %v2552_v55, %v2551_v41  ;;  %v2586_v60 = vrot.slane %v2585_v56, 2  ;;  %v2642_v24 = vsub.s32 %v2639_v32, %v2619_v36 }
 0x1f9   : > { %v2564_v61 = vadd.f32 %v2563_v57, %v2562_v15  ;;  %v2597_v62 = vrot.slane %v2596_v58, 2 }
 0x1fa   : > { %v2554_v0 = vrot.slane %v2553_v59, 1  ;;  %v2587_v1 = vadd.f32 %v2586_v60, %v2585_v56 }
 0x1fb   : > { %v2565_v19 = vrot.slane %v2564_v61, 1  ;;  %v2598_v3 = vadd.f32 %v2597_v62, %v2596_v58 }
 0x1fc   : > { %v2555_v5 = vadd.f32 %v2554_v0, %v2553_v59  ;;  %v2588_v6 = vrot.slane %v2587_v1, 1 }
 0x1fd   : > { %v2566_v8 = vadd.f32 %v2565_v19, %v2564_v61  ;;  %v2599_v9 = vrot.slane %v2598_v3, 1 }
 0x1fe   : > { %v2589_v10 = vadd.f32 %v2588_v6, %v2587_v1  ;;  %v2601_v11 = vmul.f32 0.11111111, %v2555_v5 }
 0x1ff   : > { %v2600_v14 = vadd.f32 %v2599_v9, %v2598_v3  ;;  %v2602_v16 = vmul.f32 0.11111111, %v2566_v8 }
 0x200   : > { %v2603_v17 = vmul.f32 0.11111111, %v2589_v10  ;;  %v2605_v18 = vmul.f32 %v2601_v11, %v2601_v11 }
 0x201   : > { %v2604_v20 = vmul.f32 0.11111111, %v2600_v14  ;;  %v2606_v21 = vmul.f32 %v2602_v16, %v2602_v16 }
 0x202   : > { %v2607_v22 = vsub.f32 %v2603_v17, %v2605_v18 }
 0x203   : > { %v2608_v25 = vsub.f32 %v2604_v20, %v2606_v21 }
 0x204   : > { %v2609_v26 = vmax.f32 %v2607_v22, 0.0 }
 0x205   : > { %v2610_v30 = vmax.f32 %v2608_v25, 0.0 }
 0x206   : > { %v2611_v33 = vadd.f32 1e-05, %v2609_v26 }
 0x207   : > { %v2612_v37 = vadd.f32 1e-05, %v2610_v30 }
 0x208   : > { %3917 = vrsqrt.f32 %v2611_v33 }
 0x209   : > { %3919 = vrsqrt.f32 %v2612_v37 }
 0x212   : > { %v3918_v49 = vpop.eup %3917 }
 0x213   : > { %v3920_v50 = vpop.eup %3919  ;;  %v2628_v51 = vmul.f32 %v3918_v49, %v2621_v46 }
 0x214   : > { %v2629_v52 = vmul.f32 %v3920_v50, %v2625_v48 }
 0x215   : > { %v2632_v28 = vmul.f32 %v2628_v51, %v2601_v11  ;;  %v2656_v40 = vrot.slane %v2628_v51, %v2620_v38 }
 0x216   : > { %v2633_v31 = vmul.f32 %v2629_v52, %v2602_v16  ;;  %v2660_v41 = vrot.slane %v2629_v52, %v2620_v38 }
 0x217   : > { %v2661_v53 = vmul.f32 %v4852_v4, %v2656_v40  ;;  %v2663_v15 = vmul.f32 %v4856_v13, %v2656_v40  ;;  %v2665_v54 = vmul.f32 %v4872_v63, %v2656_v40  ;;  %v2667_v55 = vmul.f32 %v4879_v7, %v2656_v40  ;;  %v3371_v7 = vld [vmem:[%s4945_s2 + $0x2] ss:$4 sm:$0x3] }
 0x218   : > { %v2669_v56 = vmul.f32 %v4892_v29, %v2656_v40  ;;  %v2671_v57 = vmul.f32 %v4899_v42, %v2656_v40  ;;  %v2636_v58 = vcombine.low %v2632_v28, %v2633_v31  ;;  %v2662_v59 = vmul.f32 %v4854_v35, %v2660_v41 }
 0x219   : > { %v2664_v60 = vmul.f32 %v4858_v43, %v2660_v41  ;;  %v2666_v61 = vmul.f32 %v4874_v2, %v2660_v41  ;;  %v2668_v62 = vmul.f32 %v4884_v12, %v2660_v41  ;;  %v2670_v4 = vmul.f32 %v4894_v34, %v2660_v41 }
 0x21a   : > { %v2643_v13 = vrot.slane %v2636_v58, %v2642_v24  ;;  %v2672_v63 = vmul.f32 %v4904_v47, %v2660_v41 }
 0x21c   : > { %v2650_v29 = vrot.slane %v2643_v13, %v2642_v24 }
 0x21e   : > { %v2652_v42 = vsub.f32 %v3371_v7, %v2650_v29 }
 0x220   : > { %v2677_v0 = vrot.slane %v2652_v42, %v2620_v38  ;;  %v2681_v35 = vrot.slane %v2652_v42, %v2624_v44 }
 0x222   : > { %v2684_v1 = vadd.f32 %v2677_v0, %v2661_v53  ;;  %v2685_v43 = vadd.f32 %v2681_v35, %v2662_v59  ;;  %v2686_v19 = vadd.f32 %v2677_v0, %v2663_v15  ;;  %v2687_v2 = vadd.f32 %v2681_v35, %v2664_v60 }
 0x223   : > { %v2688_v3 = vadd.f32 %v2677_v0, %v2665_v54  ;;  %v2689_v12 = vadd.f32 %v2681_v35, %v2666_v61  ;;  %v2690_v5 = vadd.f32 %v2677_v0, %v2667_v55  ;;  %v2691_v34 = vadd.f32 %v2681_v35, %v2668_v62 }
 0x224   : > { %v2692_v6 = vadd.f32 %v2677_v0, %v2669_v56  ;;  %v2693_v8 = vadd.f32 %v2681_v35, %v2670_v4  ;;  %v2694_v47 = vadd.f32 %v2677_v0, %v2671_v57  ;;  %v2695_v9 = vadd.f32 %v2681_v35, %v2672_v63 }
 0x225   : > { %v2696_v10 = vmul.f32 0.2, %v2684_v1  ;;  %v2697_v11 = vmul.f32 0.2, %v2685_v43  ;;  %v2698_v14 = vmul.f32 0.2, %v2686_v19 }
 0x226   : > { %v2699_v16 = vmul.f32 0.2, %v2687_v2  ;;  %v2700_v17 = vmul.f32 0.2, %v2688_v3  ;;  %v2701_v18 = vmul.f32 0.2, %v2689_v12 }
 0x227   : > { %v2702_v20 = vmul.f32 0.2, %v2690_v5  ;;  %v2703_v21 = vmul.f32 0.2, %v2691_v34  ;;  %v2704_v22 = vmul.f32 0.2, %v2692_v6  ;;  %v2708_v23 = vmax.f32 %v2684_v1, %v2696_v10 }
 0x228   : > { %v2705_v25 = vmul.f32 0.2, %v2693_v8  ;;  %v2706_v26 = vmul.f32 0.2, %v2694_v47  ;;  %v2707_v30 = vmul.f32 0.2, %v2695_v9  ;;  %v2709_v33 = vmax.f32 %v2685_v43, %v2697_v11 }
 0x229   : > { %v2710_v36 = vmax.f32 %v2686_v19, %v2698_v14  ;;  %v2711_v37 = vmax.f32 %v2687_v2, %v2699_v16  ;;  %v2712_v38 = vmax.f32 %v2688_v3, %v2700_v17  ;;  %v2713_v39 = vmax.f32 %v2689_v12, %v2701_v18 }
 0x22a   : > { %v2714_v44 = vmax.f32 %v2690_v5, %v2702_v20  ;;  %v2715_v45 = vmax.f32 %v2691_v34, %v2703_v21  ;;  %v2716_v27 = vmax.f32 %v2692_v6, %v2704_v22  ;;  %v2717_v46 = vmax.f32 %v2693_v8, %v2705_v25 }
 0x22b   : > { %v2718_v48 = vmax.f32 %v2694_v47, %v2706_v26  ;;  %v2719_v49 = vmax.f32 %v2695_v9, %v2707_v30  ;;  %v3380_v32 = vpack.c.bf16 %v2709_v33, %v2708_v23  ;;  %v3381_v50 = vpack.c.bf16 %v2711_v37, %v2710_v36 }
 0x22c   : > { %v3382_v51 = vpack.c.bf16 %v2713_v39, %v2712_v38  ;;  %v3383_v52 = vpack.c.bf16 %v2715_v45, %v2714_v44  ;;  %v3384_v28 = vpack.c.bf16 %v2717_v46, %v2716_v27 }
 0x22d   : > { %v3385_v40 = vpack.c.bf16 %v2719_v49, %v2718_v48  ;;  %2756 = vst [vmem:[%s236_s27] sm:$0xff] %v3380_v32  ;;  %2757 = vst [vmem:[%s236_s27 + $0x8] sm:$0xff] %v3381_v50 }
 0x22e   : > { %2758 = vst [vmem:[%s236_s27 + $0x10] sm:$0xff] %v3382_v51  ;;  %2759 = vst [vmem:[%s236_s27 + $0x18] sm:$0xff] %v3383_v52 }
 0x22f   : > { %2760 = vst [vmem:[%s236_s27 + $0x20] sm:$0xff] %v3384_v28  ;;  %2761 = vst [vmem:[%s236_s27 + $0x28] sm:$0xff] %v3385_v40 }
 0x230 PF: > { %s13_s14 = sadd.s32 1, %s3946_s14   ;;  %s4947_s12 = smov %s3942_s13 }
 0x231   : > { %p10_p5 = scmp.ge.s32.totalorder %s13_s14, 4   ;;  %s4948_s13 = smov %s4950_s15 }
 0x233   :  { %12 = sbr.rel (!%p10_p5) target bundleno = 2 (0x2), region = 73 }

// kernel: _lambda_.9
= control target key start
LH: loop header
LB: loop body
LE: loop exit
PB: predicated region body
PF: predicated region fallthrough
CT: control target
= control target key end

     0   :  { %s5009_s12 = smov 0   ;;  %s5011_s13 = smov 0   ;;  %s5971_s0 = inlined_call_operand.vmem [shape: bf16[2,80,1024], index: 0, kind: input, shape index: {}]   ;;  %s5972_s1 = inlined_call_operand.vmem [shape: bf16[4,1024,128], index: 1, kind: input, shape index: {}]   ;;  %s5973_s2 = inlined_call_operand.vmem [shape: f32[3,128], index: 2, kind: input, shape index: {}]   ;;  %s5974_s3 = inlined_call_operand.vmem [shape: f32[2,32,128], index: 3, kind: output, shape index: {}]  }
   0x1   :  { %s5013_s14 = smov 0  }
   0x2 LB: > { %s25_s15 = sadd.s32 1, %s4983_s13  ;;  %p3532_p0 = scmp.ge.s32.totalorder %s4987_s14, 1  ;;  %s4987_s14 = sphi %s5013_s14, %s13_s14   ;;  %s4983_s13 = sphi %s5011_s13, %s5976_s13   ;;  %s4979_s12 = sphi %s5009_s12, %s5975_s12  }
   0x3   : > { %p27_p1 = scmp.ge.s32.totalorder %s25_s15, 2  ;;  %p169_p2 = scmp.lt.s32.totalorder %s4987_s14, 3 }
   0x5   : > { %s5978_s15 = smov (%p27_p1, %s25_s15), 0  ;;  %p170_p3 = pnand %p3532_p0, %p169_p2 }
   0x6   : > { %v4709_v0 = vld [vmem:[%s5972_s1 + $0x240] sm:$0xff] (!%p170_p3)   ;;  %v4713_v4 = vld [vmem:[%s5972_s1 + $0x248] sm:$0xff] (!%p170_p3)   ;;  %v4717_v8 = vld [vmem:[%s5972_s1 + $0x250] sm:$0xff] (!%p170_p3)   ;;  %p204_p4 = scmp.lt.s32.totalorder (!%p170_p3), %s4979_s12, 1 }
   0x7   : > { %173 = sbr.rel (%p170_p3) target bundleno = 499 (0x1f3), region = 32  ;;  %v4710_v1 = vld [vmem:[%s5972_s1 + $0x2c0] sm:$0xff] (!%p170_p3)   ;;  %4236 = vmatprep.subr.bf16.mxu0 (!%p170_p3), %v4709_v0  ;;  %v4714_v5 = vld [vmem:[%s5972_s1 + $0x2c8] sm:$0xff] (!%p170_p3)   ;;  %v4718_v9 = vld [vmem:[%s5972_s1 + $0x2d0] sm:$0xff] (!%p170_p3)  }
   0x8   : > { %v4711_v2 = vld [vmem:[%s5972_s1 + $0x200] sm:$0xff] (!%p170_p3)   ;;  %4264 = vmatprep.subr.bf16.mxu1 (!%p170_p3), %v4710_v1  ;;  %v4715_v6 = vld [vmem:[%s5972_s1 + $0x208] sm:$0xff] (!%p170_p3)   ;;  %v4719_v10 = vld [vmem:[%s5972_s1 + $0x210] sm:$0xff] (!%p170_p3)  }
   0x9   : > { %v4712_v3 = vld [vmem:[%s5972_s1 + $0x280] sm:$0xff] (!%p170_p3)   ;;  %4237 = vmatpush3.bf16.msra.mxu0 (!%p170_p3), %v4711_v2  ;;  %v4716_v7 = vld [vmem:[%s5972_s1 + $0x288] sm:$0xff] (!%p170_p3)   ;;  %v4720_v11 = vld [vmem:[%s5972_s1 + $0x290] sm:$0xff] (!%p170_p3)  }
   0xa   : > { %4265 = vmatpush3.bf16.msra.mxu1 (!%p170_p3), %v4712_v3  ;;  %4238 = vmatprep.subr.bf16.mxu0 (!%p170_p3), %v4713_v4  ;;  %v4721_v12 = vld [vmem:[%s5972_s1 + $0x258] sm:$0xff] (!%p170_p3)   ;;  %v4725_v16 = vld [vmem:[%s5972_s1 + $0x260] sm:$0xff] (!%p170_p3)   ;;  %v4729_v20 = vld [vmem:[%s5972_s1 + $0x268] sm:$0xff] (!%p170_p3)  }
   0xb   : > { %4266 = vmatprep.subr.bf16.mxu1 (!%p170_p3), %v4714_v5  ;;  %v4722_v13 = vld [vmem:[%s5972_s1 + $0x2d8] sm:$0xff] (!%p170_p3)   ;;  %v4726_v17 = vld [vmem:[%s5972_s1 + $0x2e0] sm:$0xff] (!%p170_p3)   ;;  %v4730_v21 = vld [vmem:[%s5972_s1 + $0x2e8] sm:$0xff] (!%p170_p3)  }
   0xc   : > { %v4723_v14 = vld [vmem:[%s5972_s1 + $0x218] sm:$0xff] (!%p170_p3)   ;;  %v4727_v18 = vld [vmem:[%s5972_s1 + $0x220] sm:$0xff] (!%p170_p3)   ;;  %v4731_v22 = vld [vmem:[%s5972_s1 + $0x228] sm:$0xff] (!%p170_p3)  }
   0xd   : > { %4239 = vmatpush3.bf16.msra.mxu0 (!%p170_p3), %v4715_v6  ;;  %v4724_v15 = vld [vmem:[%s5972_s1 + $0x298] sm:$0xff] (!%p170_p3)   ;;  %v4728_v19 = vld [vmem:[%s5972_s1 + $0x2a0] sm:$0xff] (!%p170_p3)   ;;  %v4732_v23 = vld [vmem:[%s5972_s1 + $0x2a8] sm:$0xff] (!%p170_p3)  }
   0xe   : > { %4267 = vmatpush3.bf16.msra.mxu1 %v4716_v7  ;;  %4240 = vmatprep.subr.bf16.mxu0 %v4717_v8  ;;  %s5980_s12 = smov (!%p204_p4, %s4979_s12), 1  ;;  %v4733_v24 = vld [vmem:[%s5972_s1 + $0x270] sm:$0xff]   ;;  %v4737_v28 = vld [vmem:[%s5972_s1 + $0x278] sm:$0xff]   ;;  %v4741_v40 = vld [vmem:[%s5972_s1 + $0x340] sm:$0xff]  }
   0xf   : > { %4268 = vmatprep.subr.bf16.mxu1 %v4718_v9  ;;  %v4734_v25 = vld [vmem:[%s5972_s1 + $0x2f0] sm:$0xff]   ;;  %s4684_s22 = smul.u32 320, %s5980_s12  ;;  %v4738_v29 = vld [vmem:[%s5972_s1 + $0x2f8] sm:$0xff]   ;;  %v4742_v41 = vld [vmem:[%s5972_s1 + $0x3c0] sm:$0xff]  }
  0x10   : > { %v4735_v26 = vld [vmem:[%s5972_s1 + $0x230] sm:$0xff]   ;;  %v4739_v30 = vld [vmem:[%s5972_s1 + $0x238] sm:$0xff]   ;;  %v4743_v42 = vld [vmem:[%s5972_s1 + $0x300] sm:$0xff]  }
  0x11   : > { %4241 = vmatpush3.bf16.msra.mxu0 %v4719_v10  ;;  %v4736_v27 = vld [vmem:[%s5972_s1 + $0x2b0] sm:$0xff]   ;;  %s5127_s6 = scalar_lea.vmem %s5971_s0, %s4684_s22  ;;  %v4740_v31 = vld [vmem:[%s5972_s1 + $0x2b8] sm:$0xff]   ;;  %v4744_v43 = vld [vmem:[%s5972_s1 + $0x380] sm:$0xff]  }
  0x12   : > { %4269 = vmatpush3.bf16.msra.mxu1 %v4720_v11  ;;  %4242 = vmatprep.subr.bf16.mxu0 %v4721_v12  ;;  %v234_v32 = vld [vmem:[%s5127_s6 + $0x40] sm:$0xff]  ;;  %v235_v34 = vld [vmem:[%s5127_s6 + $0x48] sm:$0xff]  ;;  %v4749_v48 = vld [vmem:[%s5972_s1 + $0x350] sm:$0xff]  }
  0x13   : > { %4270 = vmatprep.subr.bf16.mxu1 %v4722_v13  ;;  %v238_v33 = vld [vmem:[%s5127_s6 + $0x60] sm:$0xff]  ;;  %v239_v37 = vld [vmem:[%s5127_s6 + $0x68] sm:$0xff]  ;;  %v4750_v49 = vld [vmem:[%s5972_s1 + $0x3d0] sm:$0xff]  }
  0x14   : > { %v5138_v35 = vcombine.low %v234_v32, %v238_v33  ;;  %v5140_v36 = vcombine.high %v234_v32, %v238_v33  ;;  %v5143_v38 = vcombine.low %v235_v34, %v239_v37  ;;  %v5145_v39 = vcombine.high %v235_v34, %v239_v37  ;;  %v4745_v44 = vld [vmem:[%s5972_s1 + $0x348] sm:$0xff]   ;;  %v4751_v50 = vld [vmem:[%s5972_s1 + $0x310] sm:$0xff]   ;;  %v4753_v52 = vld [vmem:[%s5972_s1 + $0x358] sm:$0xff]  }
  0x15   : > { %4243 = vmatpush3.bf16.msra.mxu0 %v4723_v14  ;;  %v4746_v45 = vld [vmem:[%s5972_s1 + $0x3c8] sm:$0xff]   ;;  %v4752_v51 = vld [vmem:[%s5972_s1 + $0x390] sm:$0xff]   ;;  %v4754_v53 = vld [vmem:[%s5972_s1 + $0x3d8] sm:$0xff]  }
  0x16   : > { %4271 = vmatpush3.bf16.msra.mxu1 %v4724_v15  ;;  %4244 = vmatprep.subr.bf16.mxu0 %v4725_v16  ;;  %v4747_v46 = vld [vmem:[%s5972_s1 + $0x308] sm:$0xff]   ;;  %v4755_v54 = vld [vmem:[%s5972_s1 + $0x318] sm:$0xff]   ;;  %v4757_v56 = vld [vmem:[%s5972_s1 + $0x360] sm:$0xff]  }
  0x17   : > { %4272 = vmatprep.subr.bf16.mxu1 %v4726_v17  ;;  %1003 = vmatprep.mubr.bf16.mxu0 %v5140_v36  ;;  %v4748_v47 = vld [vmem:[%s5972_s1 + $0x388] sm:$0xff]   ;;  %v4756_v55 = vld [vmem:[%s5972_s1 + $0x398] sm:$0xff]   ;;  %v4758_v57 = vld [vmem:[%s5972_s1 + $0x3e0] sm:$0xff]  }
  0x18   : > { %1052 = vmatprep.mubr.bf16.mxu1 %v5145_v39  ;;  %v4759_v58 = vld [vmem:[%s5972_s1 + $0x320] sm:$0xff]   ;;  %v4761_v60 = vld [vmem:[%s5972_s1 + $0x368] sm:$0xff]   ;;  %v4765_v8 = vld [vmem:[%s5972_s1 + $0x370] sm:$0xff]  }
  0x19   : > { %4245 = vmatpush3.bf16.msra.mxu0 %v4727_v18  ;;  %v4760_v59 = vld [vmem:[%s5972_s1 + $0x3a0] sm:$0xff]   ;;  %v4762_v61 = vld [vmem:[%s5972_s1 + $0x3e8] sm:$0xff]   ;;  %v4766_v9 = vld [vmem:[%s5972_s1 + $0x3f0] sm:$0xff]  }
  0x1a   : > { %4273 = vmatpush3.bf16.msra.mxu1 %v4728_v19  ;;  %4246 = vmatprep.subr.bf16.mxu0 %v4729_v20  ;;  %v370_v62 = vld [vmem:[%s5127_s6 + $0x80] sm:$0xff]  ;;  %v371_v1 = vld [vmem:[%s5127_s6 + $0x88] sm:$0xff]  ;;  %v4767_v10 = vld [vmem:[%s5972_s1 + $0x330] sm:$0xff]  }
  0x1b   : > { %4274 = vmatprep.subr.bf16.mxu1 %v4730_v21  ;;  %v374_v63 = vld [vmem:[%s5127_s6 + $0xa0] sm:$0xff]  ;;  %v375_v2 = vld [vmem:[%s5127_s6 + $0xa8] sm:$0xff]  ;;  %v4768_v11 = vld [vmem:[%s5972_s1 + $0x3b0] sm:$0xff]  }
  0x1c   : > { %v5219_v0 = vcombine.high %v370_v62, %v374_v63  ;;  %v5223_v3 = vcombine.low %v370_v62, %v374_v63  ;;  %v5225_v4 = vcombine.high %v371_v1, %v375_v2  ;;  %v4763_v5 = vld [vmem:[%s5972_s1 + $0x328] sm:$0xff]   ;;  %v5230_v6 = vcombine.low %v371_v1, %v375_v2  ;;  %v4769_v12 = vld [vmem:[%s5972_s1 + $0x378] sm:$0xff]   ;;  %v236_v16 = vld [vmem:[%s5127_s6 + $0x50] sm:$0xff] }
  0x1d   : > { %4247 = vmatpush3.bf16.msra.mxu0 %v4731_v22  ;;  %v4764_v7 = vld [vmem:[%s5972_s1 + $0x3a8] sm:$0xff]   ;;  %v4770_v13 = vld [vmem:[%s5972_s1 + $0x3f8] sm:$0xff]   ;;  %v240_v17 = vld [vmem:[%s5127_s6 + $0x70] sm:$0xff] }
  0x1e   : > { %4275 = vmatpush3.bf16.msra.mxu1 %v4732_v23  ;;  %4248 = vmatprep.subr.bf16.mxu0 %v4733_v24  ;;  %v4771_v14 = vld [vmem:[%s5972_s1 + $0x338] sm:$0xff]   ;;  %v5267_v20 = vcombine.low %v236_v16, %v240_v17  ;;  %v5269_v21 = vcombine.high %v236_v16, %v240_v17  ;;  %v4773_v24 = vld [vmem:[%s5972_s1 + $0x40] sm:$0xff]   ;;  %v372_v32 = vld [vmem:[%s5127_s6 + $0x90] sm:$0xff] }
  0x1f   : > { %4276 = vmatprep.subr.bf16.mxu1 %v4734_v25  ;;  %v4772_v15 = vld [vmem:[%s5972_s1 + $0x3b8] sm:$0xff]   ;;  %v4774_v25 = vld [vmem:[%s5972_s1 + $0xc0] sm:$0xff]   ;;  %v376_v33 = vld [vmem:[%s5127_s6 + $0xb0] sm:$0xff] }
  0x20   : > { %v237_v18 = vld [vmem:[%s5127_s6 + $0x58] sm:$0xff]  ;;  %v3677_v34 = vcombine.high %v372_v32, %v376_v33  ;;  %v3676_v37 = vcombine.low %v372_v32, %v376_v33  ;;  %v4799_v62 = vld [vmem:[%s5972_s1 + $0x30] sm:$0xff]   ;;  %v4805_v16 = vld [vmem:[%s5972_s1 + $0x140] sm:$0xff]  }
  0x21   : > { %4249 = vmatpush3.bf16.msra.mxu0 %v4735_v26  ;;  %v241_v19 = vld [vmem:[%s5127_s6 + $0x78] sm:$0xff]  ;;  %v4775_v26 = vld [vmem:[%s5972_s1] sm:$0xff]   ;;  %v4800_v63 = vld [vmem:[%s5972_s1 + $0xb0] sm:$0xff]  }
  0x22   : > { %4277 = vmatpush3.bf16.msra.mxu1 %v4736_v27  ;;  %4250 = vmatprep.subr.bf16.mxu0 %v4737_v28  ;;  %v5271_v22 = vcombine.low %v237_v18, %v241_v19  ;;  %v5273_v23 = vcombine.high %v237_v18, %v241_v19  ;;  %v4776_v27 = vld [vmem:[%s5972_s1 + $0x80] sm:$0xff]   ;;  %v4777_v28 = vld [vmem:[%s5972_s1 + $0x48] sm:$0xff]   ;;  %v4801_v1 = vld [vmem:[%s5972_s1 + $0x78] sm:$0xff]  }
  0x23   : > { %4278 = vmatprep.subr.bf16.mxu1 %v4738_v29  ;;  %v4778_v29 = vld [vmem:[%s5972_s1 + $0xc8] sm:$0xff]   ;;  %v4802_v2 = vld [vmem:[%s5972_s1 + $0xf8] sm:$0xff]   ;;  %v4806_v17 = vld [vmem:[%s5972_s1 + $0x1c0] sm:$0xff]  }
  0x24   : > { %v4807_v18 = vld [vmem:[%s5972_s1 + $0x100] sm:$0xff]  }
  0x25   : > { %4251 = vmatpush3.bf16.msra.mxu0 %v4739_v30  ;;  %v4779_v30 = vld [vmem:[%s5972_s1 + $0x8] sm:$0xff]   ;;  %v4808_v19 = vld [vmem:[%s5972_s1 + $0x180] sm:$0xff]  }
  0x26   : > { %4279 = vmatpush3.bf16.msra.mxu1 %v4740_v31  ;;  %4292 = vmatprep.subr.bf16.mxu0 %v4741_v40  ;;  %v4780_v31 = vld [vmem:[%s5972_s1 + $0x88] sm:$0xff]   ;;  %v4781_v40 = vld [vmem:[%s5972_s1 + $0x50] sm:$0xff]   ;;  %v4821_v32 = vld [vmem:[%s5972_s1 + $0x160] sm:$0xff]  }
  0x27   : > { %4320 = vmatprep.subr.bf16.mxu1 %v4742_v41  ;;  %v4782_v41 = vld [vmem:[%s5972_s1 + $0xd0] sm:$0xff]   ;;  %v4822_v33 = vld [vmem:[%s5972_s1 + $0x1e0] sm:$0xff]  }
  0x28   : > { %1004 = vmatmul.mubr.bf16.vlgmr.msra.gmra.mrb[0].mxu0 %v5138_v35 }
  0x29   : > { %1053 = vmatmul.mubr.bf16.vlgmr.msra.gmra.mrb[0].mxu1 %v5143_v38  ;;  %4293 = vmatpush3.bf16.msra.mxu0 %v4743_v42  ;;  %v373_v42 = vld [vmem:[%s5127_s6 + $0x98] sm:$0xff] }
  0x2a   : > { %4321 = vmatpush3.bf16.msra.mxu1 %v4744_v43  ;;  %4294 = vmatprep.subr.bf16.mxu0 %v4745_v44  ;;  %v377_v43 = vld [vmem:[%s5127_s6 + $0xb8] sm:$0xff] }
  0x2b   : > { %4322 = vmatprep.subr.bf16.mxu1 %v4746_v45  ;;  %1011 = vmatprep.mubr.bf16.mxu0 %v5219_v0  ;;  %v3679_v44 = vcombine.high %v373_v42, %v377_v43  ;;  %v4783_v45 = vld [vmem:[%s5972_s1 + $0x10] sm:$0xff]  }
  0x2c   : > { %1060 = vmatprep.mubr.bf16.mxu1 %v5225_v4 }
  0x2d   : > { %4295 = vmatpush3.bf16.msra.mxu0 %v4747_v46  ;;  %v3678_v46 = vcombine.low %v373_v42, %v377_v43  ;;  %v4827_v42 = vld [vmem:[%s5972_s1 + $0x128] sm:$0xff]  }
  0x2e   : > { %4323 = vmatpush3.bf16.msra.mxu1 %v4748_v47  ;;  %4296 = vmatprep.subr.bf16.mxu0 %v4749_v48  ;;  %v4784_v47 = vld [vmem:[%s5972_s1 + $0x90] sm:$0xff]   ;;  %v4785_v48 = vld [vmem:[%s5972_s1 + $0x58] sm:$0xff]   ;;  %v4828_v43 = vld [vmem:[%s5972_s1 + $0x1a8] sm:$0xff]  }
  0x2f   : > { %4324 = vmatprep.subr.bf16.mxu1 %v4750_v49  ;;  %v4786_v49 = vld [vmem:[%s5972_s1 + $0xd8] sm:$0xff]  }
  0x30   : > { %1012 = vmatmul.mubr.bf16.gmra.mrb[4].mxu0 %v5223_v3 }
  0x31   : > { %4297 = vmatpush3.bf16.msra.mxu0 %v4751_v50  ;;  %1061 = vmatmul.mubr.bf16.gmra.mrb[4].mxu1 %v5230_v6  ;;  %v4787_v50 = vld [vmem:[%s5972_s1 + $0x18] sm:$0xff]  }
  0x32   : > { %4325 = vmatpush3.bf16.msra.mxu1 %v4752_v51  ;;  %4298 = vmatprep.subr.bf16.mxu0 %v4753_v52  ;;  %v4788_v51 = vld [vmem:[%s5972_s1 + $0x98] sm:$0xff]   ;;  %v4789_v52 = vld [vmem:[%s5972_s1 + $0x60] sm:$0xff]  }
  0x33   : > { %4326 = vmatprep.subr.bf16.mxu1 %v4754_v53  ;;  %1101 = vmatprep.mubr.bf16.mxu0 %v5269_v21  ;;  %v4790_v53 = vld [vmem:[%s5972_s1 + $0xe0] sm:$0xff]  }
  0x34   : > { %1150 = vmatprep.mubr.bf16.mxu1 %v5273_v23 }
  0x35   : > { %4299 = vmatpush3.bf16.msra.mxu0 %v4755_v54  ;;  %v4791_v54 = vld [vmem:[%s5972_s1 + $0x20] sm:$0xff]  }
  0x36   : > { %4327 = vmatpush3.bf16.msra.mxu1 %v4756_v55  ;;  %4300 = vmatprep.subr.bf16.mxu0 %v4757_v56  ;;  %v4792_v55 = vld [vmem:[%s5972_s1 + $0xa0] sm:$0xff]   ;;  %v4793_v56 = vld [vmem:[%s5972_s1 + $0x68] sm:$0xff]  }
  0x37   : > { %4328 = vmatprep.subr.bf16.mxu1 %v4758_v57  ;;  %v4794_v57 = vld [vmem:[%s5972_s1 + $0xe8] sm:$0xff]  }
  0x39   : > { %4301 = vmatpush3.bf16.msra.mxu0 %v4759_v58  ;;  %v4795_v58 = vld [vmem:[%s5972_s1 + $0x28] sm:$0xff]  }
  0x3a   : > { %4329 = vmatpush3.bf16.msra.mxu1 %v4760_v59  ;;  %4302 = vmatprep.subr.bf16.mxu0 %v4761_v60  ;;  %v4796_v59 = vld [vmem:[%s5972_s1 + $0xa8] sm:$0xff]   ;;  %v4797_v60 = vld [vmem:[%s5972_s1 + $0x70] sm:$0xff]  }
  0x3b   : > { %4330 = vmatprep.subr.bf16.mxu1 %v4762_v61  ;;  %v4798_v61 = vld [vmem:[%s5972_s1 + $0xf0] sm:$0xff]  }
  0x3d   : > { %4303 = vmatpush3.bf16.msra.mxu0 %v4763_v5  ;;  %v4803_v5 = vld [vmem:[%s5972_s1 + $0x38] sm:$0xff]  }
  0x3e   : > { %4331 = vmatpush3.bf16.msra.mxu1 %v4764_v7  ;;  %4304 = vmatprep.subr.bf16.mxu0 %v4765_v8  ;;  %v4804_v7 = vld [vmem:[%s5972_s1 + $0xb8] sm:$0xff]   ;;  %v226_v8 = vld [vmem:[%s5127_s6] sm:$0xff] }
  0x3f   : > { %4332 = vmatprep.subr.bf16.mxu1 %v4766_v9  ;;  %v230_v9 = vld [vmem:[%s5127_s6 + $0x20] sm:$0xff] }
  0x41   : > { %4305 = vmatpush3.bf16.msra.mxu0 %v4767_v10  ;;  %v3744_v10 = vcombine.low %v226_v8, %v230_v9 }
  0x42   : > { %4333 = vmatpush3.bf16.msra.mxu1 %v4768_v11  ;;  %4306 = vmatprep.subr.bf16.mxu0 %v4769_v12  ;;  %v3745_v11 = vcombine.high %v226_v8, %v230_v9  ;;  %v227_v12 = vld [vmem:[%s5127_s6 + $0x8] sm:$0xff]  ;;  %v4845_v8 = vld [vmem:[%s5972_s1 + $0x450] sm:$0xff]  }
  0x43   : > { %4334 = vmatprep.subr.bf16.mxu1 %v4770_v13  ;;  %v231_v13 = vld [vmem:[%s5127_s6 + $0x28] sm:$0xff]  ;;  %v4846_v9 = vld [vmem:[%s5972_s1 + $0x4d0] sm:$0xff]  }
  0x45   : > { %4307 = vmatpush3.bf16.msra.mxu0 %v4771_v14  ;;  %v3746_v14 = vcombine.low %v227_v12, %v231_v13 }
  0x46   : > { %4335 = vmatpush3.bf16.msra.mxu1 %v4772_v15  ;;  %4348 = vmatprep.subr.bf16.mxu0 %v4773_v24  ;;  %v3747_v15 = vcombine.high %v227_v12, %v231_v13  ;;  %v4809_v24 = vld [vmem:[%s5972_s1 + $0x148] sm:$0xff]   ;;  %v4854_v12 = vld [vmem:[%s5972_s1 + $0x4e0] sm:$0xff]  }
  0x47   : > { %4376 = vmatprep.subr.bf16.mxu1 %v4774_v25  ;;  %v4810_v25 = vld [vmem:[%s5972_s1 + $0x1c8] sm:$0xff]   ;;  %v4856_v13 = vld [vmem:[%s5972_s1 + $0x4a0] sm:$0xff]  }
  0x48   : > { %1102 = vmatmul.mubr.bf16.vlgmr.msra.gmra.mrb[8].mxu0 %v5267_v20 }
  0x49   : > { %1151 = vmatmul.mubr.bf16.vlgmr.msra.gmra.mrb[8].mxu1 %v5271_v22  ;;  %4349 = vmatpush3.bf16.msra.mxu0 %v4775_v26  ;;  %v4811_v26 = vld [vmem:[%s5972_s1 + $0x108] sm:$0xff]  }
  0x4a   : > { %4377 = vmatpush3.bf16.msra.mxu1 %v4776_v27  ;;  %4350 = vmatprep.subr.bf16.mxu0 %v4777_v28  ;;  %v4812_v27 = vld [vmem:[%s5972_s1 + $0x188] sm:$0xff]   ;;  %v4813_v28 = vld [vmem:[%s5972_s1 + $0x150] sm:$0xff]  }
  0x4b   : > { %4378 = vmatprep.subr.bf16.mxu1 %v4778_v29  ;;  %1109 = vmatprep.mubr.bf16.mxu0 %v3677_v34  ;;  %v4816_v29 = vld [vmem:[%s5972_s1 + $0x190] sm:$0xff]   ;;  %v4823_v34 = vld [vmem:[%s5972_s1 + $0x120] sm:$0xff]  }
  0x4c   : > { %1158 = vmatprep.mubr.bf16.mxu1 %v3679_v44  ;;  %v4829_v44 = vld [vmem:[%s5972_s1 + $0x170] sm:$0xff]  }
  0x4d   : > { %4351 = vmatpush3.bf16.msra.mxu0 %v4779_v30  ;;  %v4817_v30 = vld [vmem:[%s5972_s1 + $0x158] sm:$0xff]  }
  0x4e   : > { %4379 = vmatpush3.bf16.msra.mxu1 %v4780_v31  ;;  %4352 = vmatprep.subr.bf16.mxu0 %v4781_v40  ;;  %v4819_v31 = vld [vmem:[%s5972_s1 + $0x118] sm:$0xff]   ;;  %v4825_v40 = vld [vmem:[%s5972_s1 + $0x168] sm:$0xff]  }
  0x4f   : > { %4380 = vmatprep.subr.bf16.mxu1 %v4782_v41  ;;  %v4826_v41 = vld [vmem:[%s5972_s1 + $0x1e8] sm:$0xff]  }
  0x50   : > { %1110 = vmatmul.mubr.bf16.gmra.mrb[12].mxu0 %v3676_v37  ;;  %v4824_v37 = vld [vmem:[%s5972_s1 + $0x1a0] sm:$0xff]  }
  0x51   : > { %4353 = vmatpush3.bf16.msra.mxu0 %v4783_v45  ;;  %1159 = vmatmul.mubr.bf16.gmra.mrb[12].mxu1 %v3678_v46  ;;  %v4830_v45 = vld [vmem:[%s5972_s1 + $0x1f0] sm:$0xff]  }
  0x52   : > { %4381 = vmatpush3.bf16.msra.mxu1 %v4784_v47  ;;  %4354 = vmatprep.subr.bf16.mxu0 %v4785_v48  ;;  %v4831_v46 = vld [vmem:[%s5972_s1 + $0x130] sm:$0xff]   ;;  %v4833_v48 = vld [vmem:[%s5972_s1 + $0x178] sm:$0xff]  }
  0x53   : > { %4382 = vmatprep.subr.bf16.mxu1 %v4786_v49  ;;  %1623 = vmatprep.mubr.bf16.mxu0 %v3745_v11  ;;  %v4832_v47 = vld [vmem:[%s5972_s1 + $0x1b0] sm:$0xff]   ;;  %v4834_v49 = vld [vmem:[%s5972_s1 + $0x1f8] sm:$0xff]  }
  0x54   : > { %1672 = vmatprep.mubr.bf16.mxu1 %v3747_v15  ;;  %v4850_v11 = vld [vmem:[%s5972_s1 + $0x4d8] sm:$0xff]   ;;  %v4858_v15 = vld [vmem:[%s5972_s1 + $0x4e8] sm:$0xff]  }
  0x55   : > { %4355 = vmatpush3.bf16.msra.mxu0 %v4787_v50  ;;  %v4835_v50 = vld [vmem:[%s5972_s1 + $0x138] sm:$0xff]  }
  0x56   : > { %4383 = vmatpush3.bf16.msra.mxu1 %v4788_v51  ;;  %4356 = vmatprep.subr.bf16.mxu0 %v4789_v52  ;;  %v4836_v51 = vld [vmem:[%s5972_s1 + $0x1b8] sm:$0xff]   ;;  %v228_v52 = vld [vmem:[%s5127_s6 + $0x10] sm:$0xff] }
  0x57   : > { %4384 = vmatprep.subr.bf16.mxu1 %v4790_v53  ;;  %v232_v53 = vld [vmem:[%s5127_s6 + $0x30] sm:$0xff] }
  0x59   : > { %4357 = vmatpush3.bf16.msra.mxu0 %v4791_v54  ;;  %v229_v54 = vld [vmem:[%s5127_s6 + $0x18] sm:$0xff] }
  0x5a   : > { %4385 = vmatpush3.bf16.msra.mxu1 %v4792_v55  ;;  %4358 = vmatprep.subr.bf16.mxu0 %v4793_v56  ;;  %v233_v55 = vld [vmem:[%s5127_s6 + $0x38] sm:$0xff]  ;;  %v3748_v56 = vcombine.low %v228_v52, %v232_v53 }
  0x5b   : > { %4386 = vmatprep.subr.bf16.mxu1 %v4794_v57  ;;  %v3749_v57 = vcombine.high %v228_v52, %v232_v53  ;;  %v1796_v52 = vld [vmem:[%s5127_s6 + $0xc8] sm:$0xff] }
  0x5d   : > { %4359 = vmatpush3.bf16.msra.mxu0 %v4795_v58  ;;  %v3750_v58 = vcombine.low %v229_v54, %v233_v55 }
  0x5e   : > { %4387 = vmatpush3.bf16.msra.mxu1 %v4796_v59  ;;  %4360 = vmatprep.subr.bf16.mxu0 %v4797_v60  ;;  %v3751_v59 = vcombine.high %v229_v54, %v233_v55  ;;  %v4837_v60 = vld [vmem:[%s5972_s1 + $0x440] sm:$0xff]   ;;  %v1800_v54 = vld [vmem:[%s5127_s6 + $0xe8] sm:$0xff] }
  0x5f   : > { %4388 = vmatprep.subr.bf16.mxu1 %v4798_v61  ;;  %v4838_v61 = vld [vmem:[%s5972_s1 + $0x4c0] sm:$0xff]  }
  0x61   : > { %4361 = vmatpush3.bf16.msra.mxu0 %v4799_v62  ;;  %v4839_v62 = vld [vmem:[%s5972_s1 + $0x400] sm:$0xff]  }
  0x62   : > { %4389 = vmatpush3.bf16.msra.mxu1 %v4800_v63  ;;  %4362 = vmatprep.subr.bf16.mxu0 %v4801_v1  ;;  %v4840_v63 = vld [vmem:[%s5972_s1 + $0x480] sm:$0xff]   ;;  %v4841_v1 = vld [vmem:[%s5972_s1 + $0x448] sm:$0xff]  }
  0x63   : > { %4390 = vmatprep.subr.bf16.mxu1 %v4802_v2  ;;  %v4842_v2 = vld [vmem:[%s5972_s1 + $0x4c8] sm:$0xff]  }
  0x65   : > { %4363 = vmatpush3.bf16.msra.mxu0 %v4803_v5  ;;  %v4843_v5 = vld [vmem:[%s5972_s1 + $0x408] sm:$0xff]  }
  0x66   : > { %4391 = vmatpush3.bf16.msra.mxu1 %v4804_v7  ;;  %4404 = vmatprep.subr.bf16.mxu0 %v4805_v16  ;;  %v4844_v7 = vld [vmem:[%s5972_s1 + $0x488] sm:$0xff]  }
  0x67   : > { %4432 = vmatprep.subr.bf16.mxu1 %v4806_v17  ;;  %v4859_v16 = vld [vmem:[%s5972_s1 + $0x428] sm:$0xff]  }
  0x68   : > { %1624 = vmatmul.mubr.bf16.vlgmr.msra.gmra.mrb[16].mxu0 %v3744_v10  ;;  %v4849_v10 = vld [vmem:[%s5972_s1 + $0x458] sm:$0xff]   ;;  %v4860_v17 = vld [vmem:[%s5972_s1 + $0x4a8] sm:$0xff]  }
  0x69   : > { %1673 = vmatmul.mubr.bf16.vlgmr.msra.gmra.mrb[16].mxu1 %v3746_v14  ;;  %4405 = vmatpush3.bf16.msra.mxu0 %v4807_v18  ;;  %v4857_v14 = vld [vmem:[%s5972_s1 + $0x468] sm:$0xff]   ;;  %v4861_v18 = vld [vmem:[%s5972_s1 + $0x470] sm:$0xff]  }
  0x6a   : > { %4433 = vmatpush3.bf16.msra.mxu1 %v4808_v19  ;;  %1631 = vmatprep.mubr.bf16.mxu0 %v5140_v36  ;;  %v4814_v36 = vld [vmem:[%s5972_s1 + $0x1d0] sm:$0xff]  }
  0x6b   : > { %4406 = vmatprep.subr.bf16.mxu0 %v4809_v24  ;;  %1680 = vmatprep.mubr.bf16.mxu1 %v5145_v39  ;;  %v4815_v39 = vld [vmem:[%s5972_s1 + $0x110] sm:$0xff]  }
  0x6c   : > { %4434 = vmatprep.subr.bf16.mxu1 %v4810_v25  ;;  %v4862_v19 = vld [vmem:[%s5972_s1 + $0x4f0] sm:$0xff]  }
  0x6d   : > { %4407 = vmatpush3.bf16.msra.mxu0 %v4811_v26  ;;  %v4863_v24 = vld [vmem:[%s5972_s1 + $0x430] sm:$0xff]   ;;  %v4865_v26 = vld [vmem:[%s5972_s1 + $0x478] sm:$0xff]  }
  0x6e   : > { %4435 = vmatpush3.bf16.msra.mxu1 %v4812_v27  ;;  %4408 = vmatprep.subr.bf16.mxu0 %v4813_v28  ;;  %v4864_v25 = vld [vmem:[%s5972_s1 + $0x4b0] sm:$0xff]   ;;  %v4866_v27 = vld [vmem:[%s5972_s1 + $0x4f8] sm:$0xff]  }
  0x6f   : > { %4436 = vmatprep.subr.bf16.mxu1 %v4814_v36  ;;  %v4867_v28 = vld [vmem:[%s5972_s1 + $0x438] sm:$0xff]  }
  0x70   : > { %1632 = vmatmul.mubr.bf16.gmra.mrb[20].mxu0 %v5138_v35  ;;  %v4818_v35 = vld [vmem:[%s5972_s1 + $0x1d8] sm:$0xff]  }
  0x71   : > { %1681 = vmatmul.mubr.bf16.gmra.mrb[20].mxu1 %v5143_v38  ;;  %4409 = vmatpush3.bf16.msra.mxu0 %v4815_v39  ;;  %v4820_v38 = vld [vmem:[%s5972_s1 + $0x198] sm:$0xff]   ;;  %v4869_v39 = vld [vmem:[%s5972_s1 + $0x540] sm:$0xff]  }
  0x72   : > { %4437 = vmatpush3.bf16.msra.mxu1 %v4816_v29  ;;  %4410 = vmatprep.subr.bf16.mxu0 %v4817_v30  ;;  %v4868_v36 = vld [vmem:[%s5972_s1 + $0x4b8] sm:$0xff]   ;;  %v4870_v29 = vld [vmem:[%s5972_s1 + $0x5c0] sm:$0xff]  }
  0x73   : > { %4438 = vmatprep.subr.bf16.mxu1 %v4818_v35  ;;  %1721 = vmatprep.mubr.bf16.mxu0 %v3749_v57  ;;  %v4871_v30 = vld [vmem:[%s5972_s1 + $0x500] sm:$0xff]   ;;  %v4891_v57 = vld [vmem:[%s5972_s1 + $0x528] sm:$0xff]  }
  0x74   : > { %1770 = vmatprep.mubr.bf16.mxu1 %v3751_v59  ;;  %v4872_v35 = vld [vmem:[%s5972_s1 + $0x580] sm:$0xff]   ;;  %v4892_v59 = vld [vmem:[%s5972_s1 + $0x5a8] sm:$0xff]  }
  0x75   : > { %4411 = vmatpush3.bf16.msra.mxu0 %v4819_v31  ;;  %v4873_v31 = vld [vmem:[%s5972_s1 + $0x548] sm:$0xff]  }
  0x76   : > { %4439 = vmatpush3.bf16.msra.mxu1 %v4820_v38  ;;  %4412 = vmatprep.subr.bf16.mxu0 %v4821_v32  ;;  %v4874_v38 = vld [vmem:[%s5972_s1 + $0x5c8] sm:$0xff]  }
  0x77   : > { %4440 = vmatprep.subr.bf16.mxu1 %v4822_v33  ;;  %v4875_v32 = vld [vmem:[%s5972_s1 + $0x508] sm:$0xff]   ;;  %v4878_v33 = vld [vmem:[%s5972_s1 + $0x5d0] sm:$0xff]  }
  0x79   : > { %4413 = vmatpush3.bf16.msra.mxu0 %v4823_v34  ;;  %v4879_v34 = vld [vmem:[%s5972_s1 + $0x510] sm:$0xff]  }
  0x7a   : > { %4441 = vmatpush3.bf16.msra.mxu1 %v4824_v37  ;;  %4414 = vmatprep.subr.bf16.mxu0 %v4825_v40  ;;  %v4880_v37 = vld [vmem:[%s5972_s1 + $0x590] sm:$0xff]   ;;  %v4881_v40 = vld [vmem:[%s5972_s1 + $0x558] sm:$0xff]  }
  0x7b   : > { %4442 = vmatprep.subr.bf16.mxu1 %v4826_v41  ;;  %v4882_v41 = vld [vmem:[%s5972_s1 + $0x5d8] sm:$0xff]  }
  0x7d   : > { %4415 = vmatpush3.bf16.msra.mxu0 %v4827_v42  ;;  %v4883_v42 = vld [vmem:[%s5972_s1 + $0x518] sm:$0xff]  }
  0x7e   : > { %4443 = vmatpush3.bf16.msra.mxu1 %v4828_v43  ;;  %4416 = vmatprep.subr.bf16.mxu0 %v4829_v44  ;;  %v4884_v43 = vld [vmem:[%s5972_s1 + $0x598] sm:$0xff]   ;;  %v4885_v44 = vld [vmem:[%s5972_s1 + $0x560] sm:$0xff]  }
  0x7f   : > { %4444 = vmatprep.subr.bf16.mxu1 %v4830_v45  ;;  %v4886_v45 = vld [vmem:[%s5972_s1 + $0x5e0] sm:$0xff]  }
  0x81   : > { %4417 = vmatpush3.bf16.msra.mxu0 %v4831_v46  ;;  %v4887_v46 = vld [vmem:[%s5972_s1 + $0x520] sm:$0xff]  }
  0x82   : > { %4445 = vmatpush3.bf16.msra.mxu1 %v4832_v47  ;;  %4418 = vmatprep.subr.bf16.mxu0 %v4833_v48  ;;  %v4888_v47 = vld [vmem:[%s5972_s1 + $0x5a0] sm:$0xff]   ;;  %v4889_v48 = vld [vmem:[%s5972_s1 + $0x568] sm:$0xff]  }
  0x83   : > { %4446 = vmatprep.subr.bf16.mxu1 %v4834_v49  ;;  %v4890_v49 = vld [vmem:[%s5972_s1 + $0x5e8] sm:$0xff]  }
  0x85   : > { %4419 = vmatpush3.bf16.msra.mxu0 %v4835_v50  ;;  %v1795_v50 = vld [vmem:[%s5127_s6 + $0xc0] sm:$0xff] }
  0x86   : > { %4447 = vmatpush3.bf16.msra.mxu1 %v4836_v51  ;;  %4460 = vmatprep.subr.bf16.mxu0 %v4837_v60  ;;  %v1799_v51 = vld [vmem:[%s5127_s6 + $0xe0] sm:$0xff]  ;;  %v4893_v60 = vld [vmem:[%s5972_s1 + $0x570] sm:$0xff]  }
  0x87   : > { %4488 = vmatprep.subr.bf16.mxu1 %v4838_v61  ;;  %v5660_v53 = vcombine.high %v1795_v50, %v1799_v51  ;;  %v5663_v55 = vcombine.low %v1795_v50, %v1799_v51  ;;  %v4894_v61 = vld [vmem:[%s5972_s1 + $0x5f0] sm:$0xff]   ;;  %v4931_v50 = vld [vmem:[%s5972_s1 + $0x638] sm:$0xff]  }
  0x88   : > { %1722 = vmatmul.mubr.bf16.vlgmr.msra.gmra.mrb[24].mxu0 %v3748_v56  ;;  %v5665_v56 = vcombine.high %v1796_v52, %v1800_v54  ;;  %v4932_v51 = vld [vmem:[%s5972_s1 + $0x6b8] sm:$0xff]  }
  0x89   : > { %1771 = vmatmul.mubr.bf16.vlgmr.msra.gmra.mrb[24].mxu1 %v3750_v58  ;;  %4461 = vmatpush3.bf16.msra.mxu0 %v4839_v62  ;;  %v5670_v58 = vcombine.low %v1796_v52, %v1800_v54  ;;  %v4895_v62 = vld [vmem:[%s5972_s1 + $0x530] sm:$0xff]   ;;  %v4933_v52 = vld [vmem:[%s5972_s1 + $0x740] sm:$0xff]  }
  0x8a   : > { %4489 = vmatpush3.bf16.msra.mxu1 %v4840_v63  ;;  %4462 = vmatprep.subr.bf16.mxu0 %v4841_v1  ;;  %v4896_v63 = vld [vmem:[%s5972_s1 + $0x5b0] sm:$0xff]   ;;  %v4897_v1 = vld [vmem:[%s5972_s1 + $0x578] sm:$0xff]   ;;  %v4935_v54 = vld [vmem:[%s5972_s1 + $0x700] sm:$0xff]  }
  0x8b   : > { %1729 = vmatprep.mubr.bf16.mxu0 %v5269_v21  ;;  %4490 = vmatprep.subr.bf16.mxu1 %v4842_v2  ;;  %v4847_v21 = vld [vmem:[%s5972_s1 + $0x410] sm:$0xff]   ;;  %v4898_v2 = vld [vmem:[%s5972_s1 + $0x5f8] sm:$0xff]  }
  0x8c   : > { %1778 = vmatprep.mubr.bf16.mxu1 %v5273_v23  ;;  %v4848_v23 = vld [vmem:[%s5972_s1 + $0x490] sm:$0xff]  }
  0x8d   : > { %4463 = vmatpush3.bf16.msra.mxu0 %v4843_v5  ;;  %v4899_v5 = vld [vmem:[%s5972_s1 + $0x538] sm:$0xff]  }
  0x8e   : > { %4491 = vmatpush3.bf16.msra.mxu1 %v4844_v7  ;;  %4464 = vmatprep.subr.bf16.mxu0 %v4845_v8  ;;  %v4900_v7 = vld [vmem:[%s5972_s1 + $0x5b8] sm:$0xff]   ;;  %v1789_v8 = vld [vmem:[%s5127_s6 + $0x90] sm:$0xff] }
  0x8f   : > { %4492 = vmatprep.subr.bf16.mxu1 %v4846_v9  ;;  %v1793_v9 = vld [vmem:[%s5127_s6 + $0xb0] sm:$0xff] }
  0x90   : > { %1730 = vmatmul.mubr.bf16.gmra.mrb[28].mxu0 %v5267_v20  ;;  %v4851_v20 = vld [vmem:[%s5972_s1 + $0x418] sm:$0xff]  }
  0x91   : > { %1779 = vmatmul.mubr.bf16.gmra.mrb[28].mxu1 %v5271_v22  ;;  %2428 = vmatprep.mubr.bf16.mxu0 %v5219_v0  ;;  %v4852_v22 = vld [vmem:[%s5972_s1 + $0x498] sm:$0xff]   ;;  %v4853_v0 = vld [vmem:[%s5972_s1 + $0x460] sm:$0xff]  }
  0x92   : > { %4465 = vmatpush3.bf16.msra.mxu0 %v4847_v21  ;;  %4493 = vmatpush3.bf16.msra.mxu1 %v4848_v23  ;;  %v3948_v21 = vcombine.low %v1789_v8, %v1793_v9  ;;  %v3949_v23 = vcombine.high %v1789_v8, %v1793_v9  ;;  %v4947_v9 = vld [vmem:[%s5972_s1 + $0x718] sm:$0xff]  }
  0x93   : > { %4466 = vmatprep.subr.bf16.mxu0 %v4849_v10  ;;  %2477 = vmatprep.mubr.bf16.mxu1 %v5225_v4  ;;  %v4855_v4 = vld [vmem:[%s5972_s1 + $0x420] sm:$0xff]   ;;  %v1790_v10 = vld [vmem:[%s5127_s6 + $0x98] sm:$0xff] }
  0x94   : > { %4494 = vmatprep.subr.bf16.mxu1 %v4850_v11  ;;  %v1794_v11 = vld [vmem:[%s5127_s6 + $0xb8] sm:$0xff] }
  0x96   : > { %4467 = vmatpush3.bf16.msra.mxu0 %v4851_v20  ;;  %4495 = vmatpush3.bf16.msra.mxu1 %v4852_v22  ;;  %v3950_v20 = vcombine.low %v1790_v10, %v1794_v11  ;;  %v3951_v22 = vcombine.high %v1790_v10, %v1794_v11  ;;  %v4948_v10 = vld [vmem:[%s5972_s1 + $0x798] sm:$0xff]  }
  0x97   : > { %4468 = vmatprep.subr.bf16.mxu0 %v4853_v0  ;;  %4496 = vmatprep.subr.bf16.mxu1 %v4854_v12  ;;  %v4901_v0 = vld [vmem:[%s5972_s1 + $0x640] sm:$0xff]  }
  0x98   : > { %v4902_v12 = vld [vmem:[%s5972_s1 + $0x6c0] sm:$0xff]  }
  0x9a   : > { %4469 = vmatpush3.bf16.msra.mxu0 %v4855_v4  ;;  %4497 = vmatpush3.bf16.msra.mxu1 %v4856_v13  ;;  %v4903_v4 = vld [vmem:[%s5972_s1 + $0x600] sm:$0xff]  }
  0x9b   : > { %4470 = vmatprep.subr.bf16.mxu0 %v4857_v14  ;;  %4498 = vmatprep.subr.bf16.mxu1 %v4858_v15  ;;  %v4904_v13 = vld [vmem:[%s5972_s1 + $0x680] sm:$0xff]   ;;  %v4905_v14 = vld [vmem:[%s5972_s1 + $0x648] sm:$0xff]  }
  0x9c   : > { %v4906_v15 = vld [vmem:[%s5972_s1 + $0x6c8] sm:$0xff]  }
  0x9e   : > { %4471 = vmatpush3.bf16.msra.mxu0 %v4859_v16  ;;  %4499 = vmatpush3.bf16.msra.mxu1 %v4860_v17  ;;  %v4907_v16 = vld [vmem:[%s5972_s1 + $0x608] sm:$0xff]  }
  0x9f   : > { %4472 = vmatprep.subr.bf16.mxu0 %v4861_v18  ;;  %4500 = vmatprep.subr.bf16.mxu1 %v4862_v19  ;;  %v4908_v17 = vld [vmem:[%s5972_s1 + $0x688] sm:$0xff]   ;;  %v1797_v18 = vld [vmem:[%s5127_s6 + $0xd0] sm:$0xff] }
  0xa0   : > { %v1801_v19 = vld [vmem:[%s5127_s6 + $0xf0] sm:$0xff] }
  0xa2   : > { %4473 = vmatpush3.bf16.msra.mxu0 %v4863_v24  ;;  %4501 = vmatpush3.bf16.msra.mxu1 %v4864_v25  ;;  %v5733_v24 = vcombine.high %v1797_v18, %v1801_v19  ;;  %v5735_v25 = vcombine.low %v1797_v18, %v1801_v19  ;;  %v2604_v19 = vld [vmem:[%s5127_s6 + $0x100] sm:$0xff] }
  0xa3   : > { %4474 = vmatprep.subr.bf16.mxu0 %v4865_v26  ;;  %4502 = vmatprep.subr.bf16.mxu1 %v4866_v27  ;;  %v4909_v26 = vld [vmem:[%s5972_s1 + $0x650] sm:$0xff]  }
  0xa4   : > { %v4910_v27 = vld [vmem:[%s5972_s1 + $0x6d0] sm:$0xff]  }
  0xa6   : > { %4475 = vmatpush3.bf16.msra.mxu0 %v4867_v28  ;;  %4503 = vmatpush3.bf16.msra.mxu1 %v4868_v36  ;;  %v1798_v28 = vld [vmem:[%s5127_s6 + $0xd8] sm:$0xff] }
  0xa7   : > { %4516 = vmatprep.subr.bf16.mxu0 %v4869_v39  ;;  %4544 = vmatprep.subr.bf16.mxu1 %v4870_v29  ;;  %v1802_v36 = vld [vmem:[%s5127_s6 + $0xf8] sm:$0xff]  ;;  %v4911_v29 = vld [vmem:[%s5972_s1 + $0x610] sm:$0xff]  }
  0xa8   : > { %v5746_v39 = vcombine.high %v1798_v28, %v1802_v36 }
  0xa9   : > { %2429 = vmatmul.mubr.bf16.vlgmr.msra.gmra.mrb[32].mxu0 %v5223_v3  ;;  %2478 = vmatmul.mubr.bf16.vlgmr.msra.gmra.mrb[32].mxu1 %v5230_v6  ;;  %v4876_v3 = vld [vmem:[%s5972_s1 + $0x588] sm:$0xff]   ;;  %v4877_v6 = vld [vmem:[%s5972_s1 + $0x550] sm:$0xff]  }
  0xaa   : > { %4517 = vmatpush3.bf16.msra.mxu0 %v4871_v30  ;;  %4545 = vmatpush3.bf16.msra.mxu1 %v4872_v35  ;;  %v5751_v30 = vcombine.low %v1798_v28, %v1802_v36  ;;  %v4912_v35 = vld [vmem:[%s5972_s1 + $0x690] sm:$0xff]   ;;  %v2609_v36 = vld [vmem:[%s5127_s6 + $0x128] sm:$0xff] }
  0xab   : > { %4518 = vmatprep.subr.bf16.mxu0 %v4873_v31  ;;  %4546 = vmatprep.subr.bf16.mxu1 %v4874_v38  ;;  %v4913_v31 = vld [vmem:[%s5972_s1 + $0x658] sm:$0xff]  }
  0xac   : > { %2436 = vmatprep.mubr.bf16.mxu0 %v5660_v53  ;;  %2485 = vmatprep.mubr.bf16.mxu1 %v5665_v56  ;;  %v4914_v38 = vld [vmem:[%s5972_s1 + $0x6d8] sm:$0xff]  }
  0xae   : > { %4519 = vmatpush3.bf16.msra.mxu0 %v4875_v32  ;;  %4547 = vmatpush3.bf16.msra.mxu1 %v4876_v3  ;;  %v4915_v32 = vld [vmem:[%s5972_s1 + $0x618] sm:$0xff]  }
  0xaf   : > { %4520 = vmatprep.subr.bf16.mxu0 %v4877_v6  ;;  %4548 = vmatprep.subr.bf16.mxu1 %v4878_v33  ;;  %v4916_v3 = vld [vmem:[%s5972_s1 + $0x698] sm:$0xff]   ;;  %v4917_v6 = vld [vmem:[%s5972_s1 + $0x660] sm:$0xff]  }
  0xb0   : > { %v4918_v33 = vld [vmem:[%s5972_s1 + $0x6e0] sm:$0xff]  }
  0xb1   : > { %2437 = vmatmul.mubr.bf16.gmra.mrb[36].mxu0 %v5663_v55  ;;  %2486 = vmatmul.mubr.bf16.gmra.mrb[36].mxu1 %v5670_v58 }
  0xb2   : > { %4521 = vmatpush3.bf16.msra.mxu0 %v4879_v34  ;;  %4549 = vmatpush3.bf16.msra.mxu1 %v4880_v37  ;;  %v4919_v34 = vld [vmem:[%s5972_s1 + $0x620] sm:$0xff]  }
  0xb3   : > { %4522 = vmatprep.subr.bf16.mxu0 %v4881_v40  ;;  %4550 = vmatprep.subr.bf16.mxu1 %v4882_v41  ;;  %v4920_v37 = vld [vmem:[%s5972_s1 + $0x6a0] sm:$0xff]   ;;  %v4921_v40 = vld [vmem:[%s5972_s1 + $0x668] sm:$0xff]  }
  0xb4   : > { %2526 = vmatprep.mubr.bf16.mxu0 %v3949_v23  ;;  %2575 = vmatprep.mubr.bf16.mxu1 %v3951_v22  ;;  %v4922_v41 = vld [vmem:[%s5972_s1 + $0x6e8] sm:$0xff]   ;;  %v4949_v22 = vld [vmem:[%s5972_s1 + $0x760] sm:$0xff]  }
  0xb6   : > { %4523 = vmatpush3.bf16.msra.mxu0 %v4883_v42  ;;  %4551 = vmatpush3.bf16.msra.mxu1 %v4884_v43  ;;  %v4923_v42 = vld [vmem:[%s5972_s1 + $0x628] sm:$0xff]  }
  0xb7   : > { %4524 = vmatprep.subr.bf16.mxu0 %v4885_v44  ;;  %4552 = vmatprep.subr.bf16.mxu1 %v4886_v45  ;;  %v4924_v43 = vld [vmem:[%s5972_s1 + $0x6a8] sm:$0xff]   ;;  %v4925_v44 = vld [vmem:[%s5972_s1 + $0x670] sm:$0xff]  }
  0xb8   : > { %v4926_v45 = vld [vmem:[%s5972_s1 + $0x6f0] sm:$0xff]  }
  0xba   : > { %4525 = vmatpush3.bf16.msra.mxu0 %v4887_v46  ;;  %4553 = vmatpush3.bf16.msra.mxu1 %v4888_v47  ;;  %v4927_v46 = vld [vmem:[%s5972_s1 + $0x630] sm:$0xff]  }
  0xbb   : > { %4526 = vmatprep.subr.bf16.mxu0 %v4889_v48  ;;  %4554 = vmatprep.subr.bf16.mxu1 %v4890_v49  ;;  %v4928_v47 = vld [vmem:[%s5972_s1 + $0x6b0] sm:$0xff]   ;;  %v4929_v48 = vld [vmem:[%s5972_s1 + $0x678] sm:$0xff]  }
  0xbc   : > { %v4930_v49 = vld [vmem:[%s5972_s1 + $0x6f8] sm:$0xff]  }
  0xbe   : > { %4527 = vmatpush3.bf16.msra.mxu0 %v4891_v57  ;;  %4555 = vmatpush3.bf16.msra.mxu1 %v4892_v59  ;;  %v4937_v57 = vld [vmem:[%s5972_s1 + $0x748] sm:$0xff]  }
  0xbf   : > { %4528 = vmatprep.subr.bf16.mxu0 %v4893_v60  ;;  %4556 = vmatprep.subr.bf16.mxu1 %v4894_v61  ;;  %v4938_v59 = vld [vmem:[%s5972_s1 + $0x7c8] sm:$0xff]   ;;  %v4941_v60 = vld [vmem:[%s5972_s1 + $0x750] sm:$0xff]  }
  0xc0   : > { %v4942_v61 = vld [vmem:[%s5972_s1 + $0x7d0] sm:$0xff]  }
  0xc2   : > { %4529 = vmatpush3.bf16.msra.mxu0 %v4895_v62  ;;  %4557 = vmatpush3.bf16.msra.mxu1 %v4896_v63  ;;  %v4943_v62 = vld [vmem:[%s5972_s1 + $0x710] sm:$0xff]  }
  0xc3   : > { %4530 = vmatprep.subr.bf16.mxu0 %v4897_v1  ;;  %4558 = vmatprep.subr.bf16.mxu1 %v4898_v2  ;;  %v4944_v63 = vld [vmem:[%s5972_s1 + $0x790] sm:$0xff]   ;;  %v4945_v2 = vld [vmem:[%s5972_s1 + $0x758] sm:$0xff]  }
  0xc6   : > { %4531 = vmatpush3.bf16.msra.mxu0 %v4899_v5  ;;  %4559 = vmatpush3.bf16.msra.mxu1 %v4900_v7  ;;  %v4946_v7 = vld [vmem:[%s5972_s1 + $0x7d8] sm:$0xff]  }
  0xc7   : > { %4572 = vmatprep.subr.bf16.mxu0 %v4901_v0  ;;  %4600 = vmatprep.subr.bf16.mxu1 %v4902_v12  ;;  %v4950_v12 = vld [vmem:[%s5972_s1 + $0x7e0] sm:$0xff]  }
  0xc9   : > { %2527 = vmatmul.mubr.bf16.vlgmr.msra.gmra.mrb[40].mxu0 %v3948_v21  ;;  %2576 = vmatmul.mubr.bf16.vlgmr.msra.gmra.mrb[40].mxu1 %v3950_v20 }
  0xca   : > { %4573 = vmatpush3.bf16.msra.mxu0 %v4903_v4  ;;  %4601 = vmatpush3.bf16.msra.mxu1 %v4904_v13 }
  0xcb   : > { %4574 = vmatprep.subr.bf16.mxu0 %v4905_v14  ;;  %4602 = vmatprep.subr.bf16.mxu1 %v4906_v15  ;;  %v4951_v14 = vld [vmem:[%s5972_s1 + $0x720] sm:$0xff]  }
  0xcc   : > { %2534 = vmatprep.mubr.bf16.mxu0 %v5733_v24  ;;  %2583 = vmatprep.mubr.bf16.mxu1 %v5746_v39 }
  0xce   : > { %4575 = vmatpush3.bf16.msra.mxu0 %v4907_v16  ;;  %4603 = vmatpush3.bf16.msra.mxu1 %v4908_v17  ;;  %v4952_v17 = vld [vmem:[%s5972_s1 + $0x7a0] sm:$0xff]  }
  0xcf   : > { %4576 = vmatprep.subr.bf16.mxu0 %v4909_v26  ;;  %4604 = vmatprep.subr.bf16.mxu1 %v4910_v27  ;;  %v2608_v26 = vld [vmem:[%s5127_s6 + $0x120] sm:$0xff]  ;;  %v2605_v27 = vld [vmem:[%s5127_s6 + $0x108] sm:$0xff] }
  0xd0   : > { %v4161_v28 = vcombine.high %v2604_v19, %v2608_v26 }
  0xd1   : > { %2535 = vmatmul.mubr.bf16.gmra.mrb[44].mxu0 %v5735_v25  ;;  %2584 = vmatmul.mubr.bf16.gmra.mrb[44].mxu1 %v5751_v30 }
  0xd2   : > { %4577 = vmatpush3.bf16.msra.mxu0 %v4911_v29  ;;  %4605 = vmatpush3.bf16.msra.mxu1 %v4912_v35  ;;  %v4160_v29 = vcombine.low %v2604_v19, %v2608_v26 }
  0xd3   : > { %3237 = vmatprep.mubr.bf16.mxu0 %v5660_v53  ;;  %4578 = vmatprep.subr.bf16.mxu0 %v4913_v31  ;;  %v4934_v53 = vld [vmem:[%s5972_s1 + $0x7c0] sm:$0xff]   ;;  %v4163_v31 = vcombine.high %v2605_v27, %v2609_v36 }
  0xd4   : > { %4606 = vmatprep.subr.bf16.mxu1 %v4914_v38  ;;  %3286 = vmatprep.mubr.bf16.mxu1 %v5665_v56  ;;  %v4936_v56 = vld [vmem:[%s5972_s1 + $0x780] sm:$0xff]   ;;  %v4953_v38 = vld [vmem:[%s5972_s1 + $0x768] sm:$0xff]  }
  0xd6   : > { %4579 = vmatpush3.bf16.msra.mxu0 %v4915_v32  ;;  %4607 = vmatpush3.bf16.msra.mxu1 %v4916_v3  ;;  %v4162_v32 = vcombine.low %v2605_v27, %v2609_v36  ;;  %v4954_v3 = vld [vmem:[%s5972_s1 + $0x7e8] sm:$0xff]  }
  0xd7   : > { %4580 = vmatprep.subr.bf16.mxu0 %v4917_v6  ;;  %4608 = vmatprep.subr.bf16.mxu1 %v4918_v33  ;;  %v4955_v6 = vld [vmem:[%s5972_s1 + $0x728] sm:$0xff]  }
  0xd8   : > { %v4956_v33 = vld [vmem:[%s5972_s1 + $0x7a8] sm:$0xff]  }
  0xda   : > { %4581 = vmatpush3.bf16.msra.mxu0 %v4919_v34  ;;  %4609 = vmatpush3.bf16.msra.mxu1 %v4920_v37  ;;  %v4957_v34 = vld [vmem:[%s5972_s1 + $0x770] sm:$0xff]  }
  0xdb   : > { %4582 = vmatprep.subr.bf16.mxu0 %v4921_v40  ;;  %4610 = vmatprep.subr.bf16.mxu1 %v4922_v41  ;;  %v4958_v37 = vld [vmem:[%s5972_s1 + $0x7f0] sm:$0xff]  }
  0xdc   : > { %v4959_v40 = vld [vmem:[%s5972_s1 + $0x730] sm:$0xff]  }
  0xdd   : > { %v4960_v41 = vld [vmem:[%s5972_s1 + $0x7b0] sm:$0xff]  }
  0xde   : > { %4583 = vmatpush3.bf16.msra.mxu0 %v4923_v42  ;;  %4611 = vmatpush3.bf16.msra.mxu1 %v4924_v43  ;;  %v4961_v42 = vld [vmem:[%s5972_s1 + $0x778] sm:$0xff]  }
  0xdf   : > { %4584 = vmatprep.subr.bf16.mxu0 %v4925_v44  ;;  %4612 = vmatprep.subr.bf16.mxu1 %v4926_v45  ;;  %v4964_v43 = vld [vmem:[%s5972_s1 + $0x7b8] sm:$0xff]   ;;  %v2606_v44 = vld [vmem:[%s5127_s6 + $0x110] sm:$0xff] }
  0xe0   : > { %v2610_v45 = vld [vmem:[%s5127_s6 + $0x130] sm:$0xff] }
  0xe2   : > { %4585 = vmatpush3.bf16.msra.mxu0 %v4927_v46  ;;  %4613 = vmatpush3.bf16.msra.mxu1 %v4928_v47  ;;  %v4165_v46 = vcombine.high %v2606_v44, %v2610_v45  ;;  %v2607_v47 = vld [vmem:[%s5127_s6 + $0x118] sm:$0xff] }
  0xe3   : > { %4586 = vmatprep.subr.bf16.mxu0 %v4929_v48  ;;  %4614 = vmatprep.subr.bf16.mxu1 %v4930_v49  ;;  %v2611_v48 = vld [vmem:[%s5127_s6 + $0x138] sm:$0xff]  ;;  %s4235_s6 = sshll.u32 %s5980_s12, 5 }
  0xe4   : > { %v4167_v49 = vcombine.high %v2607_v47, %v2611_v48  ;;  %s224_s27 = scalar_lea.vmem %s5974_s3, %s4235_s6 }
  0xe6   : > { %4587 = vmatpush3.bf16.msra.mxu0 %v4931_v50  ;;  %4615 = vmatpush3.bf16.msra.mxu1 %v4932_v51 }
  0xe7   : > { %4628 = vmatprep.subr.bf16.mxu0 %v4933_v52  ;;  %4656 = vmatprep.subr.bf16.mxu1 %v4934_v53 }
  0xe9   : > { %3238 = vmatmul.mubr.bf16.vlgmr.msra.gmra.mrb[48].mxu0 %v5663_v55  ;;  %3287 = vmatmul.mubr.bf16.vlgmr.msra.gmra.mrb[48].mxu1 %v5670_v58  ;;  %v4939_v55 = vld [vmem:[%s5972_s1 + $0x708] sm:$0xff]  }
  0xea   : > { %4629 = vmatpush3.bf16.msra.mxu0 %v4935_v54  ;;  %4657 = vmatpush3.bf16.msra.mxu1 %v4936_v56  ;;  %v4940_v58 = vld [vmem:[%s5972_s1 + $0x788] sm:$0xff]  }
  0xeb   : > { %4630 = vmatprep.subr.bf16.mxu0 %v4937_v57  ;;  %4658 = vmatprep.subr.bf16.mxu1 %v4938_v59 }
  0xec   : > { %3245 = vmatprep.mubr.bf16.mxu0 %v4161_v28  ;;  %3294 = vmatprep.mubr.bf16.mxu1 %v4163_v31 }
  0xee   : > { %4631 = vmatpush3.bf16.msra.mxu0 %v4939_v55  ;;  %4659 = vmatpush3.bf16.msra.mxu1 %v4940_v58 }
  0xef   : > { %4632 = vmatprep.subr.bf16.mxu0 %v4941_v60  ;;  %4660 = vmatprep.subr.bf16.mxu1 %v4942_v61 }
  0xf1   : > { %3246 = vmatmul.mubr.bf16.gmra.mrb[52].mxu0 %v4160_v29  ;;  %3295 = vmatmul.mubr.bf16.gmra.mrb[52].mxu1 %v4162_v32 }
  0xf2   : > { %4633 = vmatpush3.bf16.msra.mxu0 %v4943_v62  ;;  %4661 = vmatpush3.bf16.msra.mxu1 %v4944_v63  ;;  %v4164_v63 = vcombine.low %v2606_v44, %v2610_v45 }
  0xf3   : > { %4634 = vmatprep.subr.bf16.mxu0 %v4945_v2  ;;  %4662 = vmatprep.subr.bf16.mxu1 %v4946_v7 }
  0xf4   : > { %3335 = vmatprep.mubr.bf16.mxu0 %v5733_v24  ;;  %3384 = vmatprep.mubr.bf16.mxu1 %v5746_v39  ;;  %v4962_v24 = vld [vmem:[%s5972_s1 + $0x7f8] sm:$0xff]  }
  0xf5   : > { %v4963_v39 = vld [vmem:[%s5972_s1 + $0x738] sm:$0xff]  }
  0xf6   : > { %4635 = vmatpush3.bf16.msra.mxu0 %v4947_v9  ;;  %4663 = vmatpush3.bf16.msra.mxu1 %v4948_v10 }
  0xf7   : > { %4636 = vmatprep.subr.bf16.mxu0 %v4949_v22  ;;  %4664 = vmatprep.subr.bf16.mxu1 %v4950_v12 }
  0xfa   : > { %4637 = vmatpush3.bf16.msra.mxu0 %v4951_v14  ;;  %4665 = vmatpush3.bf16.msra.mxu1 %v4952_v17 }
  0xfb   : > { %v4252_v1 = vpop.f32.mrb[0].mxu0  ;;  %4638 = vmatprep.subr.bf16.mxu0 %v4953_v38  ;;  %4666 = vmatprep.subr.bf16.mxu1 %v4954_v3 }
  0xfc   : > { %v4280_v5 = vpop.f32.mrb[0].mxu1  ;;  %v4253_v8 = vpop.f32.mrb[1].mxu0 }
  0xfd   : > { %v4254_v21 = vadd.f32 %v4253_v8, %v4252_v1  ;;  %v4281_v23 = vpop.f32.mrb[1].mxu1  ;;  %v4255_v20 = vpop.f32.mrb[2].mxu0  ;;  %v4166_v1 = vcombine.low %v2607_v47, %v2611_v48 }
  0xfe   : > { %v4282_v11 = vadd.f32 %v4281_v23, %v4280_v5  ;;  %v4283_v0 = vpop.f32.mrb[2].mxu1  ;;  %v4256_v13 = vpop.f32.mrb[3].mxu0  ;;  %4639 = vmatpush3.bf16.msra.mxu0 %v4955_v6  ;;  %4667 = vmatpush3.bf16.msra.mxu1 %v4956_v33 }
  0xff   : > { %v4257_v15 = vadd.f32 %v4256_v13, %v4255_v20  ;;  %v4284_v16 = vpop.f32.mrb[3].mxu1  ;;  %4640 = vmatprep.subr.bf16.mxu0 %v4957_v34  ;;  %4668 = vmatprep.subr.bf16.mxu1 %v4958_v37 }
 0x100   : > { %v5877_v4 = vadd.f32 %v4282_v11, %v4254_v21  ;;  %v4285_v18 = vadd.f32 %v4284_v16, %v4283_v0 }
 0x102   : > { %v5889_v35 = vadd.f32 %v4285_v18, %v4257_v15  ;;  %4641 = vmatpush3.bf16.msra.mxu0 %v4959_v40  ;;  %4669 = vmatpush3.bf16.msra.mxu1 %v4960_v41 }
 0x103   : > { %4642 = vmatprep.subr.bf16.mxu0 %v4961_v42  ;;  %4670 = vmatprep.subr.bf16.mxu1 %v4962_v24  ;;  %v4258_v50 = vpop.f32.mrb[4].mxu0 }
 0x104   : > { %v4286_v51 = vpop.f32.mrb[4].mxu1  ;;  %v4259_v52 = vpop.f32.mrb[5].mxu0 }
 0x105   : > { %v4260_v53 = vadd.f32 %v4259_v52, %v4258_v50  ;;  %v4287_v54 = vpop.f32.mrb[5].mxu1  ;;  %v4261_v56 = vpop.f32.mrb[6].mxu0 }
 0x106   : > { %4643 = vmatpush3.bf16.msra.mxu0 %v4963_v39  ;;  %4671 = vmatpush3.bf16.msra.mxu1 %v4964_v43  ;;  %v4288_v57 = vadd.f32 %v4287_v54, %v4286_v51  ;;  %v4289_v59 = vpop.f32.mrb[6].mxu1  ;;  %v4262_v55 = vpop.f32.mrb[7].mxu0 }
 0x107   : > { %v4263_v58 = vadd.f32 %v4262_v55, %v4261_v56  ;;  %v4290_v60 = vpop.f32.mrb[7].mxu1 }
 0x108   : > { %v1063_v61 = vadd.f32 %v4288_v57, %v4260_v53  ;;  %v4291_v62 = vadd.f32 %v4290_v60, %v4289_v59 }
 0x109   : > { %3336 = vmatmul.mubr.bf16.vlgmr.msra.gmra.mrb[56].mxu0 %v5735_v25  ;;  %3385 = vmatmul.mubr.bf16.vlgmr.msra.gmra.mrb[56].mxu1 %v5751_v30 }
 0x10a   : > { %3343 = vmatprep.mubr.bf16.mxu0 %v4165_v46  ;;  %3392 = vmatprep.mubr.bf16.mxu1 %v4167_v49  ;;  %v1066_v2 = vadd.f32 %v4291_v62, %v4263_v58 }
 0x111   : > { %3344 = vmatmul.mubr.bf16.gmra.mrb[60].mxu0 %v4164_v63  ;;  %3393 = vmatmul.mubr.bf16.gmra.mrb[60].mxu1 %v4166_v1 }
 0x11b   : > { %v4308_v25 = vpop.f32.mrb[8].mxu0 }
 0x11c   : > { %v4336_v5 = vpop.f32.mrb[8].mxu1  ;;  %v4309_v7 = vpop.f32.mrb[9].mxu0 }
 0x11d   : > { %v4337_v8 = vpop.f32.mrb[9].mxu1  ;;  %v4310_v9 = vadd.f32 %v4309_v7, %v4308_v25  ;;  %v4311_v21 = vpop.f32.mrb[10].mxu0 }
 0x11e   : > { %v4338_v30 = vadd.f32 %v4337_v8, %v4336_v5  ;;  %v4339_v23 = vpop.f32.mrb[10].mxu1  ;;  %v4312_v10 = vpop.f32.mrb[11].mxu0 }
 0x11f   : > { %v4340_v11 = vpop.f32.mrb[11].mxu1  ;;  %v1104_v20 = vadd.f32 %v4310_v9, %v5877_v4  ;;  %v4313_v22 = vadd.f32 %v4312_v10, %v4311_v21 }
 0x120   : > { %v4341_v0 = vadd.f32 %v4340_v11, %v4339_v23 }
 0x121   : > { %v1153_v12 = vadd.f32 %v4338_v30, %v1104_v20  ;;  %v1107_v13 = vadd.f32 %v4313_v22, %v5889_v35 }
 0x123   : > { %v1156_v14 = vadd.f32 %v4341_v0, %v1107_v13  ;;  %v4314_v15 = vpop.f32.mrb[12].mxu0 }
 0x124   : > { %v4315_v16 = vpop.f32.mrb[13].mxu0  ;;  %v4342_v27 = vpop.f32.mrb[12].mxu1 }
 0x125   : > { %v4316_v17 = vadd.f32 %v4315_v16, %v4314_v15  ;;  %v4317_v18 = vpop.f32.mrb[14].mxu0  ;;  %v4343_v36 = vpop.f32.mrb[13].mxu1 }
 0x126   : > { %v4318_v19 = vpop.f32.mrb[15].mxu0  ;;  %v4344_v31 = vadd.f32 %v4343_v36, %v4342_v27  ;;  %v4345_v38 = vpop.f32.mrb[14].mxu1 }
 0x127   : > { %v1112_v26 = vadd.f32 %v4316_v17, %v1063_v61  ;;  %v4319_v28 = vadd.f32 %v4318_v19, %v4317_v18  ;;  %v4346_v32 = vpop.f32.mrb[15].mxu1 }
 0x128   : > { %v4347_v3 = vadd.f32 %v4346_v32, %v4345_v38 }
 0x129   : > { %v1115_v29 = vadd.f32 %v4319_v28, %v1066_v2  ;;  %v1161_v4 = vadd.f32 %v4344_v31, %v1112_v26 }
 0x12b   : > { %v1164_v6 = vadd.f32 %v4347_v3, %v1115_v29 }
 0x13b   : > { %v4364_v33 = vpop.f32.mrb[16].mxu0 }
 0x13c   : > { %v4392_v34 = vpop.f32.mrb[16].mxu1  ;;  %v4365_v35 = vpop.f32.mrb[17].mxu0 }
 0x13d   : > { %v4366_v37 = vadd.f32 %v4365_v35, %v4364_v33  ;;  %v4393_v40 = vpop.f32.mrb[17].mxu1  ;;  %v4367_v41 = vpop.f32.mrb[18].mxu0 }
 0x13e   : > { %v4394_v42 = vadd.f32 %v4393_v40, %v4392_v34  ;;  %v4395_v24 = vpop.f32.mrb[18].mxu1  ;;  %v4368_v39 = vpop.f32.mrb[19].mxu0 }
 0x13f   : > { %v1626_v43 = vadd.f32 %v4366_v37, %v1153_v12  ;;  %v4369_v44 = vadd.f32 %v4368_v39, %v4367_v41  ;;  %v4396_v45 = vpop.f32.mrb[19].mxu1 }
 0x140   : > { %v4397_v46 = vadd.f32 %v4396_v45, %v4395_v24 }
 0x141   : > { %v1675_v47 = vadd.f32 %v4394_v42, %v1626_v43  ;;  %v1629_v48 = vadd.f32 %v4369_v44, %v1156_v14 }
 0x143   : > { %v1678_v49 = vadd.f32 %v4397_v46, %v1629_v48  ;;  %v4370_v50 = vpop.f32.mrb[20].mxu0 }
 0x144   : > { %v4371_v51 = vpop.f32.mrb[21].mxu0  ;;  %v4398_v52 = vpop.f32.mrb[20].mxu1 }
 0x145   : > { %v4372_v53 = vadd.f32 %v4371_v51, %v4370_v50  ;;  %v4373_v54 = vpop.f32.mrb[22].mxu0  ;;  %v4399_v56 = vpop.f32.mrb[21].mxu1 }
 0x146   : > { %v4374_v57 = vpop.f32.mrb[23].mxu0  ;;  %v4400_v59 = vadd.f32 %v4399_v56, %v4398_v52  ;;  %v4401_v55 = vpop.f32.mrb[22].mxu1 }
 0x147   : > { %v1634_v58 = vadd.f32 %v4372_v53, %v1161_v4  ;;  %v4375_v60 = vadd.f32 %v4374_v57, %v4373_v54  ;;  %v4402_v61 = vpop.f32.mrb[23].mxu1 }
 0x148   : > { %v4403_v62 = vadd.f32 %v4402_v61, %v4401_v55 }
 0x149   : > { %v1637_v63 = vadd.f32 %v4375_v60, %v1164_v6  ;;  %v1683_v1 = vadd.f32 %v4400_v59, %v1634_v58 }
 0x14b   : > { %v1686_v2 = vadd.f32 %v4403_v62, %v1637_v63 }
 0x15b   : > { %v4420_v25 = vpop.f32.mrb[24].mxu0 }
 0x15c   : > { %v4448_v5 = vpop.f32.mrb[24].mxu1  ;;  %v4421_v7 = vpop.f32.mrb[25].mxu0 }
 0x15d   : > { %v4449_v8 = vpop.f32.mrb[25].mxu1  ;;  %v4422_v9 = vadd.f32 %v4421_v7, %v4420_v25  ;;  %v4423_v21 = vpop.f32.mrb[26].mxu0 }
 0x15e   : > { %v4450_v30 = vadd.f32 %v4449_v8, %v4448_v5  ;;  %v4451_v23 = vpop.f32.mrb[26].mxu1  ;;  %v4424_v10 = vpop.f32.mrb[27].mxu0 }
 0x15f   : > { %v4452_v11 = vpop.f32.mrb[27].mxu1  ;;  %v1724_v20 = vadd.f32 %v4422_v9, %v1675_v47  ;;  %v4425_v22 = vadd.f32 %v4424_v10, %v4423_v21 }
 0x160   : > { %v4453_v0 = vadd.f32 %v4452_v11, %v4451_v23 }
 0x161   : > { %v1773_v12 = vadd.f32 %v4450_v30, %v1724_v20  ;;  %v1727_v13 = vadd.f32 %v4425_v22, %v1678_v49 }
 0x163   : > { %v1776_v14 = vadd.f32 %v4453_v0, %v1727_v13  ;;  %v4426_v15 = vpop.f32.mrb[28].mxu0 }
 0x164   : > { %v4427_v16 = vpop.f32.mrb[29].mxu0  ;;  %v4454_v17 = vpop.f32.mrb[28].mxu1 }
 0x165   : > { %v4428_v18 = vadd.f32 %v4427_v16, %v4426_v15  ;;  %v4429_v19 = vpop.f32.mrb[30].mxu0  ;;  %v4455_v26 = vpop.f32.mrb[29].mxu1 }
 0x166   : > { %v4430_v27 = vpop.f32.mrb[31].mxu0  ;;  %v4456_v28 = vadd.f32 %v4455_v26, %v4454_v17  ;;  %v4457_v36 = vpop.f32.mrb[30].mxu1 }
 0x167   : > { %v1732_v29 = vadd.f32 %v4428_v18, %v1683_v1  ;;  %v4431_v31 = vadd.f32 %v4430_v27, %v4429_v19  ;;  %v4458_v38 = vpop.f32.mrb[31].mxu1 }
 0x168   : > { %v4459_v32 = vadd.f32 %v4458_v38, %v4457_v36 }
 0x169   : > { %v1735_v4 = vadd.f32 %v4431_v31, %v1686_v2  ;;  %v5937_v3 = vadd.f32 %v4456_v28, %v1732_v29 }
 0x16b   : > { %v5939_v6 = vadd.f32 %v4459_v32, %v1735_v4 }
 0x17c   : > { %v4476_v33 = vpop.f32.mrb[32].mxu0  ;;  %v4504_v34 = vpop.f32.mrb[32].mxu1 }
 0x17d   : > { %v4477_v35 = vpop.f32.mrb[33].mxu0  ;;  %v4505_v37 = vpop.f32.mrb[33].mxu1 }
 0x17e   : > { %v4478_v40 = vadd.f32 %v4477_v35, %v4476_v33  ;;  %v4506_v41 = vadd.f32 %v4505_v37, %v4504_v34  ;;  %v4479_v42 = vpop.f32.mrb[34].mxu0  ;;  %v4507_v24 = vpop.f32.mrb[34].mxu1 }
 0x17f   : > { %v4480_v39 = vpop.f32.mrb[35].mxu0  ;;  %v4508_v43 = vpop.f32.mrb[35].mxu1 }
 0x180   : > { %v2480_v44 = vadd.f32 %v4506_v41, %v4478_v40  ;;  %v4481_v45 = vadd.f32 %v4480_v39, %v4479_v42  ;;  %v4509_v46 = vadd.f32 %v4508_v43, %v4507_v24 }
 0x182   : > { %v2483_v47 = vadd.f32 %v4509_v46, %v4481_v45 }
 0x184   : > { %v4482_v48 = vpop.f32.mrb[36].mxu0  ;;  %v4510_v49 = vpop.f32.mrb[36].mxu1 }
 0x185   : > { %v4483_v50 = vpop.f32.mrb[37].mxu0  ;;  %v4511_v52 = vpop.f32.mrb[37].mxu1 }
 0x186   : > { %v4484_v51 = vadd.f32 %v4483_v50, %v4482_v48  ;;  %v4485_v53 = vpop.f32.mrb[38].mxu0  ;;  %v4512_v54 = vadd.f32 %v4511_v52, %v4510_v49  ;;  %v4513_v56 = vpop.f32.mrb[38].mxu1 }
 0x187   : > { %v4486_v57 = vpop.f32.mrb[39].mxu0  ;;  %v4514_v55 = vpop.f32.mrb[39].mxu1 }
 0x188   : > { %v4487_v59 = vadd.f32 %v4486_v57, %v4485_v53  ;;  %v2488_v58 = vadd.f32 %v4512_v54, %v4484_v51  ;;  %v4515_v60 = vadd.f32 %v4514_v55, %v4513_v56 }
 0x18a   : > { %v2491_v61 = vadd.f32 %v4515_v60, %v4487_v59 }
 0x19c   : > { %v4532_v62 = vpop.f32.mrb[40].mxu0  ;;  %v4560_v63 = vpop.f32.mrb[40].mxu1 }
 0x19d   : > { %v4533_v1 = vpop.f32.mrb[41].mxu0  ;;  %v4561_v25 = vpop.f32.mrb[41].mxu1 }
 0x19e   : > { %v4534_v2 = vadd.f32 %v4533_v1, %v4532_v62  ;;  %v4535_v5 = vpop.f32.mrb[42].mxu0  ;;  %v4562_v7 = vadd.f32 %v4561_v25, %v4560_v63  ;;  %v4563_v8 = vpop.f32.mrb[42].mxu1 }
 0x19f   : > { %v4536_v9 = vpop.f32.mrb[43].mxu0  ;;  %v4564_v23 = vpop.f32.mrb[43].mxu1 }
 0x1a0   : > { %v2529_v30 = vadd.f32 %v4534_v2, %v2480_v44  ;;  %v4537_v21 = vadd.f32 %v4536_v9, %v4535_v5  ;;  %v4565_v10 = vadd.f32 %v4564_v23, %v4563_v8 }
 0x1a2   : > { %v2578_v11 = vadd.f32 %v4562_v7, %v2529_v30  ;;  %v2532_v20 = vadd.f32 %v4537_v21, %v2483_v47 }
 0x1a4   : > { %v5941_v22 = vadd.f32 %v2578_v11, %v1773_v12  ;;  %v2581_v0 = vadd.f32 %v4565_v10, %v2532_v20  ;;  %v4538_v15 = vpop.f32.mrb[44].mxu0  ;;  %v4566_v19 = vpop.f32.mrb[44].mxu1 }
 0x1a5   : > { %v4539_v16 = vpop.f32.mrb[45].mxu0  ;;  %v4567_v36 = vpop.f32.mrb[45].mxu1 }
 0x1a6   : > { %v5943_v13 = vadd.f32 %v2581_v0, %v1776_v14  ;;  %v4540_v17 = vadd.f32 %v4539_v16, %v4538_v15  ;;  %v4541_v18 = vpop.f32.mrb[46].mxu0  ;;  %v4568_v29 = vadd.f32 %v4567_v36, %v4566_v19  ;;  %v4569_v31 = vpop.f32.mrb[46].mxu1  ;;  %v4232_v0 = vld [vmem:[%s5973_s2] ss:$0 sm:$0xff] }
 0x1a7   : > { %v4542_v26 = vpop.f32.mrb[47].mxu0  ;;  %v4570_v32 = vpop.f32.mrb[47].mxu1 }
 0x1a8   : > { %v2537_v27 = vadd.f32 %v4540_v17, %v2488_v58  ;;  %v4543_v28 = vadd.f32 %v4542_v26, %v4541_v18  ;;  %v4571_v33 = vadd.f32 %v4570_v32, %v4569_v31 }
 0x1aa   : > { %v2540_v38 = vadd.f32 %v4543_v28, %v2491_v61  ;;  %v2586_v4 = vadd.f32 %v4568_v29, %v2537_v27 }
 0x1ac   : > { %v5946_v12 = vadd.f32 %v2586_v4, %v5937_v3  ;;  %v2589_v14 = vadd.f32 %v4571_v33, %v2540_v38 }
 0x1ae   : > { %v5949_v34 = vadd.f32 %v2589_v14, %v5939_v6 }
 0x1bc   : > { %v4588_v35 = vpop.f32.mrb[48].mxu0  ;;  %v4616_v37 = vpop.f32.mrb[48].mxu1 }
 0x1bd   : > { %v4589_v40 = vpop.f32.mrb[49].mxu0  ;;  %v4617_v42 = vpop.f32.mrb[49].mxu1 }
 0x1be   : > { %v4590_v41 = vadd.f32 %v4589_v40, %v4588_v35  ;;  %v4591_v24 = vpop.f32.mrb[50].mxu0  ;;  %v4618_v39 = vadd.f32 %v4617_v42, %v4616_v37  ;;  %v4619_v43 = vpop.f32.mrb[50].mxu1 }
 0x1bf   : > { %v4592_v44 = vpop.f32.mrb[51].mxu0  ;;  %v4620_v46 = vpop.f32.mrb[51].mxu1 }
 0x1c0   : > { %v4593_v45 = vadd.f32 %v4592_v44, %v4591_v24  ;;  %v3289_v47 = vadd.f32 %v4618_v39, %v4590_v41  ;;  %v4621_v48 = vadd.f32 %v4620_v46, %v4619_v43 }
 0x1c2   : > { %v3292_v49 = vadd.f32 %v4621_v48, %v4593_v45 }
 0x1c4   : > { %v4594_v3 = vpop.f32.mrb[52].mxu0  ;;  %v4622_v50 = vpop.f32.mrb[52].mxu1 }
 0x1c5   : > { %v4595_v51 = vpop.f32.mrb[53].mxu0  ;;  %v4623_v6 = vpop.f32.mrb[53].mxu1 }
 0x1c6   : > { %v4596_v52 = vadd.f32 %v4595_v51, %v4594_v3  ;;  %v4597_v53 = vpop.f32.mrb[54].mxu0  ;;  %v4624_v54 = vadd.f32 %v4623_v6, %v4622_v50  ;;  %v4625_v56 = vpop.f32.mrb[54].mxu1 }
 0x1c7   : > { %v4598_v57 = vpop.f32.mrb[55].mxu0  ;;  %v4626_v55 = vpop.f32.mrb[55].mxu1 }
 0x1c8   : > { %v4599_v59 = vadd.f32 %v4598_v57, %v4597_v53  ;;  %v3297_v58 = vadd.f32 %v4624_v54, %v4596_v52  ;;  %v4627_v60 = vadd.f32 %v4626_v55, %v4625_v56 }
 0x1ca   : > { %v3300_v61 = vadd.f32 %v4627_v60, %v4599_v59 }
 0x1dc   : > { %v4644_v62 = vpop.f32.mrb[56].mxu0  ;;  %v4672_v63 = vpop.f32.mrb[56].mxu1 }
 0x1dd   : > { %v4645_v1 = vpop.f32.mrb[57].mxu0  ;;  %v4673_v25 = vpop.f32.mrb[57].mxu1 }
 0x1de   : > { %v4646_v2 = vadd.f32 %v4645_v1, %v4644_v62  ;;  %v4647_v5 = vpop.f32.mrb[58].mxu0  ;;  %v4674_v7 = vadd.f32 %v4673_v25, %v4672_v63  ;;  %v4675_v8 = vpop.f32.mrb[58].mxu1 }
 0x1df   : > { %v4648_v9 = vpop.f32.mrb[59].mxu0  ;;  %v4676_v23 = vpop.f32.mrb[59].mxu1 }
 0x1e0   : > { %v3338_v30 = vadd.f32 %v4646_v2, %v3289_v47  ;;  %v4649_v21 = vadd.f32 %v4648_v9, %v4647_v5  ;;  %v4677_v10 = vadd.f32 %v4676_v23, %v4675_v8 }
 0x1e2   : > { %v3387_v11 = vadd.f32 %v4674_v7, %v3338_v30  ;;  %v3341_v20 = vadd.f32 %v4649_v21, %v3292_v49 }
 0x1e4   : > { %v3401_v15 = vadd.f32 %v3387_v11, %v5941_v22  ;;  %v3390_v16 = vadd.f32 %v4677_v10, %v3341_v20  ;;  %v4650_v17 = vpop.f32.mrb[60].mxu0  ;;  %v4678_v18 = vpop.f32.mrb[60].mxu1 }
 0x1e5   : > { %v4651_v19 = vpop.f32.mrb[61].mxu0  ;;  %v4679_v36 = vpop.f32.mrb[61].mxu1 }
 0x1e6   : > { %v3410_v26 = vadd.f32 %v4232_v0, %v3401_v15  ;;  %v3402_v27 = vadd.f32 %v3390_v16, %v5943_v13  ;;  %v4652_v28 = vadd.f32 %v4651_v19, %v4650_v17  ;;  %v4653_v29 = vpop.f32.mrb[62].mxu0  ;;  %v4680_v31 = vadd.f32 %v4679_v36, %v4678_v18  ;;  %v4681_v38 = vpop.f32.mrb[62].mxu1 }
 0x1e7   : > { %v4654_v32 = vpop.f32.mrb[63].mxu0  ;;  %v4682_v14 = vpop.f32.mrb[63].mxu1 }
 0x1e8   : > { %3414 = vst [vmem:[%s224_s27] sm:$0xff] %v3410_v26  ;;  %v3411_v4 = vadd.f32 %v4232_v0, %v3402_v27  ;;  %v3346_v22 = vadd.f32 %v4652_v28, %v3297_v58  ;;  %v4655_v33 = vadd.f32 %v4654_v32, %v4653_v29  ;;  %v4683_v35 = vadd.f32 %v4682_v14, %v4681_v38 }
 0x1ea   : > { %3415 = vst [vmem:[%s224_s27 + $0x8] sm:$0xff] %v3411_v4  ;;  %v3395_v37 = vadd.f32 %v4680_v31, %v3346_v22  ;;  %v3349_v40 = vadd.f32 %v4655_v33, %v3300_v61 }
 0x1ec   : > { %v3403_v41 = vadd.f32 %v3395_v37, %v5946_v12  ;;  %v3398_v42 = vadd.f32 %v4683_v35, %v3349_v40 }
 0x1ee   : > { %v3412_v24 = vadd.f32 %v4232_v0, %v3403_v41  ;;  %v3404_v13 = vadd.f32 %v3398_v42, %v5949_v34 }
 0x1f0   : > { %3416 = vst [vmem:[%s224_s27 + $0x10] sm:$0xff] %v3412_v24  ;;  %v3413_v39 = vadd.f32 %v4232_v0, %v3404_v13 }
 0x1f2   : > { %3417 = vst [vmem:[%s224_s27 + $0x18] sm:$0xff] %v3413_v39 }
 0x1f3 PF: > { %s13_s14 = sadd.s32 1, %s4987_s14   ;;  %s5975_s12 = smov %s4983_s13 }
 0x1f4   : > { %p10_p5 = scmp.ge.s32.totalorder %s13_s14, 4   ;;  %s5976_s13 = smov %s5978_s15 }
 0x1f6   :  { %12 = sbr.rel (!%p10_p5) target bundleno = 2 (0x2), region = 71 }

</bundles_post_ra>
